<compile_context>
chip_gen: v7x
topology: tpu7x:2x2x1
jax: 0.10.0
libtpu: 0.0.40
codegen_flags: <defaults>
</compile_context>

<pallas_src>
import jax
import jax.numpy as jnp
from jax.experimental import pallas as pl
from jax.experimental.pallas import tpu as pltpu

INI = 0.01


def _round_up(x, m):
    return ((x + m - 1) // m) * m


# ----------------------------------------------------------------------------
# Kernel 1: fused projection  [B*NsP, D] @ [D, 2H] -> attn_feat | hop_feat
# ----------------------------------------------------------------------------
def proj_kernel(x_ref, w_ref, o_ref):
    o_ref[...] = jnp.dot(x_ref[...], w_ref[...], preferred_element_type=jnp.float32)


def fused_proj(x2d, w_cat):
    M, _ = x2d.shape
    N = w_cat.shape[1]
    vmem = lambda: pl.BlockSpec(memory_space=pltpu.MemorySpace.VMEM)
    return pl.pallas_call(
        proj_kernel,
        in_specs=[vmem(), vmem()],
        out_specs=vmem(),
        out_shape=jax.ShapeDtypeStruct((M, N), jnp.float32),
    )(x2d, w_cat)


# ----------------------------------------------------------------------------
# Kernel 2: multi-layer LSTM (time-major), weights/state resident, x/out streamed
# ----------------------------------------------------------------------------
def make_lstm_kernel(n_layer, t_chunk, hp):
    def kernel(*refs):
        x_ref, h0_ref, c0_ref = refs[0], refs[1], refs[2]
        w_refs = refs[3:3 + 2 * n_layer]          # per layer: W_cat (in+HP, 4HP), b (1, 4HP)
        out_ref = refs[3 + 2 * n_layer]
        h_scr = refs[4 + 2 * n_layer]
        c_scr = refs[5 + 2 * n_layer]

        @pl.when(pl.program_id(0) == 0)
        def _init():
            h_scr[...] = h0_ref[...]
            c_scr[...] = c0_ref[...]

        # Fully unrolled static time loop (equivalent to fori_loop(..., unroll=True)):
        # gives the scheduler visibility across the serial recurrence.
        for s in range(t_chunk):
            inp = x_ref[s]                        # (B, DP) for layer 0, (B, HP) afterwards
            for l in range(n_layer):
                w = w_refs[2 * l][...]
                b = w_refs[2 * l + 1][...]
                xcat = jnp.concatenate([inp, h_scr[l]], axis=-1)  # lane-aligned concat
                gates = jnp.dot(xcat, w, preferred_element_type=jnp.float32) + b
                # HP is a multiple of 128 -> each gate is a whole aligned lane tile.
                i_g = jax.nn.sigmoid(gates[:, 0 * hp:1 * hp])
                f_g = jax.nn.sigmoid(gates[:, 1 * hp:2 * hp])
                g_g = jnp.tanh(gates[:, 2 * hp:3 * hp])
                o_g = jax.nn.sigmoid(gates[:, 3 * hp:4 * hp])
                c_new = f_g * c_scr[l] + i_g * g_g
                h_new = o_g * jnp.tanh(c_new)
                h_scr[l] = h_new
                c_scr[l] = c_new
                inp = h_new
            out_ref[s] = inp

    return kernel


def lstm_forward(x, h0, c0, packed, *, t_chunk=None):
    # x: (T, B, DP) time-major (zero-padded last dim), h0/c0: (L, B, HP) zero-padded.
    T, B, DP = x.shape
    L, _, HP = h0.shape
    if t_chunk is None:
        t_chunk = T                                # toy sizes: whole sequence, grid=(1,)
    assert T % t_chunk == 0

    in_specs = [
        pl.BlockSpec((t_chunk, B, DP), lambda t: (t, 0, 0)),   # streamed over time
        pl.BlockSpec((L, B, HP), lambda t: (0, 0, 0)),         # resident
        pl.BlockSpec((L, B, HP), lambda t: (0, 0, 0)),         # resident
    ]
    flat = []
    for (W, b) in packed:
        in_specs.append(pl.BlockSpec(W.shape, lambda t: (0, 0)))   # resident weights
        in_specs.append(pl.BlockSpec(b.shape, lambda t: (0, 0)))
        flat.extend([W, b])

    kernel = make_lstm_kernel(L, t_chunk, HP)
    return pl.pallas_call(
        kernel,
        grid=(T // t_chunk,),
        in_specs=in_specs,
        out_specs=pl.BlockSpec((t_chunk, B, HP), lambda t: (t, 0, 0)),
        out_shape=jax.ShapeDtypeStruct((T, B, HP), jnp.float32),
        scratch_shapes=[
            pltpu.VMEM((L, B, HP), jnp.float32),   # h state, persists across grid steps
            pltpu.VMEM((L, B, HP), jnp.float32),   # c state
        ],
        compiler_params=pltpu.CompilerParams(
            dimension_semantics=("arbitrary",),    # sequential recurrence over time
            vmem_limit_bytes=64 * 1024 * 1024,     # explicit; fits v5e/v6e/v7x
        ),
    )(x, h0, c0, *flat)


# ----------------------------------------------------------------------------
# Kernel 3: fused hop attention (n_hop times) + final pointer score
# ----------------------------------------------------------------------------
def make_fused_attn_kernel(n_hop, Nq, NsP):
    def kernel(ms_ref, hopf_ref, attnf_ref, q_ref, hwq_ref, awq_ref, hv_ref, av_ref,
               out_ref):
        b = pl.program_id(0)
        n_valid = ms_ref[b]
        hopf = hopf_ref[0]                                    # (NsP, H), zero pad rows
        q = q_ref[0]                                          # (Nq, H)
        idx = jax.lax.broadcasted_iota(jnp.int32, (Nq, NsP), 1)

        for _ in range(n_hop):                                # query stays in VMEM/vregs
            qw = jnp.dot(q, hwq_ref[...], preferred_element_type=jnp.float32)
            s = jnp.tanh(hopf[None, :, :] + qw[:, None, :])   # (Nq, NsP, H)
            score = jnp.sum(s * hv_ref[0][None, None, :], axis=-1)
            masked = jnp.where(idx < n_valid, score, -1e18)   # pad rows >= n_valid
            m = jnp.max(masked, axis=-1, keepdims=True)
            e = jnp.exp(masked - m)
            p = e / jnp.sum(e, axis=-1, keepdims=True)        # (Nq, NsP)
            q = jnp.dot(p, hopf, preferred_element_type=jnp.float32)

        qw = jnp.dot(q, awq_ref[...], preferred_element_type=jnp.float32)
        s = jnp.tanh(attnf_ref[0][None, :, :] + qw[:, None, :])
        out_ref[...] = jnp.sum(s * av_ref[0][None, None, :], axis=-1)[None]

    return kernel


def fused_attention(hop_feat, attn_feat, query, hop_wq, attn_wq, hop_v, attn_v,
                    mem_sizes, n_hop):
    B, NsP, H = hop_feat.shape
    Nq = query.shape[1]
    kernel = make_fused_attn_kernel(n_hop, Nq, NsP)
    grid_spec = pltpu.PrefetchScalarGridSpec(
        num_scalar_prefetch=1,
        grid=(B,),
        in_specs=[
            pl.BlockSpec((1, NsP, H), lambda b, ms: (b, 0, 0)),
            pl.BlockSpec((1, NsP, H), lambda b, ms: (b, 0, 0)),
            pl.BlockSpec((1, Nq, H), lambda b, ms: (b, 0, 0)),
            pl.BlockSpec((H, H), lambda b, ms: (0, 0)),
            pl.BlockSpec((H, H), lambda b, ms: (0, 0)),
            pl.BlockSpec((1, H), lambda b, ms: (0, 0)),
            pl.BlockSpec((1, H), lambda b, ms: (0, 0)),
        ],
        out_specs=pl.BlockSpec((1, Nq, NsP), lambda b, ms: (b, 0, 0)),
    )
    return pl.pallas_call(
        kernel,
        grid_spec=grid_spec,
        out_shape=jax.ShapeDtypeStruct((B, Nq, NsP), jnp.float32),
        compiler_params=pltpu.CompilerParams(
            dimension_semantics=("parallel",),    # batch rows shard across v7x's 2 TCs
        ),
    )(mem_sizes, hop_feat, attn_feat, query, hop_wq, attn_wq,
      hop_v[None, :], attn_v[None, :])


# ----------------------------------------------------------------------------
# One-time parameter preparation (weight fusion / lane-aligned repacking)
# ----------------------------------------------------------------------------
def prepare_params(params):
    D, H = params["attn_wm"].shape
    HP = _round_up(H, 128)
    DP = _round_up(D, 128)

    prepared = dict(params)
    # Fused projection weight: [attn_wm | hop_wm]  -> (D, 2H)
    prepared["proj_w"] = jnp.concatenate([params["attn_wm"], params["hop_wm"]], axis=1)

    packed = []
    for l, (w_ih, w_hh, b) in enumerate(params["lstm"]):
        in_dim = w_ih.shape[0]                    # D (layer 0) or H (deeper layers)
        in_pad = DP if l == 0 else HP             # physical input width fed to the layer
        W = jnp.zeros((in_pad + HP, 4 * HP), jnp.float32)
        bp = jnp.zeros((1, 4 * HP), jnp.float32)
        for g in range(4):                        # gate order i, f, g, o (as nn.LSTM)
            W = W.at[:in_dim, g * HP:g * HP + H].set(w_ih[:, g * H:(g + 1) * H])
            W = W.at[in_pad:in_pad + H, g * HP:g * HP + H].set(w_hh[:, g * H:(g + 1) * H])
            bp = bp.at[:, g * HP:g * HP + H].set(b[:, g * H:(g + 1) * H])
        packed.append((W, bp))
    prepared["lstm_packed"] = packed
    return prepared


# ----------------------------------------------------------------------------
# Full forward (glue in plain JAX, hot paths in Pallas)
# ----------------------------------------------------------------------------
def pointer_net_forward(params, attn_mem, mem_sizes, lstm_in, n_hop):
    B, Ns, D = attn_mem.shape
    L, H = params["init_h"].shape
    HP = _round_up(H, 128)
    DP = _round_up(D, 128)
    NsP = _round_up(Ns, 128)                      # lane-dense score output

    # --- fused projection: both feature maps from one matmul ---
    mem_p = jnp.pad(attn_mem, ((0, 0), (0, NsP - Ns), (0, 0)))       # zero pad rows
    feats = fused_proj(mem_p.reshape(B * NsP, D), params["proj_w"])  # (B*NsP, 2H)
    attn_feat = feats[:, :H].reshape(B, NsP, H)
    hop_feat = feats[:, H:].reshape(B, NsP, H)

    # --- LSTM over [init_i ; lstm_in] (time-major) ---
    init_i = jnp.broadcast_to(params["init_i"][None, None, :], (B, 1, D))
    x = jnp.concatenate([init_i, lstm_in], axis=1)                   # (B, T, D)
    T = x.shape[1]
    x = jnp.transpose(x, (1, 0, 2))                                  # (T, B, D)
    x = jnp.pad(x, ((0, 0), (0, 0), (0, DP - D)))
    h0 = jnp.pad(jnp.broadcast_to(params["init_h"][:, None, :], (L, B, H)),
                 ((0, 0), (0, 0), (0, HP - H)))
    c0 = jnp.pad(jnp.broadcast_to(params["init_c"][:, None, :], (L, B, H)),
                 ((0, 0), (0, 0), (0, HP - H)))

    q_tm = lstm_forward(x, h0, c0, params["lstm_packed"])            # (T, B, HP)
    query = jnp.transpose(q_tm, (1, 0, 2))[:, :, :H]                 # (B, T, H)

    # --- fused hop attention + final pointer score ---
    scores = fused_attention(hop_feat, attn_feat, query,
                             params["hop_wq"], params["attn_wq"],
                             params["hop_v"], params["attn_v"],
                             mem_sizes, n_hop)                       # (B, T, NsP)
    return scores[:, :, :Ns]


# ----------------------------------------------------------------------------
# Pure-JAX reference (for correctness check)
# ----------------------------------------------------------------------------
def ref_forward(params, attn_mem, mem_sizes, lstm_in, n_hop):
    B, Ns, D = attn_mem.shape
    L, H = params["init_h"].shape
    attn_feat = attn_mem @ params["attn_wm"]
    hop_feat = attn_mem @ params["hop_wm"]

    init_i = jnp.broadcast_to(params["init_i"][None, None, :], (B, 1, D))
    x = jnp.transpose(jnp.concatenate([init_i, lstm_in], axis=1), (1, 0, 2))

    h = jnp.broadcast_to(params["init_h"][:, None, :], (L, B, H))
    c = jnp.broadcast_to(params["init_c"][:, None, :], (L, B, H))
    outs = []
    for t in range(x.shape[0]):
        inp = x[t]
        new_h, new_c = [], []
        for l in range(L):
            w_ih, w_hh, b = params["lstm"][l]
            gates = inp @ w_ih + h[l] @ w_hh + b[0]
            i_, f_, g_, o_ = jnp.split(gates, 4, axis=-1)
            i_, f_, o_ = jax.nn.sigmoid(i_), jax.nn.sigmoid(f_), jax.nn.sigmoid(o_)
            g_ = jnp.tanh(g_)
            cn = f_ * c[l] + i_ * g_
            hn = o_ * jnp.tanh(cn)
            new_h.append(hn)
            new_c.append(cn)
            inp = hn
        h, c = jnp.stack(new_h), jnp.stack(new_c)
        outs.append(inp)
    query = jnp.stack(outs, axis=1)                           # (B, T, H)

    def att_score(feat, q, v, w):
        qw = q @ w
        s = jnp.tanh(feat[:, None, :, :] + qw[:, :, None, :])
        return jnp.einsum("bqsh,h->bqs", s, v)

    mask = jnp.arange(Ns)[None, :] < mem_sizes[:, None]
    for _ in range(n_hop):
        sc = att_score(hop_feat, query, params["hop_v"], params["hop_wq"])
        sc = jnp.where(mask[:, None, :], sc, -1e18)
        p = jax.nn.softmax(sc, axis=-1)
        query = p @ hop_feat

    return att_score(attn_feat, query, params["attn_v"], params["attn_wq"])


# ----------------------------------------------------------------------------
# Deterministic parameter init (mirrors the PyTorch __init__)
# ----------------------------------------------------------------------------
def init_params(key, input_dim, n_hidden, n_layer):
    keys = jax.random.split(key, 16)

    def xavier_normal(k, shape):
        std = (2.0 / (shape[0] + shape[1])) ** 0.5
        return std * jax.random.normal(k, shape, dtype=jnp.float32)

    params = {
        "init_h": jax.random.uniform(keys[0], (n_layer, n_hidden), jnp.float32, -INI, INI),
        "init_c": jax.random.uniform(keys[1], (n_layer, n_hidden), jnp.float32, -INI, INI),
        "init_i": jax.random.uniform(keys[2], (input_dim,), jnp.float32, -0.1, 0.1),
        "attn_wm": xavier_normal(keys[3], (input_dim, n_hidden)),
        "attn_wq": xavier_normal(keys[4], (n_hidden, n_hidden)),
        "attn_v": jax.random.uniform(keys[5], (n_hidden,), jnp.float32, -INI, INI),
        "hop_wm": xavier_normal(keys[6], (input_dim, n_hidden)),
        "hop_wq": xavier_normal(keys[7], (n_hidden, n_hidden)),
        "hop_v": jax.random.uniform(keys[8], (n_hidden,), jnp.float32, -INI, INI),
    }
    k_lstm = 1.0 / (n_hidden ** 0.5)
    lstm = []
    for l in range(n_layer):
        in_dim = input_dim if l == 0 else n_hidden
        kk = jax.random.split(keys[9 + l], 4)
        w_ih = jax.random.uniform(kk[0], (in_dim, 4 * n_hidden), jnp.float32, -k_lstm, k_lstm)
        w_hh = jax.random.uniform(kk[1], (n_hidden, 4 * n_hidden), jnp.float32, -k_lstm, k_lstm)
        b_ih = jax.random.uniform(kk[2], (4 * n_hidden,), jnp.float32, -k_lstm, k_lstm)
        b_hh = jax.random.uniform(kk[3], (4 * n_hidden,), jnp.float32, -k_lstm, k_lstm)
        lstm.append((w_ih, w_hh, (b_ih + b_hh)[None, :]))
    params["lstm"] = lstm
    return params


if __name__ == "__main__":
    B, Ns, Nt = 2, 8, 4            # batch, max sentences, max golden sentences
    D, H, L, n_hop = 48, 32, 2, 2  # input_dim, n_hidden, n_layer, n_hop

    key = jax.random.PRNGKey(0)
    kp, ka, kl = jax.random.split(key, 3)
    params = init_params(kp, D, H, L)
    run_params = prepare_params(params)           # one-time weight fusion / repacking

    attn_mem = jax.random.normal(ka, (B, Ns, D), dtype=jnp.float32)
    lstm_in = jax.random.normal(kl, (B, Nt, D), dtype=jnp.float32)
    mem_sizes = jnp.array([8, 5], dtype=jnp.int32)

    fwd = jax.jit(pointer_net_forward, static_argnames=("n_hop",))
    out = jax.block_until_ready(fwd(run_params, attn_mem, mem_sizes, lstm_in, n_hop=n_hop))

    ref = jax.block_until_ready(ref_forward(params, attn_mem, mem_sizes, lstm_in, n_hop))

    assert out.shape == (B, Nt + 1, Ns), out.shape
    err = float(jnp.max(jnp.abs(out - ref)))
    assert jnp.allclose(out, ref, atol=2e-3, rtol=2e-3), err
    print("KERNEL_OK")
</pallas_src>

<mosaic_0001>
module attributes {stable_mosaic.version = 11 : i64} {
  func.func @proj_kernel(%arg0: memref<256x48xf32, #tpu.memory_space<vmem>>, %arg1: memref<48x64xf32, #tpu.memory_space<vmem>>, %arg2: memref<256x64xf32, #tpu.memory_space<vmem>>) attributes {dimension_semantics = [], scalar_prefetch = 0 : i64, scratch_operands = 0 : i64, tpu.core_type = #tpu.core_type<tc>} {
    %c0 = arith.constant 0 : index
    %c0_0 = arith.constant 0 : index
    %0 = vector.load %arg0[%c0, %c0_0] : memref<256x48xf32, #tpu.memory_space<vmem>>, vector<256x48xf32>
    %c0_1 = arith.constant 0 : index
    %c0_2 = arith.constant 0 : index
    %1 = vector.load %arg1[%c0_1, %c0_2] : memref<48x64xf32, #tpu.memory_space<vmem>>, vector<48x64xf32>
    %cst = arith.constant dense<0.000000e+00> : vector<256x64xf32>
    %2 = tpu.matmul %0, %1, %cst {dimension_numbers = #tpu.dot_dimension_numbers<[1], [0], [0], [1], [0, 0, 1, 1], [], []>} : vector<256x48xf32>, vector<48x64xf32>, vector<256x64xf32> -> vector<256x64xf32>
    %c0_3 = arith.constant 0 : index
    %c0_4 = arith.constant 0 : index
    %3 = vector.load %arg2[%c0_3, %c0_4] : memref<256x64xf32, #tpu.memory_space<vmem>>, vector<256x64xf32>
    tpu.vector_store %arg2[%c0_3, %c0_4], %2 {strides = array<i32>} : memref<256x64xf32, #tpu.memory_space<vmem>>, vector<256x64xf32>,
    return
  }
}

module attributes {stable_mosaic.version = 11 : i64} {
  func.func @kernel(%arg0: i32, %arg1: memref<2xi32, #tpu.memory_space<smem>>, %arg2: memref<1x128x32xf32, #tpu.memory_space<vmem>>, %arg3: memref<1x128x32xf32, #tpu.memory_space<vmem>>, %arg4: memref<1x5x32xf32, #tpu.memory_space<vmem>>, %arg5: memref<32x32xf32, #tpu.memory_space<vmem>>, %arg6: memref<32x32xf32, #tpu.memory_space<vmem>>, %arg7: memref<1x32xf32, #tpu.memory_space<vmem>>, %arg8: memref<1x32xf32, #tpu.memory_space<vmem>>, %arg9: memref<1x5x128xf32, #tpu.memory_space<vmem>>) attributes {dimension_semantics = [#tpu.dimension_semantics<parallel>], iteration_bounds = array<i64: 2>, scalar_prefetch = 1 : i64, scratch_operands = 0 : i64, tpu.core_type = #tpu.core_type<tc>, window_params = [{transform_indices = @transform_0, window_bounds = array<i64: 1, 128, 32>}, {transform_indices = @transform_1, window_bounds = array<i64: 1, 128, 32>}, {transform_indices = @transform_2, window_bounds = array<i64: 1, 5, 32>}, {pipeline_mode = #tpu.pipeline_mode<synchronous>, transform_indices = @transform_3, window_bounds = array<i64: 32, 32>}, {pipeline_mode = #tpu.pipeline_mode<synchronous>, transform_indices = @transform_4, window_bounds = array<i64: 32, 32>}, {pipeline_mode = #tpu.pipeline_mode<synchronous>, transform_indices = @transform_5, window_bounds = array<i64: 1, 32>}, {pipeline_mode = #tpu.pipeline_mode<synchronous>, transform_indices = @transform_6, window_bounds = array<i64: 1, 32>}, {transform_indices = @transform_7, window_bounds = array<i64: 1, 5, 128>}]} {
    %0 = arith.index_cast %arg0 : i32 to index
    %1 = memref.load %arg1[%0] : memref<2xi32, #tpu.memory_space<smem>>
    %c0 = arith.constant 0 : index
    %c0_0 = arith.constant 0 : index
    %c0_1 = arith.constant 0 : index
    %2 = vector.load %arg2[%c0, %c0_0, %c0_1] : memref<1x128x32xf32, #tpu.memory_space<vmem>>, vector<1x128x32xf32>
    %3 = vector.shape_cast %2 : vector<1x128x32xf32> to vector<128x32xf32>
    %c0_2 = arith.constant 0 : index
    %c0_3 = arith.constant 0 : index
    %c0_4 = arith.constant 0 : index
    %4 = vector.load %arg4[%c0_2, %c0_3, %c0_4] : memref<1x5x32xf32, #tpu.memory_space<vmem>>, vector<1x5x32xf32>
    %5 = vector.shape_cast %4 : vector<1x5x32xf32> to vector<5x32xf32>
    %6 = tpu.iota {dimensions = array<i32: 1>} : vector<5x128xi32>
    %c0_5 = arith.constant 0 : index
    %c0_6 = arith.constant 0 : index
    %7 = vector.load %arg5[%c0_5, %c0_6] : memref<32x32xf32, #tpu.memory_space<vmem>>, vector<32x32xf32>
    %cst = arith.constant dense<0.000000e+00> : vector<5x32xf32>
    %8 = tpu.matmul %5, %7, %cst {dimension_numbers = #tpu.dot_dimension_numbers<[1], [0], [0], [1], [0, 0, 1, 1], [], []>} : vector<5x32xf32>, vector<32x32xf32>, vector<5x32xf32> -> vector<5x32xf32>
    %9 = vector.shape_cast %3 : vector<128x32xf32> to vector<1x128x32xf32>
    %10 = vector.shape_cast %8 : vector<5x32xf32> to vector<5x1x32xf32>
    %11 = vector.broadcast %9 : vector<1x128x32xf32> to vector<5x128x32xf32>
    %12 = vector.broadcast %10 : vector<5x1x32xf32> to vector<5x128x32xf32>
    %13 = arith.addf %11, %12 : vector<5x128x32xf32>
    %14 = math.tanh %13 : vector<5x128x32xf32>
    %c0_7 = arith.constant 0 : index
    %c0_8 = arith.constant 0 : index
    %15 = vector.load %arg7[%c0_7, %c0_8] : memref<1x32xf32, #tpu.memory_space<vmem>>, vector<1x32xf32>
    %16 = vector.shape_cast %15 : vector<1x32xf32> to vector<32xf32>
    %17 = vector.shape_cast %16 : vector<32xf32> to vector<1x1x32xf32>
    %18 = vector.broadcast %17 : vector<1x1x32xf32> to vector<5x128x32xf32>
    %19 = arith.mulf %14, %18 : vector<5x128x32xf32>
    %cst_9 = arith.constant dense<0.000000e+00> : vector<5x128xf32>
    %20 = vector.multi_reduction <add>, %19, %cst_9 [2] : vector<5x128x32xf32> to vector<5x128xf32>
    %21 = vector.broadcast %1 : i32 to vector<5x128xi32>
    %22 = arith.cmpi slt, %6, %21 : vector<5x128xi32>
    %cst_10 = arith.constant -9.99999984E+17 : f32
    %23 = vector.broadcast %cst_10 : f32 to vector<5x128xf32>
    %24 = arith.select %22, %20, %23 : vector<5x128xi1>, vector<5x128xf32>
    %cst_11 = arith.constant dense<0xFF800000> : vector<5xf32>
    %25 = vector.multi_reduction <maximumf>, %24, %cst_11 [1] : vector<5x128xf32> to vector<5xf32>
    %26 = vector.shape_cast %25 : vector<5xf32> to vector<5x1xf32>
    %27 = vector.broadcast %26 : vector<5x1xf32> to vector<5x128xf32>
    %28 = arith.subf %24, %27 : vector<5x128xf32>
    %29 = math.exp %28 : vector<5x128xf32>
    %cst_12 = arith.constant dense<0.000000e+00> : vector<5xf32>
    %30 = vector.multi_reduction <add>, %29, %cst_12 [1] : vector<5x128xf32> to vector<5xf32>
    %31 = vector.shape_cast %30 : vector<5xf32> to vector<5x1xf32>
    %32 = vector.broadcast %31 : vector<5x1xf32> to vector<5x128xf32>
    %33 = arith.divf %29, %32 : vector<5x128xf32>
    %cst_13 = arith.constant dense<0.000000e+00> : vector<5x32xf32>
    %34 = tpu.matmul %33, %3, %cst_13 {dimension_numbers = #tpu.dot_dimension_numbers<[1], [0], [0], [1], [0, 0, 1, 1], [], []>} : vector<5x128xf32>, vector<128x32xf32>, vector<5x32xf32> -> vector<5x32xf32>
    %c0_14 = arith.constant 0 : index
    %c0_15 = arith.constant 0 : index
    %35 = vector.load %arg5[%c0_14, %c0_15] : memref<32x32xf32, #tpu.memory_space<vmem>>, vector<32x32xf32>
    %cst_16 = arith.constant dense<0.000000e+00> : vector<5x32xf32>
    %36 = tpu.matmul %34, %35, %cst_16 {dimension_numbers = #tpu.dot_dimension_numbers<[1], [0], [0], [1], [0, 0, 1, 1], [], []>} : vector<5x32xf32>, vector<32x32xf32>, vector<5x32xf32> -> vector<5x32xf32>
    %37 = vector.shape_cast %3 : vector<128x32xf32> to vector<1x128x32xf32>
    %38 = vector.shape_cast %36 : vector<5x32xf32> to vector<5x1x32xf32>
    %39 = vector.broadcast %37 : vector<1x128x32xf32> to vector<5x128x32xf32>
    %40 = vector.broadcast %38 : vector<5x1x32xf32> to vector<5x128x32xf32>
    %41 = arith.addf %39, %40 : vector<5x128x32xf32>
    %42 = math.tanh %41 : vector<5x128x32xf32>
    %c0_17 = arith.constant 0 : index
    %c0_18 = arith.constant 0 : index
    %43 = vector.load %arg7[%c0_17, %c0_18] : memref<1x32xf32, #tpu.memory_space<vmem>>, vector<1x32xf32>
    %44 = vector.shape_cast %43 : vector<1x32xf32> to vector<32xf32>
    %45 = vector.shape_cast %44 : vector<32xf32> to vector<1x1x32xf32>
    %46 = vector.broadcast %45 : vector<1x1x32xf32> to vector<5x128x32xf32>
    %47 = arith.mulf %42, %46 : vector<5x128x32xf32>
    %cst_19 = arith.constant dense<0.000000e+00> : vector<5x128xf32>
    %48 = vector.multi_reduction <add>, %47, %cst_19 [2] : vector<5x128x32xf32> to vector<5x128xf32>
    %49 = vector.broadcast %1 : i32 to vector<5x128xi32>
    %50 = arith.cmpi slt, %6, %49 : vector<5x128xi32>
    %cst_20 = arith.constant -9.99999984E+17 : f32
    %51 = vector.broadcast %cst_20 : f32 to vector<5x128xf32>
    %52 = arith.select %50, %48, %51 : vector<5x128xi1>, vector<5x128xf32>
    %cst_21 = arith.constant dense<0xFF800000> : vector<5xf32>
    %53 = vector.multi_reduction <maximumf>, %52, %cst_21 [1] : vector<5x128xf32> to vector<5xf32>
    %54 = vector.shape_cast %53 : vector<5xf32> to vector<5x1xf32>
    %55 = vector.broadcast %54 : vector<5x1xf32> to vector<5x128xf32>
    %56 = arith.subf %52, %55 : vector<5x128xf32>
    %57 = math.exp %56 : vector<5x128xf32>
    %cst_22 = arith.constant dense<0.000000e+00> : vector<5xf32>
    %58 = vector.multi_reduction <add>, %57, %cst_22 [1] : vector<5x128xf32> to vector<5xf32>
    %59 = vector.shape_cast %58 : vector<5xf32> to vector<5x1xf32>
    %60 = vector.broadcast %59 : vector<5x1xf32> to vector<5x128xf32>
    %61 = arith.divf %57, %60 : vector<5x128xf32>
    %cst_23 = arith.constant dense<0.000000e+00> : vector<5x32xf32>
    %62 = tpu.matmul %61, %3, %cst_23 {dimension_numbers = #tpu.dot_dimension_numbers<[1], [0], [0], [1], [0, 0, 1, 1], [], []>} : vector<5x128xf32>, vector<128x32xf32>, vector<5x32xf32> -> vector<5x32xf32>
    %c0_24 = arith.constant 0 : index
    %c0_25 = arith.constant 0 : index
    %63 = vector.load %arg6[%c0_24, %c0_25] : memref<32x32xf32, #tpu.memory_space<vmem>>, vector<32x32xf32>
    %cst_26 = arith.constant dense<0.000000e+00> : vector<5x32xf32>
    %64 = tpu.matmul %62, %63, %cst_26 {dimension_numbers = #tpu.dot_dimension_numbers<[1], [0], [0], [1], [0, 0, 1, 1], [], []>} : vector<5x32xf32>, vector<32x32xf32>, vector<5x32xf32> -> vector<5x32xf32>
    %c0_27 = arith.constant 0 : index
    %c0_28 = arith.constant 0 : index
    %c0_29 = arith.constant 0 : index
    %65 = vector.load %arg3[%c0_27, %c0_28, %c0_29] : memref<1x128x32xf32, #tpu.memory_space<vmem>>, vector<1x128x32xf32>
    %66 = vector.shape_cast %65 : vector<1x128x32xf32> to vector<128x32xf32>
    %67 = vector.shape_cast %66 : vector<128x32xf32> to vector<1x128x32xf32>
    %68 = vector.shape_cast %64 : vector<5x32xf32> to vector<5x1x32xf32>
    %69 = vector.broadcast %67 : vector<1x128x32xf32> to vector<5x128x32xf32>
    %70 = vector.broadcast %68 : vector<5x1x32xf32> to vector<5x128x32xf32>
    %71 = arith.addf %69, %70 : vector<5x128x32xf32>
    %72 = math.tanh %71 : vector<5x128x32xf32>
    %c0_30 = arith.constant 0 : index
    %c0_31 = arith.constant 0 : index
    %73 = vector.load %arg8[%c0_30, %c0_31] : memref<1x32xf32, #tpu.memory_space<vmem>>, vector<1x32xf32>
    %74 = vector.shape_cast %73 : vector<1x32xf32> to vector<32xf32>
    %75 = vector.shape_cast %74 : vector<32xf32> to vector<1x1x32xf32>
    %76 = vector.broadcast %75 : vector<1x1x32xf32> to vector<5x128x32xf32>
    %77 = arith.mulf %72, %76 : vector<5x128x32xf32>
    %cst_32 = arith.constant dense<0.000000e+00> : vector<5x128xf32>
    %78 = vector.multi_reduction <add>, %77, %cst_32 [2] : vector<5x128x32xf32> to vector<5x128xf32>
    %79 = vector.shape_cast %78 : vector<5x128xf32> to vector<1x5x128xf32>
    %c0_33 = arith.constant 0 : index
    %c0_34 = arith.constant 0 : index
    %c0_35 = arith.constant 0 : index
    %80 = vector.load %arg9[%c0_33, %c0_34, %c0_35] : memref<1x5x128xf32, #tpu.memory_space<vmem>>, vector<1x5x128xf32>
    tpu.vector_store %arg9[%c0_33, %c0_34, %c0_35], %79 {strides = array<i32>} : memref<1x5x128xf32, #tpu.memory_space<vmem>>, vector<1x5x128xf32>,
    return
  }
  func.func @transform_0(%arg0: i32, %arg1: memref<2xi32, #tpu.memory_space<smem>>) -> (i32, i32, i32) {
    %c0_i32 = arith.constant 0 : i32
    %c0_i32_0 = arith.constant 0 : i32
    %c0_i32_1 = arith.constant 0 : i32
    return %arg0, %c0_i32, %c0_i32_0 : i32, i32, i32
  }
  func.func @transform_1(%arg0: i32, %arg1: memref<2xi32, #tpu.memory_space<smem>>) -> (i32, i32, i32) {
    %c0_i32 = arith.constant 0 : i32
    %c0_i32_0 = arith.constant 0 : i32
    %c0_i32_1 = arith.constant 0 : i32
    return %arg0, %c0_i32, %c0_i32_0 : i32, i32, i32
  }
  func.func @transform_2(%arg0: i32, %arg1: memref<2xi32, #tpu.memory_space<smem>>) -> (i32, i32, i32) {
    %c0_i32 = arith.constant 0 : i32
    %c0_i32_0 = arith.constant 0 : i32
    %c0_i32_1 = arith.constant 0 : i32
    return %arg0, %c0_i32, %c0_i32_0 : i32, i32, i32
  }
  func.func @transform_3(%arg0: i32, %arg1: memref<2xi32, #tpu.memory_space<smem>>) -> (i32, i32) {
    %c0_i32 = arith.constant 0 : i32
    %c0_i32_0 = arith.constant 0 : i32
    %c0_i32_1 = arith.constant 0 : i32
    return %c0_i32, %c0_i32_0 : i32, i32
  }
  func.func @transform_4(%arg0: i32, %arg1: memref<2xi32, #tpu.memory_space<smem>>) -> (i32, i32) {
    %c0_i32 = arith.constant 0 : i32
    %c0_i32_0 = arith.constant 0 : i32
    %c0_i32_1 = arith.constant 0 : i32
    return %c0_i32, %c0_i32_0 : i32, i32
  }
  func.func @transform_5(%arg0: i32, %arg1: memref<2xi32, #tpu.memory_space<smem>>) -> (i32, i32) {
    %c0_i32 = arith.constant 0 : i32
    %c0_i32_0 = arith.constant 0 : i32
    %c0_i32_1 = arith.constant 0 : i32
    return %c0_i32, %c0_i32_0 : i32, i32
  }
  func.func @transform_6(%arg0: i32, %arg1: memref<2xi32, #tpu.memory_space<smem>>) -> (i32, i32) {
    %c0_i32 = arith.constant 0 : i32
    %c0_i32_0 = arith.constant 0 : i32
    %c0_i32_1 = arith.constant 0 : i32
    return %c0_i32, %c0_i32_0 : i32, i32
  }
  func.func @transform_7(%arg0: i32, %arg1: memref<2xi32, #tpu.memory_space<smem>>) -> (i32, i32, i32) {
    %c0_i32 = arith.constant 0 : i32
    %c0_i32_0 = arith.constant 0 : i32
    %c0_i32_1 = arith.constant 0 : i32
    return %arg0, %c0_i32, %c0_i32_0 : i32, i32, i32
  }
}

module attributes {stable_mosaic.version = 11 : i64} {
  func.func @kernel(%arg0: i32, %arg1: memref<5x2x128xf32, #tpu.memory_space<vmem>>, %arg2: memref<2x2x128xf32, #tpu.memory_space<vmem>>, %arg3: memref<2x2x128xf32, #tpu.memory_space<vmem>>, %arg4: memref<256x512xf32, #tpu.memory_space<vmem>>, %arg5: memref<1x512xf32, #tpu.memory_space<vmem>>, %arg6: memref<256x512xf32, #tpu.memory_space<vmem>>, %arg7: memref<1x512xf32, #tpu.memory_space<vmem>>, %arg8: memref<5x2x128xf32, #tpu.memory_space<vmem>>, %arg9: memref<2x2x128xf32, #tpu.memory_space<vmem>>, %arg10: memref<2x2x128xf32, #tpu.memory_space<vmem>>) attributes {dimension_semantics = [#tpu.dimension_semantics<arbitrary>], iteration_bounds = array<i64: 1>, scalar_prefetch = 0 : i64, scratch_operands = 2 : i64, tpu.core_type = #tpu.core_type<tc>, window_params = [{transform_indices = @transform_0, window_bounds = array<i64: 5, 2, 128>}, {pipeline_mode = #tpu.pipeline_mode<synchronous>, transform_indices = @transform_1, window_bounds = array<i64: 2, 2, 128>}, {pipeline_mode = #tpu.pipeline_mode<synchronous>, transform_indices = @transform_2, window_bounds = array<i64: 2, 2, 128>}, {pipeline_mode = #tpu.pipeline_mode<synchronous>, transform_indices = @transform_3, window_bounds = array<i64: 256, 512>}, {pipeline_mode = #tpu.pipeline_mode<synchronous>, transform_indices = @transform_4, window_bounds = array<i64: 1, 512>}, {pipeline_mode = #tpu.pipeline_mode<synchronous>, transform_indices = @transform_5, window_bounds = array<i64: 256, 512>}, {pipeline_mode = #tpu.pipeline_mode<synchronous>, transform_indices = @transform_6, window_bounds = array<i64: 1, 512>}, {transform_indices = @transform_7, window_bounds = array<i64: 5, 2, 128>}]} {
    %c0_i32 = arith.constant 0 : i32
    %0 = arith.cmpi eq, %arg0, %c0_i32 : i32
    %1 = arith.extui %0 : i1 to i32
    %c0_i32_0 = arith.constant 0 : i32
    %2 = arith.cmpi ne, %1, %c0_i32_0 : i32
    scf.if %2 {
      %c0_225 = arith.constant 0 : index
      %c0_226 = arith.constant 0 : index
      %c0_227 = arith.constant 0 : index
      %438 = vector.load %arg2[%c0_225, %c0_226, %c0_227] : memref<2x2x128xf32, #tpu.memory_space<vmem>>, vector<2x2x128xf32>
      %c0_228 = arith.constant 0 : index
      %c0_229 = arith.constant 0 : index
      %c0_230 = arith.constant 0 : index
      %439 = vector.load %arg9[%c0_228, %c0_229, %c0_230] : memref<2x2x128xf32, #tpu.memory_space<vmem>>, vector<2x2x128xf32>
      tpu.vector_store %arg9[%c0_228, %c0_229, %c0_230], %438 {strides = array<i32>} : memref<2x2x128xf32, #tpu.memory_space<vmem>>, vector<2x2x128xf32>,
      %c0_231 = arith.constant 0 : index
      %c0_232 = arith.constant 0 : index
      %c0_233 = arith.constant 0 : index
      %440 = vector.load %arg3[%c0_231, %c0_232, %c0_233] : memref<2x2x128xf32, #tpu.memory_space<vmem>>, vector<2x2x128xf32>
      %c0_234 = arith.constant 0 : index
      %c0_235 = arith.constant 0 : index
      %c0_236 = arith.constant 0 : index
      %441 = vector.load %arg10[%c0_234, %c0_235, %c0_236] : memref<2x2x128xf32, #tpu.memory_space<vmem>>, vector<2x2x128xf32>
      tpu.vector_store %arg10[%c0_234, %c0_235, %c0_236], %440 {strides = array<i32>} : memref<2x2x128xf32, #tpu.memory_space<vmem>>, vector<2x2x128xf32>,
    } else {
    }
    %c0 = arith.constant 0 : index
    %c0_1 = arith.constant 0 : index
    %c0_2 = arith.constant 0 : index
    %3 = vector.load %arg1[%c0, %c0_1, %c0_2] : memref<5x2x128xf32, #tpu.memory_space<vmem>>, vector<1x2x128xf32>
    %4 = vector.shape_cast %3 : vector<1x2x128xf32> to vector<2x128xf32>
    %c0_3 = arith.constant 0 : index
    %c0_4 = arith.constant 0 : index
    %5 = vector.load %arg4[%c0_3, %c0_4] : memref<256x512xf32, #tpu.memory_space<vmem>>, vector<256x512xf32>
    %c0_5 = arith.constant 0 : index
    %c0_6 = arith.constant 0 : index
    %6 = vector.load %arg5[%c0_5, %c0_6] : memref<1x512xf32, #tpu.memory_space<vmem>>, vector<1x512xf32>
    %c0_7 = arith.constant 0 : index
    %c0_8 = arith.constant 0 : index
    %c0_9 = arith.constant 0 : index
    %7 = vector.load %arg9[%c0_7, %c0_8, %c0_9] : memref<2x2x128xf32, #tpu.memory_space<vmem>>, vector<1x2x128xf32>
    %8 = vector.shape_cast %7 : vector<1x2x128xf32> to vector<2x128xf32>
    %9 = tpu.concatenate %4, %8 in 1 : vector<2x128xf32>, vector<2x128xf32> -> vector<2x256xf32>
    %cst = arith.constant dense<0.000000e+00> : vector<2x512xf32>
    %10 = tpu.matmul %9, %5, %cst {dimension_numbers = #tpu.dot_dimension_numbers<[1], [0], [0], [1], [0, 0, 1, 1], [], []>} : vector<2x256xf32>, vector<256x512xf32>, vector<2x512xf32> -> vector<2x512xf32>
    %11 = vector.broadcast %6 : vector<1x512xf32> to vector<2x512xf32>
    %12 = arith.addf %10, %11 : vector<2x512xf32>
    %13 = vector.extract_strided_slice %12 {offsets = [0, 0], sizes = [2, 128], strides = [1, 1]} : vector<2x512xf32> to vector<2x128xf32>
    %14 = arith.negf %13 : vector<2x128xf32>
    %15 = math.exp %14 : vector<2x128xf32>
    %cst_10 = arith.constant 1.000000e+00 : f32
    %16 = vector.broadcast %cst_10 : f32 to vector<2x128xf32>
    %17 = arith.addf %16, %15 : vector<2x128xf32>
    %18 = arith.divf %16, %17 : vector<2x128xf32>
    %19 = vector.extract_strided_slice %12 {offsets = [0, 128], sizes = [2, 128], strides = [1, 1]} : vector<2x512xf32> to vector<2x128xf32>
    %20 = arith.negf %19 : vector<2x128xf32>
    %21 = math.exp %20 : vector<2x128xf32>
    %cst_11 = arith.constant 1.000000e+00 : f32
    %22 = vector.broadcast %cst_11 : f32 to vector<2x128xf32>
    %23 = arith.addf %22, %21 : vector<2x128xf32>
    %24 = arith.divf %22, %23 : vector<2x128xf32>
    %25 = vector.extract_strided_slice %12 {offsets = [0, 256], sizes = [2, 128], strides = [1, 1]} : vector<2x512xf32> to vector<2x128xf32>
    %26 = math.tanh %25 : vector<2x128xf32>
    %27 = vector.extract_strided_slice %12 {offsets = [0, 384], sizes = [2, 128], strides = [1, 1]} : vector<2x512xf32> to vector<2x128xf32>
    %28 = arith.negf %27 : vector<2x128xf32>
    %29 = math.exp %28 : vector<2x128xf32>
    %cst_12 = arith.constant 1.000000e+00 : f32
    %30 = vector.broadcast %cst_12 : f32 to vector<2x128xf32>
    %31 = arith.addf %30, %29 : vector<2x128xf32>
    %32 = arith.divf %30, %31 : vector<2x128xf32>
    %c0_13 = arith.constant 0 : index
    %c0_14 = arith.constant 0 : index
    %c0_15 = arith.constant 0 : index
    %33 = vector.load %arg10[%c0_13, %c0_14, %c0_15] : memref<2x2x128xf32, #tpu.memory_space<vmem>>, vector<1x2x128xf32>
    %34 = vector.shape_cast %33 : vector<1x2x128xf32> to vector<2x128xf32>
    %35 = arith.mulf %24, %34 : vector<2x128xf32>
    %36 = arith.mulf %18, %26 : vector<2x128xf32>
    %37 = arith.addf %35, %36 : vector<2x128xf32>
    %38 = math.tanh %37 : vector<2x128xf32>
    %39 = arith.mulf %32, %38 : vector<2x128xf32>
    %c0_16 = arith.constant 0 : index
    %c0_17 = arith.constant 0 : index
    %c0_18 = arith.constant 0 : index
    %40 = vector.load %arg9[%c0_16, %c0_17, %c0_18] : memref<2x2x128xf32, #tpu.memory_space<vmem>>, vector<1x2x128xf32>
    %41 = vector.shape_cast %40 : vector<1x2x128xf32> to vector<2x128xf32>
    %42 = vector.shape_cast %39 : vector<2x128xf32> to vector<1x2x128xf32>
    tpu.vector_store %arg9[%c0_16, %c0_17, %c0_18], %42 {strides = array<i32>} : memref<2x2x128xf32, #tpu.memory_space<vmem>>, vector<1x2x128xf32>,
    %c0_19 = arith.constant 0 : index
    %c0_20 = arith.constant 0 : index
    %c0_21 = arith.constant 0 : index
    %43 = vector.load %arg10[%c0_19, %c0_20, %c0_21] : memref<2x2x128xf32, #tpu.memory_space<vmem>>, vector<1x2x128xf32>
    %44 = vector.shape_cast %43 : vector<1x2x128xf32> to vector<2x128xf32>
    %45 = vector.shape_cast %37 : vector<2x128xf32> to vector<1x2x128xf32>
    tpu.vector_store %arg10[%c0_19, %c0_20, %c0_21], %45 {strides = array<i32>} : memref<2x2x128xf32, #tpu.memory_space<vmem>>, vector<1x2x128xf32>,
    %c0_22 = arith.constant 0 : index
    %c0_23 = arith.constant 0 : index
    %46 = vector.load %arg6[%c0_22, %c0_23] : memref<256x512xf32, #tpu.memory_space<vmem>>, vector<256x512xf32>
    %c0_24 = arith.constant 0 : index
    %c0_25 = arith.constant 0 : index
    %47 = vector.load %arg7[%c0_24, %c0_25] : memref<1x512xf32, #tpu.memory_space<vmem>>, vector<1x512xf32>
    %c1 = arith.constant 1 : index
    %c0_26 = arith.constant 0 : index
    %c0_27 = arith.constant 0 : index
    %48 = vector.load %arg9[%c1, %c0_26, %c0_27] : memref<2x2x128xf32, #tpu.memory_space<vmem>>, vector<1x2x128xf32>
    %49 = vector.shape_cast %48 : vector<1x2x128xf32> to vector<2x128xf32>
    %50 = tpu.concatenate %39, %49 in 1 : vector<2x128xf32>, vector<2x128xf32> -> vector<2x256xf32>
    %cst_28 = arith.constant dense<0.000000e+00> : vector<2x512xf32>
    %51 = tpu.matmul %50, %46, %cst_28 {dimension_numbers = #tpu.dot_dimension_numbers<[1], [0], [0], [1], [0, 0, 1, 1], [], []>} : vector<2x256xf32>, vector<256x512xf32>, vector<2x512xf32> -> vector<2x512xf32>
    %52 = vector.broadcast %47 : vector<1x512xf32> to vector<2x512xf32>
    %53 = arith.addf %51, %52 : vector<2x512xf32>
    %54 = vector.extract_strided_slice %53 {offsets = [0, 0], sizes = [2, 128], strides = [1, 1]} : vector<2x512xf32> to vector<2x128xf32>
    %55 = arith.negf %54 : vector<2x128xf32>
    %56 = math.exp %55 : vector<2x128xf32>
    %cst_29 = arith.constant 1.000000e+00 : f32
    %57 = vector.broadcast %cst_29 : f32 to vector<2x128xf32>
    %58 = arith.addf %57, %56 : vector<2x128xf32>
    %59 = arith.divf %57, %58 : vector<2x128xf32>
    %60 = vector.extract_strided_slice %53 {offsets = [0, 128], sizes = [2, 128], strides = [1, 1]} : vector<2x512xf32> to vector<2x128xf32>
    %61 = arith.negf %60 : vector<2x128xf32>
    %62 = math.exp %61 : vector<2x128xf32>
    %cst_30 = arith.constant 1.000000e+00 : f32
    %63 = vector.broadcast %cst_30 : f32 to vector<2x128xf32>
    %64 = arith.addf %63, %62 : vector<2x128xf32>
    %65 = arith.divf %63, %64 : vector<2x128xf32>
    %66 = vector.extract_strided_slice %53 {offsets = [0, 256], sizes = [2, 128], strides = [1, 1]} : vector<2x512xf32> to vector<2x128xf32>
    %67 = math.tanh %66 : vector<2x128xf32>
    %68 = vector.extract_strided_slice %53 {offsets = [0, 384], sizes = [2, 128], strides = [1, 1]} : vector<2x512xf32> to vector<2x128xf32>
    %69 = arith.negf %68 : vector<2x128xf32>
    %70 = math.exp %69 : vector<2x128xf32>
    %cst_31 = arith.constant 1.000000e+00 : f32
    %71 = vector.broadcast %cst_31 : f32 to vector<2x128xf32>
    %72 = arith.addf %71, %70 : vector<2x128xf32>
    %73 = arith.divf %71, %72 : vector<2x128xf32>
    %c1_32 = arith.constant 1 : index
    %c0_33 = arith.constant 0 : index
    %c0_34 = arith.constant 0 : index
    %74 = vector.load %arg10[%c1_32, %c0_33, %c0_34] : memref<2x2x128xf32, #tpu.memory_space<vmem>>, vector<1x2x128xf32>
    %75 = vector.shape_cast %74 : vector<1x2x128xf32> to vector<2x128xf32>
    %76 = arith.mulf %65, %75 : vector<2x128xf32>
    %77 = arith.mulf %59, %67 : vector<2x128xf32>
    %78 = arith.addf %76, %77 : vector<2x128xf32>
    %79 = math.tanh %78 : vector<2x128xf32>
    %80 = arith.mulf %73, %79 : vector<2x128xf32>
    %c1_35 = arith.constant 1 : index
    %c0_36 = arith.constant 0 : index
    %c0_37 = arith.constant 0 : index
    %81 = vector.load %arg9[%c1_35, %c0_36, %c0_37] : memref<2x2x128xf32, #tpu.memory_space<vmem>>, vector<1x2x128xf32>
    %82 = vector.shape_cast %81 : vector<1x2x128xf32> to vector<2x128xf32>
    %83 = vector.shape_cast %80 : vector<2x128xf32> to vector<1x2x128xf32>
    tpu.vector_store %arg9[%c1_35, %c0_36, %c0_37], %83 {strides = array<i32>} : memref<2x2x128xf32, #tpu.memory_space<vmem>>, vector<1x2x128xf32>,
    %c1_38 = arith.constant 1 : index
    %c0_39 = arith.constant 0 : index
    %c0_40 = arith.constant 0 : index
    %84 = vector.load %arg10[%c1_38, %c0_39, %c0_40] : memref<2x2x128xf32, #tpu.memory_space<vmem>>, vector<1x2x128xf32>
    %85 = vector.shape_cast %84 : vector<1x2x128xf32> to vector<2x128xf32>
    %86 = vector.shape_cast %78 : vector<2x128xf32> to vector<1x2x128xf32>
    tpu.vector_store %arg10[%c1_38, %c0_39, %c0_40], %86 {strides = array<i32>} : memref<2x2x128xf32, #tpu.memory_space<vmem>>, vector<1x2x128xf32>,
    %c0_41 = arith.constant 0 : index
    %c0_42 = arith.constant 0 : index
    %c0_43 = arith.constant 0 : index
    %87 = vector.load %arg8[%c0_41, %c0_42, %c0_43] : memref<5x2x128xf32, #tpu.memory_space<vmem>>, vector<1x2x128xf32>
    %88 = vector.shape_cast %87 : vector<1x2x128xf32> to vector<2x128xf32>
    %89 = vector.shape_cast %80 : vector<2x128xf32> to vector<1x2x128xf32>
    tpu.vector_store %arg8[%c0_41, %c0_42, %c0_43], %89 {strides = array<i32>} : memref<5x2x128xf32, #tpu.memory_space<vmem>>, vector<1x2x128xf32>,
    %c1_44 = arith.constant 1 : index
    %c0_45 = arith.constant 0 : index
    %c0_46 = arith.constant 0 : index
    %90 = vector.load %arg1[%c1_44, %c0_45, %c0_46] : memref<5x2x128xf32, #tpu.memory_space<vmem>>, vector<1x2x128xf32>
    %91 = vector.shape_cast %90 : vector<1x2x128xf32> to vector<2x128xf32>
    %c0_47 = arith.constant 0 : index
    %c0_48 = arith.constant 0 : index
    %92 = vector.load %arg4[%c0_47, %c0_48] : memref<256x512xf32, #tpu.memory_space<vmem>>, vector<256x512xf32>
    %c0_49 = arith.constant 0 : index
    %c0_50 = arith.constant 0 : index
    %93 = vector.load %arg5[%c0_49, %c0_50] : memref<1x512xf32, #tpu.memory_space<vmem>>, vector<1x512xf32>
    %c0_51 = arith.constant 0 : index
    %c0_52 = arith.constant 0 : index
    %c0_53 = arith.constant 0 : index
    %94 = vector.load %arg9[%c0_51, %c0_52, %c0_53] : memref<2x2x128xf32, #tpu.memory_space<vmem>>, vector<1x2x128xf32>
    %95 = vector.shape_cast %94 : vector<1x2x128xf32> to vector<2x128xf32>
    %96 = tpu.concatenate %91, %95 in 1 : vector<2x128xf32>, vector<2x128xf32> -> vector<2x256xf32>
    %cst_54 = arith.constant dense<0.000000e+00> : vector<2x512xf32>
    %97 = tpu.matmul %96, %92, %cst_54 {dimension_numbers = #tpu.dot_dimension_numbers<[1], [0], [0], [1], [0, 0, 1, 1], [], []>} : vector<2x256xf32>, vector<256x512xf32>, vector<2x512xf32> -> vector<2x512xf32>
    %98 = vector.broadcast %93 : vector<1x512xf32> to vector<2x512xf32>
    %99 = arith.addf %97, %98 : vector<2x512xf32>
    %100 = vector.extract_strided_slice %99 {offsets = [0, 0], sizes = [2, 128], strides = [1, 1]} : vector<2x512xf32> to vector<2x128xf32>
    %101 = arith.negf %100 : vector<2x128xf32>
    %102 = math.exp %101 : vector<2x128xf32>
    %cst_55 = arith.constant 1.000000e+00 : f32
    %103 = vector.broadcast %cst_55 : f32 to vector<2x128xf32>
    %104 = arith.addf %103, %102 : vector<2x128xf32>
    %105 = arith.divf %103, %104 : vector<2x128xf32>
    %106 = vector.extract_strided_slice %99 {offsets = [0, 128], sizes = [2, 128], strides = [1, 1]} : vector<2x512xf32> to vector<2x128xf32>
    %107 = arith.negf %106 : vector<2x128xf32>
    %108 = math.exp %107 : vector<2x128xf32>
    %cst_56 = arith.constant 1.000000e+00 : f32
    %109 = vector.broadcast %cst_56 : f32 to vector<2x128xf32>
    %110 = arith.addf %109, %108 : vector<2x128xf32>
    %111 = arith.divf %109, %110 : vector<2x128xf32>
    %112 = vector.extract_strided_slice %99 {offsets = [0, 256], sizes = [2, 128], strides = [1, 1]} : vector<2x512xf32> to vector<2x128xf32>
    %113 = math.tanh %112 : vector<2x128xf32>
    %114 = vector.extract_strided_slice %99 {offsets = [0, 384], sizes = [2, 128], strides = [1, 1]} : vector<2x512xf32> to vector<2x128xf32>
    %115 = arith.negf %114 : vector<2x128xf32>
    %116 = math.exp %115 : vector<2x128xf32>
    %cst_57 = arith.constant 1.000000e+00 : f32
    %117 = vector.broadcast %cst_57 : f32 to vector<2x128xf32>
    %118 = arith.addf %117, %116 : vector<2x128xf32>
    %119 = arith.divf %117, %118 : vector<2x128xf32>
    %c0_58 = arith.constant 0 : index
    %c0_59 = arith.constant 0 : index
    %c0_60 = arith.constant 0 : index
    %120 = vector.load %arg10[%c0_58, %c0_59, %c0_60] : memref<2x2x128xf32, #tpu.memory_space<vmem>>, vector<1x2x128xf32>
    %121 = vector.shape_cast %120 : vector<1x2x128xf32> to vector<2x128xf32>
    %122 = arith.mulf %111, %121 : vector<2x128xf32>
    %123 = arith.mulf %105, %113 : vector<2x128xf32>
    %124 = arith.addf %122, %123 : vector<2x128xf32>
    %125 = math.tanh %124 : vector<2x128xf32>
    %126 = arith.mulf %119, %125 : vector<2x128xf32>
    %c0_61 = arith.constant 0 : index
    %c0_62 = arith.constant 0 : index
    %c0_63 = arith.constant 0 : index
    %127 = vector.load %arg9[%c0_61, %c0_62, %c0_63] : memref<2x2x128xf32, #tpu.memory_space<vmem>>, vector<1x2x128xf32>
    %128 = vector.shape_cast %127 : vector<1x2x128xf32> to vector<2x128xf32>
    %129 = vector.shape_cast %126 : vector<2x128xf32> to vector<1x2x128xf32>
    tpu.vector_store %arg9[%c0_61, %c0_62, %c0_63], %129 {strides = array<i32>} : memref<2x2x128xf32, #tpu.memory_space<vmem>>, vector<1x2x128xf32>,
    %c0_64 = arith.constant 0 : index
    %c0_65 = arith.constant 0 : index
    %c0_66 = arith.constant 0 : index
    %130 = vector.load %arg10[%c0_64, %c0_65, %c0_66] : memref<2x2x128xf32, #tpu.memory_space<vmem>>, vector<1x2x128xf32>
    %131 = vector.shape_cast %130 : vector<1x2x128xf32> to vector<2x128xf32>
    %132 = vector.shape_cast %124 : vector<2x128xf32> to vector<1x2x128xf32>
    tpu.vector_store %arg10[%c0_64, %c0_65, %c0_66], %132 {strides = array<i32>} : memref<2x2x128xf32, #tpu.memory_space<vmem>>, vector<1x2x128xf32>,
    %c0_67 = arith.constant 0 : index
    %c0_68 = arith.constant 0 : index
    %133 = vector.load %arg6[%c0_67, %c0_68] : memref<256x512xf32, #tpu.memory_space<vmem>>, vector<256x512xf32>
    %c0_69 = arith.constant 0 : index
    %c0_70 = arith.constant 0 : index
    %134 = vector.load %arg7[%c0_69, %c0_70] : memref<1x512xf32, #tpu.memory_space<vmem>>, vector<1x512xf32>
    %c1_71 = arith.constant 1 : index
    %c0_72 = arith.constant 0 : index
    %c0_73 = arith.constant 0 : index
    %135 = vector.load %arg9[%c1_71, %c0_72, %c0_73] : memref<2x2x128xf32, #tpu.memory_space<vmem>>, vector<1x2x128xf32>
    %136 = vector.shape_cast %135 : vector<1x2x128xf32> to vector<2x128xf32>
    %137 = tpu.concatenate %126, %136 in 1 : vector<2x128xf32>, vector<2x128xf32> -> vector<2x256xf32>
    %cst_74 = arith.constant dense<0.000000e+00> : vector<2x512xf32>
    %138 = tpu.matmul %137, %133, %cst_74 {dimension_numbers = #tpu.dot_dimension_numbers<[1], [0], [0], [1], [0, 0, 1, 1], [], []>} : vector<2x256xf32>, vector<256x512xf32>, vector<2x512xf32> -> vector<2x512xf32>
    %139 = vector.broadcast %134 : vector<1x512xf32> to vector<2x512xf32>
    %140 = arith.addf %138, %139 : vector<2x512xf32>
    %141 = vector.extract_strided_slice %140 {offsets = [0, 0], sizes = [2, 128], strides = [1, 1]} : vector<2x512xf32> to vector<2x128xf32>
    %142 = arith.negf %141 : vector<2x128xf32>
    %143 = math.exp %142 : vector<2x128xf32>
    %cst_75 = arith.constant 1.000000e+00 : f32
    %144 = vector.broadcast %cst_75 : f32 to vector<2x128xf32>
    %145 = arith.addf %144, %143 : vector<2x128xf32>
    %146 = arith.divf %144, %145 : vector<2x128xf32>
    %147 = vector.extract_strided_slice %140 {offsets = [0, 128], sizes = [2, 128], strides = [1, 1]} : vector<2x512xf32> to vector<2x128xf32>
    %148 = arith.negf %147 : vector<2x128xf32>
    %149 = math.exp %148 : vector<2x128xf32>
    %cst_76 = arith.constant 1.000000e+00 : f32
    %150 = vector.broadcast %cst_76 : f32 to vector<2x128xf32>
    %151 = arith.addf %150, %149 : vector<2x128xf32>
    %152 = arith.divf %150, %151 : vector<2x128xf32>
    %153 = vector.extract_strided_slice %140 {offsets = [0, 256], sizes = [2, 128], strides = [1, 1]} : vector<2x512xf32> to vector<2x128xf32>
    %154 = math.tanh %153 : vector<2x128xf32>
    %155 = vector.extract_strided_slice %140 {offsets = [0, 384], sizes = [2, 128], strides = [1, 1]} : vector<2x512xf32> to vector<2x128xf32>
    %156 = arith.negf %155 : vector<2x128xf32>
    %157 = math.exp %156 : vector<2x128xf32>
    %cst_77 = arith.constant 1.000000e+00 : f32
    %158 = vector.broadcast %cst_77 : f32 to vector<2x128xf32>
    %159 = arith.addf %158, %157 : vector<2x128xf32>
    %160 = arith.divf %158, %159 : vector<2x128xf32>
    %c1_78 = arith.constant 1 : index
    %c0_79 = arith.constant 0 : index
    %c0_80 = arith.constant 0 : index
    %161 = vector.load %arg10[%c1_78, %c0_79, %c0_80] : memref<2x2x128xf32, #tpu.memory_space<vmem>>, vector<1x2x128xf32>
    %162 = vector.shape_cast %161 : vector<1x2x128xf32> to vector<2x128xf32>
    %163 = arith.mulf %152, %162 : vector<2x128xf32>
    %164 = arith.mulf %146, %154 : vector<2x128xf32>
    %165 = arith.addf %163, %164 : vector<2x128xf32>
    %166 = math.tanh %165 : vector<2x128xf32>
    %167 = arith.mulf %160, %166 : vector<2x128xf32>
    %c1_81 = arith.constant 1 : index
    %c0_82 = arith.constant 0 : index
    %c0_83 = arith.constant 0 : index
    %168 = vector.load %arg9[%c1_81, %c0_82, %c0_83] : memref<2x2x128xf32, #tpu.memory_space<vmem>>, vector<1x2x128xf32>
    %169 = vector.shape_cast %168 : vector<1x2x128xf32> to vector<2x128xf32>
    %170 = vector.shape_cast %167 : vector<2x128xf32> to vector<1x2x128xf32>
    tpu.vector_store %arg9[%c1_81, %c0_82, %c0_83], %170 {strides = array<i32>} : memref<2x2x128xf32, #tpu.memory_space<vmem>>, vector<1x2x128xf32>,
    %c1_84 = arith.constant 1 : index
    %c0_85 = arith.constant 0 : index
    %c0_86 = arith.constant 0 : index
    %171 = vector.load %arg10[%c1_84, %c0_85, %c0_86] : memref<2x2x128xf32, #tpu.memory_space<vmem>>, vector<1x2x128xf32>
    %172 = vector.shape_cast %171 : vector<1x2x128xf32> to vector<2x128xf32>
    %173 = vector.shape_cast %165 : vector<2x128xf32> to vector<1x2x128xf32>
    tpu.vector_store %arg10[%c1_84, %c0_85, %c0_86], %173 {strides = array<i32>} : memref<2x2x128xf32, #tpu.memory_space<vmem>>, vector<1x2x128xf32>,
    %c1_87 = arith.constant 1 : index
    %c0_88 = arith.constant 0 : index
    %c0_89 = arith.constant 0 : index
    %174 = vector.load %arg8[%c1_87, %c0_88, %c0_89] : memref<5x2x128xf32, #tpu.memory_space<vmem>>, vector<1x2x128xf32>
    %175 = vector.shape_cast %174 : vector<1x2x128xf32> to vector<2x128xf32>
    %176 = vector.shape_cast %167 : vector<2x128xf32> to vector<1x2x128xf32>
    tpu.vector_store %arg8[%c1_87, %c0_88, %c0_89], %176 {strides = array<i32>} : memref<5x2x128xf32, #tpu.memory_space<vmem>>, vector<1x2x128xf32>,
    %c2 = arith.constant 2 : index
    %c0_90 = arith.constant 0 : index
    %c0_91 = arith.constant 0 : index
    %177 = vector.load %arg1[%c2, %c0_90, %c0_91] : memref<5x2x128xf32, #tpu.memory_space<vmem>>, vector<1x2x128xf32>
    %178 = vector.shape_cast %177 : vector<1x2x128xf32> to vector<2x128xf32>
    %c0_92 = arith.constant 0 : index
    %c0_93 = arith.constant 0 : index
    %179 = vector.load %arg4[%c0_92, %c0_93] : memref<256x512xf32, #tpu.memory_space<vmem>>, vector<256x512xf32>
    %c0_94 = arith.constant 0 : index
    %c0_95 = arith.constant 0 : index
    %180 = vector.load %arg5[%c0_94, %c0_95] : memref<1x512xf32, #tpu.memory_space<vmem>>, vector<1x512xf32>
    %c0_96 = arith.constant 0 : index
    %c0_97 = arith.constant 0 : index
    %c0_98 = arith.constant 0 : index
    %181 = vector.load %arg9[%c0_96, %c0_97, %c0_98] : memref<2x2x128xf32, #tpu.memory_space<vmem>>, vector<1x2x128xf32>
    %182 = vector.shape_cast %181 : vector<1x2x128xf32> to vector<2x128xf32>
    %183 = tpu.concatenate %178, %182 in 1 : vector<2x128xf32>, vector<2x128xf32> -> vector<2x256xf32>
    %cst_99 = arith.constant dense<0.000000e+00> : vector<2x512xf32>
    %184 = tpu.matmul %183, %179, %cst_99 {dimension_numbers = #tpu.dot_dimension_numbers<[1], [0], [0], [1], [0, 0, 1, 1], [], []>} : vector<2x256xf32>, vector<256x512xf32>, vector<2x512xf32> -> vector<2x512xf32>
    %185 = vector.broadcast %180 : vector<1x512xf32> to vector<2x512xf32>
    %186 = arith.addf %184, %185 : vector<2x512xf32>
    %187 = vector.extract_strided_slice %186 {offsets = [0, 0], sizes = [2, 128], strides = [1, 1]} : vector<2x512xf32> to vector<2x128xf32>
    %188 = arith.negf %187 : vector<2x128xf32>
    %189 = math.exp %188 : vector<2x128xf32>
    %cst_100 = arith.constant 1.000000e+00 : f32
    %190 = vector.broadcast %cst_100 : f32 to vector<2x128xf32>
    %191 = arith.addf %190, %189 : vector<2x128xf32>
    %192 = arith.divf %190, %191 : vector<2x128xf32>
    %193 = vector.extract_strided_slice %186 {offsets = [0, 128], sizes = [2, 128], strides = [1, 1]} : vector<2x512xf32> to vector<2x128xf32>
    %194 = arith.negf %193 : vector<2x128xf32>
    %195 = math.exp %194 : vector<2x128xf32>
    %cst_101 = arith.constant 1.000000e+00 : f32
    %196 = vector.broadcast %cst_101 : f32 to vector<2x128xf32>
    %197 = arith.addf %196, %195 : vector<2x128xf32>
    %198 = arith.divf %196, %197 : vector<2x128xf32>
    %199 = vector.extract_strided_slice %186 {offsets = [0, 256], sizes = [2, 128], strides = [1, 1]} : vector<2x512xf32> to vector<2x128xf32>
    %200 = math.tanh %199 : vector<2x128xf32>
    %201 = vector.extract_strided_slice %186 {offsets = [0, 384], sizes = [2, 128], strides = [1, 1]} : vector<2x512xf32> to vector<2x128xf32>
    %202 = arith.negf %201 : vector<2x128xf32>
    %203 = math.exp %202 : vector<2x128xf32>
    %cst_102 = arith.constant 1.000000e+00 : f32
    %204 = vector.broadcast %cst_102 : f32 to vector<2x128xf32>
    %205 = arith.addf %204, %203 : vector<2x128xf32>
    %206 = arith.divf %204, %205 : vector<2x128xf32>
    %c0_103 = arith.constant 0 : index
    %c0_104 = arith.constant 0 : index
    %c0_105 = arith.constant 0 : index
    %207 = vector.load %arg10[%c0_103, %c0_104, %c0_105] : memref<2x2x128xf32, #tpu.memory_space<vmem>>, vector<1x2x128xf32>
    %208 = vector.shape_cast %207 : vector<1x2x128xf32> to vector<2x128xf32>
    %209 = arith.mulf %198, %208 : vector<2x128xf32>
    %210 = arith.mulf %192, %200 : vector<2x128xf32>
    %211 = arith.addf %209, %210 : vector<2x128xf32>
    %212 = math.tanh %211 : vector<2x128xf32>
    %213 = arith.mulf %206, %212 : vector<2x128xf32>
    %c0_106 = arith.constant 0 : index
    %c0_107 = arith.constant 0 : index
    %c0_108 = arith.constant 0 : index
    %214 = vector.load %arg9[%c0_106, %c0_107, %c0_108] : memref<2x2x128xf32, #tpu.memory_space<vmem>>, vector<1x2x128xf32>
    %215 = vector.shape_cast %214 : vector<1x2x128xf32> to vector<2x128xf32>
    %216 = vector.shape_cast %213 : vector<2x128xf32> to vector<1x2x128xf32>
    tpu.vector_store %arg9[%c0_106, %c0_107, %c0_108], %216 {strides = array<i32>} : memref<2x2x128xf32, #tpu.memory_space<vmem>>, vector<1x2x128xf32>,
    %c0_109 = arith.constant 0 : index
    %c0_110 = arith.constant 0 : index
    %c0_111 = arith.constant 0 : index
    %217 = vector.load %arg10[%c0_109, %c0_110, %c0_111] : memref<2x2x128xf32, #tpu.memory_space<vmem>>, vector<1x2x128xf32>
    %218 = vector.shape_cast %217 : vector<1x2x128xf32> to vector<2x128xf32>
    %219 = vector.shape_cast %211 : vector<2x128xf32> to vector<1x2x128xf32>
    tpu.vector_store %arg10[%c0_109, %c0_110, %c0_111], %219 {strides = array<i32>} : memref<2x2x128xf32, #tpu.memory_space<vmem>>, vector<1x2x128xf32>,
    %c0_112 = arith.constant 0 : index
    %c0_113 = arith.constant 0 : index
    %220 = vector.load %arg6[%c0_112, %c0_113] : memref<256x512xf32, #tpu.memory_space<vmem>>, vector<256x512xf32>
    %c0_114 = arith.constant 0 : index
    %c0_115 = arith.constant 0 : index
    %221 = vector.load %arg7[%c0_114, %c0_115] : memref<1x512xf32, #tpu.memory_space<vmem>>, vector<1x512xf32>
    %c1_116 = arith.constant 1 : index
    %c0_117 = arith.constant 0 : index
    %c0_118 = arith.constant 0 : index
    %222 = vector.load %arg9[%c1_116, %c0_117, %c0_118] : memref<2x2x128xf32, #tpu.memory_space<vmem>>, vector<1x2x128xf32>
    %223 = vector.shape_cast %222 : vector<1x2x128xf32> to vector<2x128xf32>
    %224 = tpu.concatenate %213, %223 in 1 : vector<2x128xf32>, vector<2x128xf32> -> vector<2x256xf32>
    %cst_119 = arith.constant dense<0.000000e+00> : vector<2x512xf32>
    %225 = tpu.matmul %224, %220, %cst_119 {dimension_numbers = #tpu.dot_dimension_numbers<[1], [0], [0], [1], [0, 0, 1, 1], [], []>} : vector<2x256xf32>, vector<256x512xf32>, vector<2x512xf32> -> vector<2x512xf32>
    %226 = vector.broadcast %221 : vector<1x512xf32> to vector<2x512xf32>
    %227 = arith.addf %225, %226 : vector<2x512xf32>
    %228 = vector.extract_strided_slice %227 {offsets = [0, 0], sizes = [2, 128], strides = [1, 1]} : vector<2x512xf32> to vector<2x128xf32>
    %229 = arith.negf %228 : vector<2x128xf32>
    %230 = math.exp %229 : vector<2x128xf32>
    %cst_120 = arith.constant 1.000000e+00 : f32
    %231 = vector.broadcast %cst_120 : f32 to vector<2x128xf32>
    %232 = arith.addf %231, %230 : vector<2x128xf32>
    %233 = arith.divf %231, %232 : vector<2x128xf32>
    %234 = vector.extract_strided_slice %227 {offsets = [0, 128], sizes = [2, 128], strides = [1, 1]} : vector<2x512xf32> to vector<2x128xf32>
    %235 = arith.negf %234 : vector<2x128xf32>
    %236 = math.exp %235 : vector<2x128xf32>
    %cst_121 = arith.constant 1.000000e+00 : f32
    %237 = vector.broadcast %cst_121 : f32 to vector<2x128xf32>
    %238 = arith.addf %237, %236 : vector<2x128xf32>
    %239 = arith.divf %237, %238 : vector<2x128xf32>
    %240 = vector.extract_strided_slice %227 {offsets = [0, 256], sizes = [2, 128], strides = [1, 1]} : vector<2x512xf32> to vector<2x128xf32>
    %241 = math.tanh %240 : vector<2x128xf32>
    %242 = vector.extract_strided_slice %227 {offsets = [0, 384], sizes = [2, 128], strides = [1, 1]} : vector<2x512xf32> to vector<2x128xf32>
    %243 = arith.negf %242 : vector<2x128xf32>
    %244 = math.exp %243 : vector<2x128xf32>
    %cst_122 = arith.constant 1.000000e+00 : f32
    %245 = vector.broadcast %cst_122 : f32 to vector<2x128xf32>
    %246 = arith.addf %245, %244 : vector<2x128xf32>
    %247 = arith.divf %245, %246 : vector<2x128xf32>
    %c1_123 = arith.constant 1 : index
    %c0_124 = arith.constant 0 : index
    %c0_125 = arith.constant 0 : index
    %248 = vector.load %arg10[%c1_123, %c0_124, %c0_125] : memref<2x2x128xf32, #tpu.memory_space<vmem>>, vector<1x2x128xf32>
    %249 = vector.shape_cast %248 : vector<1x2x128xf32> to vector<2x128xf32>
    %250 = arith.mulf %239, %249 : vector<2x128xf32>
    %251 = arith.mulf %233, %241 : vector<2x128xf32>
    %252 = arith.addf %250, %251 : vector<2x128xf32>
    %253 = math.tanh %252 : vector<2x128xf32>
    %254 = arith.mulf %247, %253 : vector<2x128xf32>
    %c1_126 = arith.constant 1 : index
    %c0_127 = arith.constant 0 : index
    %c0_128 = arith.constant 0 : index
    %255 = vector.load %arg9[%c1_126, %c0_127, %c0_128] : memref<2x2x128xf32, #tpu.memory_space<vmem>>, vector<1x2x128xf32>
    %256 = vector.shape_cast %255 : vector<1x2x128xf32> to vector<2x128xf32>
    %257 = vector.shape_cast %254 : vector<2x128xf32> to vector<1x2x128xf32>
    tpu.vector_store %arg9[%c1_126, %c0_127, %c0_128], %257 {strides = array<i32>} : memref<2x2x128xf32, #tpu.memory_space<vmem>>, vector<1x2x128xf32>,
    %c1_129 = arith.constant 1 : index
    %c0_130 = arith.constant 0 : index
    %c0_131 = arith.constant 0 : index
    %258 = vector.load %arg10[%c1_129, %c0_130, %c0_131] : memref<2x2x128xf32, #tpu.memory_space<vmem>>, vector<1x2x128xf32>
    %259 = vector.shape_cast %258 : vector<1x2x128xf32> to vector<2x128xf32>
    %260 = vector.shape_cast %252 : vector<2x128xf32> to vector<1x2x128xf32>
    tpu.vector_store %arg10[%c1_129, %c0_130, %c0_131], %260 {strides = array<i32>} : memref<2x2x128xf32, #tpu.memory_space<vmem>>, vector<1x2x128xf32>,
    %c2_132 = arith.constant 2 : index
    %c0_133 = arith.constant 0 : index
    %c0_134 = arith.constant 0 : index
    %261 = vector.load %arg8[%c2_132, %c0_133, %c0_134] : memref<5x2x128xf32, #tpu.memory_space<vmem>>, vector<1x2x128xf32>
    %262 = vector.shape_cast %261 : vector<1x2x128xf32> to vector<2x128xf32>
    %263 = vector.shape_cast %254 : vector<2x128xf32> to vector<1x2x128xf32>
    tpu.vector_store %arg8[%c2_132, %c0_133, %c0_134], %263 {strides = array<i32>} : memref<5x2x128xf32, #tpu.memory_space<vmem>>, vector<1x2x128xf32>,
    %c3 = arith.constant 3 : index
    %c0_135 = arith.constant 0 : index
    %c0_136 = arith.constant 0 : index
    %264 = vector.load %arg1[%c3, %c0_135, %c0_136] : memref<5x2x128xf32, #tpu.memory_space<vmem>>, vector<1x2x128xf32>
    %265 = vector.shape_cast %264 : vector<1x2x128xf32> to vector<2x128xf32>
    %c0_137 = arith.constant 0 : index
    %c0_138 = arith.constant 0 : index
    %266 = vector.load %arg4[%c0_137, %c0_138] : memref<256x512xf32, #tpu.memory_space<vmem>>, vector<256x512xf32>
    %c0_139 = arith.constant 0 : index
    %c0_140 = arith.constant 0 : index
    %267 = vector.load %arg5[%c0_139, %c0_140] : memref<1x512xf32, #tpu.memory_space<vmem>>, vector<1x512xf32>
    %c0_141 = arith.constant 0 : index
    %c0_142 = arith.constant 0 : index
    %c0_143 = arith.constant 0 : index
    %268 = vector.load %arg9[%c0_141, %c0_142, %c0_143] : memref<2x2x128xf32, #tpu.memory_space<vmem>>, vector<1x2x128xf32>
    %269 = vector.shape_cast %268 : vector<1x2x128xf32> to vector<2x128xf32>
    %270 = tpu.concatenate %265, %269 in 1 : vector<2x128xf32>, vector<2x128xf32> -> vector<2x256xf32>
    %cst_144 = arith.constant dense<0.000000e+00> : vector<2x512xf32>
    %271 = tpu.matmul %270, %266, %cst_144 {dimension_numbers = #tpu.dot_dimension_numbers<[1], [0], [0], [1], [0, 0, 1, 1], [], []>} : vector<2x256xf32>, vector<256x512xf32>, vector<2x512xf32> -> vector<2x512xf32>
    %272 = vector.broadcast %267 : vector<1x512xf32> to vector<2x512xf32>
    %273 = arith.addf %271, %272 : vector<2x512xf32>
    %274 = vector.extract_strided_slice %273 {offsets = [0, 0], sizes = [2, 128], strides = [1, 1]} : vector<2x512xf32> to vector<2x128xf32>
    %275 = arith.negf %274 : vector<2x128xf32>
    %276 = math.exp %275 : vector<2x128xf32>
    %cst_145 = arith.constant 1.000000e+00 : f32
    %277 = vector.broadcast %cst_145 : f32 to vector<2x128xf32>
    %278 = arith.addf %277, %276 : vector<2x128xf32>
    %279 = arith.divf %277, %278 : vector<2x128xf32>
    %280 = vector.extract_strided_slice %273 {offsets = [0, 128], sizes = [2, 128], strides = [1, 1]} : vector<2x512xf32> to vector<2x128xf32>
    %281 = arith.negf %280 : vector<2x128xf32>
    %282 = math.exp %281 : vector<2x128xf32>
    %cst_146 = arith.constant 1.000000e+00 : f32
    %283 = vector.broadcast %cst_146 : f32 to vector<2x128xf32>
    %284 = arith.addf %283, %282 : vector<2x128xf32>
    %285 = arith.divf %283, %284 : vector<2x128xf32>
    %286 = vector.extract_strided_slice %273 {offsets = [0, 256], sizes = [2, 128], strides = [1, 1]} : vector<2x512xf32> to vector<2x128xf32>
    %287 = math.tanh %286 : vector<2x128xf32>
    %288 = vector.extract_strided_slice %273 {offsets = [0, 384], sizes = [2, 128], strides = [1, 1]} : vector<2x512xf32> to vector<2x128xf32>
    %289 = arith.negf %288 : vector<2x128xf32>
    %290 = math.exp %289 : vector<2x128xf32>
    %cst_147 = arith.constant 1.000000e+00 : f32
    %291 = vector.broadcast %cst_147 : f32 to vector<2x128xf32>
    %292 = arith.addf %291, %290 : vector<2x128xf32>
    %293 = arith.divf %291, %292 : vector<2x128xf32>
    %c0_148 = arith.constant 0 : index
    %c0_149 = arith.constant 0 : index
    %c0_150 = arith.constant 0 : index
    %294 = vector.load %arg10[%c0_148, %c0_149, %c0_150] : memref<2x2x128xf32, #tpu.memory_space<vmem>>, vector<1x2x128xf32>
    %295 = vector.shape_cast %294 : vector<1x2x128xf32> to vector<2x128xf32>
    %296 = arith.mulf %285, %295 : vector<2x128xf32>
    %297 = arith.mulf %279, %287 : vector<2x128xf32>
    %298 = arith.addf %296, %297 : vector<2x128xf32>
    %299 = math.tanh %298 : vector<2x128xf32>
    %300 = arith.mulf %293, %299 : vector<2x128xf32>
    %c0_151 = arith.constant 0 : index
    %c0_152 = arith.constant 0 : index
    %c0_153 = arith.constant 0 : index
    %301 = vector.load %arg9[%c0_151, %c0_152, %c0_153] : memref<2x2x128xf32, #tpu.memory_space<vmem>>, vector<1x2x128xf32>
    %302 = vector.shape_cast %301 : vector<1x2x128xf32> to vector<2x128xf32>
    %303 = vector.shape_cast %300 : vector<2x128xf32> to vector<1x2x128xf32>
    tpu.vector_store %arg9[%c0_151, %c0_152, %c0_153], %303 {strides = array<i32>} : memref<2x2x128xf32, #tpu.memory_space<vmem>>, vector<1x2x128xf32>,
    %c0_154 = arith.constant 0 : index
    %c0_155 = arith.constant 0 : index
    %c0_156 = arith.constant 0 : index
    %304 = vector.load %arg10[%c0_154, %c0_155, %c0_156] : memref<2x2x128xf32, #tpu.memory_space<vmem>>, vector<1x2x128xf32>
    %305 = vector.shape_cast %304 : vector<1x2x128xf32> to vector<2x128xf32>
    %306 = vector.shape_cast %298 : vector<2x128xf32> to vector<1x2x128xf32>
    tpu.vector_store %arg10[%c0_154, %c0_155, %c0_156], %306 {strides = array<i32>} : memref<2x2x128xf32, #tpu.memory_space<vmem>>, vector<1x2x128xf32>,
    %c0_157 = arith.constant 0 : index
    %c0_158 = arith.constant 0 : index
    %307 = vector.load %arg6[%c0_157, %c0_158] : memref<256x512xf32, #tpu.memory_space<vmem>>, vector<256x512xf32>
    %c0_159 = arith.constant 0 : index
    %c0_160 = arith.constant 0 : index
    %308 = vector.load %arg7[%c0_159, %c0_160] : memref<1x512xf32, #tpu.memory_space<vmem>>, vector<1x512xf32>
    %c1_161 = arith.constant 1 : index
    %c0_162 = arith.constant 0 : index
    %c0_163 = arith.constant 0 : index
    %309 = vector.load %arg9[%c1_161, %c0_162, %c0_163] : memref<2x2x128xf32, #tpu.memory_space<vmem>>, vector<1x2x128xf32>
    %310 = vector.shape_cast %309 : vector<1x2x128xf32> to vector<2x128xf32>
    %311 = tpu.concatenate %300, %310 in 1 : vector<2x128xf32>, vector<2x128xf32> -> vector<2x256xf32>
    %cst_164 = arith.constant dense<0.000000e+00> : vector<2x512xf32>
    %312 = tpu.matmul %311, %307, %cst_164 {dimension_numbers = #tpu.dot_dimension_numbers<[1], [0], [0], [1], [0, 0, 1, 1], [], []>} : vector<2x256xf32>, vector<256x512xf32>, vector<2x512xf32> -> vector<2x512xf32>
    %313 = vector.broadcast %308 : vector<1x512xf32> to vector<2x512xf32>
    %314 = arith.addf %312, %313 : vector<2x512xf32>
    %315 = vector.extract_strided_slice %314 {offsets = [0, 0], sizes = [2, 128], strides = [1, 1]} : vector<2x512xf32> to vector<2x128xf32>
    %316 = arith.negf %315 : vector<2x128xf32>
    %317 = math.exp %316 : vector<2x128xf32>
    %cst_165 = arith.constant 1.000000e+00 : f32
    %318 = vector.broadcast %cst_165 : f32 to vector<2x128xf32>
    %319 = arith.addf %318, %317 : vector<2x128xf32>
    %320 = arith.divf %318, %319 : vector<2x128xf32>
    %321 = vector.extract_strided_slice %314 {offsets = [0, 128], sizes = [2, 128], strides = [1, 1]} : vector<2x512xf32> to vector<2x128xf32>
    %322 = arith.negf %321 : vector<2x128xf32>
    %323 = math.exp %322 : vector<2x128xf32>
    %cst_166 = arith.constant 1.000000e+00 : f32
    %324 = vector.broadcast %cst_166 : f32 to vector<2x128xf32>
    %325 = arith.addf %324, %323 : vector<2x128xf32>
    %326 = arith.divf %324, %325 : vector<2x128xf32>
    %327 = vector.extract_strided_slice %314 {offsets = [0, 256], sizes = [2, 128], strides = [1, 1]} : vector<2x512xf32> to vector<2x128xf32>
    %328 = math.tanh %327 : vector<2x128xf32>
    %329 = vector.extract_strided_slice %314 {offsets = [0, 384], sizes = [2, 128], strides = [1, 1]} : vector<2x512xf32> to vector<2x128xf32>
    %330 = arith.negf %329 : vector<2x128xf32>
    %331 = math.exp %330 : vector<2x128xf32>
    %cst_167 = arith.constant 1.000000e+00 : f32
    %332 = vector.broadcast %cst_167 : f32 to vector<2x128xf32>
    %333 = arith.addf %332, %331 : vector<2x128xf32>
    %334 = arith.divf %332, %333 : vector<2x128xf32>
    %c1_168 = arith.constant 1 : index
    %c0_169 = arith.constant 0 : index
    %c0_170 = arith.constant 0 : index
    %335 = vector.load %arg10[%c1_168, %c0_169, %c0_170] : memref<2x2x128xf32, #tpu.memory_space<vmem>>, vector<1x2x128xf32>
    %336 = vector.shape_cast %335 : vector<1x2x128xf32> to vector<2x128xf32>
    %337 = arith.mulf %326, %336 : vector<2x128xf32>
    %338 = arith.mulf %320, %328 : vector<2x128xf32>
    %339 = arith.addf %337, %338 : vector<2x128xf32>
    %340 = math.tanh %339 : vector<2x128xf32>
    %341 = arith.mulf %334, %340 : vector<2x128xf32>
    %c1_171 = arith.constant 1 : index
    %c0_172 = arith.constant 0 : index
    %c0_173 = arith.constant 0 : index
    %342 = vector.load %arg9[%c1_171, %c0_172, %c0_173] : memref<2x2x128xf32, #tpu.memory_space<vmem>>, vector<1x2x128xf32>
    %343 = vector.shape_cast %342 : vector<1x2x128xf32> to vector<2x128xf32>
    %344 = vector.shape_cast %341 : vector<2x128xf32> to vector<1x2x128xf32>
    tpu.vector_store %arg9[%c1_171, %c0_172, %c0_173], %344 {strides = array<i32>} : memref<2x2x128xf32, #tpu.memory_space<vmem>>, vector<1x2x128xf32>,
    %c1_174 = arith.constant 1 : index
    %c0_175 = arith.constant 0 : index
    %c0_176 = arith.constant 0 : index
    %345 = vector.load %arg10[%c1_174, %c0_175, %c0_176] : memref<2x2x128xf32, #tpu.memory_space<vmem>>, vector<1x2x128xf32>
    %346 = vector.shape_cast %345 : vector<1x2x128xf32> to vector<2x128xf32>
    %347 = vector.shape_cast %339 : vector<2x128xf32> to vector<1x2x128xf32>
    tpu.vector_store %arg10[%c1_174, %c0_175, %c0_176], %347 {strides = array<i32>} : memref<2x2x128xf32, #tpu.memory_space<vmem>>, vector<1x2x128xf32>,
    %c3_177 = arith.constant 3 : index
    %c0_178 = arith.constant 0 : index
    %c0_179 = arith.constant 0 : index
    %348 = vector.load %arg8[%c3_177, %c0_178, %c0_179] : memref<5x2x128xf32, #tpu.memory_space<vmem>>, vector<1x2x128xf32>
    %349 = vector.shape_cast %348 : vector<1x2x128xf32> to vector<2x128xf32>
    %350 = vector.shape_cast %341 : vector<2x128xf32> to vector<1x2x128xf32>
    tpu.vector_store %arg8[%c3_177, %c0_178, %c0_179], %350 {strides = array<i32>} : memref<5x2x128xf32, #tpu.memory_space<vmem>>, vector<1x2x128xf32>,
    %c4 = arith.constant 4 : index
    %c0_180 = arith.constant 0 : index
    %c0_181 = arith.constant 0 : index
    %351 = vector.load %arg1[%c4, %c0_180, %c0_181] : memref<5x2x128xf32, #tpu.memory_space<vmem>>, vector<1x2x128xf32>
    %352 = vector.shape_cast %351 : vector<1x2x128xf32> to vector<2x128xf32>
    %c0_182 = arith.constant 0 : index
    %c0_183 = arith.constant 0 : index
    %353 = vector.load %arg4[%c0_182, %c0_183] : memref<256x512xf32, #tpu.memory_space<vmem>>, vector<256x512xf32>
    %c0_184 = arith.constant 0 : index
    %c0_185 = arith.constant 0 : index
    %354 = vector.load %arg5[%c0_184, %c0_185] : memref<1x512xf32, #tpu.memory_space<vmem>>, vector<1x512xf32>
    %c0_186 = arith.constant 0 : index
    %c0_187 = arith.constant 0 : index
    %c0_188 = arith.constant 0 : index
    %355 = vector.load %arg9[%c0_186, %c0_187, %c0_188] : memref<2x2x128xf32, #tpu.memory_space<vmem>>, vector<1x2x128xf32>
    %356 = vector.shape_cast %355 : vector<1x2x128xf32> to vector<2x128xf32>
    %357 = tpu.concatenate %352, %356 in 1 : vector<2x128xf32>, vector<2x128xf32> -> vector<2x256xf32>
    %cst_189 = arith.constant dense<0.000000e+00> : vector<2x512xf32>
    %358 = tpu.matmul %357, %353, %cst_189 {dimension_numbers = #tpu.dot_dimension_numbers<[1], [0], [0], [1], [0, 0, 1, 1], [], []>} : vector<2x256xf32>, vector<256x512xf32>, vector<2x512xf32> -> vector<2x512xf32>
    %359 = vector.broadcast %354 : vector<1x512xf32> to vector<2x512xf32>
    %360 = arith.addf %358, %359 : vector<2x512xf32>
    %361 = vector.extract_strided_slice %360 {offsets = [0, 0], sizes = [2, 128], strides = [1, 1]} : vector<2x512xf32> to vector<2x128xf32>
    %362 = arith.negf %361 : vector<2x128xf32>
    %363 = math.exp %362 : vector<2x128xf32>
    %cst_190 = arith.constant 1.000000e+00 : f32
    %364 = vector.broadcast %cst_190 : f32 to vector<2x128xf32>
    %365 = arith.addf %364, %363 : vector<2x128xf32>
    %366 = arith.divf %364, %365 : vector<2x128xf32>
    %367 = vector.extract_strided_slice %360 {offsets = [0, 128], sizes = [2, 128], strides = [1, 1]} : vector<2x512xf32> to vector<2x128xf32>
    %368 = arith.negf %367 : vector<2x128xf32>
    %369 = math.exp %368 : vector<2x128xf32>
    %cst_191 = arith.constant 1.000000e+00 : f32
    %370 = vector.broadcast %cst_191 : f32 to vector<2x128xf32>
    %371 = arith.addf %370, %369 : vector<2x128xf32>
    %372 = arith.divf %370, %371 : vector<2x128xf32>
    %373 = vector.extract_strided_slice %360 {offsets = [0, 256], sizes = [2, 128], strides = [1, 1]} : vector<2x512xf32> to vector<2x128xf32>
    %374 = math.tanh %373 : vector<2x128xf32>
    %375 = vector.extract_strided_slice %360 {offsets = [0, 384], sizes = [2, 128], strides = [1, 1]} : vector<2x512xf32> to vector<2x128xf32>
    %376 = arith.negf %375 : vector<2x128xf32>
    %377 = math.exp %376 : vector<2x128xf32>
    %cst_192 = arith.constant 1.000000e+00 : f32
    %378 = vector.broadcast %cst_192 : f32 to vector<2x128xf32>
    %379 = arith.addf %378, %377 : vector<2x128xf32>
    %380 = arith.divf %378, %379 : vector<2x128xf32>
    %c0_193 = arith.constant 0 : index
    %c0_194 = arith.constant 0 : index
    %c0_195 = arith.constant 0 : index
    %381 = vector.load %arg10[%c0_193, %c0_194, %c0_195] : memref<2x2x128xf32, #tpu.memory_space<vmem>>, vector<1x2x128xf32>
    %382 = vector.shape_cast %381 : vector<1x2x128xf32> to vector<2x128xf32>
    %383 = arith.mulf %372, %382 : vector<2x128xf32>
    %384 = arith.mulf %366, %374 : vector<2x128xf32>
    %385 = arith.addf %383, %384 : vector<2x128xf32>
    %386 = math.tanh %385 : vector<2x128xf32>
    %387 = arith.mulf %380, %386 : vector<2x128xf32>
    %c0_196 = arith.constant 0 : index
    %c0_197 = arith.constant 0 : index
    %c0_198 = arith.constant 0 : index
    %388 = vector.load %arg9[%c0_196, %c0_197, %c0_198] : memref<2x2x128xf32, #tpu.memory_space<vmem>>, vector<1x2x128xf32>
    %389 = vector.shape_cast %388 : vector<1x2x128xf32> to vector<2x128xf32>
    %390 = vector.shape_cast %387 : vector<2x128xf32> to vector<1x2x128xf32>
    tpu.vector_store %arg9[%c0_196, %c0_197, %c0_198], %390 {strides = array<i32>} : memref<2x2x128xf32, #tpu.memory_space<vmem>>, vector<1x2x128xf32>,
    %c0_199 = arith.constant 0 : index
    %c0_200 = arith.constant 0 : index
    %c0_201 = arith.constant 0 : index
    %391 = vector.load %arg10[%c0_199, %c0_200, %c0_201] : memref<2x2x128xf32, #tpu.memory_space<vmem>>, vector<1x2x128xf32>
    %392 = vector.shape_cast %391 : vector<1x2x128xf32> to vector<2x128xf32>
    %393 = vector.shape_cast %385 : vector<2x128xf32> to vector<1x2x128xf32>
    tpu.vector_store %arg10[%c0_199, %c0_200, %c0_201], %393 {strides = array<i32>} : memref<2x2x128xf32, #tpu.memory_space<vmem>>, vector<1x2x128xf32>,
    %c0_202 = arith.constant 0 : index
    %c0_203 = arith.constant 0 : index
    %394 = vector.load %arg6[%c0_202, %c0_203] : memref<256x512xf32, #tpu.memory_space<vmem>>, vector<256x512xf32>
    %c0_204 = arith.constant 0 : index
    %c0_205 = arith.constant 0 : index
    %395 = vector.load %arg7[%c0_204, %c0_205] : memref<1x512xf32, #tpu.memory_space<vmem>>, vector<1x512xf32>
    %c1_206 = arith.constant 1 : index
    %c0_207 = arith.constant 0 : index
    %c0_208 = arith.constant 0 : index
    %396 = vector.load %arg9[%c1_206, %c0_207, %c0_208] : memref<2x2x128xf32, #tpu.memory_space<vmem>>, vector<1x2x128xf32>
    %397 = vector.shape_cast %396 : vector<1x2x128xf32> to vector<2x128xf32>
    %398 = tpu.concatenate %387, %397 in 1 : vector<2x128xf32>, vector<2x128xf32> -> vector<2x256xf32>
    %cst_209 = arith.constant dense<0.000000e+00> : vector<2x512xf32>
    %399 = tpu.matmul %398, %394, %cst_209 {dimension_numbers = #tpu.dot_dimension_numbers<[1], [0], [0], [1], [0, 0, 1, 1], [], []>} : vector<2x256xf32>, vector<256x512xf32>, vector<2x512xf32> -> vector<2x512xf32>
    %400 = vector.broadcast %395 : vector<1x512xf32> to vector<2x512xf32>
    %401 = arith.addf %399, %400 : vector<2x512xf32>
    %402 = vector.extract_strided_slice %401 {offsets = [0, 0], sizes = [2, 128], strides = [1, 1]} : vector<2x512xf32> to vector<2x128xf32>
    %403 = arith.negf %402 : vector<2x128xf32>
    %404 = math.exp %403 : vector<2x128xf32>
    %cst_210 = arith.constant 1.000000e+00 : f32
    %405 = vector.broadcast %cst_210 : f32 to vector<2x128xf32>
    %406 = arith.addf %405, %404 : vector<2x128xf32>
    %407 = arith.divf %405, %406 : vector<2x128xf32>
    %408 = vector.extract_strided_slice %401 {offsets = [0, 128], sizes = [2, 128], strides = [1, 1]} : vector<2x512xf32> to vector<2x128xf32>
    %409 = arith.negf %408 : vector<2x128xf32>
    %410 = math.exp %409 : vector<2x128xf32>
    %cst_211 = arith.constant 1.000000e+00 : f32
    %411 = vector.broadcast %cst_211 : f32 to vector<2x128xf32>
    %412 = arith.addf %411, %410 : vector<2x128xf32>
    %413 = arith.divf %411, %412 : vector<2x128xf32>
    %414 = vector.extract_strided_slice %401 {offsets = [0, 256], sizes = [2, 128], strides = [1, 1]} : vector<2x512xf32> to vector<2x128xf32>
    %415 = math.tanh %414 : vector<2x128xf32>
    %416 = vector.extract_strided_slice %401 {offsets = [0, 384], sizes = [2, 128], strides = [1, 1]} : vector<2x512xf32> to vector<2x128xf32>
    %417 = arith.negf %416 : vector<2x128xf32>
    %418 = math.exp %417 : vector<2x128xf32>
    %cst_212 = arith.constant 1.000000e+00 : f32
    %419 = vector.broadcast %cst_212 : f32 to vector<2x128xf32>
    %420 = arith.addf %419, %418 : vector<2x128xf32>
    %421 = arith.divf %419, %420 : vector<2x128xf32>
    %c1_213 = arith.constant 1 : index
    %c0_214 = arith.constant 0 : index
    %c0_215 = arith.constant 0 : index
    %422 = vector.load %arg10[%c1_213, %c0_214, %c0_215] : memref<2x2x128xf32, #tpu.memory_space<vmem>>, vector<1x2x128xf32>
    %423 = vector.shape_cast %422 : vector<1x2x128xf32> to vector<2x128xf32>
    %424 = arith.mulf %413, %423 : vector<2x128xf32>
    %425 = arith.mulf %407, %415 : vector<2x128xf32>
    %426 = arith.addf %424, %425 : vector<2x128xf32>
    %427 = math.tanh %426 : vector<2x128xf32>
    %428 = arith.mulf %421, %427 : vector<2x128xf32>
    %c1_216 = arith.constant 1 : index
    %c0_217 = arith.constant 0 : index
    %c0_218 = arith.constant 0 : index
    %429 = vector.load %arg9[%c1_216, %c0_217, %c0_218] : memref<2x2x128xf32, #tpu.memory_space<vmem>>, vector<1x2x128xf32>
    %430 = vector.shape_cast %429 : vector<1x2x128xf32> to vector<2x128xf32>
    %431 = vector.shape_cast %428 : vector<2x128xf32> to vector<1x2x128xf32>
    tpu.vector_store %arg9[%c1_216, %c0_217, %c0_218], %431 {strides = array<i32>} : memref<2x2x128xf32, #tpu.memory_space<vmem>>, vector<1x2x128xf32>,
    %c1_219 = arith.constant 1 : index
    %c0_220 = arith.constant 0 : index
    %c0_221 = arith.constant 0 : index
    %432 = vector.load %arg10[%c1_219, %c0_220, %c0_221] : memref<2x2x128xf32, #tpu.memory_space<vmem>>, vector<1x2x128xf32>
    %433 = vector.shape_cast %432 : vector<1x2x128xf32> to vector<2x128xf32>
    %434 = vector.shape_cast %426 : vector<2x128xf32> to vector<1x2x128xf32>
    tpu.vector_store %arg10[%c1_219, %c0_220, %c0_221], %434 {strides = array<i32>} : memref<2x2x128xf32, #tpu.memory_space<vmem>>, vector<1x2x128xf32>,
    %c4_222 = arith.constant 4 : index
    %c0_223 = arith.constant 0 : index
    %c0_224 = arith.constant 0 : index
    %435 = vector.load %arg8[%c4_222, %c0_223, %c0_224] : memref<5x2x128xf32, #tpu.memory_space<vmem>>, vector<1x2x128xf32>
    %436 = vector.shape_cast %435 : vector<1x2x128xf32> to vector<2x128xf32>
    %437 = vector.shape_cast %428 : vector<2x128xf32> to vector<1x2x128xf32>
    tpu.vector_store %arg8[%c4_222, %c0_223, %c0_224], %437 {strides = array<i32>} : memref<5x2x128xf32, #tpu.memory_space<vmem>>, vector<1x2x128xf32>,
    return
  }
  func.func @transform_0(%arg0: i32) -> (i32, i32, i32) {
    %c0_i32 = arith.constant 0 : i32
    %c0_i32_0 = arith.constant 0 : i32
    %c0_i32_1 = arith.constant 0 : i32
    return %arg0, %c0_i32, %c0_i32_0 : i32, i32, i32
  }
  func.func @transform_1(%arg0: i32) -> (i32, i32, i32) {
    %c0_i32 = arith.constant 0 : i32
    %c0_i32_0 = arith.constant 0 : i32
    %c0_i32_1 = arith.constant 0 : i32
    %c0_i32_2 = arith.constant 0 : i32
    return %c0_i32, %c0_i32_0, %c0_i32_1 : i32, i32, i32
  }
  func.func @transform_2(%arg0: i32) -> (i32, i32, i32) {
    %c0_i32 = arith.constant 0 : i32
    %c0_i32_0 = arith.constant 0 : i32
    %c0_i32_1 = arith.constant 0 : i32
    %c0_i32_2 = arith.constant 0 : i32
    return %c0_i32, %c0_i32_0, %c0_i32_1 : i32, i32, i32
  }
  func.func @transform_3(%arg0: i32) -> (i32, i32) {
    %c0_i32 = arith.constant 0 : i32
    %c0_i32_0 = arith.constant 0 : i32
    %c0_i32_1 = arith.constant 0 : i32
    return %c0_i32, %c0_i32_0 : i32, i32
  }
  func.func @transform_4(%arg0: i32) -> (i32, i32) {
    %c0_i32 = arith.constant 0 : i32
    %c0_i32_0 = arith.constant 0 : i32
    %c0_i32_1 = arith.constant 0 : i32
    return %c0_i32, %c0_i32_0 : i32, i32
  }
  func.func @transform_5(%arg0: i32) -> (i32, i32) {
    %c0_i32 = arith.constant 0 : i32
    %c0_i32_0 = arith.constant 0 : i32
    %c0_i32_1 = arith.constant 0 : i32
    return %c0_i32, %c0_i32_0 : i32, i32
  }
  func.func @transform_6(%arg0: i32) -> (i32, i32) {
    %c0_i32 = arith.constant 0 : i32
    %c0_i32_0 = arith.constant 0 : i32
    %c0_i32_1 = arith.constant 0 : i32
    return %c0_i32, %c0_i32_0 : i32, i32
  }
  func.func @transform_7(%arg0: i32) -> (i32, i32, i32) {
    %c0_i32 = arith.constant 0 : i32
    %c0_i32_0 = arith.constant 0 : i32
    %c0_i32_1 = arith.constant 0 : i32
    return %arg0, %c0_i32, %c0_i32_0 : i32, i32, i32
  }
}

</mosaic_0001>

<bundles_post_ra>
// kernel: pointer_net_forward.3
= control target key start
LH: loop header
LB: loop body
LE: loop exit
PB: predicated region body
PF: predicated region fallthrough
CT: control target
= control target key end

     0   :  { %vm49_vm0 = vcmask 392192   ;;  %vm371_vm1 = vcmask 523264   ;;  %s845_s1 = inlined_call_operand.vmem [shape: f32[48,64], index: 1, kind: input, shape index: {}]   ;;  %s846_s0 = inlined_call_operand.vmem [shape: f32[256,48], index: 0, kind: input, shape index: {}]   ;;  %s847_s2 = inlined_call_operand.vmem [shape: f32[256,64], index: 2, kind: output, shape index: {}]  }
   0x1   :  { %v43_v0 = vld [vmem:[%s845_s1] sm:$0xff]  ;;  %v44_v1 = vld [vmem:[%s845_s1 + $0x8] sm:$0xff]  ;;  %v45_v2 = vld [vmem:[%s845_s1 + $0x10] sm:$0xff] }
   0x2   :  { %v538_v3 = vpack.c.bf16 %v44_v1, %v43_v0  ;;  %v46_v4 = vld [vmem:[%s845_s1 + $0x18] sm:$0xff]  ;;  %v47_v6 = vld [vmem:[%s845_s1 + $0x20] sm:$0xff]  ;;  %v48_v7 = vld [vmem:[%s845_s1 + $0x28] sm:$0xff] }
   0x3   :  { %v542_v5 = vpack.c.bf16 %v46_v4, %v45_v2  ;;  %v11_v8 = vld [vmem:[%s846_s0] sm:$0xff]  ;;  %v546_v10 = vpack.c.bf16 %v48_v7, %v47_v6  ;;  %v12_v11 = vld [vmem:[%s846_s0 + $0x8] sm:$0xff]  ;;  %v13_v13 = vld [vmem:[%s846_s0 + $0x10] sm:$0xff] }
   0x4   :  { %539 = vmatprep.subr.bf16.mxu0 %v538_v3  ;;  %550 = vmatprep.subr.bf16.mxu1 %v538_v3  ;;  %v27_v9 = vld [vmem:[%s846_s0 + $0x80] sm:$0xff]  ;;  %v28_v12 = vld [vmem:[%s846_s0 + $0x88] sm:$0xff]  ;;  %v29_v14 = vld [vmem:[%s846_s0 + $0x90] sm:$0xff] }
   0x5   :  { %541 = vmatpush3.bf16.msra.mxu0 %v538_v3  ;;  %553 = vmatpush3.bf16.msra.mxu1 %v538_v3  ;;  %v14_v15 = vld [vmem:[%s846_s0 + $0x18] sm:$0xff]  ;;  %v15_v17 = vld [vmem:[%s846_s0 + $0x20] sm:$0xff]  ;;  %v16_v19 = vld [vmem:[%s846_s0 + $0x28] sm:$0xff] }
   0x6   :  { %543 = vmatprep.subr.bf16.mxu0 %v542_v5  ;;  %551 = vmatprep.subr.bf16.mxu1 %v542_v5  ;;  %v30_v16 = vld [vmem:[%s846_s0 + $0x98] sm:$0xff]  ;;  %v31_v18 = vld [vmem:[%s846_s0 + $0xa0] sm:$0xff]  ;;  %v32_v20 = vld [vmem:[%s846_s0 + $0xa8] sm:$0xff] }
   0x7   :  { %490 = vmatprep.mubr.msk.f32.mxu0 %vm49_vm0, %v11_v8  ;;  %514 = vmatprep.mubr.msk.f32.mxu1 %vm49_vm0, %v27_v9  ;;  %v17_v21 = vld [vmem:[%s846_s0 + $0x30] sm:$0xff]  ;;  %v18_v23 = vld [vmem:[%s846_s0 + $0x38] sm:$0xff]  ;;  %v19_v25 = vld [vmem:[%s846_s0 + $0x40] sm:$0xff] }
   0x8   :  { %v33_v22 = vld [vmem:[%s846_s0 + $0xb0] sm:$0xff]  ;;  %v34_v24 = vld [vmem:[%s846_s0 + $0xb8] sm:$0xff]  ;;  %v35_v26 = vld [vmem:[%s846_s0 + $0xc0] sm:$0xff] }
   0x9   :  { %545 = vmatpush3.bf16.msra.mxu0 %v542_v5  ;;  %554 = vmatpush3.bf16.msra.mxu1 %v542_v5  ;;  %v20_v27 = vld [vmem:[%s846_s0 + $0x48] sm:$0xff]  ;;  %v21_v29 = vld [vmem:[%s846_s0 + $0x50] sm:$0xff]  ;;  %v22_v31 = vld [vmem:[%s846_s0 + $0x58] sm:$0xff] }
   0xa   :  { %547 = vmatprep.subr.bf16.mxu0 %v546_v10  ;;  %552 = vmatprep.subr.bf16.mxu1 %v546_v10  ;;  %v36_v28 = vld [vmem:[%s846_s0 + $0xc8] sm:$0xff]  ;;  %v37_v30 = vld [vmem:[%s846_s0 + $0xd0] sm:$0xff]  ;;  %v38_v32 = vld [vmem:[%s846_s0 + $0xd8] sm:$0xff] }
   0xb   :  { %v23_v33 = vld [vmem:[%s846_s0 + $0x60] sm:$0xff]  ;;  %v24_v35 = vld [vmem:[%s846_s0 + $0x68] sm:$0xff]  ;;  %v25_v37 = vld [vmem:[%s846_s0 + $0x70] sm:$0xff] }
   0xc   :  { %v39_v34 = vld [vmem:[%s846_s0 + $0xe0] sm:$0xff]  ;;  %v40_v36 = vld [vmem:[%s846_s0 + $0xe8] sm:$0xff]  ;;  %v41_v38 = vld [vmem:[%s846_s0 + $0xf0] sm:$0xff] }
   0xd   :  { %549 = vmatpush3.bf16.msra.mxu0 %v546_v10  ;;  %555 = vmatpush3.bf16.msra.mxu1 %v546_v10  ;;  %v26_v39 = vld [vmem:[%s846_s0 + $0x78] sm:$0xff] }
   0xe   :  { %v42_v40 = vld [vmem:[%s846_s0 + $0xf8] sm:$0xff] }
  0x10   :  { %491 = vmatmul.mubr.msk.f32.vlgmr.msra.gmra.mrb[0].mxu0 %vm49_vm0, %v12_v11  ;;  %515 = vmatmul.mubr.msk.f32.vlgmr.msra.gmra.mrb[0].mxu1 %vm49_vm0, %v28_v12 }
  0x11   :  { %493 = vmatprep.mubr.msk.f32.mxu0 %vm49_vm0, %v13_v13  ;;  %517 = vmatprep.mubr.msk.f32.mxu1 %vm49_vm0, %v29_v14 }
  0x14   :  { %494 = vmatmul.mubr.msk.f32.gmra.mrb[2].mxu0 %vm49_vm0, %v14_v15  ;;  %518 = vmatmul.mubr.msk.f32.gmra.mrb[2].mxu1 %vm49_vm0, %v30_v16 }
  0x15   :  { %496 = vmatprep.mubr.msk.f32.mxu0 %vm49_vm0, %v15_v17  ;;  %520 = vmatprep.mubr.msk.f32.mxu1 %vm49_vm0, %v31_v18 }
  0x18   :  { %497 = vmatmul.mubr.msk.f32.gmra.mrb[4].mxu0 %vm49_vm0, %v16_v19  ;;  %521 = vmatmul.mubr.msk.f32.gmra.mrb[4].mxu1 %vm49_vm0, %v32_v20 }
  0x19   :  { %499 = vmatprep.mubr.msk.f32.mxu0 %vm49_vm0, %v17_v21  ;;  %523 = vmatprep.mubr.msk.f32.mxu1 %vm49_vm0, %v33_v22 }
  0x1c   :  { %500 = vmatmul.mubr.msk.f32.gmra.mrb[6].mxu0 %vm49_vm0, %v18_v23  ;;  %524 = vmatmul.mubr.msk.f32.gmra.mrb[6].mxu1 %vm49_vm0, %v34_v24 }
  0x1d   :  { %502 = vmatprep.mubr.msk.f32.mxu0 %vm49_vm0, %v19_v25  ;;  %526 = vmatprep.mubr.msk.f32.mxu1 %vm49_vm0, %v35_v26 }
  0x20   :  { %503 = vmatmul.mubr.msk.f32.gmra.mrb[8].mxu0 %vm49_vm0, %v20_v27  ;;  %527 = vmatmul.mubr.msk.f32.gmra.mrb[8].mxu1 %vm49_vm0, %v36_v28 }
  0x21   :  { %505 = vmatprep.mubr.msk.f32.mxu0 %vm49_vm0, %v21_v29  ;;  %529 = vmatprep.mubr.msk.f32.mxu1 %vm49_vm0, %v37_v30 }
  0x24   :  { %506 = vmatmul.mubr.msk.f32.gmra.mrb[10].mxu0 %vm49_vm0, %v22_v31  ;;  %530 = vmatmul.mubr.msk.f32.gmra.mrb[10].mxu1 %vm49_vm0, %v38_v32 }
  0x25   :  { %508 = vmatprep.mubr.msk.f32.mxu0 %vm49_vm0, %v23_v33  ;;  %532 = vmatprep.mubr.msk.f32.mxu1 %vm49_vm0, %v39_v34 }
  0x28   :  { %509 = vmatmul.mubr.msk.f32.gmra.mrb[12].mxu0 %vm49_vm0, %v24_v35  ;;  %533 = vmatmul.mubr.msk.f32.gmra.mrb[12].mxu1 %vm49_vm0, %v40_v36 }
  0x29   :  { %511 = vmatprep.mubr.msk.f32.mxu0 %vm49_vm0, %v25_v37  ;;  %535 = vmatprep.mubr.msk.f32.mxu1 %vm49_vm0, %v41_v38 }
  0x2c   :  { %512 = vmatmul.mubr.msk.f32.gmra.mrb[14].mxu0 %vm49_vm0, %v26_v39  ;;  %536 = vmatmul.mubr.msk.f32.gmra.mrb[14].mxu1 %vm49_vm0, %v42_v40 }
  0xe3   :  { %v492_v41 = vpop.f32.mrb[0].mxu0  ;;  %v516_v42 = vpop.f32.mrb[0].mxu1 }
  0xe4   :  { %373 = vst.msk [vmem:[%s847_s2 + $0x8] sm:$0xff] %vm371_vm1, %v492_v41  ;;  %389 = vst.msk [vmem:[%s847_s2 + $0x88] sm:$0xff] %vm371_vm1, %v516_v42  ;;  %v212_v43 = vpop.f32.mrb[1].mxu0  ;;  %v292_v44 = vpop.f32.mrb[1].mxu1 }
  0xe5   :  { %372 = vst.msk [vmem:[%s847_s2] sm:$0xff] %vm371_vm1, %v212_v43  ;;  %388 = vst.msk [vmem:[%s847_s2 + $0x80] sm:$0xff] %vm371_vm1, %v292_v44 }
  0xe7   :  { %v495_v45 = vpop.f32.mrb[2].mxu0  ;;  %v519_v46 = vpop.f32.mrb[2].mxu1 }
  0xe8   :  { %375 = vst.msk [vmem:[%s847_s2 + $0x18] sm:$0xff] %vm371_vm1, %v495_v45  ;;  %391 = vst.msk [vmem:[%s847_s2 + $0x98] sm:$0xff] %vm371_vm1, %v519_v46  ;;  %v222_v47 = vpop.f32.mrb[3].mxu0  ;;  %v302_v48 = vpop.f32.mrb[3].mxu1 }
  0xe9   :  { %374 = vst.msk [vmem:[%s847_s2 + $0x10] sm:$0xff] %vm371_vm1, %v222_v47  ;;  %390 = vst.msk [vmem:[%s847_s2 + $0x90] sm:$0xff] %vm371_vm1, %v302_v48 }
  0xeb   :  { %v498_v49 = vpop.f32.mrb[4].mxu0  ;;  %v522_v50 = vpop.f32.mrb[4].mxu1 }
  0xec   :  { %377 = vst.msk [vmem:[%s847_s2 + $0x28] sm:$0xff] %vm371_vm1, %v498_v49  ;;  %393 = vst.msk [vmem:[%s847_s2 + $0xa8] sm:$0xff] %vm371_vm1, %v522_v50  ;;  %v232_v51 = vpop.f32.mrb[5].mxu0  ;;  %v312_v52 = vpop.f32.mrb[5].mxu1 }
  0xed   :  { %376 = vst.msk [vmem:[%s847_s2 + $0x20] sm:$0xff] %vm371_vm1, %v232_v51  ;;  %392 = vst.msk [vmem:[%s847_s2 + $0xa0] sm:$0xff] %vm371_vm1, %v312_v52 }
  0xef   :  { %v501_v53 = vpop.f32.mrb[6].mxu0  ;;  %v525_v54 = vpop.f32.mrb[6].mxu1 }
  0xf0   :  { %379 = vst.msk [vmem:[%s847_s2 + $0x38] sm:$0xff] %vm371_vm1, %v501_v53  ;;  %395 = vst.msk [vmem:[%s847_s2 + $0xb8] sm:$0xff] %vm371_vm1, %v525_v54  ;;  %v242_v55 = vpop.f32.mrb[7].mxu0  ;;  %v322_v56 = vpop.f32.mrb[7].mxu1 }
  0xf1   :  { %378 = vst.msk [vmem:[%s847_s2 + $0x30] sm:$0xff] %vm371_vm1, %v242_v55  ;;  %394 = vst.msk [vmem:[%s847_s2 + $0xb0] sm:$0xff] %vm371_vm1, %v322_v56 }
  0xf3   :  { %v504_v57 = vpop.f32.mrb[8].mxu0  ;;  %v528_v58 = vpop.f32.mrb[8].mxu1 }
  0xf4   :  { %381 = vst.msk [vmem:[%s847_s2 + $0x48] sm:$0xff] %vm371_vm1, %v504_v57  ;;  %397 = vst.msk [vmem:[%s847_s2 + $0xc8] sm:$0xff] %vm371_vm1, %v528_v58  ;;  %v252_v59 = vpop.f32.mrb[9].mxu0  ;;  %v332_v60 = vpop.f32.mrb[9].mxu1 }
  0xf5   :  { %380 = vst.msk [vmem:[%s847_s2 + $0x40] sm:$0xff] %vm371_vm1, %v252_v59  ;;  %396 = vst.msk [vmem:[%s847_s2 + $0xc0] sm:$0xff] %vm371_vm1, %v332_v60 }
  0xf7   :  { %v507_v61 = vpop.f32.mrb[10].mxu0  ;;  %v531_v62 = vpop.f32.mrb[10].mxu1 }
  0xf8   :  { %383 = vst.msk [vmem:[%s847_s2 + $0x58] sm:$0xff] %vm371_vm1, %v507_v61  ;;  %399 = vst.msk [vmem:[%s847_s2 + $0xd8] sm:$0xff] %vm371_vm1, %v531_v62  ;;  %v262_v63 = vpop.f32.mrb[11].mxu0  ;;  %v342_v0 = vpop.f32.mrb[11].mxu1 }
  0xf9   :  { %382 = vst.msk [vmem:[%s847_s2 + $0x50] sm:$0xff] %vm371_vm1, %v262_v63  ;;  %398 = vst.msk [vmem:[%s847_s2 + $0xd0] sm:$0xff] %vm371_vm1, %v342_v0 }
  0xfb   :  { %v510_v1 = vpop.f32.mrb[12].mxu0  ;;  %v534_v2 = vpop.f32.mrb[12].mxu1 }
  0xfc   :  { %385 = vst.msk [vmem:[%s847_s2 + $0x68] sm:$0xff] %vm371_vm1, %v510_v1  ;;  %401 = vst.msk [vmem:[%s847_s2 + $0xe8] sm:$0xff] %vm371_vm1, %v534_v2  ;;  %v272_v3 = vpop.f32.mrb[13].mxu0  ;;  %v352_v4 = vpop.f32.mrb[13].mxu1 }
  0xfd   :  { %384 = vst.msk [vmem:[%s847_s2 + $0x60] sm:$0xff] %vm371_vm1, %v272_v3  ;;  %400 = vst.msk [vmem:[%s847_s2 + $0xe0] sm:$0xff] %vm371_vm1, %v352_v4 }
  0xff   :  { %v513_v5 = vpop.f32.mrb[14].mxu0  ;;  %v537_v6 = vpop.f32.mrb[14].mxu1 }
 0x100   :  { %387 = vst.msk [vmem:[%s847_s2 + $0x78] sm:$0xff] %vm371_vm1, %v513_v5  ;;  %403 = vst.msk [vmem:[%s847_s2 + $0xf8] sm:$0xff] %vm371_vm1, %v537_v6  ;;  %v282_v7 = vpop.f32.mrb[15].mxu0  ;;  %v362_v8 = vpop.f32.mrb[15].mxu1 }
 0x101   :  { %386 = vst.msk [vmem:[%s847_s2 + $0x70] sm:$0xff] %vm371_vm1, %v282_v7  ;;  %402 = vst.msk [vmem:[%s847_s2 + $0xf0] sm:$0xff] %vm371_vm1, %v362_v8 }

// kernel: pointer_net_forward.5
= control target key start
LH: loop header
LB: loop body
LE: loop exit
PB: predicated region body
PF: predicated region fallthrough
CT: control target
= control target key end

     0   :  { %s7647_s0 = inlined_call_operand.vmem [shape: s32[2], index: 0, kind: input, shape index: {}]   ;;  %s7648_s1 = inlined_call_operand.hbm [shape: f32[2,128,32], index: 1, kind: input, shape index: {}]   ;;  %s7649_s2 = inlined_call_operand.hbm [shape: f32[2,128,32], index: 2, kind: input, shape index: {}]   ;;  %s7650_s3 = inlined_call_operand.vmem [shape: f32[2,5,32], index: 3, kind: input, shape index: {}]   ;;  %s7651_s4 = inlined_call_operand.vmem [shape: f32[32,32], index: 4, kind: input, shape index: {}]   ;;  %s7652_s5 = inlined_call_operand.hbm [shape: f32[32,32], index: 5, kind: input, shape index: {}]   ;;  %s7653_s6 = inlined_call_operand.vmem [shape: f32[1,32], index: 6, kind: input, shape index: {}]   ;;  %s7654_s7 = inlined_call_operand.vmem [shape: f32[1,32], index: 7, kind: input, shape index: {}]   ;;  %s7655_s8 = inlined_call_operand.vmem [shape: f32[2,5,128], index: 8, kind: output, shape index: {}]  }
   0x1   :  { %7721 = sst [smem:[#allocation48_spill]] %s7648_s1  ;;  %s13_s29 = sshll.u32 %s7647_s0, 4  ;;  %s14_s29 = int_to_ptr.vmem [resolvable:$true] %s13_s29 }
   0x2   :  { %s4849_s30 = scalar_lea.vmem %s14_s29, 16  ;;  %p4854_p1 = scmp.lt.s32.totalorder %s14_s29, %s14_s29 }
   0x3   :  { %p4850_p0 = scmp.ne.s32.totalorder %s14_s29, %s4849_s30  ;;  %p4855_p2 = scmp.lt.s32.totalorder %s4849_s30, %s4849_s30 }
   0x5   :  { %p4856_p3 = por %p4855_p2, %p4854_p1 }
   0x7   :  { %p4857_p4 = pnand %p4856_p3, %p4850_p0 }
   0x9   :  { %4860 = shalt.err (!%p4857_p4)  }
   0xa   :  { %s4995_s9 = smov [#allocation3]  }
   0xb   :  { %16 = dma.vmem_to_smem %s14_s29, 16, %s4995_s9, [#allocation2] }
   0xc   :  { %4965 = dma.done.wait [#allocation2], 16 }
   0xd   :  { %4966 = vsyncadd [#allocation2], 4294967280 }
   0xe   :  { %18 = sfence }
   0xf   :  { %19 = vsyncpa [#allocation5], 0 }
  0x10   :  { %21 = vsyncpa [#allocation5 + $0x1], 0 }
  0x11   :  { %22 = vsyncpa [#allocation7], 0 }
  0x12   :  { %24 = vsyncpa [#allocation7 + $0x1], 0  ;;  %s5053_s10 = smov 0   ;;  %s5055_s0 = smov 0  }
  0x13   :  { %s5057_s11 = smov 0   ;;  %s5059_s12 = smov 0  }
  0x14 LB: > { %s5072_s13 = sadd.s32 4294967295, %s4993_s12   ;;  %p50_p5 = scmp.ne.s32.totalorder %s4985_s0, %s4981_s10  ;;  %s4993_s12 = sphi %s5059_s12, %s8000_s12   ;;  %s4989_s11 = sphi %s5057_s11, %s7999_s11   ;;  %s4985_s0 = sphi %s5055_s0, %s7998_s0   ;;  %s4981_s10 = sphi %s5053_s10, %s7997_s10  }
  0x15   : > { %p7656_p6 = scmp.eq.s32.totalorder %s5072_s13, 0  ;;  %p4040_p7 = scmp.ge.s32.totalorder %s4993_s12, 1 }
  0x16   : > { %p223_p8 = scmp.lt.s32.totalorder %s4993_s12, 3  ;;  %s4996_s16 = smov [#allocation8]  }
  0x17   : > { %p5080_p9 = por %p7656_p6, %p50_p5  ;;  %s238_s17 = sshll.u32 %s4996_s16, 4  ;;  %s239_s17 = int_to_ptr.vmem [resolvable:$true] %s238_s17 }
  0x18   : > { %p5084_p10 = pnand %p4040_p7, %p223_p8  ;;  %s5097_s19 = sadd.s32 1, %s4993_s12  }
  0x19   : > { %s7722_s14 = scalar_select %p5080_p9, 1, 0 }
  0x1a   : > { %s7723_s15 = scalar_select %p5084_p10, 1, 0 }
  0x1b   : > { %p4290_p11 = pneg %p5084_p10  ;;  %s37_s20 = sadd.s32 1, %s4989_s11 }
  0x1c   : > { %s34_s21 = ssub.s32 %s4993_s12, %s5097_s19  ;;  %s4861_s24 = scalar_lea.hbm %s7652_s5, 512 }
  0x1d   : > { %p5092_p12 = pnand %p4290_p11, %p7656_p6  ;;  %p4862_p13 = scmp.ne.s32.totalorder %s7652_s5, %s4861_s24 }
  0x1e   : > { %p4868_p3 = scmp.lt.u32.totalorder %s4861_s24, %s7652_s5 }
  0x1f   : > { %p4863_p0 = pneg %p5092_p12 }
  0x21   : > { %p4864_p1 = pnand %p4863_p0, %p4862_p13 }
  0x23   : > { %p4865_p2 = pneg %p4864_p1 }
  0x25   : > { %p4870_p4 = pnand %p4868_p3, %p4865_p2 }
  0x27   : > { %4873 = shalt.err (!%p4870_p4)
}
  0x28   : > { %s4874_s29 = scalar_lea.vmem %s239_s17, 512  ;;  %p4882_p11 = scmp.lt.s32.totalorder %s239_s17, %s239_s17 }
  0x29   : > { %p4875_p5 = scmp.ne.s32.totalorder %s239_s17, %s4874_s29  ;;  %p4883_p6 = scmp.lt.s32.totalorder %s4874_s29, %s4874_s29 }
  0x2b   : > { %p4877_p7 = pnand %p4875_p5, %p4863_p0  ;;  %p4884_p9 = por %p4883_p6, %p4882_p11 }
  0x2d   : > { %p4878_p8 = pneg %p4877_p7 }
  0x2f   : > { %p4885_p10 = pnand %p4884_p9, %p4878_p8 }
  0x31   : > { %4888 = shalt.err (!%p4885_p10)
}
  0x32   : > { %s7659_s30 = smov 128   ;;  %s7661_s9 = smov 8  }
  0x33   : > { %4293 = dma.hbm_to_vmem [thread:$0]  (!%p5092_p12), %s7652_s5, 512, %s239_s17, [#allocation7], %s7659_s30, %s7659_s30, %s7661_s9  }
  0x34   : > { %p35_p6 = scmp.eq.s32.totalorder %s34_s21, 0  ;;  %p44_p9 = scmp.ne.s32.totalorder %s4989_s11, %s4985_s0 }
  0x35   : > { %p45_p10 = scmp.eq.s32.totalorder %s4993_s12, 0  ;;  %p4302_p13 = scmp.lt.s32.totalorder %s4993_s12, 2 }
  0x36   : > { %s5126_s22 = scalar_select %p35_p6, %s4989_s11, %s37_s20  }
  0x37   : > { %p46_p0 = por %p45_p10, %p44_p9  ;;  %s258_s23 = sand.u32 1, %s4989_s11  }
  0x38   : > { %s4043_s24 = sshll.u32 %s258_s23, 7  ;;  %s4062_s25 = sshll.u32 %s4993_s12, 11 }
  0x39   : > { %s7725_s1 = sld [smem:[#allocation48_spill]]  ;;  %s262_s28 = scalar_lea.vmem [#allocation4], %s4043_s24 }
  0x3a   : > { %s269_s17 = sshll.u32 %s262_s28, 4  ;;  %p5137_p12 = pnand %p4302_p13, %p46_p0  ;;  %s5135_s17 = int_to_ptr.vmem [resolvable:$true] %s269_s17 }
  0x3b   : > { %s5144_s10 = scalar_lea.hbm %s7649_s2, %s4062_s25  ;;  %s283_s16 = scalar_lea.vmem [#allocation6], %s4043_s24 }
  0x3c   : > { %s5146_s26 = sshll.u32 %s283_s16, 4  ;;  %s5148_s27 = scalar_lea.sflag [#allocation5], %s258_s23  ;;  %s5180_s26 = int_to_ptr.vmem [resolvable:$true] %s5146_s26 }
  0x3d   : > { %p4891_p2 = pneg %p5137_p12 }
  0x3f   : > { %s5133_s18 = scalar_lea.hbm %s7725_s1, %s4062_s25  ;;  %s4894_s21 = scalar_lea.hbm %s7725_s1, 4096 }
  0x40   : > { %s4889_s28 = scalar_lea.hbm %s5133_s18, 2048  ;;  %p4895_p5 = scmp.lt.u32.totalorder %s5133_s18, %s7725_s1 }
  0x41   : > { %p4890_p1 = scmp.ne.s32.totalorder %s5133_s18, %s4889_s28  ;;  %p4896_p7 = scmp.lt.u32.totalorder %s4894_s21, %s4889_s28 }
  0x42   : > { %p4898_p11 = scmp.lt.u32.totalorder %s4889_s28, %s5133_s18 }
  0x43   : > { %p4892_p3 = pnand %p4891_p2, %p4890_p1  ;;  %p4897_p8 = por %p4896_p7, %p4895_p5 }
  0x45   : > { %p4893_p4 = pneg %p4892_p3  ;;  %p4899_p6 = por %p4898_p11, %p4897_p8 }
  0x47   : > { %p4900_p9 = pnand %p4899_p6, %p4893_p4 }
  0x49   : > { %4903 = shalt.err (!%p4900_p9)
}
  0x4a   : > { %s4904_s23 = scalar_lea.vmem %s5135_s17, 2048  ;;  %s4999_s30 = smov [#allocation4]  }
  0x4b   : > { %p4905_p10 = scmp.ne.s32.totalorder %s5135_s17, %s4904_s23  ;;  %s4909_s9 = sshll.u32 %s4999_s30, 4  ;;  %s4910_s9 = int_to_ptr.vmem [resolvable:$false] %s4909_s9 }
  0x4c   : > { %s4911_s24 = scalar_lea.vmem %s4910_s9, 4096  ;;  %p4912_p1 = scmp.lt.s32.totalorder %s5135_s17, %s4910_s9 }
  0x4d   : > { %p4907_p13 = pnand %p4905_p10, %p4891_p2  ;;  %p4913_p3 = scmp.lt.s32.totalorder %s4911_s24, %s4904_s23 }
  0x4f   : > { %p4908_p0 = pneg %p4907_p13  ;;  %p4914_p5 = por %p4913_p3, %p4912_p1 }
  0x51   : > { %p4915_p7 = pnand %p4914_p5, %p4908_p0 }
  0x53   : > { %4918 = shalt.err (!%p4915_p7)
}
  0x54   : > { %s7727_s16 = smov 8   ;;  %s7728_s28 = smov 128  }
  0x55   : > { %4297 = dma.hbm_to_vmem [thread:$0]  (!%p5137_p12), %s5133_s18, 2048, %s5135_s17, %s5148_s27, %s7728_s28, %s7728_s28, %s7727_s16  }
  0x56   : > { %s279_s21 = sand.u32 1, %s4993_s12   ;;  %s4919_s25 = scalar_lea.hbm %s5144_s10, 2048 }
  0x57   : > { %s5183_s29 = scalar_lea.sflag [#allocation7], %s279_s21  ;;  %p4920_p4 = scmp.ne.s32.totalorder %s5144_s10, %s4919_s25 }
  0x58   : > { %s4924_s9 = scalar_lea.hbm %s7649_s2, 4096  ;;  %p4925_p6 = scmp.lt.u32.totalorder %s5144_s10, %s7649_s2 }
  0x59   : > { %p4922_p8 = pnand %p4920_p4, %p4891_p2  ;;  %p4926_p9 = scmp.lt.u32.totalorder %s4924_s9, %s4919_s25 }
  0x5a   : > { %p4928_p13 = scmp.lt.u32.totalorder %s4919_s25, %s5144_s10 }
  0x5b   : > { %p4923_p11 = pneg %p4922_p8  ;;  %p4927_p10 = por %p4926_p9, %p4925_p6 }
  0x5d   : > { %p4929_p0 = por %p4928_p13, %p4927_p10 }
  0x5f   : > { %p4930_p1 = pnand %p4929_p0, %p4923_p11 }
  0x61   : > { %4933 = shalt.err (!%p4930_p1)
}
  0x62   : > { %s4934_s12 = scalar_lea.vmem %s5180_s26, 2048  ;;  %s5000_s18 = smov [#allocation6]  }
  0x63   : > { %p4935_p3 = scmp.ne.s32.totalorder %s5180_s26, %s4934_s12  ;;  %s4939_s17 = sshll.u32 %s5000_s18, 4  ;;  %s4940_s17 = int_to_ptr.vmem [resolvable:$false] %s4939_s17 }
  0x64   : > { %s4941_s1 = scalar_lea.vmem %s4940_s17, 4096  ;;  %p4942_p4 = scmp.lt.s32.totalorder %s5180_s26, %s4940_s17 }
  0x65   : > { %p4937_p5 = pnand %p4935_p3, %p4891_p2  ;;  %p4943_p8 = scmp.lt.s32.totalorder %s4941_s1, %s4934_s12 }
  0x67   : > { %p4938_p7 = pneg %p4937_p5  ;;  %p4944_p6 = por %p4943_p8, %p4942_p4 }
  0x69   : > { %p4945_p9 = pnand %p4944_p6, %p4938_p7 }
  0x6b   : > { %4948 = shalt.err (!%p4945_p9)
}
  0x6c   : > { %4300 = dma.hbm_to_vmem [thread:$0]  (!%p5137_p12), %s5144_s10, 2048, %s5180_s26, %s5183_s29, %s7728_s28, %s7728_s28, %s7727_s16  }
  0x6d   : > { %p7729_p2 = scmp.ne.s32.totalorder %s7723_s15, 0 }
  0x6f   : > { %309 = sbr.rel (%p7729_p2) target bundleno = 2807 (0xaf7), region = 48 }
  0x76   : > { %s311_s27 = sand.u32 1, %s4985_s0   ;;  %p7730_p11 = scmp.ne.s32.totalorder %s7722_s14, 0 }
  0x77   : > { %s4050_s21 = sshll.u32 %s311_s27, 7  ;;  %s312_s25 = scalar_lea.sflag [#allocation5], %s311_s27 }
  0x78   : > { %s5215_s23 = scalar_lea.vmem [#allocation4], %s4050_s21 }
  0x79   : > { %4968 = dma.done.wait (%p7730_p11), %s312_s25, 2048  }
  0x7a   : > { %4970 = vsyncadd (%p7730_p11), %s312_s25, 4294965248  ;;  %s320_s20 = sand.u32 1, %s5072_s13   ;;  %s5222_s10 = scalar_lea.vmem [#allocation6], %s4050_s21 }
  0x7b   : > { %s321_s30 = scalar_lea.sflag [#allocation7], %s320_s20 }
  0x7c   : > { %4972 = dma.done.wait (%p7730_p11), %s321_s30, 2048  }
  0x7d   : > { %4974 = vsyncadd (%p7730_p11), %s321_s30, 4294965248  ;;  %p7731_p12 = scmp.eq.s32.totalorder %s5072_s13, 0 }
  0x7f   : > { %4976 = dma.done.wait (%p7731_p12), [#allocation7], 512   ;;  %p7732_p10 = pmov %p7731_p12 }
  0x80   : > { %p367_p13 = scmp.lt.s32.totalorder %s5072_s13, 1  ;;  %v7665_v0 = vmov 0.0|0.0   ;;  %vm5002_vm0 = vmmov 0   ;;  %v7663_v1 = vmov 0.0   ;;  %v395_v2 = vld [vmem:[%s7651_s4] sm:$0xff]  ;;  %v396_v3 = vld [vmem:[%s7651_s4 + $0x8] sm:$0xff]  ;;  %v393_v9 = vlaneseq }
  0x81   : > { %4978 = vsyncadd (%p7732_p10), [#allocation7], 4294966784  ;;  %4216 = vmatprep.subr.bf16.mxu0 %v7665_v0  ;;  %4121 = vmatprep.mubr.msk.f32.mxu0 %vm5002_vm0, %v7663_v1  ;;  %v4217_v4 = vpack.c.bf16 %v396_v3, %v395_v2  ;;  %v397_v5 = vld [vmem:[%s7651_s4 + $0x10] sm:$0xff]  ;;  %v398_v6 = vld [vmem:[%s7651_s4 + $0x18] sm:$0xff]  ;;  %vm7687_vm1 = vcmask 261120   ;;  %vm1116_vm2 = vcmask 130112  }
  0x82   : > { %4222 = vmatprep.subr.bf16.mxu1 %v7665_v0  ;;  %4156 = vmatprep.mubr.msk.f32.mxu1 %vm5002_vm0, %v7663_v1  ;;  %s5240_s14 = scalar_select %p367_p13, %s5072_s13, 1  ;;  %v4220_v7 = vpack.c.bf16 %v398_v6, %v397_v5  ;;  %v5004_v10 = vmov 1966171168   ;;  %v5268_v13 = vshrl.u32 %v393_v9, 7  ;;  %v5288_v21 = vld [vmem:[%s5215_s23 + $0x20] sm:$0xff]  ;;  %v5294_v23 = vld [vmem:[%s5215_s23 + $0x28] sm:$0xff] }
  0x83   : > { %4218 = vmatpush3.bf16.msra.mxu0 %v4217_v4  ;;  %v476_v11 = vunpack.c.l.s4 %v5004_v10  ;;  %v5291_v22 = vld [vmem:[%s5215_s23] sm:$0xff]  ;;  %v5297_v24 = vld [vmem:[%s5215_s23 + $0x8] sm:$0xff]  ;;  %v5300_v25 = vld [vmem:[%s5215_s23 + $0x38] sm:$0xff]  ;;  %vm1123_vm3 = vcmask 195712   ;;  %vm7688_vm4 = vcmask 261312   ;;  %vm7690_vm5 = vcmask 326912  }
  0x84   : > { %s4053_s18 = sshll.u32 %s5240_s14, 3  ;;  %4219 = vmatprep.subr.bf16.mxu0 %v7665_v0  ;;  %v5278_v17 = vsub.s32 0, %v5268_v13  ;;  %v5309_v29 = vld [vmem:[%s5215_s23 + $0x10] sm:$0xff]  ;;  %v5318_v33 = vld [vmem:[%s5215_s23 + $0x48] sm:$0xff]  ;;  %v5321_v34 = vld [vmem:[%s5215_s23 + $0x18] sm:$0xff]  ;;  %vm7689_vm6 = vcmask 392512  }
  0x85   : > { %s370_s27 = scalar_lea.vmem %s7650_s3, %s4053_s18  ;;  %v477_v12 = vunpack.c.0.s8 %v476_v11  ;;  %v5328_v37 = vld [vmem:[%s5215_s23 + $0x58] sm:$0xff]  ;;  %v5331_v38 = vld [vmem:[%s5215_s23 + $0x30] sm:$0xff]  ;;  %v5336_v39 = vld [vmem:[%s7653_s6] ss:$0 sm:$0xff]  ;;  %vm7672_vm7 = vcmask 458112   ;;  %vm7673_vm8 = vcmask 523712   ;;  %s374_s16 = scalar_lea.vmem %s7655_s8, %s4053_s18 }
  0x86   : > { %v392_v8 = vld [vmem:[%s370_s27] sm:$0x1f]  ;;  %7734 = vst [vmem:[#allocation14_spill] sm:$0xff] %v5278_v17  ;;  %v5343_v43 = vld [vmem:[%s5215_s23 + $0x68] sm:$0xff]  ;;  %v5360_v56 = vld [vmem:[%s5215_s23 + $0x78] sm:$0xff]  ;;  %vm1165_vm9 = vcmask 589312  }
  0x87   : > { %4221 = vmatpush3.bf16.msra.mxu0 %v4220_v7  ;;  %v5271_v14 = vsub.s32 %v477_v12, %v5268_v13  ;;  %v5346_v45 = vld [vmem:[%s5215_s23 + $0x40] sm:$0xff]  ;;  %v5365_v60 = vld [vmem:[%s5215_s23 + $0x50] sm:$0xff]  ;;  %vm7677_vm10 = vcmask 654912   ;;  %vm7674_vm11 = vcmask 720512   ;;  %vm7676_vm12 = vcmask 786112   ;;  %s6053_s20 = sld [smem:[#allocation3 + %s5072_s13]] }
  0x88   : > { %4246 = vmatprep.subr.bf16.mxu0 %v7665_v0  ;;  %vm7675_vm13 = vcmask 851712   ;;  %vm1200_vm14 = vcmask 917312   ;;  %vm1207_vm15 = vcmask 982912  }
  0x89   : > { %7733 = vst [vmem:[#allocation13_spill] sm:$0xff] %v5271_v14 }
  0x8a   : > { %4122 = vmatmul.mubr.msk.f32.vlgmr.msra.gmra.mrb[0].mxu0 %vm7687_vm1, %v392_v8  ;;  %v5380_v8 = vld [vmem:[%s5215_s23 + $0x60] sm:$0xff] }
  0x8b   : > { %4248 = vmatpush3.bf16.msra.mxu0 %v4217_v4  ;;  %4167 = vmatprep.mubr.msk.f32.mxu0 %vm5002_vm0, %v7663_v1 }
  0x8c   : > { %4249 = vmatprep.subr.bf16.mxu0 %v7665_v0 }
  0x8f   : > { %4251 = vmatpush3.bf16.msra.mxu0 %v4220_v7 }
  0x90   : > { %4252 = vmatprep.subr.bf16.mxu0 %v7665_v0 }
 0x15d   : > { %v5273_v15 = vpop.f32.mrb[0].mxu0 }
 0x15e   : > { %v481_v16 = vrot.slane %v5273_v15, %v5271_v14  ;;  %v4123_v18 = vpop.f32.mrb[1].mxu0 }
 0x160   : > { %v5281_v19 = vrot.slane %v481_v16, %v5271_v14  ;;  %v489_v40 = vcombine.high %v481_v16, %v481_v16 }
 0x162   : > { %v5285_v20 = vrot.slane %v5281_v19, %v5278_v17  ;;  %v5350_v49 = vrot.slane %v489_v40, %v5271_v14  ;;  %v511_v11 = vcombine.high %v5281_v19, %v5281_v19 }
 0x164   : > { %v542_v26 = vadd.f32 %v5285_v20, %v5288_v21  ;;  %v538_v27 = vadd.f32 %v5285_v20, %v5291_v22  ;;  %v543_v28 = vadd.f32 %v5285_v20, %v5294_v23  ;;  %v539_v30 = vadd.f32 %v5285_v20, %v5297_v24 }
 0x165   : > { %v545_v31 = vadd.f32 %v5285_v20, %v5300_v25  ;;  %v540_v32 = vadd.f32 %v5285_v20, %v5309_v29  ;;  %v547_v35 = vadd.f32 %v5285_v20, %v5318_v33  ;;  %v541_v36 = vadd.f32 %v5285_v20, %v5321_v34 }
 0x166   : > { %4344 = vtanh.f32 %v542_v26  ;;  %v549_v41 = vadd.f32 %v5285_v20, %v5328_v37  ;;  %v544_v42 = vadd.f32 %v5285_v20, %v5331_v38  ;;  %v551_v51 = vadd.f32 %v5285_v20, %v5343_v43 }
 0x167   : > { %4346 = vtanh.f32 %v538_v27  ;;  %v546_v55 = vadd.f32 %v5285_v20, %v5346_v45  ;;  %v5369_v62 = vrot.slane %v5350_v49, %v5278_v17  ;;  %v553_v63 = vadd.f32 %v5285_v20, %v5360_v56 }
 0x168   : > { %4348 = vtanh.f32 %v543_v28  ;;  %v548_v4 = vadd.f32 %v5285_v20, %v5365_v60  ;;  %v550_v26 = vadd.f32 %v5285_v20, %v5380_v8 }
 0x169   : > { %4350 = vtanh.f32 %v539_v30  ;;  %v554_v12 = vadd.f32 %v5369_v62, %v5291_v22 }
 0x16a   : > { %4352 = vtanh.f32 %v545_v31  ;;  %v5393_v31 = vld [vmem:[%s5215_s23 + $0x70] sm:$0xff] }
 0x16b   : > { %4354 = vtanh.f32 %v540_v32  ;;  %v474_v32 = vcombine.high %v5273_v15, %v5273_v15 }
 0x16c   : > { %4356 = vtanh.f32 %v547_v35  ;;  %v5398_v35 = vrot.slane %v511_v11, %v5278_v17 }
 0x16d   : > { %4358 = vtanh.f32 %v541_v36  ;;  %v555_v36 = vadd.f32 %v5369_v62, %v5297_v24 }
 0x16e   : > { %4360 = vtanh.f32 %v549_v41 }
 0x16f   : > { %4362 = vtanh.f32 %v544_v42  ;;  %v552_v42 = vadd.f32 %v5285_v20, %v5393_v31  ;;  %v570_v20 = vadd.f32 %v5398_v35, %v5291_v22 }
 0x170   : > { %v4345_v44 = vpop.eup %4344  ;;  %4364 = vtanh.f32 %v551_v51 }
 0x171   : > { %v4347_v46 = vpop.eup %4346  ;;  %v709_v47 = vmul.f32 %v4345_v44, %v5336_v39  ;;  %4366 = vtanh.f32 %v546_v55 }
 0x172   : > { %v4349_v48 = vpop.eup %4348  ;;  %v705_v50 = vmul.f32 %v4347_v46, %v5336_v39  ;;  %4368 = vtanh.f32 %v553_v63 }
 0x173   : > { %v4351_v52 = vpop.eup %4350  ;;  %v797_v53 = vsel %vm7687_vm1, %v709_v47, 0.0  ;;  %v710_v54 = vmul.f32 %v4349_v48, %v5336_v39  ;;  %4370 = vtanh.f32 %v548_v4  ;;  %v488_v48 = vrot.slane %v474_v32, %v5271_v14 }
 0x174   : > { %v4353_v57 = vpop.eup %4352  ;;  %798 = vadd.xlane.f32.xlu1 %v797_v53  ;;  %v785_v58 = vsel %vm7687_vm1, %v705_v50, 0.0  ;;  %v706_v59 = vmul.f32 %v4351_v52, %v5336_v39  ;;  %4372 = vtanh.f32 %v554_v12  ;;  %v556_v50 = vadd.f32 %v5369_v62, %v5309_v29 }
 0x175   : > { %v4355_v61 = vpop.eup %4354  ;;  %786 = vadd.xlane.f32.xlu0 %v785_v58  ;;  %v800_v2 = vsel %vm7687_vm1, %v710_v54, 0.0  ;;  %v712_v3 = vmul.f32 %v4353_v57, %v5336_v39  ;;  %4374 = vtanh.f32 %v550_v26  ;;  %v503_v58 = vrot.slane %v488_v48, %v5271_v14 }
 0x176   : > { %v4357_v5 = vpop.eup %4356  ;;  %v788_v6 = vsel %vm7687_vm1, %v706_v59, 0.0  ;;  %v707_v7 = vmul.f32 %v4355_v61, %v5336_v39  ;;  %4376 = vtanh.f32 %v555_v36  ;;  %v571_v59 = vadd.f32 %v5398_v35, %v5297_v24 }
 0x177   : > { %v4359_v10 = vpop.eup %4358  ;;  %v806_v16 = vsel %vm7687_vm1, %v712_v3, 0.0  ;;  %v714_v18 = vmul.f32 %v4357_v5, %v5336_v39  ;;  %4378 = vtanh.f32 %v552_v42  ;;  %v559_v48 = vadd.f32 %v5369_v62, %v5294_v23 }
 0x178   : > { %801 = vadd.xlane.f32.xlu1 %v800_v2  ;;  %v4361_v27 = vpop.eup %4360  ;;  %v791_v28 = vsel %vm7687_vm1, %v707_v7, 0.0  ;;  %v708_v30 = vmul.f32 %v4359_v10, %v5336_v39  ;;  %4380 = vtanh.f32 %v556_v50  ;;  %v572_v2 = vadd.f32 %v5398_v35, %v5309_v29 }
 0x179   : > { %789 = vadd.xlane.f32.xlu0 %v788_v6  ;;  %v4363_v19 = vpop.eup %4362  ;;  %v812_v40 = vsel %vm7687_vm1, %v714_v18, 0.0  ;;  %v716_v41 = vmul.f32 %v4361_v27, %v5336_v39  ;;  %4382 = vtanh.f32 %v570_v20  ;;  %v5427_v7 = vrot.slane %v503_v58, %v5278_v17 }
 0x17a   : > { %v4365_v44 = vpop.eup %4364  ;;  %v794_v46 = vsel %vm7687_vm1, %v708_v30, 0.0  ;;  %v711_v15 = vmul.f32 %v4363_v19, %v5336_v39  ;;  %4384 = vtanh.f32 %v571_v59  ;;  %v557_v10 = vadd.f32 %v5369_v62, %v5321_v34 }
 0x17b   : > { %v4367_v47 = vpop.eup %4366  ;;  %v818_v51 = vsel %vm7687_vm1, %v716_v41, 0.0  ;;  %v718_v52 = vmul.f32 %v4365_v44, %v5336_v39  ;;  %4386 = vtanh.f32 %v572_v2  ;;  %v573_v30 = vadd.f32 %v5398_v35, %v5321_v34 }
 0x17c   : > { %807 = vadd.xlane.f32.xlu1 %v806_v16  ;;  %v4369_v53 = vpop.eup %4368  ;;  %v803_v54 = vsel %vm7687_vm1, %v711_v15, 0.0  ;;  %v713_v55 = vmul.f32 %v4367_v47, %v5336_v39  ;;  %v558_v16 = vadd.f32 %v5369_v62, %v5288_v21  ;;  %4388 = vtanh.f32 %v557_v10 }
 0x17d   : > { %792 = vadd.xlane.f32.xlu0 %v791_v28  ;;  %v4371_v57 = vpop.eup %4370  ;;  %v824_v61 = vsel %vm7687_vm1, %v718_v52, 0.0  ;;  %v720_v63 = vmul.f32 %v4369_v53, %v5336_v39  ;;  %v603_v36 = vadd.f32 %v5427_v7, %v5297_v24  ;;  %v574_v53 = vadd.f32 %v5398_v35, %v5288_v21 }
 0x17e   : > { %v4373_v3 = vpop.eup %4372  ;;  %v809_v4 = vsel %vm7687_vm1, %v713_v55, 0.0  ;;  %v715_v5 = vmul.f32 %v4371_v57, %v5336_v39  ;;  %4390 = vtanh.f32 %v558_v16  ;;  %v575_v57 = vadd.f32 %v5398_v35, %v5294_v23 }
 0x17f   : > { %v4375_v6 = vpop.eup %4374  ;;  %v830_v11 = vsel %vm7687_vm1, %v720_v63, 0.0  ;;  %v721_v12 = vmul.f32 %v4373_v3, %v5336_v39  ;;  %4392 = vtanh.f32 %v573_v30  ;;  %v604_v2 = vadd.f32 %v5427_v7, %v5309_v29 }
 0x180   : > { %813 = vadd.xlane.f32.xlu1 %v812_v40  ;;  %v4377_v18 = vpop.eup %4376  ;;  %v815_v26 = vsel %vm7687_vm1, %v715_v5, 0.0  ;;  %v717_v27 = vmul.f32 %v4375_v6, %v5336_v39  ;;  %4394 = vtanh.f32 %v603_v36  ;;  %v605_v5 = vadd.f32 %v5427_v7, %v5321_v34 }
 0x181   : > { %795 = vadd.xlane.f32.xlu0 %v794_v46  ;;  %v4379_v28 = vpop.eup %4378  ;;  %v833_v19 = vsel %vm7687_vm1, %v721_v12, 0.0  ;;  %v722_v32 = vmul.f32 %v4377_v18, %v5336_v39  ;;  %v602_v46 = vadd.f32 %v5427_v7, %v5291_v22  ;;  %v560_v16 = vadd.f32 %v5369_v62, %v5331_v38 }
 0x182   : > { %v4381_v40 = vpop.eup %4380  ;;  %v821_v41 = vsel %vm7687_vm1, %v717_v27, 0.0  ;;  %v719_v42 = vmul.f32 %v4379_v28, %v5336_v39  ;;  %v561_v27 = vadd.f32 %v5369_v62, %v5300_v25  ;;  %v576_v36 = vadd.f32 %v5398_v35, %v5331_v38 }
 0x183   : > { %v4383_v44 = vpop.eup %4382  ;;  %v836_v15 = vsel %vm7687_vm1, %v722_v32, 0.0  ;;  %v723_v47 = vmul.f32 %v4381_v40, %v5336_v39  ;;  %4396 = vtanh.f32 %v602_v46 }
 0x184   : > { %819 = vadd.xlane.f32.xlu1 %v818_v51  ;;  %v4385_v50 = vpop.eup %4384  ;;  %v827_v51 = vsel %vm7687_vm1, %v719_v42, 0.0  ;;  %v737_v52 = vmul.f32 %v4383_v44, %v5336_v39  ;;  %4398 = vtanh.f32 %v559_v48  ;;  %v577_v42 = vadd.f32 %v5398_v35, %v5300_v25 }
 0x185   : > { %804 = vadd.xlane.f32.xlu0 %v803_v54  ;;  %v4387_v20 = vpop.eup %4386  ;;  %v839_v54 = vsel %vm7687_vm1, %v723_v47, 0.0  ;;  %v738_v55 = vmul.f32 %v4385_v50, %v5336_v39  ;;  %4400 = vtanh.f32 %v574_v53  ;;  %v606_v48 = vadd.f32 %v5427_v7, %v5288_v21 }
 0x186   : > { %v4389_v58 = vpop.eup %4388  ;;  %v881_v59 = vsel %vm7687_vm1, %v737_v52, 0.0  ;;  %4402 = vtanh.f32 %v575_v57  ;;  %v607_v52 = vadd.f32 %v5427_v7, %v5294_v23  ;;  %v562_v57 = vadd.f32 %v5369_v62, %v5346_v45 }
 0x187   : > { %v884_v3 = vsel %vm7687_vm1, %v738_v55, 0.0  ;;  %4404 = vtanh.f32 %v604_v2 }
 0x188   : > { %825 = vadd.xlane.f32.xlu1 %v824_v61  ;;  %v739_v61 = vmul.f32 %v4387_v20, %v5336_v39  ;;  %v4391_v63 = vpop.eup %4390  ;;  %4406 = vtanh.f32 %v605_v5  ;;  %v578_v5 = vadd.f32 %v5398_v35, %v5346_v45 }
 0x189   : > { %810 = vadd.xlane.f32.xlu0 %v809_v4  ;;  %v724_v4 = vmul.f32 %v4389_v58, %v5336_v39  ;;  %v4393_v6 = vpop.eup %4392  ;;  %4408 = vtanh.f32 %v560_v16 }
 0x18a   : > { %v887_v10 = vsel %vm7687_vm1, %v739_v61, 0.0  ;;  %v4395_v12 = vpop.eup %4394  ;;  %4410 = vtanh.f32 %v561_v27  ;;  %v563_v61 = vadd.f32 %v5369_v62, %v5318_v33  ;;  %v608_v27 = vadd.f32 %v5427_v7, %v5331_v38 }
 0x18b   : > { %v842_v18 = vsel %vm7687_vm1, %v724_v4, 0.0  ;;  %4412 = vtanh.f32 %v576_v36 }
 0x18c   : > { %831 = vadd.xlane.f32.xlu1 %v830_v11  ;;  %v725_v11 = vmul.f32 %v4391_v63, %v5336_v39  ;;  %4414 = vtanh.f32 %v577_v42  ;;  %v564_v42 = vadd.f32 %v5369_v62, %v5365_v60 }
 0x18d   : > { %816 = vadd.xlane.f32.xlu0 %v815_v26  ;;  %v740_v26 = vmul.f32 %v4393_v6, %v5336_v39  ;;  %v4397_v28 = vpop.eup %4396  ;;  %4416 = vtanh.f32 %v606_v48 }
 0x18e   : > { %v845_v30 = vsel %vm7687_vm1, %v725_v11, 0.0  ;;  %v4399_v32 = vpop.eup %4398  ;;  %4418 = vtanh.f32 %v607_v52  ;;  %v579_v11 = vadd.f32 %v5398_v35, %v5318_v33  ;;  %v580_v52 = vadd.f32 %v5398_v35, %v5365_v60 }
 0x18f   : > { %v890_v40 = vsel %vm7687_vm1, %v740_v26, 0.0  ;;  %v4401_v44 = vpop.eup %4400  ;;  %4420 = vtanh.f32 %v562_v57 }
 0x190   : > { %834 = vadd.xlane.f32.xlu1 %v833_v19  ;;  %v770_v19 = vmul.f32 %v4395_v12, %v5336_v39  ;;  %v4403_v47 = vpop.eup %4402  ;;  %4422 = vtanh.f32 %v563_v61  ;;  %v610_v61 = vadd.f32 %v5427_v7, %v5346_v45 }
 0x191   : > { %822 = vadd.xlane.f32.xlu0 %v821_v41  ;;  %v769_v41 = vmul.f32 %v4397_v28, %v5336_v39  ;;  %v4405_v20 = vpop.eup %4404  ;;  %4424 = vtanh.f32 %v578_v5 }
 0x192   : > { %v980_v46 = vsel %vm7687_vm1, %v770_v19, 0.0  ;;  %v4407_v55 = vpop.eup %4406  ;;  %4426 = vtanh.f32 %v579_v11  ;;  %v609_v19 = vadd.f32 %v5427_v7, %v5300_v25  ;;  %v566_v11 = vadd.f32 %v5369_v62, %v5380_v8 }
 0x193   : > { %v977_v50 = vsel %vm7687_vm1, %v769_v41, 0.0  ;;  %v4409_v63 = vpop.eup %4408  ;;  %4428 = vtanh.f32 %v608_v27 }
 0x194   : > { %837 = vadd.xlane.f32.xlu1 %v836_v15  ;;  %v726_v15 = vmul.f32 %v4399_v32, %v5336_v39  ;;  %v4411_v4 = vpop.eup %4410  ;;  %4430 = vtanh.f32 %v609_v19  ;;  %v582_v19 = vadd.f32 %v5398_v35, %v5380_v8 }
 0x195   : > { %828 = vadd.xlane.f32.xlu0 %v827_v51  ;;  %v741_v51 = vmul.f32 %v4401_v44, %v5336_v39  ;;  %v4413_v12 = vpop.eup %4412  ;;  %4432 = vtanh.f32 %v564_v42 }
 0x196   : > { %v848_v53 = vsel %vm7687_vm1, %v726_v15, 0.0  ;;  %v4415_v26 = vpop.eup %4414  ;;  %v565_v15 = vadd.f32 %v5369_v62, %v5328_v37 }
 0x197   : > { %v893_v58 = vsel %vm7687_vm1, %v741_v51, 0.0  ;;  %v4417_v32 = vpop.eup %4416 }
 0x198   : > { %840 = vadd.xlane.f32.xlu1 %v839_v54  ;;  %v742_v54 = vmul.f32 %v4403_v47, %v5336_v39  ;;  %v4419_v41 = vpop.eup %4418  ;;  %4434 = vtanh.f32 %v565_v15  ;;  %v612_v15 = vadd.f32 %v5427_v7, %v5365_v60 }
 0x199   : > { %882 = vadd.xlane.f32.xlu0 %v881_v59  ;;  %v771_v59 = vmul.f32 %v4405_v20, %v5336_v39  ;;  %v4421_v47 = vpop.eup %4420  ;;  %4436 = vtanh.f32 %v580_v52 }
 0x19a   : > { %v896_v2 = vsel %vm7687_vm1, %v742_v54, 0.0  ;;  %v4423_v51 = vpop.eup %4422  ;;  %v581_v54 = vadd.f32 %v5398_v35, %v5328_v37 }
 0x19b   : > { %v983_v6 = vsel %vm7687_vm1, %v771_v59, 0.0 }
 0x19c   : > { %885 = vadd.xlane.f32.xlu1 %v884_v3  ;;  %v772_v3 = vmul.f32 %v4407_v55, %v5336_v39  ;;  %v4425_v55 = vpop.eup %4424  ;;  %4438 = vtanh.f32 %v581_v54  ;;  %v568_v54 = vadd.f32 %v5369_v62, %v5393_v31 }
 0x19d   : > { %888 = vadd.xlane.f32.xlu0 %v887_v10  ;;  %v727_v10 = vmul.f32 %v4409_v63, %v5336_v39  ;;  %v4427_v59 = vpop.eup %4426  ;;  %4440 = vtanh.f32 %v610_v61 }
 0x19e   : > { %v986_v16 = vsel %vm7687_vm1, %v772_v3, 0.0  ;;  %v611_v3 = vadd.f32 %v5427_v7, %v5318_v33 }
 0x19f   : > { %v851_v28 = vsel %vm7687_vm1, %v727_v10, 0.0 }
 0x1a0   : > { %843 = vadd.xlane.f32.xlu1 %v842_v18  ;;  %v728_v18 = vmul.f32 %v4411_v4, %v5336_v39  ;;  %v4429_v4 = vpop.eup %4428  ;;  %4442 = vtanh.f32 %v611_v3  ;;  %v512_v3 = vcombine.high %v5350_v49, %v5350_v49 }
 0x1a1   : > { %846 = vadd.xlane.f32.xlu0 %v845_v30  ;;  %v743_v30 = vmul.f32 %v4413_v12, %v5336_v39  ;;  %v4431_v10 = vpop.eup %4430  ;;  %4444 = vtanh.f32 %v566_v11 }
 0x1a2   : > { %v854_v36 = vsel %vm7687_vm1, %v728_v18, 0.0  ;;  %v567_v18 = vadd.f32 %v5369_v62, %v5343_v43  ;;  %v5584_v49 = vrot.slane %v512_v3, %v5278_v17 }
 0x1a3   : > { %v899_v44 = vsel %vm7687_vm1, %v743_v30, 0.0 }
 0x1a4   : > { %891 = vadd.xlane.f32.xlu1 %v890_v40  ;;  %v744_v40 = vmul.f32 %v4415_v26, %v5336_v39  ;;  %v4433_v26 = vpop.eup %4432  ;;  %4446 = vtanh.f32 %v567_v18  ;;  %v614_v18 = vadd.f32 %v5427_v7, %v5380_v8 }
 0x1a5   : > { %981 = vadd.xlane.f32.xlu0 %v980_v46  ;;  %v773_v46 = vmul.f32 %v4417_v32, %v5336_v39  ;;  %v4435_v30 = vpop.eup %4434  ;;  %4448 = vtanh.f32 %v582_v19 }
 0x1a6   : > { %v902_v48 = vsel %vm7687_vm1, %v744_v40, 0.0  ;;  %v583_v40 = vadd.f32 %v5398_v35, %v5343_v43 }
 0x1a7   : > { %v989_v20 = vsel %vm7687_vm1, %v773_v46, 0.0 }
 0x1a8   : > { %978 = vadd.xlane.f32.xlu1 %v977_v50  ;;  %v774_v50 = vmul.f32 %v4419_v41, %v5336_v39  ;;  %v4437_v41 = vpop.eup %4436  ;;  %4450 = vtanh.f32 %v583_v40 }
 0x1a9   : > { %849 = vadd.xlane.f32.xlu0 %v848_v53  ;;  %v729_v53 = vmul.f32 %v4421_v47, %v5336_v39  ;;  %v4439_v46 = vpop.eup %4438  ;;  %4452 = vtanh.f32 %v612_v15 }
 0x1aa   : > { %v992_v57 = vsel %vm7687_vm1, %v774_v50, 0.0  ;;  %v613_v50 = vadd.f32 %v5427_v7, %v5328_v37 }
 0x1ab   : > { %v857_v63 = vsel %vm7687_vm1, %v729_v53, 0.0 }
 0x1ac   : > { %894 = vadd.xlane.f32.xlu1 %v893_v58  ;;  %v730_v58 = vmul.f32 %v4423_v51, %v5336_v39  ;;  %v4441_v51 = vpop.eup %4440  ;;  %4454 = vtanh.f32 %v613_v50 }
 0x1ad   : > { %897 = vadd.xlane.f32.xlu0 %v896_v2  ;;  %v745_v2 = vmul.f32 %v4425_v55, %v5336_v39  ;;  %v4443_v53 = vpop.eup %4442  ;;  %4456 = vtanh.f32 %v568_v54 }
 0x1ae   : > { %v860_v5 = vsel %vm7687_vm1, %v730_v58, 0.0  ;;  %v569_v58 = vadd.f32 %v5369_v62, %v5360_v56  ;;  %v585_v62 = vadd.f32 %v5398_v35, %v5360_v56 }
 0x1af   : > { %v905_v12 = vsel %vm7687_vm1, %v745_v2, 0.0 }
 0x1b0   : > { %984 = vadd.xlane.f32.xlu1 %v983_v6  ;;  %v746_v6 = vmul.f32 %v4427_v59, %v5336_v39  ;;  %v4445_v59 = vpop.eup %4444  ;;  %4458 = vtanh.f32 %v569_v58 }
 0x1b1   : > { %987 = vadd.xlane.f32.xlu0 %v986_v16  ;;  %v775_v16 = vmul.f32 %v4429_v4, %v5336_v39  ;;  %v4447_v2 = vpop.eup %4446  ;;  %v584_v4 = vadd.f32 %v5398_v35, %v5393_v31  ;;  %v615_v35 = vadd.f32 %v5427_v7, %v5343_v43 }
 0x1b2   : > { %v908_v27 = vsel %vm7687_vm1, %v746_v6, 0.0  ;;  %v733_v6 = vmul.f32 %v4445_v59, %v5336_v39 }
 0x1b3   : > { %v995_v32 = vsel %vm7687_vm1, %v775_v16, 0.0  ;;  %4460 = vtanh.f32 %v584_v4 }
 0x1b4   : > { %852 = vadd.xlane.f32.xlu1 %v851_v28  ;;  %v776_v28 = vmul.f32 %v4431_v10, %v5336_v39  ;;  %v4449_v10 = vpop.eup %4448  ;;  %4462 = vtanh.f32 %v585_v62 }
 0x1b5   : > { %855 = vadd.xlane.f32.xlu0 %v854_v36  ;;  %v731_v36 = vmul.f32 %v4433_v26, %v5336_v39  ;;  %v4451_v16 = vpop.eup %4450  ;;  %v869_v26 = vsel %vm7687_vm1, %v733_v6, 0.0  ;;  %4464 = vtanh.f32 %v614_v18 }
 0x1b6   : > { %v998_v42 = vsel %vm7687_vm1, %v776_v28, 0.0  ;;  %v4453_v28 = vpop.eup %4452  ;;  %v750_v19 = vmul.f32 %v4451_v16, %v5336_v39  ;;  %4466 = vtanh.f32 %v615_v35 }
 0x1b7   : > { %v863_v47 = vsel %vm7687_vm1, %v731_v36, 0.0  ;;  %v586_v36 = vadd.f32 %v5584_v49, %v5291_v22  ;;  %v590_v22 = vadd.f32 %v5584_v49, %v5288_v21  ;;  %v592_v21 = vadd.f32 %v5584_v49, %v5331_v38 }
 0x1b8   : > { %900 = vadd.xlane.f32.xlu1 %v899_v44  ;;  %v732_v44 = vmul.f32 %v4435_v30, %v5336_v39  ;;  %v594_v38 = vadd.f32 %v5584_v49, %v5346_v45  ;;  %v596_v45 = vadd.f32 %v5584_v49, %v5365_v60  ;;  %v598_v60 = vadd.f32 %v5584_v49, %v5380_v8 }
 0x1b9   : > { %903 = vadd.xlane.f32.xlu0 %v902_v48  ;;  %v747_v48 = vmul.f32 %v4437_v41, %v5336_v39  ;;  %v779_v41 = vmul.f32 %v4453_v28, %v5336_v39  ;;  %4468 = vtanh.f32 %v586_v36  ;;  %v600_v8 = vadd.f32 %v5584_v49, %v5393_v31 }
 0x1ba   : > { %v866_v52 = vsel %vm7687_vm1, %v732_v44, 0.0 }
 0x1bb   : > { %v911_v55 = vsel %vm7687_vm1, %v747_v48, 0.0  ;;  %v1007_v48 = vsel %vm7687_vm1, %v779_v41, 0.0 }
 0x1bc   : > { %990 = vadd.xlane.f32.xlu1 %v989_v20  ;;  %v748_v20 = vmul.f32 %v4439_v46, %v5336_v39  ;;  %v920_v46 = vsel %vm7687_vm1, %v750_v19, 0.0 }
 0x1bd   : > { %993 = vadd.xlane.f32.xlu0 %v992_v57  ;;  %v777_v57 = vmul.f32 %v4441_v51, %v5336_v39 }
 0x1be   : > { %v914_v61 = vsel %vm7687_vm1, %v748_v20, 0.0 }
 0x1c0   : > { %858 = vadd.xlane.f32.xlu1 %v857_v63  ;;  %v778_v63 = vmul.f32 %v4443_v53, %v5336_v39 }
 0x1c1   : > { %861 = vadd.xlane.f32.xlu0 %v860_v5  ;;  %v1001_v5 = vsel %vm7687_vm1, %v777_v57, 0.0 }
 0x1c2   : > { %v1004_v11 = vsel %vm7687_vm1, %v778_v63, 0.0 }
 0x1c4   : > { %906 = vadd.xlane.f32.xlu1 %v905_v12  ;;  %v734_v12 = vmul.f32 %v4447_v2, %v5336_v39 }
 0x1c5   : > { %909 = vadd.xlane.f32.xlu0 %v908_v27  ;;  %v749_v27 = vmul.f32 %v4449_v10, %v5336_v39 }
 0x1c6   : > { %v872_v30 = vsel %vm7687_vm1, %v734_v12, 0.0 }
 0x1c7   : > { %v917_v40 = vsel %vm7687_vm1, %v749_v27, 0.0 }
 0x1c8   : > { %996 = vadd.xlane.f32.xlu1 %v995_v32  ;;  %v4455_v32 = vpop.eup %4454 }
 0x1c9   : > { %999 = vadd.xlane.f32.xlu0 %v998_v42  ;;  %v587_v42 = vadd.f32 %v5584_v49, %v5297_v24  ;;  %v4457_v44 = vpop.eup %4456  ;;  %v780_v15 = vmul.f32 %v4455_v32, %v5336_v39  ;;  %v588_v24 = vadd.f32 %v5584_v49, %v5309_v29  ;;  %v589_v29 = vadd.f32 %v5584_v49, %v5321_v34 }
 0x1ca   : > { %v735_v50 = vmul.f32 %v4457_v44, %v5336_v39  ;;  %v591_v34 = vadd.f32 %v5584_v49, %v5294_v23  ;;  %v593_v23 = vadd.f32 %v5584_v49, %v5300_v25  ;;  %v595_v25 = vadd.f32 %v5584_v49, %v5318_v33 }
 0x1cb   : > { %4470 = vtanh.f32 %v587_v42  ;;  %v597_v33 = vadd.f32 %v5584_v49, %v5328_v37  ;;  %v599_v37 = vadd.f32 %v5584_v49, %v5343_v43  ;;  %v616_v43 = vadd.f32 %v5427_v7, %v5393_v31 }
 0x1cc   : > { %864 = vadd.xlane.f32.xlu1 %v863_v47  ;;  %v4459_v47 = vpop.eup %4458  ;;  %4472 = vtanh.f32 %v590_v22  ;;  %v875_v54 = vsel %vm7687_vm1, %v735_v50, 0.0 }
 0x1cd   : > { %867 = vadd.xlane.f32.xlu0 %v866_v52  ;;  %v4461_v51 = vpop.eup %4460  ;;  %v1010_v52 = vsel %vm7687_vm1, %v780_v15, 0.0  ;;  %v736_v20 = vmul.f32 %v4459_v47, %v5336_v39  ;;  %4474 = vtanh.f32 %v588_v24 }
 0x1ce   : > { %v4463_v53 = vpop.eup %4462  ;;  %4476 = vtanh.f32 %v592_v21 }
 0x1cf   : > { %v4465_v57 = vpop.eup %4464  ;;  %v878_v58 = vsel %vm7687_vm1, %v736_v20, 0.0  ;;  %v752_v59 = vmul.f32 %v4463_v53, %v5336_v39  ;;  %4478 = vtanh.f32 %v589_v29 }
 0x1d0   : > { %912 = vadd.xlane.f32.xlu1 %v911_v55  ;;  %v751_v55 = vmul.f32 %v4461_v51, %v5336_v39  ;;  %v781_v2 = vmul.f32 %v4465_v57, %v5336_v39  ;;  %4480 = vtanh.f32 %v594_v38  ;;  %v617_v51 = vadd.f32 %v5427_v7, %v5360_v56 }
 0x1d1   : > { %915 = vadd.xlane.f32.xlu0 %v914_v61  ;;  %v4467_v61 = vpop.eup %4466  ;;  %v926_v4 = vsel %vm7687_vm1, %v752_v59, 0.0  ;;  %4482 = vtanh.f32 %v591_v34 }
 0x1d2   : > { %v923_v63 = vsel %vm7687_vm1, %v751_v55, 0.0  ;;  %v4469_v3 = vpop.eup %4468  ;;  %v1013_v62 = vsel %vm7687_vm1, %v781_v2, 0.0  ;;  %4484 = vtanh.f32 %v596_v45 }
 0x1d3   : > { %v753_v10 = vmul.f32 %v4469_v3, %v5336_v39  ;;  %4486 = vtanh.f32 %v593_v23 }
 0x1d4   : > { %1002 = vadd.xlane.f32.xlu1 %v1001_v5  ;;  %v782_v5 = vmul.f32 %v4467_v61, %v5336_v39  ;;  %4488 = vtanh.f32 %v598_v60 }
 0x1d5   : > { %1005 = vadd.xlane.f32.xlu0 %v1004_v11  ;;  %v4471_v6 = vpop.eup %4470  ;;  %4490 = vtanh.f32 %v595_v25 }
 0x1d6   : > { %v4473_v11 = vpop.eup %4472  ;;  %v1016_v12 = vsel %vm7687_vm1, %v782_v5, 0.0  ;;  %v754_v16 = vmul.f32 %v4471_v6, %v5336_v39  ;;  %4492 = vtanh.f32 %v600_v8 }
 0x1d7   : > { %v4475_v18 = vpop.eup %4474  ;;  %v757_v27 = vmul.f32 %v4473_v11, %v5336_v39  ;;  %4494 = vtanh.f32 %v597_v33 }
 0x1d8   : > { %870 = vadd.xlane.f32.xlu1 %v869_v26  ;;  %v929_v26 = vsel %vm7687_vm1, %v753_v10, 0.0  ;;  %v4477_v35 = vpop.eup %4476  ;;  %v932_v28 = vsel %vm7687_vm1, %v754_v16, 0.0 }
 0x1d9   : > { %873 = vadd.xlane.f32.xlu0 %v872_v30  ;;  %v755_v30 = vmul.f32 %v4475_v18, %v5336_v39  ;;  %v4479_v19 = vpop.eup %4478  ;;  %v941_v32 = vsel %vm7687_vm1, %v757_v27, 0.0  ;;  %v759_v36 = vmul.f32 %v4477_v35, %v5336_v39 }
 0x1da   : > { %v756_v42 = vmul.f32 %v4479_v19, %v5336_v39 }
 0x1db   : > { %v935_v41 = vsel %vm7687_vm1, %v755_v30, 0.0  ;;  %v947_v15 = vsel %vm7687_vm1, %v759_v36, 0.0 }
 0x1dc   : > { %918 = vadd.xlane.f32.xlu1 %v917_v40  ;;  %v4481_v40 = vpop.eup %4480 }
 0x1dd   : > { %921 = vadd.xlane.f32.xlu0 %v920_v46  ;;  %v4483_v44 = vpop.eup %4482  ;;  %v601_v46 = vadd.f32 %v5584_v49, %v5360_v56  ;;  %v761_v47 = vmul.f32 %v4481_v40, %v5336_v39 }
 0x1de   : > { %v4485_v22 = vpop.eup %4484  ;;  %v758_v50 = vmul.f32 %v4483_v44, %v5336_v39 }
 0x1df   : > { %v4487_v24 = vpop.eup %4486  ;;  %4496 = vtanh.f32 %v601_v46  ;;  %v763_v20 = vmul.f32 %v4485_v22, %v5336_v39 }
 0x1e0   : > { %1008 = vadd.xlane.f32.xlu1 %v1007_v48  ;;  %v938_v48 = vsel %vm7687_vm1, %v756_v42, 0.0  ;;  %4498 = vtanh.f32 %v599_v37  ;;  %v4489_v49 = vpop.eup %4488  ;;  %v944_v53 = vsel %vm7687_vm1, %v758_v50, 0.0  ;;  %v760_v21 = vmul.f32 %v4487_v24, %v5336_v39 }
 0x1e1   : > { %1011 = vadd.xlane.f32.xlu0 %v1010_v52  ;;  %v953_v52 = vsel %vm7687_vm1, %v761_v47, 0.0  ;;  %4500 = vtanh.f32 %v617_v51  ;;  %v959_v55 = vsel %vm7687_vm1, %v763_v20, 0.0  ;;  %v765_v56 = vmul.f32 %v4489_v49, %v5336_v39 }
 0x1e2   : > { %4502 = vtanh.f32 %v616_v43  ;;  %v950_v57 = vsel %vm7687_vm1, %v760_v21, 0.0 }
 0x1e3   : > { %v965_v61 = vsel %vm7687_vm1, %v765_v56, 0.0 }
 0x1e4   : > { %876 = vadd.xlane.f32.xlu1 %v875_v54  ;;  %v4491_v54 = vpop.eup %4490 }
 0x1e5   : > { %879 = vadd.xlane.f32.xlu0 %v878_v58  ;;  %v4493_v29 = vpop.eup %4492  ;;  %v762_v31 = vmul.f32 %v4491_v54, %v5336_v39 }
 0x1e6   : > { %v4495_v7 = vpop.eup %4494  ;;  %v767_v38 = vmul.f32 %v4493_v29, %v5336_v39 }
 0x1e7   : > { %v956_v2 = vsel %vm7687_vm1, %v762_v31, 0.0  ;;  %v764_v34 = vmul.f32 %v4495_v7, %v5336_v39 }
 0x1e8   : > { %924 = vadd.xlane.f32.xlu1 %v923_v63  ;;  %v971_v6 = vsel %vm7687_vm1, %v767_v38, 0.0 }
 0x1e9   : > { %927 = vadd.xlane.f32.xlu0 %v926_v4  ;;  %v4497_v63 = vpop.eup %4496  ;;  %v962_v10 = vsel %vm7687_vm1, %v764_v34, 0.0 }
 0x1ea   : > { %v4499_v3 = vpop.eup %4498  ;;  %v768_v45 = vmul.f32 %v4497_v63, %v5336_v39 }
 0x1eb   : > { %v766_v23 = vmul.f32 %v4499_v3, %v5336_v39 }
 0x1ec   : > { %1014 = vadd.xlane.f32.xlu1 %v1013_v62  ;;  %v4501_v62 = vpop.eup %4500  ;;  %v974_v18 = vsel %vm7687_vm1, %v768_v45, 0.0 }
 0x1ed   : > { %1017 = vadd.xlane.f32.xlu0 %v1016_v12  ;;  %v4503_v11 = vpop.eup %4502  ;;  %v784_v60 = vmul.f32 %v4501_v62, %v5336_v39  ;;  %v5781_v62 = vand.u32 127, %v393_v9 }
 0x1ee   : > { %v783_v27 = vmul.f32 %v4503_v11, %v5336_v39 }
 0x1ef   : > { %7738 = vst [vmem:[#allocation18_spill] sm:$0xff] %v5781_v62  ;;  %v1118_v11 = vadd.s32 4294967280, %v5781_v62  ;;  %v1132_v0 = vadd.s32 4294967264, %v5781_v62 }
 0x1f0   : > { %930 = vadd.xlane.f32.xlu1 %v929_v26  ;;  %v968_v26 = vsel %vm7687_vm1, %v766_v23, 0.0  ;;  %v1019_v30 = vsel %vm7687_vm1, %v783_v27, 0.0 }
 0x1f1   : > { %933 = vadd.xlane.f32.xlu0 %v932_v28  ;;  %v1022_v28 = vsel %vm7687_vm1, %v784_v60, 0.0  ;;  %v1125_v60 = vadd.s32 4294967272, %v5781_v62 }
 0x1f3   : > { %v5805_v1 = vsub.s32 %v1125_v60, %v5268_v13 }
 0x1f4   : > { %942 = vadd.xlane.f32.xlu1 %v941_v32 }
 0x1f5   : > { %936 = vadd.xlane.f32.xlu0 %v935_v41  ;;  %7746 = vst [vmem:[#allocation26_spill] sm:$0xff] %v5805_v1 }
 0x1f8   : > { %948 = vadd.xlane.f32.xlu1 %v947_v15 }
 0x1f9   : > { %939 = vadd.xlane.f32.xlu0 %v938_v48 }
 0x1fc   : > { %954 = vadd.xlane.f32.xlu1 %v953_v52 }
 0x1fd   : > { %945 = vadd.xlane.f32.xlu0 %v944_v53 }
 0x200   : > { %960 = vadd.xlane.f32.xlu1 %v959_v55 }
 0x201   : > { %951 = vadd.xlane.f32.xlu0 %v950_v57  ;;  %v5670_v58 = vpop.xlane.xlu1 %798 }
 0x202   : > { %v5672_v59 = vpop.xlane.xlu0 %786 }
 0x204   : > { %966 = vadd.xlane.f32.xlu1 %v965_v61 }
 0x205   : > { %957 = vadd.xlane.f32.xlu0 %v956_v2  ;;  %v5678_v4 = vpop.xlane.xlu1 %801 }
 0x206   : > { %v5680_v5 = vpop.xlane.xlu0 %789 }
 0x208   : > { %972 = vadd.xlane.f32.xlu1 %v971_v6 }
 0x209   : > { %963 = vadd.xlane.f32.xlu0 %v962_v10  ;;  %v5686_v12 = vpop.xlane.xlu1 %807  ;;  %v1111_v10 = vadd.s32 4294967288, %v5781_v62 }
 0x20a   : > { %v5688_v16 = vpop.xlane.xlu0 %792 }
 0x20c   : > { %975 = vadd.xlane.f32.xlu1 %v974_v18 }
 0x20d   : > { %969 = vadd.xlane.f32.xlu0 %v968_v26  ;;  %v5694_v25 = vpop.xlane.xlu1 %813  ;;  %v5791_v26 = vsub.s32 %v1111_v10, %v5268_v13 }
 0x20e   : > { %v5696_v35 = vpop.xlane.xlu0 %795 }
 0x20f   : > { %7741 = vst [vmem:[#allocation21_spill] sm:$0xff] %v5791_v26  ;;  %v1115_v10 = vrot.slane %v5680_v5, %v5791_v26  ;;  %v1129_v60 = vrot.slane %v5696_v35, %v5805_v1  ;;  %v1146_v5 = vadd.s32 4294967248, %v5781_v62 }
 0x210   : > { %1023 = vadd.xlane.f32.xlu1 %v1022_v28  ;;  %v5796_v28 = vsub.s32 %v1118_v11, %v5268_v13 }
 0x211   : > { %1020 = vadd.xlane.f32.xlu0 %v1019_v30  ;;  %v5700_v19 = vpop.xlane.xlu1 %819  ;;  %v5802_v30 = vsub.s32 %v5781_v62, %v5268_v13 }
 0x212   : > { %v5702_v8 = vpop.xlane.xlu0 %804  ;;  %7743 = vst [vmem:[#allocation23_spill] sm:$0xff] %v5796_v28  ;;  %v1122_v11 = vrot.slane %v5688_v16, %v5796_v28 }
 0x213   : > { %7745 = vst [vmem:[#allocation25_spill] sm:$0xff] %v5802_v30 }
 0x215   : > { %v5704_v32 = vpop.xlane.xlu1 %825 }
 0x216   : > { %v5706_v36 = vpop.xlane.xlu0 %810 }
 0x219   : > { %v5708_v39 = vpop.xlane.xlu1 %831 }
 0x21a   : > { %v5710_v33 = vpop.xlane.xlu0 %816 }
 0x21d   : > { %v5712_v40 = vpop.xlane.xlu1 %834 }
 0x21e   : > { %v5714_v41 = vpop.xlane.xlu0 %822 }
 0x221   : > { %v5716_v42 = vpop.xlane.xlu1 %837 }
 0x222   : > { %v5718_v44 = vpop.xlane.xlu0 %828 }
 0x223   : > { %7735 = vst [vmem:[#allocation15_spill] sm:$0xff] %v5718_v44  ;;  %v1110_v44 = vrot.slane %v5672_v59, %v5802_v30 }
 0x225   : > { %v5720_v46 = vpop.xlane.xlu1 %840 }
 0x226   : > { %v5722_v15 = vpop.xlane.xlu0 %882 }
 0x229   : > { %v5724_v47 = vpop.xlane.xlu1 %885 }
 0x22a   : > { %v5726_v37 = vpop.xlane.xlu0 %888 }
 0x22d   : > { %v5728_v22 = vpop.xlane.xlu1 %843 }
 0x22e   : > { %v5730_v48 = vpop.xlane.xlu0 %846 }
 0x231   : > { %v5732_v50 = vpop.xlane.xlu1 %891 }
 0x232   : > { %v5734_v24 = vpop.xlane.xlu0 %981 }
 0x235   : > { %v5736_v51 = vpop.xlane.xlu1 %978 }
 0x236   : > { %v5738_v52 = vpop.xlane.xlu0 %849 }
 0x239   : > { %v5740_v20 = vpop.xlane.xlu1 %894 }
 0x23a   : > { %v5742_v43 = vpop.xlane.xlu0 %897 }
 0x23d   : > { %v5744_v49 = vpop.xlane.xlu1 %984 }
 0x23e   : > { %v5746_v53 = vpop.xlane.xlu0 %987 }
 0x241   : > { %v5748_v21 = vpop.xlane.xlu1 %852 }
 0x242   : > { %v5750_v54 = vpop.xlane.xlu0 %855 }
 0x245   : > { %v5752_v55 = vpop.xlane.xlu1 %900 }
 0x246   : > { %v5754_v56 = vpop.xlane.xlu0 %903 }
 0x249   : > { %v5756_v29 = vpop.xlane.xlu1 %990 }
 0x24a   : > { %v5758_v57 = vpop.xlane.xlu0 %993 }
 0x24d   : > { %v5760_v31 = vpop.xlane.xlu1 %858 }
 0x24e   : > { %v5762_v7 = vpop.xlane.xlu0 %861 }
 0x251   : > { %v5764_v61 = vpop.xlane.xlu1 %906 }
 0x252   : > { %v5766_v38 = vpop.xlane.xlu0 %909 }
 0x255   : > { %v5768_v63 = vpop.xlane.xlu1 %996 }
 0x256   : > { %v5770_v2 = vpop.xlane.xlu0 %999 }
 0x259   : > { %v5772_v34 = vpop.xlane.xlu1 %864 }
 0x25a   : > { %v5774_v3 = vpop.xlane.xlu0 %867 }
 0x25b   : > { %7736 = vst [vmem:[#allocation16_spill] sm:$0xff] %v5774_v3 }
 0x25d   : > { %v5776_v6 = vpop.xlane.xlu1 %912 }
 0x25e   : > { %v5778_v45 = vpop.xlane.xlu0 %915 }
 0x25f   : > { %7737 = vst [vmem:[#allocation17_spill] sm:$0xff] %v5778_v45 }
 0x261   : > { %v5784_v23 = vpop.xlane.xlu1 %1002 }
 0x262   : > { %7739 = vst [vmem:[#allocation19_spill] sm:$0xff] %v5784_v23  ;;  %v5787_v18 = vpop.xlane.xlu0 %1005 }
 0x263   : > { %7740 = vst [vmem:[#allocation20_spill] sm:$0xff] %v5787_v18  ;;  %v5822_v18 = vsub.s32 %v1132_v0, %v5268_v13 }
 0x265   : > { %v5793_v27 = vpop.xlane.xlu1 %870  ;;  %7749 = vst [vmem:[#allocation29_spill] sm:$0xff] %v5822_v18  ;;  %v1136_v0 = vrot.slane %v5670_v58, %v5822_v18 }
 0x266   : > { %7742 = vst [vmem:[#allocation22_spill] sm:$0xff] %v5793_v27  ;;  %v5798_v9 = vpop.xlane.xlu0 %873  ;;  %v5838_v27 = vsub.s32 %v1146_v5, %v5268_v13 }
 0x267   : > { %7744 = vst [vmem:[#allocation24_spill] sm:$0xff] %v5798_v9  ;;  %v1139_v9 = vadd.s32 4294967256, %v5781_v62 }
 0x268   : > { %7753 = vst [vmem:[#allocation33_spill] sm:$0xff] %v5838_v27  ;;  %v1150_v58 = vrot.slane %v5702_v8, %v5838_v27  ;;  %v1195_v8 = vadd.s32 4294967192, %v5781_v62 }
 0x269   : > { %v5810_v17 = vpop.xlane.xlu1 %918  ;;  %v5832_v59 = vsub.s32 %v1139_v9, %v5268_v13 }
 0x26a   : > { %7747 = vst [vmem:[#allocation27_spill] sm:$0xff] %v5810_v17  ;;  %v5814_v14 = vpop.xlane.xlu0 %921  ;;  %v1117_v17 = vsel %vm1116_vm2, %v1115_v10, %v1110_v44  ;;  %v1160_v44 = vadd.s32 4294967232, %v5781_v62  ;;  %v1153_v10 = vadd.s32 4294967240, %v5781_v62 }
 0x26b   : > { %7748 = vst [vmem:[#allocation28_spill] sm:$0xff] %v5814_v14  ;;  %v1124_v14 = vsel %vm1123_vm3, %v1122_v11, %v1117_v17  ;;  %7752 = vst [vmem:[#allocation32_spill] sm:$0xff] %v5832_v59 }
 0x26c   : > { %v1131_v35 = vsel %vm7688_vm4, %v1129_v60, %v1124_v14  ;;  %v1143_v14 = vrot.slane %v5678_v4, %v5832_v59  ;;  %v5852_v11 = vsub.s32 %v1160_v44, %v5268_v13  ;;  %v1174_v60 = vadd.s32 4294967216, %v5781_v62 }
 0x26d   : > { %v5826_v16 = vpop.xlane.xlu1 %1008  ;;  %v1138_v17 = vsel %vm7690_vm5, %v1136_v0, %v1131_v35  ;;  %v5856_v5 = vsub.s32 %v1153_v10, %v5268_v13  ;;  %v1181_v4 = vadd.s32 4294967208, %v5781_v62 }
 0x26e   : > { %7750 = vst [vmem:[#allocation30_spill] sm:$0xff] %v5826_v16  ;;  %v5829_v45 = vpop.xlane.xlu0 %1011  ;;  %7756 = vst [vmem:[#allocation36_spill] sm:$0xff] %v5852_v11  ;;  %v1145_v35 = vsel %vm7689_vm6, %v1143_v14, %v1138_v17  ;;  %v1164_v10 = vrot.slane %v5706_v36, %v5852_v11  ;;  %v5871_v23 = vsub.s32 %v1174_v60, %v5268_v13  ;;  %v1202_v36 = vadd.s32 4294967184, %v5781_v62 }
 0x26f   : > { %7751 = vst [vmem:[#allocation31_spill] sm:$0xff] %v5829_v45  ;;  %7757 = vst [vmem:[#allocation37_spill] sm:$0xff] %v5856_v5  ;;  %v1167_v45 = vadd.s32 4294967224, %v5781_v62  ;;  %v1152_v44 = vsel %vm7672_vm7, %v1150_v58, %v1145_v35  ;;  %v1157_v17 = vrot.slane %v5686_v12, %v5856_v5  ;;  %v1188_v58 = vadd.s32 4294967200, %v5781_v62 }
 0x270   : > { %7760 = vst [vmem:[#allocation40_spill] sm:$0xff] %v5871_v23  ;;  %v5888_v60 = vsub.s32 %v1195_v8, %v5268_v13  ;;  %v1223_v8 = vrot.slane %v5716_v42, %v5791_v26  ;;  %v1219_v42 = vrot.slane %v5712_v40, %v5802_v30 }
 0x271   : > { %v5842_v16 = vpop.xlane.xlu1 %876  ;;  %v5876_v14 = vsub.s32 %v1167_v45, %v5268_v13  ;;  %v1159_v12 = vsel %vm7673_vm8, %v1157_v17, %v1152_v44  ;;  %v1302_v44 = vrot.slane %v5724_v47, %v5791_v26  ;;  %v1298_v47 = vrot.slane %v5722_v15, %v5802_v30 }
 0x272   : > { %7754 = vst [vmem:[#allocation34_spill] sm:$0xff] %v5842_v16  ;;  %v5845_v9 = vpop.xlane.xlu0 %879  ;;  %v1209_v16 = vadd.s32 4294967176, %v5781_v62  ;;  %7764 = vst [vmem:[#allocation44_spill] sm:$0xff] %v5888_v60  ;;  %v1166_v45 = vsel %vm1165_vm9, %v1164_v10, %v1159_v12  ;;  %v5909_v12 = vsub.s32 %v1202_v36, %v5268_v13  ;;  %v1224_v36 = vsel %vm1116_vm2, %v1223_v8, %v1219_v42 }
 0x273   : > { %7755 = vst [vmem:[#allocation35_spill] sm:$0xff] %v5845_v9  ;;  %7761 = vst [vmem:[#allocation41_spill] sm:$0xff] %v5876_v14  ;;  %v1171_v62 = vrot.slane %v5694_v25, %v5876_v14  ;;  %v1228_v25 = vrot.slane %v5720_v46, %v5796_v28  ;;  %v1303_v40 = vsel %vm1116_vm2, %v1302_v44, %v1298_v47 }
 0x274   : > { %v5893_v3 = vsub.s32 %v1209_v16, %v5268_v13  ;;  %v5906_v16 = vsub.s32 %v1188_v58, %v5268_v13  ;;  %7767 = vst [vmem:[#allocation47_spill] sm:$0xff] %v5909_v12  ;;  %v1312_v15 = vrot.slane %v5732_v50, %v5805_v1  ;;  %v1460_v50 = vrot.slane %v5734_v24, %v5791_v26 }
 0x275   : > { %v5860_v0 = vpop.xlane.xlu1 %924  ;;  %v1229_v58 = vsel %vm1123_vm3, %v1228_v25, %v1224_v36  ;;  %v1322_v24 = vrot.slane %v5742_v43, %v5832_v59  ;;  %v1327_v36 = vrot.slane %v5752_v55, %v5838_v27  ;;  %v1475_v43 = vrot.slane %v5756_v29, %v5822_v18 }
 0x276   : > { %7758 = vst [vmem:[#allocation38_spill] sm:$0xff] %v5860_v0  ;;  %v5863_v9 = vpop.xlane.xlu0 %927  ;;  %v5881_v0 = vsub.s32 %v1181_v4, %v5268_v13  ;;  %7765 = vst [vmem:[#allocation45_spill] sm:$0xff] %v5893_v3  ;;  %v1178_v4 = vrot.slane %v5710_v33, %v5871_v23  ;;  %v1213_v13 = vrot.slane %v5708_v39, %v5893_v3  ;;  %v7786_v39 = vmov 0 }
 0x277   : > { %7759 = vst [vmem:[#allocation39_spill] sm:$0xff] %v5863_v9  ;;  %7766 = vst [vmem:[#allocation46_spill] sm:$0xff] %v5906_v16  ;;  %v1258_v29 = vrot.slane %v5760_v31, %v5852_v11  ;;  %v1337_v31 = vrot.slane %v5764_v61, %v5852_v11 }
 0x278   : > { %7762 = vst [vmem:[#allocation42_spill] sm:$0xff] %v5881_v0  ;;  %v1185_v10 = vrot.slane %v5700_v19, %v5881_v0  ;;  %v1233_v19 = vrot.slane %v5728_v22, %v5805_v1  ;;  %v1456_v22 = vrot.slane %v5736_v51, %v5802_v30 }
 0x279   : > { %v5878_v9 = vpop.xlane.xlu1 %1014 }
 0x27a   : > { %v5885_v35 = vpop.xlane.xlu0 %1017  ;;  %v1234_v44 = vsel %vm7688_vm4, %v1233_v19, %v1229_v58  ;;  %v1461_v19 = vsel %vm1116_vm2, %v1460_v50, %v1456_v22 }
 0x27b   : > { %7763 = vst [vmem:[#allocation43_spill] sm:$0xff] %v5885_v35  ;;  %v1173_v35 = vsel %vm7677_vm10, %v1171_v62, %v1166_v45  ;;  %v1307_v62 = vrot.slane %v5726_v37, %v5796_v28  ;;  %v1317_v37 = vrot.slane %v5740_v20, %v5822_v18  ;;  %v1243_v20 = vrot.slane %v5738_v52, %v5832_v59 }
 0x27c   : > { %v1180_v46 = vsel %vm7674_vm11, %v1178_v4, %v1173_v35  ;;  %v1238_v35 = vrot.slane %v5730_v48, %v5822_v18  ;;  %v1465_v4 = vrot.slane %v5744_v49, %v5796_v28  ;;  %v1470_v52 = vrot.slane %v5746_v53, %v5805_v1 }
 0x27d   : > { %v931_v17 = vpop.xlane.xlu1 %930  ;;  %v1187_v25 = vsel %vm7676_vm12, %v1185_v10, %v1180_v46  ;;  %v1308_v48 = vsel %vm1123_vm3, %v1307_v62, %v1303_v40  ;;  %v1253_v53 = vrot.slane %v5750_v54, %v5856_v5  ;;  %v1480_v54 = vrot.slane %v5758_v57, %v5832_v59 }
 0x27e   : > { %v934_v33 = vpop.xlane.xlu0 %933  ;;  %v1377_v51 = vrot.slane %v931_v17, %v5802_v30  ;;  %v1313_v49 = vsel %vm7688_vm4, %v1312_v15, %v1308_v48  ;;  %v1248_v17 = vrot.slane %v5748_v21, %v5838_v27  ;;  %v1239_v10 = vsel %vm7690_vm5, %v1238_v35, %v1234_v44 }
 0x27f   : > { %v1381_v42 = vrot.slane %v934_v33, %v5791_v26  ;;  %v1318_v58 = vsel %vm7690_vm5, %v1317_v37, %v1313_v49  ;;  %v1466_v46 = vsel %vm1123_vm3, %v1465_v4, %v1461_v19  ;;  %v1192_v15 = vrot.slane %v5714_v41, %v5906_v16 }
 0x280   : > { %v1244_v22 = vsel %vm7689_vm6, %v1243_v20, %v1239_v10  ;;  %v1323_v37 = vsel %vm7689_vm6, %v1322_v24, %v1318_v58  ;;  %v1471_v44 = vsel %vm7688_vm4, %v1470_v52, %v1466_v46  ;;  %v1332_v41 = vrot.slane %v5754_v56, %v5856_v5 }
 0x281   : > { %v943_v45 = vpop.xlane.xlu1 %942  ;;  %v1382_v21 = vsel %vm1116_vm2, %v1381_v42, %v1377_v51  ;;  %v1249_v55 = vsel %vm7672_vm7, %v1248_v17, %v1244_v22  ;;  %v1328_v42 = vsel %vm7672_vm7, %v1327_v36, %v1323_v37  ;;  %v1476_v48 = vsel %vm7690_vm5, %v1475_v43, %v1471_v44  ;;  %v7770_v22 = vld [vmem:[#allocation22_spill] sm:$0xff] }
 0x282   : > { %v937_v8 = vpop.xlane.xlu0 %936  ;;  %v1396_v50 = vrot.slane %v943_v45, %v5822_v18  ;;  %v1263_v56 = vrot.slane %v5762_v7, %v5876_v14  ;;  %v1485_v57 = vrot.slane %v5768_v63, %v5838_v27  ;;  %v1194_v49 = vsel %vm7675_vm13, %v1192_v15, %v1187_v25  ;;  %v7769_v15 = vld [vmem:[#allocation19_spill] sm:$0xff] }
 0x283   : > { %v1386_v47 = vrot.slane %v937_v8, %v5796_v28  ;;  %v1268_v24 = vrot.slane %v5772_v34, %v5871_v23  ;;  %v1333_v10 = vsel %vm7673_vm8, %v1332_v41, %v1328_v42  ;;  %v1481_v58 = vsel %vm7689_vm6, %v1480_v54, %v1476_v48  ;;  %v7773_v42 = vld [vmem:[#allocation27_spill] sm:$0xff] }
 0x284   : > { %v1342_v7 = vrot.slane %v5766_v38, %v5876_v14  ;;  %v1338_v25 = vsel %vm1165_vm9, %v1337_v31, %v1333_v10  ;;  %v1490_v52 = vrot.slane %v5770_v2, %v5856_v5  ;;  %v1347_v34 = vrot.slane %v5776_v6, %v5871_v23  ;;  %v7768_v38 = vld [vmem:[#allocation16_spill] sm:$0xff] }
 0x285   : > { %v949_v33 = vpop.xlane.xlu1 %948  ;;  %v1387_v35 = vsel %vm1123_vm3, %v1386_v47, %v1382_v21  ;;  %v1254_v47 = vsel %vm7673_vm8, %v1253_v53, %v1249_v55  ;;  %v1486_v43 = vsel %vm7672_vm7, %v1485_v57, %v1481_v58  ;;  %v1273_v21 = vrot.slane %v7768_v38, %v5881_v0  ;;  %v7780_v38 = vld [vmem:[#allocation38_spill] sm:$0xff] }
 0x286   : > { %v940_v62 = vpop.xlane.xlu0 %939  ;;  %v1259_v19 = vsel %vm1165_vm9, %v1258_v29, %v1254_v47  ;;  %v1406_v63 = vrot.slane %v949_v33, %v5838_v27  ;;  %v1495_v2 = vrot.slane %v7769_v15, %v5852_v11  ;;  %v1278_v6 = vrot.slane %v7770_v22, %v5906_v16 }
 0x287   : > { %v1391_v40 = vrot.slane %v940_v62, %v5805_v1  ;;  %v1264_v36 = vsel %vm7677_vm10, %v1263_v56, %v1259_v19  ;;  %v7771_v37 = vrot.slane %v5704_v32, %v5888_v60  ;;  %v1343_v29 = vsel %vm7677_vm10, %v1342_v7, %v1338_v25  ;;  %v7775_v56 = vld [vmem:[#allocation24_spill] sm:$0xff]  ;;  %v7776_v19 = vld [vmem:[#allocation30_spill] sm:$0xff] }
 0x288   : > { %v1357_v48 = vrot.slane %v7773_v42, %v5906_v16  ;;  %v7777_v7 = vld [vmem:[#allocation28_spill] sm:$0xff] }
 0x289   : > { %v1392_v4 = vsel %vm7688_vm4, %v1391_v40, %v1387_v35  ;;  %v955_v8 = vpop.xlane.xlu1 %954  ;;  %v1269_v40 = vsel %vm7674_vm11, %v1268_v24, %v1264_v36  ;;  %v1201_v55 = vsel %vm1200_vm14, %v7771_v37, %v1194_v49  ;;  %v1505_v24 = vrot.slane %v7776_v19, %v5871_v23 }
 0x28a   : > { %v946_v51 = vpop.xlane.xlu0 %945  ;;  %v1397_v45 = vsel %vm7690_vm5, %v1396_v50, %v1392_v4  ;;  %v7772_v4 = vld [vmem:[#allocation17_spill] sm:$0xff]  ;;  %v1416_v41 = vrot.slane %v955_v8, %v5852_v11  ;;  %v1491_v50 = vsel %vm7673_vm8, %v1490_v52, %v1486_v43  ;;  %v1274_v32 = vsel %vm7676_vm12, %v1273_v21, %v1269_v40 }
 0x28b   : > { %v1401_v20 = vrot.slane %v946_v51, %v5832_v59  ;;  %v1352_v44 = vrot.slane %v7772_v4, %v5881_v0  ;;  %v1348_v51 = vsel %vm7674_vm11, %v1347_v34, %v1343_v29  ;;  %v1283_v8 = vrot.slane %v7775_v56, %v5888_v60 }
 0x28c   : > { %v1279_v49 = vsel %vm7675_vm13, %v1278_v6, %v1274_v32  ;;  %v1367_v21 = vrot.slane %v7780_v38, %v5909_v12  ;;  %v1515_v29 = vrot.slane %v5878_v9, %v5906_v16 }
 0x28d   : > { %v1402_v61 = vsel %vm7689_vm6, %v1401_v20, %v1397_v45  ;;  %v961_v17 = vpop.xlane.xlu1 %960  ;;  %v7774_v20 = vld [vmem:[#allocation20_spill] sm:$0xff]  ;;  %v1496_v45 = vsel %vm1165_vm9, %v1495_v2, %v1491_v50  ;;  %v1353_v58 = vsel %vm7676_vm12, %v1352_v44, %v1348_v51  ;;  %v1284_v15 = vsel %vm1200_vm14, %v1283_v8, %v1279_v49  ;;  %v7781_v2 = vld [vmem:[#allocation31_spill] sm:$0xff] }
 0x28e   : > { %v952_v46 = vpop.xlane.xlu0 %951  ;;  %v1407_v33 = vsel %vm7672_vm7, %v1406_v63, %v1402_v61  ;;  %vm1214_vm7 = vcmask 1048512   ;;  %v1500_v47 = vrot.slane %v7774_v20, %v5876_v14  ;;  %v1362_v63 = vrot.slane %v7777_v7, %v5888_v60  ;;  %v7783_v50 = vld [vmem:[#allocation39_spill] sm:$0xff] }
 0x28f   : > { %v1411_v62 = vrot.slane %v952_v46, %v5856_v5  ;;  %v7778_v46 = vld [vmem:[#allocation34_spill] sm:$0xff]  ;;  %v1426_v52 = vrot.slane %v961_v17, %v5871_v23  ;;  %v1358_v43 = vsel %vm7675_vm13, %v1357_v48, %v1353_v58  ;;  %v1510_v17 = vrot.slane %v7781_v2, %v5881_v0 }
 0x290   : > { %v1288_v25 = vrot.slane %v7778_v46, %v5909_v12  ;;  %v1501_v40 = vsel %vm7677_vm10, %v1500_v47, %v1496_v45  ;;  %v1372_v51 = vrot.slane %v7783_v50, %v5893_v3  ;;  %v7784_v47 = vld [vmem:[#allocation43_spill] sm:$0xff]  ;;  %v6118_v2 = vld [vmem:[%s5215_s23 + $0x8] sm:$0xff] }
 0x291   : > { %v1412_v53 = vsel %vm7673_vm8, %v1411_v62, %v1407_v33  ;;  %v967_v35 = vpop.xlane.xlu1 %966  ;;  %vm7678_vm8 = vcmask 1041409   ;;  %v7779_v62 = vld [vmem:[#allocation15_spill] sm:$0xff]  ;;  %v1506_v6 = vsel %vm7674_vm11, %v1505_v24, %v1501_v40  ;;  %v1520_v56 = vrot.slane %v7784_v47, %v5888_v60 }
 0x292   : > { %v958_v54 = vpop.xlane.xlu0 %957  ;;  %v1417_v57 = vsel %vm1165_vm9, %v1416_v41, %v1412_v53  ;;  %v1206_v36 = vrot.slane %v7779_v62, %v5909_v12  ;;  %v7782_v53 = vld [vmem:[#allocation35_spill] sm:$0xff]  ;;  %v1363_v41 = vsel %vm1200_vm14, %v1362_v63, %v1358_v43  ;;  %v1436_v42 = vrot.slane %v967_v35, %v5906_v16 }
 0x293   : > { %v1421_v31 = vrot.slane %v958_v54, %v5876_v14  ;;  %v1293_v37 = vrot.slane %v7782_v53, %v5893_v3  ;;  %v1289_v54 = vsel %vm1207_vm15, %v1288_v25, %v1284_v15  ;;  %v1368_v32 = vsel %vm1207_vm15, %v1367_v21, %v1363_v41  ;;  %v6115_v15 = vld [vmem:[%s5215_s23] sm:$0xff]  ;;  %v6141_v41 = vld [vmem:[%s5215_s23 + $0x38] sm:$0xff] }
 0x294   : > { %v1511_v20 = vsel %vm7676_vm12, %v1510_v17, %v1506_v6  ;;  %v1373_v24 = vsel %vm1214_vm7, %v1372_v51, %v1368_v32  ;;  %v1025_v63 = vstv %s6053_s20  ;;  %v4223_v17 = vpack.c.bf16 %v6118_v2, %v6115_v15  ;;  %v6126_v6 = vld [vmem:[%s5215_s23 + $0x18] sm:$0xff]  ;;  %v6150_v51 = vld [vmem:[%s5215_s23 + $0x48] sm:$0xff] }
 0x295   : > { %v1422_v61 = vsel %vm7677_vm10, %v1421_v31, %v1417_v57  ;;  %v973_v10 = vpop.xlane.xlu1 %972  ;;  %v1208_v31 = vsel %vm1207_vm15, %v1206_v36, %v1201_v55  ;;  %v1294_v35 = vsel %vm1214_vm7, %v1293_v37, %v1289_v54  ;;  %v1516_v45 = vsel %vm7675_vm13, %v1515_v29, %v1511_v20  ;;  %v7785_v36 = vld [vmem:[#allocation18_spill] sm:$0xff]  ;;  %v6132_v29 = vld [vmem:[%s5215_s23 + $0x20] sm:$0xff]  ;;  %v6144_v54 = vld [vmem:[%s5215_s23 + $0x30] sm:$0xff] }
 0x296   : > { %v964_v34 = vpop.xlane.xlu0 %963  ;;  %v1427_v22 = vsel %vm7674_vm11, %v1426_v52, %v1422_v61  ;;  %vm1534_vm11 = vcmask 1042434   ;;  %v1446_v8 = vrot.slane %v973_v10, %v5909_v12  ;;  %v1215_v10 = vsel %vm1214_vm7, %v1213_v13, %v1208_v31  ;;  %4224 = vmatpush3.bf16.msra.mxu1 %v4223_v17 }
 0x297   : > { %v1431_v33 = vrot.slane %v964_v34, %v5881_v0  ;;  %v1533_v52 = vsel %vm7678_vm8, %v1294_v35, %v1215_v10  ;;  %v1521_v34 = vsel %vm1200_vm14, %v1520_v56, %v1516_v45  ;;  %vm6103_vm10 = vcmp.lt.s32.totalorder %v7785_v36, %v1025_v63  ;;  %v6161_v56 = vld [vmem:[%s5215_s23 + $0x58] sm:$0xff]  ;;  %v6169_v35 = vld [vmem:[%s5215_s23 + $0x68] sm:$0xff]  ;;  %v6172_v45 = vld [vmem:[%s5215_s23 + $0x60] sm:$0xff] }
 0x298   : > { %v7787_v39 = vsel %vm6103_vm10, 4294967295, %v7786_v39  ;;  %v1535_v13 = vsel %vm1534_vm11, %v1373_v24, %v1533_v52  ;;  %vm1542_vm8 = vcmask 1044480   ;;  %v7789_v37 = vmov 0.0|0.0   ;;  %v7791_v52 = vld [vmem:[#allocation13_spill] sm:$0xff] }
 0x299   : > { %v1432_v4 = vsel %vm7676_vm12, %v1431_v33, %v1427_v22  ;;  %v976_v44 = vpop.xlane.xlu1 %975  ;;  %vm1538_vm12 = vcmask 1044484   ;;  %7788 = vst [vmem:[#allocation16_spill] sm:$0xff] %v7787_v39  ;;  %v6123_v22 = vld [vmem:[%s5215_s23 + $0x10] sm:$0xff]  ;;  %4225 = vmatprep.subr.bf16.mxu1 %v7789_v37  ;;  %v4232_v50 = vpack.c.bf16 %v6141_v41, %v6144_v54  ;;  %v7790_v63 = vmov 0.0  }
 0x29a   : > { %v970_v48 = vpop.xlane.xlu0 %969  ;;  %v1437_v57 = vsel %vm7675_vm13, %v1436_v42, %v1432_v4  ;;  %v1451_v55 = vrot.slane %v976_v44, %v5893_v3  ;;  %vm1536_vm13 = vcmask 1043459   ;;  %v4226_v53 = vpack.c.bf16 %v6126_v6, %v6123_v22  ;;  %v6135_v4 = vld [vmem:[%s5215_s23 + $0x28] sm:$0xff]  ;;  %v6153_v42 = vld [vmem:[%s5215_s23 + $0x40] sm:$0xff] }
 0x29b   : > { %v1441_v9 = vrot.slane %v970_v48, %v5888_v60  ;;  %v4229_v44 = vpack.c.bf16 %v6135_v4, %v6132_v29  ;;  %v4235_v48 = vpack.c.bf16 %v6150_v51, %v6153_v42 }
 0x29c   : > { %4227 = vmatpush3.bf16.msra.mxu1 %v4226_v53 }
 0x29d   : > { %v1442_v49 = vsel %vm1200_vm14, %v1441_v9, %v1437_v57  ;;  %v1024_v19 = vpop.xlane.xlu1 %1023  ;;  %4228 = vmatprep.subr.bf16.mxu1 %v7789_v37 }
 0x29e   : > { %v1447_v61 = vsel %vm1207_vm15, %v1446_v8, %v1442_v49  ;;  %v1530_v58 = vrot.slane %v1024_v19, %v5893_v3  ;;  %v1021_v7 = vpop.xlane.xlu0 %1020  ;;  %v6164_v8 = vld [vmem:[%s5215_s23 + $0x50] sm:$0xff]  ;;  %v6178_v49 = vld [vmem:[%s5215_s23 + $0x78] sm:$0xff] }
 0x29f   : > { %v1525_v46 = vrot.slane %v1021_v7, %v5909_v12  ;;  %v1452_v25 = vsel %vm1214_vm7, %v1451_v55, %v1447_v61  ;;  %v4238_v57 = vpack.c.bf16 %v6161_v56, %v6164_v8  ;;  %v4241_v55 = vpack.c.bf16 %v6169_v35, %v6172_v45  ;;  %v6181_v19 = vld [vmem:[%s5215_s23 + $0x70] sm:$0xff] }
 0x2a0   : > { %v1537_v38 = vsel %vm1536_vm13, %v1452_v25, %v1535_v13  ;;  %4230 = vmatpush3.bf16.msra.mxu1 %v4229_v44  ;;  %v4244_v24 = vpack.c.bf16 %v6178_v49, %v6181_v19  ;;  %v7792_v13 = vld [vmem:[#allocation14_spill] sm:$0xff] }
 0x2a1   : > { %v1526_v62 = vsel %vm1207_vm15, %v1525_v46, %v1521_v34  ;;  %4231 = vmatprep.subr.bf16.mxu1 %v7789_v37 }
 0x2a2   : > { %v1531_v43 = vsel %vm1214_vm7, %v1530_v58, %v1526_v62 }
 0x2a3   : > { %v1539_v21 = vsel %vm1538_vm12, %v1531_v43, %v1537_v38 }
 0x2a4   : > { %v1541_v33 = vsel %vm6103_vm10, %v1539_v21, -1e+18  ;;  %4233 = vmatpush3.bf16.msra.mxu1 %v4232_v50 }
 0x2a5   : > { %v1543_v40 = vsel %vm1542_vm8, %v1541_v33, -inf  ;;  %4234 = vmatprep.subr.bf16.mxu1 %v7789_v37 }
 0x2a6   : > { %1544 = vmax.xlane.f32.xlu0 %v1543_v40 }
 0x2a8   : > { %4236 = vmatpush3.bf16.msra.mxu1 %v4235_v48 }
 0x2a9   : > { %4237 = vmatprep.subr.bf16.mxu1 %v7789_v37 }
 0x2ac   : > { %4239 = vmatpush3.bf16.msra.mxu1 %v4238_v57 }
 0x2ad   : > { %4240 = vmatprep.subr.bf16.mxu1 %v7789_v37 }
 0x2b0   : > { %4242 = vmatpush3.bf16.msra.mxu1 %v4241_v55 }
 0x2b1   : > { %4243 = vmatprep.subr.bf16.mxu1 %v7789_v37 }
 0x2b4   : > { %4245 = vmatpush3.bf16.msra.mxu1 %v4244_v24 }
 0x2b5   : > { %4276 = vmatprep.subr.bf16.mxu1 %v7789_v37 }
 0x333   : > { %v1545_v31 = vpop.xlane.xlu0 %1544 }
 0x334   : > { %v1546_v32 = vsub.f32 %v1541_v33, %v1545_v31 }
 0x336   : > { %v1547_v9 = vmul.f32 1.442695, %v1546_v32 }
 0x338   : > { %4504 = vpow2.f32 %v1547_v9 }
 0x342   : > { %v4505_v20 = vpop.eup %4504 }
 0x343   : > { %v1549_v47 = vsel %vm1542_vm8, %v4505_v20, 0.0 }
 0x344   : > { %1550 = vadd.xlane.f32.xlu1 %v1549_v47 }
 0x3d1   : > { %v1551_v61 = vpop.xlane.xlu1 %1550 }
 0x3d2   : > { %4506 = vrcp.f32 %v1551_v61 }
 0x3dc   : > { %v4507_v58 = vpop.eup %4506 }
 0x3dd   : > { %v1553_v7 = vmul.f32 %v4507_v58, %v4505_v20  ;;  %v6221_v20 = vld [vmem:[%s7653_s6] ss:$0 sm:$0xff] }
 0x3df   : > { %4157 = vmatmul.mubr.f32.vlgmr.msra.gmra.mrb[0].mxu1 %v1553_v7 }
 0x3e0   : > { %4213 = vmatprep.mubr.msk.f32.mxu1 %vm5002_vm0, %v7790_v63 }
 0x4b2   : > { %v1620_v10 = vpop.f32.mrb[0].mxu1 }
 0x4b3   : > { %v4158_v46 = vpop.f32.mrb[1].mxu1  ;;  %4168 = vmatmul.mubr.msk.f32.vlgmr.msra.gmra.mrb[2].mxu0 %vm7687_vm1, %v1620_v10 }
 0x4b4   : > { %4254 = vmatpush3.bf16.msra.mxu0 %v4223_v17  ;;  %4202 = vmatprep.mubr.msk.f32.mxu0 %vm5002_vm0, %v7790_v63  ;;  %vm7807_vm0 = vcmask 458112  }
 0x4b5   : > { %4255 = vmatprep.subr.bf16.mxu0 %v7789_v37 }
 0x4b8   : > { %4257 = vmatpush3.bf16.msra.mxu0 %v4226_v53 }
 0x4b9   : > { %4258 = vmatprep.subr.bf16.mxu0 %v7789_v37 }
 0x4bc   : > { %4260 = vmatpush3.bf16.msra.mxu0 %v4229_v44 }
 0x4bd   : > { %4261 = vmatprep.subr.bf16.mxu0 %v7789_v37 }
 0x4c0   : > { %4263 = vmatpush3.bf16.msra.mxu0 %v4232_v50 }
 0x4c1   : > { %4264 = vmatprep.subr.bf16.mxu0 %v7789_v37 }
 0x4c4   : > { %4266 = vmatpush3.bf16.msra.mxu0 %v4235_v48 }
 0x4c5   : > { %4267 = vmatprep.subr.bf16.mxu0 %v7789_v37 }
 0x4c8   : > { %4269 = vmatpush3.bf16.msra.mxu0 %v4238_v57 }
 0x4c9   : > { %4270 = vmatprep.subr.bf16.mxu0 %v7789_v37 }
 0x4cc   : > { %4272 = vmatpush3.bf16.msra.mxu0 %v4241_v55 }
 0x4cd   : > { %4273 = vmatprep.subr.bf16.mxu0 %v7789_v37 }
 0x4d0   : > { %4275 = vmatpush3.bf16.msra.mxu0 %v4244_v24 }
 0x586   : > { %v6199_v25 = vpop.f32.mrb[2].mxu0 }
 0x587   : > { %v1705_v34 = vrot.slane %v6199_v25, %v7791_v52  ;;  %v4169_v62 = vpop.f32.mrb[3].mxu0 }
 0x589   : > { %v6204_v36 = vrot.slane %v1705_v34, %v7791_v52  ;;  %v1713_v55 = vcombine.high %v1705_v34, %v1705_v34 }
 0x58b   : > { %v1740_v43 = vrot.slane %v6204_v36, %v7792_v13 }
 0x58d   : > { %v1763_v38 = vadd.f32 %v6118_v2, %v1740_v43  ;;  %v1762_v21 = vadd.f32 %v6115_v15, %v1740_v43  ;;  %v1766_v33 = vadd.f32 %v6132_v29, %v1740_v43  ;;  %v1764_v40 = vadd.f32 %v6123_v22, %v1740_v43 }
 0x58e   : > { %v1767_v17 = vadd.f32 %v6135_v4, %v1740_v43  ;;  %v1765_v53 = vadd.f32 %v6126_v6, %v1740_v43  ;;  %v1769_v44 = vadd.f32 %v6141_v41, %v1740_v43  ;;  %v1768_v50 = vadd.f32 %v6144_v54, %v1740_v43 }
 0x58f   : > { %4508 = vtanh.f32 %v1763_v38  ;;  %v1771_v48 = vadd.f32 %v6150_v51, %v1740_v43  ;;  %v1770_v31 = vadd.f32 %v6153_v42, %v1740_v43  ;;  %v1773_v61 = vadd.f32 %v6161_v56, %v1740_v43 }
 0x590   : > { %4510 = vtanh.f32 %v1762_v21  ;;  %v1772_v10 = vadd.f32 %v6164_v8, %v1740_v43  ;;  %v6232_v21 = vrot.slane %v1713_v55, %v7791_v52 }
 0x591   : > { %4512 = vtanh.f32 %v1766_v33  ;;  %v1775_v33 = vadd.f32 %v6169_v35, %v1740_v43 }
 0x592   : > { %4514 = vtanh.f32 %v1764_v40 }
 0x593   : > { %4516 = vtanh.f32 %v1767_v17 }
 0x594   : > { %4518 = vtanh.f32 %v1765_v53  ;;  %v1774_v53 = vadd.f32 %v6172_v45, %v1740_v43 }
 0x595   : > { %4520 = vtanh.f32 %v1769_v44 }
 0x596   : > { %4522 = vtanh.f32 %v1768_v50 }
 0x597   : > { %4524 = vtanh.f32 %v1771_v48 }
 0x598   : > { %4526 = vtanh.f32 %v1770_v31 }
 0x599   : > { %v4509_v32 = vpop.eup %4508  ;;  %4528 = vtanh.f32 %v1773_v61 }
 0x59a   : > { %v4511_v9 = vpop.eup %4510  ;;  %v1923_v47 = vmul.f32 %v6221_v20, %v4509_v32  ;;  %4530 = vtanh.f32 %v1772_v10  ;;  %v1735_v32 = vcombine.high %v6204_v36, %v6204_v36 }
 0x59b   : > { %v4513_v57 = vpop.eup %4512  ;;  %v1922_v24 = vmul.f32 %v6221_v20, %v4511_v9  ;;  %v6244_v9 = vrot.slane %v6232_v21, %v7792_v13  ;;  %4532 = vtanh.f32 %v1775_v33 }
 0x59c   : > { %v4515_v58 = vpop.eup %4514  ;;  %v2005_v7 = vsel %vm7687_vm1, %v1923_v47, 0.0  ;;  %v1926_v63 = vmul.f32 %v6221_v20, %v4513_v57  ;;  %v1777_v47 = vadd.f32 %v6178_v49, %v1740_v43  ;;  %4534 = vtanh.f32 %v1774_v53 }
 0x59d   : > { %v4517_v46 = vpop.eup %4516  ;;  %2006 = vadd.xlane.f32.xlu1 %v2005_v7  ;;  %v2002_v62 = vsel %vm7687_vm1, %v1922_v24, 0.0  ;;  %v1924_v38 = vmul.f32 %v6221_v20, %v4515_v58  ;;  %v1776_v24 = vadd.f32 %v6181_v19, %v1740_v43  ;;  %v6255_v10 = vrot.slane %v1735_v32, %v7792_v13 }
 0x59e   : > { %v4519_v34 = vpop.eup %4518  ;;  %2003 = vadd.xlane.f32.xlu0 %v2002_v62  ;;  %v2014_v40 = vsel %vm7687_vm1, %v1926_v63, 0.0  ;;  %v1927_v17 = vmul.f32 %v6221_v20, %v4517_v46  ;;  %v1698_v63 = vcombine.high %v6199_v25, %v6199_v25  ;;  %4536 = vtanh.f32 %v1777_v47 }
 0x59f   : > { %v4521_v44 = vpop.eup %4520  ;;  %v2008_v50 = vsel %vm7687_vm1, %v1924_v38, 0.0  ;;  %v1925_v48 = vmul.f32 %v6221_v20, %v4519_v34  ;;  %v1779_v46 = vadd.f32 %v6118_v2, %v6244_v9  ;;  %4538 = vtanh.f32 %v1776_v24 }
 0x5a0   : > { %v4523_v31 = vpop.eup %4522  ;;  %v2017_v57 = vsel %vm7687_vm1, %v1927_v17, 0.0  ;;  %v1929_v55 = vmul.f32 %v6221_v20, %v4521_v44  ;;  %v1778_v38 = vadd.f32 %v6115_v15, %v6244_v9  ;;  %v1712_v17 = vrot.slane %v1698_v63, %v7791_v52 }
 0x5a1   : > { %2015 = vadd.xlane.f32.xlu1 %v2014_v40  ;;  %v4525_v61 = vpop.eup %4524  ;;  %v2011_v58 = vsel %vm7687_vm1, %v1925_v48, 0.0  ;;  %v1928_v36 = vmul.f32 %v6221_v20, %v4523_v31  ;;  %4540 = vtanh.f32 %v1779_v46  ;;  %v1780_v53 = vadd.f32 %v6123_v22, %v6244_v9 }
 0x5a2   : > { %2009 = vadd.xlane.f32.xlu0 %v2008_v50  ;;  %v4527_v7 = vpop.eup %4526  ;;  %v2023_v43 = vsel %vm7687_vm1, %v1929_v55, 0.0  ;;  %v1931_v62 = vmul.f32 %v6221_v20, %v4525_v61  ;;  %4542 = vtanh.f32 %v1778_v38  ;;  %v1794_v48 = vadd.f32 %v6115_v15, %v6255_v10 }
 0x5a3   : > { %v4529_v34 = vpop.eup %4528  ;;  %v2020_v33 = vsel %vm7687_vm1, %v1928_v36, 0.0  ;;  %v1930_v25 = vmul.f32 %v6221_v20, %v4527_v7  ;;  %v1727_v55 = vrot.slane %v1712_v17, %v7791_v52  ;;  %4544 = vtanh.f32 %v1780_v53 }
 0x5a4   : > { %v4531_v40 = vpop.eup %4530  ;;  %v2029_v44 = vsel %vm7687_vm1, %v1931_v62, 0.0  ;;  %v1933_v50 = vmul.f32 %v6221_v20, %v4529_v34  ;;  %v1795_v24 = vadd.f32 %v6118_v2, %v6255_v10  ;;  %4546 = vtanh.f32 %v1794_v48 }
 0x5a5   : > { %2018 = vadd.xlane.f32.xlu1 %v2017_v57  ;;  %v4533_v31 = vpop.eup %4532  ;;  %v2026_v32 = vsel %vm7687_vm1, %v1930_v25, 0.0  ;;  %v1932_v47 = vmul.f32 %v6221_v20, %v4531_v40  ;;  %v1796_v36 = vadd.f32 %v6123_v22, %v6255_v10  ;;  %v6284_v62 = vrot.slane %v1727_v55, %v7792_v13 }
 0x5a6   : > { %2012 = vadd.xlane.f32.xlu0 %v2011_v58  ;;  %v4535_v57 = vpop.eup %4534  ;;  %v2035_v61 = vsel %vm7687_vm1, %v1933_v50, 0.0  ;;  %v1935_v58 = vmul.f32 %v6221_v20, %v4533_v31  ;;  %4548 = vtanh.f32 %v1795_v24  ;;  %v1781_v38 = vadd.f32 %v6126_v6, %v6244_v9 }
 0x5a7   : > { %v2032_v63 = vsel %vm7687_vm1, %v1932_v47, 0.0  ;;  %v1934_v46 = vmul.f32 %v6221_v20, %v4535_v57  ;;  %4550 = vtanh.f32 %v1796_v36  ;;  %v1782_v25 = vadd.f32 %v6132_v29, %v6244_v9 }
 0x5a8   : > { %v4537_v7 = vpop.eup %4536  ;;  %v2041_v34 = vsel %vm7687_vm1, %v1935_v58, 0.0  ;;  %4552 = vtanh.f32 %v1781_v38  ;;  %v1797_v50 = vadd.f32 %v6126_v6, %v6255_v10 }
 0x5a9   : > { %2024 = vadd.xlane.f32.xlu1 %v2023_v43  ;;  %v4539_v43 = vpop.eup %4538  ;;  %v2038_v17 = vsel %vm7687_vm1, %v1934_v46, 0.0  ;;  %4554 = vtanh.f32 %v1782_v25 }
 0x5aa   : > { %2021 = vadd.xlane.f32.xlu0 %v2020_v33  ;;  %v1937_v33 = vmul.f32 %v6221_v20, %v4537_v7  ;;  %v1936_v53 = vmul.f32 %v6221_v20, %v4539_v43  ;;  %4556 = vtanh.f32 %v1797_v50  ;;  %v1783_v7 = vadd.f32 %v6135_v4, %v6244_v9 }
 0x5ab   : > { %v4541_v40 = vpop.eup %4540 }
 0x5ac   : > { %v2047_v48 = vsel %vm7687_vm1, %v1937_v33, 0.0  ;;  %v1939_v31 = vmul.f32 %v6221_v20, %v4541_v40  ;;  %v2044_v57 = vsel %vm7687_vm1, %v1936_v53, 0.0  ;;  %v1799_v40 = vadd.f32 %v6135_v4, %v6255_v10 }
 0x5ad   : > { %2030 = vadd.xlane.f32.xlu1 %v2029_v44  ;;  %v4543_v44 = vpop.eup %4542 }
 0x5ae   : > { %2027 = vadd.xlane.f32.xlu0 %v2026_v32  ;;  %v1827_v32 = vadd.f32 %v6118_v2, %v6284_v62  ;;  %v4545_v47 = vpop.eup %4544  ;;  %v1938_v55 = vmul.f32 %v6221_v20, %v4543_v44  ;;  %v2053_v58 = vsel %vm7687_vm1, %v1939_v31, 0.0 }
 0x5af   : > { %v4547_v24 = vpop.eup %4546  ;;  %v1940_v36 = vmul.f32 %v6221_v20, %v4545_v47  ;;  %v1829_v47 = vadd.f32 %v6126_v6, %v6284_v62 }
 0x5b0   : > { %4558 = vtanh.f32 %v1827_v32  ;;  %v2050_v46 = vsel %vm7687_vm1, %v1938_v55, 0.0  ;;  %v1954_v43 = vmul.f32 %v6221_v20, %v4547_v24 }
 0x5b1   : > { %2036 = vadd.xlane.f32.xlu1 %v2035_v61  ;;  %v1826_v61 = vadd.f32 %v6115_v15, %v6284_v62  ;;  %v2056_v33 = vsel %vm7687_vm1, %v1940_v36, 0.0 }
 0x5b2   : > { %2033 = vadd.xlane.f32.xlu0 %v2032_v63  ;;  %v4549_v63 = vpop.eup %4548  ;;  %v2098_v53 = vsel %vm7687_vm1, %v1954_v43, 0.0 }
 0x5b3   : > { %v4551_v38 = vpop.eup %4550  ;;  %4560 = vtanh.f32 %v1826_v61  ;;  %v1955_v25 = vmul.f32 %v6221_v20, %v4549_v63  ;;  %v1785_v63 = vadd.f32 %v6141_v41, %v6244_v9 }
 0x5b4   : > { %4562 = vtanh.f32 %v1783_v7  ;;  %v1956_v44 = vmul.f32 %v6221_v20, %v4551_v38 }
 0x5b5   : > { %2042 = vadd.xlane.f32.xlu1 %v2041_v34  ;;  %v1798_v34 = vadd.f32 %v6132_v29, %v6255_v10  ;;  %v2101_v31 = vsel %vm7687_vm1, %v1955_v25, 0.0 }
 0x5b6   : > { %2039 = vadd.xlane.f32.xlu0 %v2038_v17  ;;  %v4553_v17 = vpop.eup %4552  ;;  %v2104_v55 = vsel %vm7687_vm1, %v1956_v44, 0.0 }
 0x5b7   : > { %v4555_v50 = vpop.eup %4554  ;;  %4564 = vtanh.f32 %v1798_v34  ;;  %v1941_v32 = vmul.f32 %v6221_v20, %v4553_v17  ;;  %v1801_v17 = vadd.f32 %v6141_v41, %v6255_v10 }
 0x5b8   : > { %4566 = vtanh.f32 %v1799_v40  ;;  %v1942_v24 = vmul.f32 %v6221_v20, %v4555_v50 }
 0x5b9   : > { %2048 = vadd.xlane.f32.xlu1 %v2047_v48  ;;  %v1828_v48 = vadd.f32 %v6123_v22, %v6284_v62  ;;  %v2059_v36 = vsel %vm7687_vm1, %v1941_v32, 0.0 }
 0x5ba   : > { %2045 = vadd.xlane.f32.xlu0 %v2044_v57  ;;  %v4557_v57 = vpop.eup %4556  ;;  %v2062_v43 = vsel %vm7687_vm1, %v1942_v24, 0.0 }
 0x5bb   : > { %v4559_v61 = vpop.eup %4558  ;;  %4568 = vtanh.f32 %v1828_v48  ;;  %v1957_v7 = vmul.f32 %v6221_v20, %v4557_v57  ;;  %v1831_v57 = vadd.f32 %v6135_v4, %v6284_v62 }
 0x5bc   : > { %4570 = vtanh.f32 %v1829_v47  ;;  %v1987_v38 = vmul.f32 %v6221_v20, %v4559_v61 }
 0x5bd   : > { %2054 = vadd.xlane.f32.xlu1 %v2053_v58  ;;  %v1784_v58 = vadd.f32 %v6144_v54, %v6244_v9  ;;  %v2107_v25 = vsel %vm7687_vm1, %v1957_v7, 0.0 }
 0x5be   : > { %2051 = vadd.xlane.f32.xlu0 %v2050_v46  ;;  %v4561_v46 = vpop.eup %4560  ;;  %v2197_v44 = vsel %vm7687_vm1, %v1987_v38, 0.0 }
 0x5bf   : > { %v4563_v34 = vpop.eup %4562  ;;  %4572 = vtanh.f32 %v1784_v58  ;;  %v1986_v40 = vmul.f32 %v6221_v20, %v4561_v46  ;;  %v1787_v46 = vadd.f32 %v6150_v51, %v6244_v9 }
 0x5c0   : > { %4574 = vtanh.f32 %v1785_v63  ;;  %v1943_v50 = vmul.f32 %v6221_v20, %v4563_v34 }
 0x5c1   : > { %2057 = vadd.xlane.f32.xlu1 %v2056_v33  ;;  %v1800_v33 = vadd.f32 %v6144_v54, %v6255_v10  ;;  %v2194_v32 = vsel %vm7687_vm1, %v1986_v40, 0.0 }
 0x5c2   : > { %2099 = vadd.xlane.f32.xlu0 %v2098_v53  ;;  %v4565_v53 = vpop.eup %4564  ;;  %v2065_v24 = vsel %vm7687_vm1, %v1943_v50, 0.0 }
 0x5c3   : > { %v4567_v48 = vpop.eup %4566  ;;  %4576 = vtanh.f32 %v1800_v33  ;;  %v1958_v47 = vmul.f32 %v6221_v20, %v4565_v53  ;;  %v1803_v53 = vadd.f32 %v6150_v51, %v6255_v10 }
 0x5c4   : > { %4578 = vtanh.f32 %v1801_v17  ;;  %v1959_v61 = vmul.f32 %v6221_v20, %v4567_v48 }
 0x5c5   : > { %2102 = vadd.xlane.f32.xlu1 %v2101_v31  ;;  %v1830_v31 = vadd.f32 %v6132_v29, %v6284_v62  ;;  %v2110_v7 = vsel %vm7687_vm1, %v1958_v47, 0.0 }
 0x5c6   : > { %2105 = vadd.xlane.f32.xlu0 %v2104_v55  ;;  %v4569_v55 = vpop.eup %4568  ;;  %v2113_v38 = vsel %vm7687_vm1, %v1959_v61, 0.0 }
 0x5c7   : > { %v4571_v58 = vpop.eup %4570  ;;  %4580 = vtanh.f32 %v1830_v31  ;;  %v1988_v63 = vmul.f32 %v6221_v20, %v4569_v55  ;;  %v1833_v55 = vadd.f32 %v6141_v41, %v6284_v62 }
 0x5c8   : > { %4582 = vtanh.f32 %v1831_v57  ;;  %v1989_v34 = vmul.f32 %v6221_v20, %v4571_v58 }
 0x5c9   : > { %2060 = vadd.xlane.f32.xlu1 %v2059_v36  ;;  %v1786_v36 = vadd.f32 %v6153_v42, %v6244_v9  ;;  %v2200_v40 = vsel %vm7687_vm1, %v1988_v63, 0.0 }
 0x5ca   : > { %2063 = vadd.xlane.f32.xlu0 %v2062_v43  ;;  %v4573_v43 = vpop.eup %4572  ;;  %v2203_v50 = vsel %vm7687_vm1, %v1989_v34, 0.0 }
 0x5cb   : > { %v4575_v33 = vpop.eup %4574  ;;  %4584 = vtanh.f32 %v1786_v36  ;;  %v1944_v17 = vmul.f32 %v6221_v20, %v4573_v43  ;;  %v1789_v43 = vadd.f32 %v6161_v56, %v6244_v9 }
 0x5cc   : > { %4586 = vtanh.f32 %v1787_v46  ;;  %v1945_v48 = vmul.f32 %v6221_v20, %v4575_v33 }
 0x5cd   : > { %2108 = vadd.xlane.f32.xlu1 %v2107_v25  ;;  %v1802_v25 = vadd.f32 %v6153_v42, %v6255_v10  ;;  %v2068_v47 = vsel %vm7687_vm1, %v1944_v17, 0.0 }
 0x5ce   : > { %2198 = vadd.xlane.f32.xlu0 %v2197_v44  ;;  %v4577_v44 = vpop.eup %4576  ;;  %v2071_v61 = vsel %vm7687_vm1, %v1945_v48, 0.0 }
 0x5cf   : > { %v4579_v31 = vpop.eup %4578  ;;  %4588 = vtanh.f32 %v1802_v25  ;;  %v1960_v57 = vmul.f32 %v6221_v20, %v4577_v44  ;;  %v1805_v44 = vadd.f32 %v6161_v56, %v6255_v10 }
 0x5d0   : > { %4590 = vtanh.f32 %v1803_v53  ;;  %v1961_v58 = vmul.f32 %v6221_v20, %v4579_v31 }
 0x5d1   : > { %2195 = vadd.xlane.f32.xlu1 %v2194_v32  ;;  %v1832_v32 = vadd.f32 %v6144_v54, %v6284_v62  ;;  %v2116_v63 = vsel %vm7687_vm1, %v1960_v57, 0.0 }
 0x5d2   : > { %2066 = vadd.xlane.f32.xlu0 %v2065_v24  ;;  %v4581_v24 = vpop.eup %4580  ;;  %v2119_v34 = vsel %vm7687_vm1, %v1961_v58, 0.0 }
 0x5d3   : > { %v4583_v36 = vpop.eup %4582  ;;  %4592 = vtanh.f32 %v1832_v32  ;;  %v1990_v46 = vmul.f32 %v6221_v20, %v4581_v24  ;;  %v1835_v24 = vadd.f32 %v6150_v51, %v6284_v62 }
 0x5d4   : > { %4594 = vtanh.f32 %v1833_v55  ;;  %v1991_v33 = vmul.f32 %v6221_v20, %v4583_v36 }
 0x5d5   : > { %2111 = vadd.xlane.f32.xlu1 %v2110_v7  ;;  %v1788_v7 = vadd.f32 %v6164_v8, %v6244_v9  ;;  %v2206_v17 = vsel %vm7687_vm1, %v1990_v46, 0.0 }
 0x5d6   : > { %2114 = vadd.xlane.f32.xlu0 %v2113_v38  ;;  %v4585_v38 = vpop.eup %4584  ;;  %v2209_v48 = vsel %vm7687_vm1, %v1991_v33, 0.0 }
 0x5d7   : > { %v4587_v25 = vpop.eup %4586  ;;  %4596 = vtanh.f32 %v1788_v7  ;;  %v1946_v53 = vmul.f32 %v6221_v20, %v4585_v38  ;;  %v1791_v38 = vadd.f32 %v6169_v35, %v6244_v9 }
 0x5d8   : > { %4598 = vtanh.f32 %v1789_v43  ;;  %v1947_v31 = vmul.f32 %v6221_v20, %v4587_v25 }
 0x5d9   : > { %2201 = vadd.xlane.f32.xlu1 %v2200_v40  ;;  %v1804_v40 = vadd.f32 %v6164_v8, %v6255_v10  ;;  %v2074_v57 = vsel %vm7687_vm1, %v1946_v53, 0.0 }
 0x5da   : > { %2204 = vadd.xlane.f32.xlu0 %v2203_v50  ;;  %v4589_v50 = vpop.eup %4588  ;;  %v2077_v58 = vsel %vm7687_vm1, %v1947_v31, 0.0 }
 0x5db   : > { %v4591_v32 = vpop.eup %4590  ;;  %4600 = vtanh.f32 %v1804_v40  ;;  %v1962_v55 = vmul.f32 %v6221_v20, %v4589_v50  ;;  %v1807_v50 = vadd.f32 %v6169_v35, %v6255_v10 }
 0x5dc   : > { %4602 = vtanh.f32 %v1805_v44  ;;  %v1963_v36 = vmul.f32 %v6221_v20, %v4591_v32 }
 0x5dd   : > { %2069 = vadd.xlane.f32.xlu1 %v2068_v47  ;;  %v1834_v47 = vadd.f32 %v6153_v42, %v6284_v62  ;;  %v2122_v46 = vsel %vm7687_vm1, %v1962_v55, 0.0 }
 0x5de   : > { %2072 = vadd.xlane.f32.xlu0 %v2071_v61  ;;  %v4593_v61 = vpop.eup %4592  ;;  %v2125_v33 = vsel %vm7687_vm1, %v1963_v36, 0.0 }
 0x5df   : > { %v4595_v7 = vpop.eup %4594  ;;  %4604 = vtanh.f32 %v1834_v47  ;;  %v1992_v43 = vmul.f32 %v6221_v20, %v4593_v61  ;;  %v1837_v61 = vadd.f32 %v6161_v56, %v6284_v62 }
 0x5e0   : > { %4606 = vtanh.f32 %v1835_v24  ;;  %v1993_v25 = vmul.f32 %v6221_v20, %v4595_v7 }
 0x5e1   : > { %2117 = vadd.xlane.f32.xlu1 %v2116_v63  ;;  %v1790_v63 = vadd.f32 %v6172_v45, %v6244_v9  ;;  %v2212_v53 = vsel %vm7687_vm1, %v1992_v43, 0.0 }
 0x5e2   : > { %2120 = vadd.xlane.f32.xlu0 %v2119_v34  ;;  %v4597_v34 = vpop.eup %4596  ;;  %v2215_v31 = vsel %vm7687_vm1, %v1993_v25, 0.0 }
 0x5e3   : > { %v4599_v40 = vpop.eup %4598  ;;  %4608 = vtanh.f32 %v1790_v63  ;;  %v1948_v44 = vmul.f32 %v6221_v20, %v4597_v34  ;;  %v1793_v34 = vadd.f32 %v6178_v49, %v6244_v9 }
 0x5e4   : > { %4610 = vtanh.f32 %v1791_v38  ;;  %v1949_v32 = vmul.f32 %v6221_v20, %v4599_v40 }
 0x5e5   : > { %2207 = vadd.xlane.f32.xlu1 %v2206_v17  ;;  %v1806_v17 = vadd.f32 %v6172_v45, %v6255_v10  ;;  %v2080_v55 = vsel %vm7687_vm1, %v1948_v44, 0.0  ;;  %v1808_v44 = vadd.f32 %v6181_v19, %v6255_v10 }
 0x5e6   : > { %2210 = vadd.xlane.f32.xlu0 %v2209_v48  ;;  %v4601_v48 = vpop.eup %4600  ;;  %v2083_v36 = vsel %vm7687_vm1, %v1949_v32, 0.0 }
 0x5e7   : > { %v4603_v47 = vpop.eup %4602  ;;  %4612 = vtanh.f32 %v1806_v17  ;;  %v1964_v24 = vmul.f32 %v6221_v20, %v4601_v48 }
 0x5e8   : > { %4614 = vtanh.f32 %v1807_v50  ;;  %v1965_v7 = vmul.f32 %v6221_v20, %v4603_v47 }
 0x5e9   : > { %2075 = vadd.xlane.f32.xlu1 %v2074_v57  ;;  %v1836_v57 = vadd.f32 %v6164_v8, %v6284_v62  ;;  %v2128_v43 = vsel %vm7687_vm1, %v1964_v24, 0.0 }
 0x5ea   : > { %2078 = vadd.xlane.f32.xlu0 %v2077_v58  ;;  %v4605_v58 = vpop.eup %4604  ;;  %v2131_v25 = vsel %vm7687_vm1, %v1965_v7, 0.0 }
 0x5eb   : > { %v4607_v63 = vpop.eup %4606  ;;  %4616 = vtanh.f32 %v1836_v57  ;;  %v1994_v38 = vmul.f32 %v6221_v20, %v4605_v58 }
 0x5ec   : > { %4618 = vtanh.f32 %v1837_v61  ;;  %v1995_v40 = vmul.f32 %v6221_v20, %v4607_v63 }
 0x5ed   : > { %2123 = vadd.xlane.f32.xlu1 %v2122_v46  ;;  %v1792_v46 = vadd.f32 %v6181_v19, %v6244_v9  ;;  %v2218_v50 = vsel %vm7687_vm1, %v1994_v38, 0.0  ;;  %v1809_v9 = vadd.f32 %v6178_v49, %v6255_v10  ;;  %v1839_v10 = vadd.f32 %v6169_v35, %v6284_v62 }
 0x5ee   : > { %2126 = vadd.xlane.f32.xlu0 %v2125_v33  ;;  %v4609_v33 = vpop.eup %4608  ;;  %v2221_v32 = vsel %vm7687_vm1, %v1995_v40, 0.0 }
 0x5ef   : > { %v4611_v17 = vpop.eup %4610  ;;  %4620 = vtanh.f32 %v1792_v46  ;;  %v1950_v48 = vmul.f32 %v6221_v20, %v4609_v33 }
 0x5f0   : > { %4622 = vtanh.f32 %v1793_v34  ;;  %v1951_v47 = vmul.f32 %v6221_v20, %v4611_v17 }
 0x5f1   : > { %2213 = vadd.xlane.f32.xlu1 %v2212_v53  ;;  %v1736_v53 = vcombine.high %v6232_v21, %v6232_v21  ;;  %4624 = vtanh.f32 %v1808_v44  ;;  %v2086_v24 = vsel %vm7687_vm1, %v1950_v48, 0.0 }
 0x5f2   : > { %2216 = vadd.xlane.f32.xlu0 %v2215_v31  ;;  %v4613_v31 = vpop.eup %4612  ;;  %4626 = vtanh.f32 %v1809_v9 }
 0x5f3   : > { %v4615_v57 = vpop.eup %4614  ;;  %v6441_v21 = vrot.slane %v1736_v53, %v7792_v13  ;;  %v1966_v61 = vmul.f32 %v6221_v20, %v4613_v31 }
 0x5f4   : > { %v1967_v7 = vmul.f32 %v6221_v20, %v4615_v57 }
 0x5f5   : > { %2081 = vadd.xlane.f32.xlu1 %v2080_v55  ;;  %v1838_v55 = vadd.f32 %v6172_v45, %v6284_v62  ;;  %v4617_v58 = vpop.eup %4616  ;;  %v1810_v46 = vadd.f32 %v6115_v15, %v6441_v21  ;;  %v1811_v34 = vadd.f32 %v6118_v2, %v6441_v21  ;;  %v1814_v15 = vadd.f32 %v6132_v29, %v6441_v21 }
 0x5f6   : > { %2084 = vadd.xlane.f32.xlu0 %v2083_v36  ;;  %v2089_v36 = vsel %vm7687_vm1, %v1951_v47, 0.0  ;;  %v4619_v63 = vpop.eup %4618  ;;  %v1996_v38 = vmul.f32 %v6221_v20, %v4617_v58  ;;  %v1812_v2 = vadd.f32 %v6123_v22, %v6441_v21  ;;  %v1816_v29 = vadd.f32 %v6144_v54, %v6441_v21 }
 0x5f7   : > { %4628 = vtanh.f32 %v1838_v55  ;;  %v1997_v40 = vmul.f32 %v6221_v20, %v4619_v63  ;;  %v1813_v22 = vadd.f32 %v6126_v6, %v6441_v21  ;;  %v1818_v54 = vadd.f32 %v6153_v42, %v6441_v21 }
 0x5f8   : > { %4630 = vtanh.f32 %v1839_v10  ;;  %v2224_v53 = vsel %vm7687_vm1, %v1996_v38, 0.0  ;;  %v1815_v6 = vadd.f32 %v6135_v4, %v6441_v21  ;;  %v1820_v42 = vadd.f32 %v6164_v8, %v6441_v21 }
 0x5f9   : > { %2129 = vadd.xlane.f32.xlu1 %v2128_v43  ;;  %v2134_v43 = vsel %vm7687_vm1, %v1966_v61, 0.0  ;;  %v4621_v33 = vpop.eup %4620  ;;  %4632 = vtanh.f32 %v1810_v46  ;;  %v2227_v48 = vsel %vm7687_vm1, %v1997_v40, 0.0  ;;  %v1817_v4 = vadd.f32 %v6141_v41, %v6441_v21 }
 0x5fa   : > { %2132 = vadd.xlane.f32.xlu0 %v2131_v25  ;;  %v2137_v25 = vsel %vm7687_vm1, %v1967_v7, 0.0  ;;  %v4623_v17 = vpop.eup %4622  ;;  %v1952_v44 = vmul.f32 %v6221_v20, %v4621_v33  ;;  %4634 = vtanh.f32 %v1811_v34  ;;  %v1822_v8 = vadd.f32 %v6172_v45, %v6441_v21 }
 0x5fb   : > { %v1953_v9 = vmul.f32 %v6221_v20, %v4623_v17  ;;  %4636 = vtanh.f32 %v1814_v15  ;;  %v1819_v41 = vadd.f32 %v6150_v51, %v6441_v21  ;;  %v1824_v45 = vadd.f32 %v6181_v19, %v6441_v21 }
 0x5fc   : > { %4638 = vtanh.f32 %v1812_v2  ;;  %v1821_v51 = vadd.f32 %v6161_v56, %v6441_v21  ;;  %v1823_v56 = vadd.f32 %v6169_v35, %v6441_v21  ;;  %v1840_v35 = vadd.f32 %v6181_v19, %v6284_v62 }
 0x5fd   : > { %2219 = vadd.xlane.f32.xlu1 %v2218_v50  ;;  %v4625_v50 = vpop.eup %4624  ;;  %v2095_v55 = vsel %vm7687_vm1, %v1953_v9, 0.0  ;;  %4640 = vtanh.f32 %v1816_v29 }
 0x5fe   : > { %2222 = vadd.xlane.f32.xlu0 %v2221_v32  ;;  %v4627_v31 = vpop.eup %4626  ;;  %v2092_v32 = vsel %vm7687_vm1, %v1952_v44, 0.0  ;;  %v1968_v47 = vmul.f32 %v6221_v20, %v4625_v50  ;;  %4642 = vtanh.f32 %v1813_v22  ;;  %v1825_v22 = vadd.f32 %v6178_v49, %v6441_v21 }
 0x5ff   : > { %4644 = vtanh.f32 %v1818_v54 }
 0x600   : > { %v2140_v10 = vsel %vm7687_vm1, %v1968_v47, 0.0  ;;  %4646 = vtanh.f32 %v1815_v6 }
 0x601   : > { %2087 = vadd.xlane.f32.xlu1 %v2086_v24  ;;  %v4629_v57 = vpop.eup %4628  ;;  %v1969_v24 = vmul.f32 %v6221_v20, %v4627_v31  ;;  %4648 = vtanh.f32 %v1820_v42 }
 0x602   : > { %2090 = vadd.xlane.f32.xlu0 %v2089_v36  ;;  %v4631_v61 = vpop.eup %4630  ;;  %v1998_v58 = vmul.f32 %v6221_v20, %v4629_v57  ;;  %4650 = vtanh.f32 %v1817_v4 }
 0x603   : > { %v4633_v36 = vpop.eup %4632  ;;  %v2143_v7 = vsel %vm7687_vm1, %v1969_v24, 0.0  ;;  %v1999_v63 = vmul.f32 %v6221_v20, %v4631_v61  ;;  %4652 = vtanh.f32 %v1822_v8 }
 0x604   : > { %v4635_v46 = vpop.eup %4634  ;;  %v1970_v38 = vmul.f32 %v6221_v20, %v4633_v36  ;;  %4654 = vtanh.f32 %v1819_v41 }
 0x605   : > { %2135 = vadd.xlane.f32.xlu1 %v2134_v43  ;;  %v2230_v43 = vsel %vm7687_vm1, %v1998_v58, 0.0  ;;  %v4637_v34 = vpop.eup %4636  ;;  %v2233_v33 = vsel %vm7687_vm1, %v1999_v63, 0.0  ;;  %4656 = vtanh.f32 %v1824_v45  ;;  %v1841_v58 = vadd.f32 %v6178_v49, %v6284_v62 }
 0x606   : > { %2138 = vadd.xlane.f32.xlu0 %v2137_v25  ;;  %v1971_v25 = vmul.f32 %v6221_v20, %v4635_v46  ;;  %v4639_v40 = vpop.eup %4638  ;;  %v2146_v17 = vsel %vm7687_vm1, %v1970_v38, 0.0  ;;  %v1974_v15 = vmul.f32 %v6221_v20, %v4637_v34  ;;  %4658 = vtanh.f32 %v1821_v51 }
 0x607   : > { %v1972_v2 = vmul.f32 %v6221_v20, %v4639_v40  ;;  %4660 = vtanh.f32 %v1825_v22 }
 0x608   : > { %v2149_v44 = vsel %vm7687_vm1, %v1971_v25, 0.0  ;;  %4662 = vtanh.f32 %v1823_v56 }
 0x609   : > { %2225 = vadd.xlane.f32.xlu1 %v2224_v53  ;;  %v4641_v53 = vpop.eup %4640  ;;  %v2152_v29 = vsel %vm7687_vm1, %v1972_v2, 0.0  ;;  %4664 = vtanh.f32 %v1841_v58 }
 0x60a   : > { %2228 = vadd.xlane.f32.xlu0 %v2227_v48  ;;  %v4643_v50 = vpop.eup %4642  ;;  %v2158_v48 = vsel %vm7687_vm1, %v1974_v15, 0.0  ;;  %v1976_v9 = vmul.f32 %v6221_v20, %v4641_v53  ;;  %4666 = vtanh.f32 %v1840_v35 }
 0x60b   : > { %v4645_v31 = vpop.eup %4644 }
 0x60c   : > { %v4647_v47 = vpop.eup %4646  ;;  %v2164_v57 = vsel %vm7687_vm1, %v1976_v9, 0.0 }
 0x60d   : > { %2093 = vadd.xlane.f32.xlu1 %v2092_v32  ;;  %v1973_v32 = vmul.f32 %v6221_v20, %v4643_v50  ;;  %v4649_v24 = vpop.eup %4648  ;;  %v1975_v54 = vmul.f32 %v6221_v20, %v4647_v47 }
 0x60e   : > { %2096 = vadd.xlane.f32.xlu0 %v2095_v55  ;;  %v1978_v55 = vmul.f32 %v6221_v20, %v4645_v31  ;;  %v1980_v36 = vmul.f32 %v6221_v20, %v4649_v24 }
 0x60f   : > { %v2155_v61 = vsel %vm7687_vm1, %v1973_v32, 0.0 }
 0x610   : > { %v2170_v6 = vsel %vm7687_vm1, %v1978_v55, 0.0  ;;  %v2176_v42 = vsel %vm7687_vm1, %v1980_v36, 0.0 }
 0x611   : > { %2141 = vadd.xlane.f32.xlu1 %v2140_v10  ;;  %v4651_v10 = vpop.eup %4650 }
 0x612   : > { %2144 = vadd.xlane.f32.xlu0 %v2143_v7  ;;  %v4653_v21 = vpop.eup %4652  ;;  %v2161_v7 = vsel %vm7687_vm1, %v1975_v54, 0.0  ;;  %v1977_v63 = vmul.f32 %v6221_v20, %v4651_v10 }
 0x613   : > { %v4655_v46 = vpop.eup %4654  ;;  %v1982_v49 = vmul.f32 %v6221_v20, %v4653_v21 }
 0x614   : > { %v2167_v38 = vsel %vm7687_vm1, %v1977_v63, 0.0  ;;  %v1979_v19 = vmul.f32 %v6221_v20, %v4655_v46 }
 0x615   : > { %2231 = vadd.xlane.f32.xlu1 %v2230_v43  ;;  %v4657_v43 = vpop.eup %4656 }
 0x616   : > { %2234 = vadd.xlane.f32.xlu0 %v2233_v33  ;;  %v4659_v62 = vpop.eup %4658  ;;  %v2182_v33 = vsel %vm7687_vm1, %v1982_v49, 0.0  ;;  %v1984_v25 = vmul.f32 %v6221_v20, %v4657_v43  ;;  %v2173_v8 = vsel %vm7687_vm1, %v1979_v19, 0.0 }
 0x617   : > { %v4661_v40 = vpop.eup %4660 }
 0x618   : > { %v4663_v15 = vpop.eup %4662  ;;  %v1985_v2 = vmul.f32 %v6221_v20, %v4661_v40 }
 0x619   : > { %2147 = vadd.xlane.f32.xlu1 %v2146_v17  ;;  %v1981_v17 = vmul.f32 %v6221_v20, %v4659_v62  ;;  %v4665_v50 = vpop.eup %4664 }
 0x61a   : > { %2150 = vadd.xlane.f32.xlu0 %v2149_v44  ;;  %v2188_v44 = vsel %vm7687_vm1, %v1984_v25, 0.0  ;;  %v4667_v9 = vpop.eup %4666  ;;  %v2001_v32 = vmul.f32 %v6221_v20, %v4665_v50 }
 0x61b   : > { %v2179_v45 = vsel %vm7687_vm1, %v1981_v17, 0.0  ;;  %v2000_v22 = vmul.f32 %v6221_v20, %v4667_v9 }
 0x61c   : > { %v2239_v56 = vsel %vm7687_vm1, %v2001_v32, 0.0 }
 0x61d   : > { %2159 = vadd.xlane.f32.xlu1 %v2158_v48  ;;  %v1983_v48 = vmul.f32 %v6221_v20, %v4663_v15  ;;  %v2236_v24 = vsel %vm7687_vm1, %v2000_v22, 0.0 }
 0x61e   : > { %2153 = vadd.xlane.f32.xlu0 %v2152_v29  ;;  %v2191_v29 = vsel %vm7687_vm1, %v1985_v2, 0.0 }
 0x61f   : > { %v2185_v47 = vsel %vm7687_vm1, %v1983_v48, 0.0  ;;  %vm7809_vm1 = vcmask 523712  }
 0x621   : > { %2165 = vadd.xlane.f32.xlu1 %v2164_v57 }
 0x622   : > { %2156 = vadd.xlane.f32.xlu0 %v2155_v61 }
 0x625   : > { %2171 = vadd.xlane.f32.xlu1 %v2170_v6 }
 0x626   : > { %2162 = vadd.xlane.f32.xlu0 %v2161_v7 }
 0x629   : > { %2177 = vadd.xlane.f32.xlu1 %v2176_v42 }
 0x62a   : > { %2168 = vadd.xlane.f32.xlu0 %v2167_v38  ;;  %v6527_v4 = vpop.xlane.xlu1 %2006 }
 0x62b   : > { %v6529_v34 = vpop.xlane.xlu0 %2003 }
 0x62d   : > { %2183 = vadd.xlane.f32.xlu1 %v2182_v33 }
 0x62e   : > { %2174 = vadd.xlane.f32.xlu0 %v2173_v8  ;;  %v6535_v41 = vpop.xlane.xlu1 %2015 }
 0x62f   : > { %v6537_v53 = vpop.xlane.xlu0 %2009 }
 0x631   : > { %2189 = vadd.xlane.f32.xlu1 %v2188_v44 }
 0x632   : > { %2180 = vadd.xlane.f32.xlu0 %v2179_v45  ;;  %v6543_v51 = vpop.xlane.xlu1 %2018 }
 0x633   : > { %v6545_v31 = vpop.xlane.xlu0 %2012 }
 0x635   : > { %2192 = vadd.xlane.f32.xlu1 %v2191_v29 }
 0x636   : > { %2186 = vadd.xlane.f32.xlu0 %v2185_v47  ;;  %v6551_v57 = vpop.xlane.xlu1 %2024 }
 0x637   : > { %v6553_v55 = vpop.xlane.xlu0 %2021 }
 0x639   : > { %2240 = vadd.xlane.f32.xlu1 %v2239_v56 }
 0x63a   : > { %2237 = vadd.xlane.f32.xlu0 %v2236_v24  ;;  %v6557_v61 = vpop.xlane.xlu1 %2030 }
 0x63b   : > { %v6559_v54 = vpop.xlane.xlu0 %2027 }
 0x63e   : > { %v6561_v10 = vpop.xlane.xlu1 %2036 }
 0x63f   : > { %v6563_v58 = vpop.xlane.xlu0 %2033 }
 0x642   : > { %v6565_v20 = vpop.xlane.xlu1 %2042 }
 0x643   : > { %v6567_v6 = vpop.xlane.xlu0 %2039 }
 0x646   : > { %v6569_v36 = vpop.xlane.xlu1 %2048 }
 0x647   : > { %7793 = vst [vmem:[#allocation19_spill] sm:$0xff] %v6569_v36  ;;  %v6571_v35 = vpop.xlane.xlu0 %2045 }
 0x648   : > { %7794 = vst [vmem:[#allocation22_spill] sm:$0xff] %v6571_v35 }
 0x64a   : > { %v6573_v21 = vpop.xlane.xlu1 %2054 }
 0x64b   : > { %v6575_v7 = vpop.xlane.xlu0 %2051 }
 0x64e   : > { %v6577_v63 = vpop.xlane.xlu1 %2057 }
 0x64f   : > { %v6579_v46 = vpop.xlane.xlu0 %2099 }
 0x652   : > { %v6581_v42 = vpop.xlane.xlu1 %2102 }
 0x653   : > { %v6583_v49 = vpop.xlane.xlu0 %2105 }
 0x656   : > { %v6585_v43 = vpop.xlane.xlu1 %2060 }
 0x657   : > { %v6587_v38 = vpop.xlane.xlu0 %2063 }
 0x65a   : > { %v6589_v19 = vpop.xlane.xlu1 %2108 }
 0x65b   : > { %v6591_v62 = vpop.xlane.xlu0 %2198 }
 0x65e   : > { %v6593_v33 = vpop.xlane.xlu1 %2195 }
 0x65f   : > { %v6595_v25 = vpop.xlane.xlu0 %2066 }
 0x662   : > { %v6597_v40 = vpop.xlane.xlu1 %2111 }
 0x663   : > { %v6599_v8 = vpop.xlane.xlu0 %2114 }
 0x666   : > { %v6601_v17 = vpop.xlane.xlu1 %2201 }
 0x667   : > { %v6603_v15 = vpop.xlane.xlu0 %2204 }
 0x66a   : > { %v6605_v44 = vpop.xlane.xlu1 %2069 }
 0x66b   : > { %v6607_v2 = vpop.xlane.xlu0 %2072 }
 0x66e   : > { %v6609_v50 = vpop.xlane.xlu1 %2117 }
 0x66f   : > { %v6611_v45 = vpop.xlane.xlu0 %2120 }
 0x672   : > { %v6613_v48 = vpop.xlane.xlu1 %2207 }
 0x673   : > { %v6615_v9 = vpop.xlane.xlu0 %2210 }
 0x676   : > { %v6617_v29 = vpop.xlane.xlu1 %2075 }
 0x677   : > { %v6619_v32 = vpop.xlane.xlu0 %2078 }
 0x67a   : > { %v6621_v47 = vpop.xlane.xlu1 %2123 }
 0x67b   : > { %v6623_v22 = vpop.xlane.xlu0 %2126 }
 0x67c   : > { %7795 = vst [vmem:[#allocation17_spill] sm:$0xff] %v6623_v22  ;;  %v2329_v22 = vrot.slane %v6527_v4, %v5791_v26 }
 0x67e   : > { %v6625_v56 = vpop.xlane.xlu1 %2213 }
 0x67f   : > { %v6627_v24 = vpop.xlane.xlu0 %2216 }
 0x680   : > { %7796 = vst [vmem:[#allocation27_spill] sm:$0xff] %v6627_v24  ;;  %v2325_v24 = vrot.slane %v6529_v34, %v5802_v30 }
 0x682   : > { %v6629_v13 = vpop.xlane.xlu1 %2081 }
 0x683   : > { %7797 = vst [vmem:[#allocation20_spill] sm:$0xff] %v6629_v13  ;;  %v6631_v52 = vpop.xlane.xlu0 %2084 }
 0x684   : > { %7798 = vst [vmem:[#allocation24_spill] sm:$0xff] %v6631_v52  ;;  %v2334_v52 = vrot.slane %v6537_v53, %v5796_v28 }
 0x686   : > { %v6633_v37 = vpop.xlane.xlu1 %2129 }
 0x687   : > { %7799 = vst [vmem:[#allocation30_spill] sm:$0xff] %v6633_v37  ;;  %v6635_v39 = vpop.xlane.xlu0 %2132 }
 0x688   : > { %7800 = vst [vmem:[#allocation28_spill] sm:$0xff] %v6635_v39 }
 0x68a   : > { %v6637_v36 = vpop.xlane.xlu1 %2219 }
 0x68b   : > { %7801 = vst [vmem:[#allocation34_spill] sm:$0xff] %v6637_v36  ;;  %v6639_v3 = vpop.xlane.xlu0 %2222 }
 0x68c   : > { %7802 = vst [vmem:[#allocation15_spill] sm:$0xff] %v6639_v3  ;;  %v2339_v3 = vrot.slane %v6545_v31, %v5805_v1  ;;  %v2349_v31 = vrot.slane %v6543_v51, %v5832_v59 }
 0x68e   : > { %v6641_v35 = vpop.xlane.xlu1 %2087 }
 0x68f   : > { %7803 = vst [vmem:[#allocation38_spill] sm:$0xff] %v6641_v35  ;;  %v6643_v12 = vpop.xlane.xlu0 %2090  ;;  %v2330_v35 = vsel %vm1116_vm2, %v2329_v22, %v2325_v24  ;;  %v2354_v22 = vrot.slane %v6553_v55, %v5838_v27  ;;  %v2369_v55 = vrot.slane %v6557_v61, %v5876_v14  ;;  %v2413_v61 = vrot.slane %v6577_v63, %v5796_v28 }
 0x690   : > { %7804 = vst [vmem:[#allocation31_spill] sm:$0xff] %v6643_v12  ;;  %v2335_v12 = vsel %vm1123_vm3, %v2334_v52, %v2330_v35  ;;  %v2492_v63 = vrot.slane %v6583_v49, %v5796_v28  ;;  %v2650_v49 = vrot.slane %v6601_v17, %v5796_v28 }
 0x691   : > { %v2340_v34 = vsel %vm7688_vm4, %v2339_v3, %v2335_v12  ;;  %v2359_v12 = vrot.slane %v6551_v57, %v5856_v5  ;;  %v2408_v57 = vrot.slane %v6573_v21, %v5791_v26  ;;  %v2379_v21 = vrot.slane %v6561_v10, %v5881_v0 }
 0x692   : > { %v6649_v13 = vpop.xlane.xlu1 %2135 }
 0x693   : > { %7805 = vst [vmem:[#allocation35_spill] sm:$0xff] %v6649_v13  ;;  %v6653_v39 = vpop.xlane.xlu0 %2138  ;;  %v2344_v13 = vrot.slane %v6535_v41, %v5822_v18 }
 0x694   : > { %7806 = vst [vmem:[#allocation39_spill] sm:$0xff] %v6653_v39 }
 0x695   : > { %v2345_v53 = vsel %vm7690_vm5, %v2344_v13, %v2340_v34  ;;  %v2364_v13 = vrot.slane %v6559_v54, %v5852_v11  ;;  %v2404_v54 = vrot.slane %v6575_v7, %v5802_v30 }
 0x696   : > { %v6658_v36 = vpop.xlane.xlu1 %2225  ;;  %v2350_v52 = vsel %vm7689_vm6, %v2349_v31, %v2345_v53  ;;  %v2374_v31 = vrot.slane %v6563_v58, %v5871_v23  ;;  %v2418_v58 = vrot.slane %v6585_v43, %v5805_v1  ;;  %v2641_v43 = vrot.slane %v6593_v33, %v5802_v30 }
 0x697   : > { %v6661_v4 = vpop.xlane.xlu0 %2228  ;;  %v2355_v41 = vsel %vm7807_vm0, %v2354_v22, %v2350_v52  ;;  %v2487_v22 = vrot.slane %v6581_v42, %v5791_v26  ;;  %vm7811_vm0 = vcmask 720512   ;;  %v2389_v42 = vrot.slane %v6565_v20, %v5888_v60  ;;  %v7834_v20 = vld [vmem:[#allocation15_spill] sm:$0xff] }
 0x698   : > { %v2360_v34 = vsel %vm7809_vm1, %v2359_v12, %v2355_v41  ;;  %vm7810_vm1 = vcmask 654912   ;;  %v2483_v41 = vrot.slane %v6579_v46, %v5802_v30  ;;  %v2497_v46 = vrot.slane %v6589_v19, %v5805_v1 }
 0x699   : > { %v2365_v53 = vsel %vm1165_vm9, %v2364_v13, %v2360_v34  ;;  %v2409_v13 = vsel %vm1116_vm2, %v2408_v57, %v2404_v54  ;;  %v2645_v19 = vrot.slane %v6591_v62, %v5791_v26  ;;  %v2507_v62 = vrot.slane %v6599_v8, %v5832_v59 }
 0x69a   : > { %v6666_v37 = vpop.xlane.xlu1 %2093  ;;  %v2370_v12 = vsel %vm7810_vm1, %v2369_v55, %v2365_v53  ;;  %v2488_v55 = vsel %vm1116_vm2, %v2487_v22, %v2483_v41  ;;  %v2414_v10 = vsel %vm1123_vm3, %v2413_v61, %v2409_v13  ;;  %v2423_v53 = vrot.slane %v6587_v38, %v5822_v18 }
 0x69b   : > { %v6669_v39 = vpop.xlane.xlu0 %2096  ;;  %v2375_v7 = vsel %vm7811_vm0, %v2374_v31, %v2370_v12  ;;  %v2502_v31 = vrot.slane %v6597_v40, %v5822_v18  ;;  %v2419_v54 = vsel %vm7688_vm4, %v2418_v58, %v2414_v10  ;;  %vm7812_vm1 = vcmask 786112  }
 0x69c   : > { %v2380_v61 = vsel %vm7812_vm1, %v2379_v21, %v2375_v7  ;;  %v2493_v38 = vsel %vm1123_vm3, %v2492_v63, %v2488_v55  ;;  %v2428_v40 = vrot.slane %v6595_v25, %v5832_v59  ;;  %v2646_v41 = vsel %vm1116_vm2, %v2645_v19, %v2641_v43 }
 0x69d   : > { %v2498_v17 = vsel %vm7688_vm4, %v2497_v46, %v2493_v38  ;;  %v2424_v58 = vsel %vm7690_vm5, %v2423_v53, %v2419_v54  ;;  %v2655_v25 = vrot.slane %v6603_v15, %v5805_v1  ;;  %v2651_v7 = vsel %vm1123_vm3, %v2650_v49, %v2646_v41  ;;  %v7817_v41 = vld [vmem:[#allocation20_spill] sm:$0xff] }
 0x69e   : > { %v6676_v35 = vpop.xlane.xlu1 %2141  ;;  %v2503_v21 = vsel %vm7690_vm5, %v2502_v31, %v2498_v17  ;;  %v2512_v13 = vrot.slane %v6609_v50, %v5838_v27  ;;  %v2660_v8 = vrot.slane %v6613_v48, %v5822_v18  ;;  %v2384_v46 = vrot.slane %v6567_v6, %v5906_v16 }
 0x69f   : > { %v6678_v3 = vpop.xlane.xlu0 %2144  ;;  %v2429_v43 = vsel %vm7689_vm6, %v2428_v40, %v2424_v58  ;;  %v2438_v15 = vrot.slane %v6607_v2, %v5856_v5  ;;  %vm7813_vm0 = vcmask 458112   ;;  %v2508_v50 = vsel %vm7689_vm6, %v2507_v62, %v2503_v21  ;;  %v7818_v58 = vld [vmem:[#allocation17_spill] sm:$0xff] }
 0x6a0   : > { %v2443_v48 = vrot.slane %v6617_v29, %v5852_v11  ;;  %v2517_v6 = vrot.slane %v6611_v45, %v5856_v5  ;;  %v2656_v2 = vsel %vm7688_vm4, %v2655_v25, %v2651_v7  ;;  %vm7814_vm1 = vmmov %vm7813_vm0  ;;  %v2522_v29 = vrot.slane %v6621_v47, %v5852_v11 }
 0x6a1   : > { %v2448_v45 = vrot.slane %v6619_v32, %v5876_v14  ;;  %v2453_v62 = vrot.slane %v7817_v41, %v5871_v23  ;;  %v2527_v32 = vrot.slane %v7818_v58, %v5876_v14 }
 0x6a2   : > { %v6685_v24 = vpop.xlane.xlu1 %2231 }
 0x6a3   : > { %v6687_v51 = vpop.xlane.xlu0 %2234 }
 0x6a4   : > { %7808 = vst [vmem:[#allocation43_spill] sm:$0xff] %v6687_v51 }
 0x6a6   : > { %v2148_v52 = vpop.xlane.xlu1 %2147 }
 0x6a7   : > { %v2151_v51 = vpop.xlane.xlu0 %2150  ;;  %v2562_v22 = vrot.slane %v2148_v52, %v5802_v30 }
 0x6a8   : > { %v2566_v33 = vrot.slane %v2151_v51, %v5791_v26  ;;  %v2433_v51 = vrot.slane %v6605_v44, %v5838_v27 }
 0x6aa   : > { %v2160_v34 = vpop.xlane.xlu1 %2159  ;;  %v2567_v55 = vsel %vm1116_vm2, %v2566_v33, %v2562_v22  ;;  %v2434_v53 = vsel %vm7813_vm0, %v2433_v51, %v2429_v43  ;;  %v2513_v33 = vsel %vm7814_vm1, %v2512_v13, %v2508_v50  ;;  %v2661_v22 = vsel %vm7690_vm5, %v2660_v8, %v2656_v2  ;;  %v7821_v8 = vld [vmem:[#allocation30_spill] sm:$0xff]  ;;  %v7823_v43 = vld [vmem:[#allocation24_spill] sm:$0xff] }
 0x6ab   : > { %v2154_v57 = vpop.xlane.xlu0 %2153  ;;  %v2581_v54 = vrot.slane %v2160_v34, %v5822_v18  ;;  %vm7815_vm0 = vcmask 523712   ;;  %v7827_v50 = vld [vmem:[#allocation34_spill] sm:$0xff] }
 0x6ac   : > { %v2571_v12 = vrot.slane %v2154_v57, %v5796_v28  ;;  %v2665_v57 = vrot.slane %v6615_v9, %v5832_v59  ;;  %v2439_v40 = vsel %vm7815_vm0, %v2438_v15, %v2434_v53  ;;  %v2670_v9 = vrot.slane %v6625_v56, %v5838_v27  ;;  %vm7819_vm1 = vmmov %vm7815_vm0 }
 0x6ad   : > { %v2444_v17 = vsel %vm1165_vm9, %v2443_v48, %v2439_v40  ;;  %v2518_v21 = vsel %vm7819_vm1, %v2517_v6, %v2513_v33  ;;  %v2458_v15 = vrot.slane %v7823_v43, %v5881_v0  ;;  %vm7824_vm0 = vcmask 654912  }
 0x6ae   : > { %v2166_v52 = vpop.xlane.xlu1 %2165  ;;  %v2572_v10 = vsel %vm1123_vm3, %v2571_v12, %v2567_v55  ;;  %v2666_v25 = vsel %vm7689_vm6, %v2665_v57, %v2661_v22  ;;  %v2532_v55 = vrot.slane %v7821_v8, %v5871_v23  ;;  %v2680_v48 = vrot.slane %v7827_v50, %v5852_v11  ;;  %v7846_v50 = vld [vmem:[#allocation45_spill] sm:$0xff] }
 0x6af   : > { %v2157_v63 = vpop.xlane.xlu0 %2156  ;;  %v2591_v56 = vrot.slane %v2166_v52, %v5838_v27 }
 0x6b0   : > { %v2576_v44 = vrot.slane %v2157_v63, %v5805_v1  ;;  %v7820_v63 = vld [vmem:[#allocation27_spill] sm:$0xff] }
 0x6b1   : > { %v2675_v13 = vrot.slane %v7820_v63, %v5856_v5  ;;  %v7840_v63 = vld [vmem:[#allocation47_spill] sm:$0xff] }
 0x6b2   : > { %v2577_v31 = vsel %vm7688_vm4, %v2576_v44, %v2572_v10  ;;  %v2172_v49 = vpop.xlane.xlu1 %2171  ;;  %vm7816_vm4 = vcmask 851712   ;;  %v2449_v10 = vsel %vm7824_vm0, %v2448_v45, %v2444_v17 }
 0x6b3   : > { %v2163_v19 = vpop.xlane.xlu0 %2162  ;;  %v2582_v34 = vsel %vm7690_vm5, %v2581_v54, %v2577_v31  ;;  %v2385_v12 = vsel %vm7816_vm4, %v2384_v46, %v2380_v61  ;;  %v2523_v61 = vsel %vm1165_vm9, %v2522_v29, %v2518_v21  ;;  %vm7822_vm4 = vcmask 458112   ;;  %v7828_v31 = vld [vmem:[#allocation38_spill] sm:$0xff] }
 0x6b4   : > { %v2586_v38 = vrot.slane %v2163_v19, %v5832_v59  ;;  %v2671_v46 = vsel %vm7822_vm4, %v2670_v9, %v2666_v25  ;;  %vm7825_vm1 = vmmov %vm7822_vm4  ;;  %v2463_v6 = vrot.slane %v7828_v31, %v5906_v16  ;;  %vm7829_vm5 = vcmask 523712   ;;  %v7830_v19 = vld [vmem:[#allocation28_spill] sm:$0xff]  ;;  %v7833_v9 = vld [vmem:[#allocation35_spill] sm:$0xff] }
 0x6b5   : > { %v2390_v54 = vsel %vm1200_vm14, %v2389_v42, %v2385_v12  ;;  %v2537_v33 = vrot.slane %v7830_v19, %v5881_v0  ;;  %vm7831_vm4 = vmmov %vm7824_vm0  ;;  %v2601_v29 = vrot.slane %v2172_v49, %v5852_v11  ;;  %v2685_v42 = vrot.slane %v7834_v20, %v5876_v14  ;;  %v7835_v12 = vld [vmem:[#allocation31_spill] sm:$0xff] }
 0x6b6   : > { %v2587_v47 = vsel %vm7689_vm6, %v2586_v38, %v2582_v34  ;;  %v2178_v51 = vpop.xlane.xlu1 %2177  ;;  %vm7826_vm6 = vcmask 720512   ;;  %v2528_v22 = vsel %vm7831_vm4, %v2527_v32, %v2523_v61  ;;  %vm7832_vm0 = vmmov %vm7829_vm5  ;;  %v2542_v34 = vrot.slane %v7833_v9, %v5906_v16 }
 0x6b7   : > { %v2169_v7 = vpop.xlane.xlu0 %2168  ;;  %v2592_v52 = vsel %vm7825_vm1, %v2591_v56, %v2587_v47  ;;  %v2454_v53 = vsel %vm7826_vm6, %v2453_v62, %v2449_v10  ;;  %v2533_v45 = vsel %vm7826_vm6, %v2532_v55, %v2528_v22  ;;  %v2676_v40 = vsel %vm7832_vm0, %v2675_v13, %v2671_v46  ;;  %v7838_v56 = vld [vmem:[#allocation39_spill] sm:$0xff] }
 0x6b8   : > { %v2596_v44 = vrot.slane %v2169_v7, %v5856_v5  ;;  %v2468_v41 = vrot.slane %v7835_v12, %v5888_v60  ;;  %v2681_v47 = vsel %vm1165_vm9, %v2680_v48, %v2676_v40  ;;  %vm7837_vm1 = vcmask 851712   ;;  %v7848_v40 = vld [vmem:[#allocation43_spill] sm:$0xff] }
 0x6b9   : > { %v2690_v32 = vrot.slane %v6658_v36, %v5871_v23  ;;  %v2547_v7 = vrot.slane %v7838_v56, %v5888_v60  ;;  %v2473_v13 = vrot.slane %v6666_v37, %v7840_v63  ;;  %v2611_v8 = vrot.slane %v2178_v51, %v5871_v23  ;;  %vm7842_vm0 = vmmov %vm7837_vm1 }
 0x6ba   : > { %v2597_v57 = vsel %vm7829_vm5, %v2596_v44, %v2592_v52  ;;  %v2184_v2 = vpop.xlane.xlu1 %2183  ;;  %vm7836_vm5 = vcmask 786112   ;;  %v7841_v44 = vld [vmem:[#allocation22_spill] sm:$0xff]  ;;  %v2552_v36 = vrot.slane %v6676_v35, %v7840_v63  ;;  %v2695_v10 = vrot.slane %v6661_v4, %v5881_v0 }
 0x6bb   : > { %v2175_v38 = vpop.xlane.xlu0 %2174  ;;  %v2459_v62 = vsel %vm7836_vm5, %v2458_v15, %v2454_v53  ;;  %v2602_v49 = vsel %vm1165_vm9, %v2601_v29, %v2597_v57  ;;  %vm7839_vm6 = vmmov %vm7836_vm5  ;;  %v2394_v46 = vrot.slane %v7841_v44, %v7840_v63  ;;  %v2478_v48 = vrot.slane %v6669_v39, %v7846_v50  ;;  %v7847_v29 = vld [vmem:[#allocation19_spill] sm:$0xff] }
 0x6bc   : > { %v2606_v17 = vrot.slane %v2175_v38, %v5876_v14  ;;  %v2464_v58 = vsel %vm7837_vm1, %v2463_v6, %v2459_v62  ;;  %v2538_v61 = vsel %vm7839_vm6, %v2537_v33, %v2533_v45  ;;  %vm7843_vm5 = vmmov %vm7831_vm4  ;;  %vm7844_vm1 = vcmask 720512  }
 0x6bd   : > { %v2543_v43 = vsel %vm7842_vm0, %v2542_v34, %v2538_v61  ;;  %v2686_v52 = vsel %vm7843_vm5, %v2685_v42, %v2681_v47  ;;  %v2469_v37 = vsel %vm1200_vm14, %v2468_v41, %v2464_v58  ;;  %v2700_v31 = vrot.slane %v6685_v24, %v5906_v16  ;;  %vm7849_vm0 = vmmov %vm7839_vm6 }
 0x6be   : > { %v2607_v21 = vsel %vm7831_vm4, %v2606_v17, %v2602_v49  ;;  %v2190_v25 = vpop.xlane.xlu1 %2189  ;;  %vm7845_vm4 = vmmov %vm7844_vm1  ;;  %v2474_v57 = vsel %vm1207_vm15, %v2473_v13, %v2469_v37  ;;  %v2557_v4 = vrot.slane %v6678_v3, %v7846_v50  ;;  %v2548_v19 = vsel %vm1200_vm14, %v2547_v7, %v2543_v43 }
 0x6bf   : > { %v2181_v55 = vpop.xlane.xlu0 %2180  ;;  %v2612_v51 = vsel %vm7844_vm1, %v2611_v8, %v2607_v21  ;;  %v2691_v53 = vsel %vm7845_vm4, %v2690_v32, %v2686_v52  ;;  %v2621_v33 = vrot.slane %v2184_v2, %v5906_v16  ;;  %v2399_v38 = vrot.slane %v7847_v29, %v7846_v50 }
 0x6c0   : > { %v2616_v15 = vrot.slane %v2181_v55, %v5881_v0  ;;  %v2395_v39 = vsel %vm1207_vm15, %v2394_v46, %v2390_v54  ;;  %v2553_v24 = vsel %vm1207_vm15, %v2552_v36, %v2548_v19  ;;  %v2705_v9 = vrot.slane %v7848_v40, %v5888_v60 }
 0x6c1   : > { %v2696_v34 = vsel %vm7849_vm0, %v2695_v10, %v2691_v53  ;;  %v2631_v3 = vrot.slane %v2190_v25, %v7840_v63  ;;  %vm7850_vm5 = vcmask 851712   ;;  %v2479_v2 = vsel %vm1214_vm7, %v2478_v48, %v2474_v57  ;;  %v2805_v53 = vld [vmem:[#allocation8 + $0x8] sm:$0xff]  ;;  %v2806_v48 = vld [vmem:[#allocation8 + $0x10] sm:$0xff] }
 0x6c2   : > { %v2617_v35 = vsel %vm7839_vm6, %v2616_v15, %v2612_v51  ;;  %v2193_v6 = vpop.xlane.xlu1 %2192  ;;  %vm7851_vm1 = vmmov %vm7850_vm5  ;;  %v2558_v41 = vsel %vm1214_vm7, %v2557_v4, %v2553_v24  ;;  %v2400_v58 = vsel %vm1214_vm7, %v2399_v38, %v2395_v39  ;;  %vm7852_vm4 = vcmask 1041409   ;;  %v2804_v51 = vld [vmem:[#allocation8] sm:$0xff] }
 0x6c3   : > { %v2187_v22 = vpop.xlane.xlu0 %2186  ;;  %v2622_v17 = vsel %vm7850_vm5, %v2621_v33, %v2617_v35  ;;  %v2701_v20 = vsel %vm7851_vm1, %v2700_v31, %v2696_v34  ;;  %v2636_v54 = vrot.slane %v2193_v6, %v7846_v50  ;;  %v2717_v56 = vsel %vm7852_vm4, %v2479_v2, %v2400_v58  ;;  %v2807_v35 = vld [vmem:[#allocation8 + $0x18] sm:$0xff]  ;;  %v7856_v39 = vld [vmem:[#allocation13_spill] sm:$0xff]  ;;  %v7857_v34 = vld [vmem:[#allocation14_spill] sm:$0xff] }
 0x6c4   : > { %v2626_v45 = vrot.slane %v2187_v22, %v5888_v60  ;;  %v2706_v25 = vsel %vm1200_vm14, %v2705_v9, %v2701_v20  ;;  %v2718_v61 = vsel %vm1534_vm11, %v2558_v41, %v2717_v56  ;;  %v4277_v31 = vpack.c.bf16 %v2805_v53, %v2804_v51  ;;  %v6907_v2 = vld [vmem:[%s5222_s10] sm:$0xff]  ;;  %v6910_v20 = vld [vmem:[%s5222_s10 + $0x18] sm:$0xff]  ;;  %v6972_v51 = vld [vmem:[%s5222_s10 + $0x50] sm:$0xff] }
 0x6c5   : > { %v4280_v6 = vpack.c.bf16 %v2807_v35, %v2806_v48  ;;  %v7854_v57 = vmov 0.0|0.0  }
 0x6c6   : > { %v2627_v42 = vsel %vm1200_vm14, %v2626_v45, %v2622_v17  ;;  %v2241_v12 = vpop.xlane.xlu1 %2240  ;;  %4278 = vmatpush3.bf16.msra.mxu1 %v4277_v31  ;;  %v6904_v17 = vld [vmem:[%s5222_s10 + $0x8] sm:$0xff] }
 0x6c7   : > { %v2632_v62 = vsel %vm1207_vm15, %v2631_v3, %v2627_v42  ;;  %v2238_v49 = vpop.xlane.xlu0 %2237  ;;  %v2715_v47 = vrot.slane %v2241_v12, %v7846_v50  ;;  %4279 = vmatprep.subr.bf16.mxu1 %v7854_v57  ;;  %v6913_v42 = vld [vmem:[%s5222_s10 + $0x10] sm:$0xff]  ;;  %v6917_v12 = vld [vmem:[%s5222_s10 + $0x28] sm:$0xff] }
 0x6c8   : > { %v2637_v32 = vsel %vm1214_vm7, %v2636_v54, %v2632_v62  ;;  %v2710_v21 = vrot.slane %v2238_v49, %v7840_v63 }
 0x6c9   : > { %v2719_v8 = vsel %vm1536_vm13, %v2637_v32, %v2718_v61  ;;  %v6939_v61 = vld [vmem:[%s5222_s10 + $0x30] sm:$0xff] }
 0x6ca   : > { %v2711_v7 = vsel %vm1207_vm15, %v2710_v21, %v2706_v25  ;;  %4281 = vmatpush3.bf16.msra.mxu1 %v4280_v6 }
 0x6cb   : > { %v2716_v13 = vsel %vm1214_vm7, %v2715_v47, %v2711_v7  ;;  %v6926_v47 = vld [vmem:[%s5222_s10 + $0x20] sm:$0xff]  ;;  %v6936_v7 = vld [vmem:[%s5222_s10 + $0x38] sm:$0xff] }
 0x6cc   : > { %v2720_v55 = vsel %vm1538_vm12, %v2716_v13, %v2719_v8 }
 0x6cd   : > { %v2722_v46 = vsel %vm6103_vm10, %v2720_v55, -1e+18  ;;  %v6947_v55 = vld [vmem:[%s5222_s10 + $0x48] sm:$0xff] }
 0x6ce   : > { %v2723_v43 = vsel %vm1542_vm8, %v2722_v46, -inf }
 0x6cf   : > { %2724 = vmax.xlane.f32.xlu0 %v2723_v43  ;;  %v6955_v43 = vld [vmem:[%s5222_s10 + $0x40] sm:$0xff] }
 0x75c   : > { %v2725_v36 = vpop.xlane.xlu0 %2724 }
 0x75d   : > { %v2726_v15 = vsub.f32 %v2722_v46, %v2725_v36 }
 0x75f   : > { %v2727_v10 = vmul.f32 1.442695, %v2726_v15 }
 0x761   : > { %4668 = vpow2.f32 %v2727_v10  ;;  %v6962_v10 = vld [vmem:[%s5222_s10 + $0x58] sm:$0xff] }
 0x76b   : > { %v4669_v52 = vpop.eup %4668 }
 0x76c   : > { %v2729_v37 = vsel %vm1542_vm8, %v4669_v52, 0.0  ;;  %vm7855_vm8 = vcmask 261120  }
 0x76d   : > { %2730 = vadd.xlane.f32.xlu1 %v2729_v37  ;;  %vm7858_vm10 = vmmov %vm7855_vm8 }
 0x76e   : > { %vm7859_vm6 = vmmov %vm7855_vm8 }
 0x76f   : > { %vm7860_vm0 = vmmov %vm7859_vm6 }
 0x770   : > { %vm7861_vm5 = vmmov %vm7860_vm0 }
 0x771   : > { %vm7862_vm1 = vmmov %vm7860_vm0 }
 0x772   : > { %vm7863_vm4 = vmmov %vm7860_vm0 }
 0x7fa   : > { %v2731_v4 = vpop.xlane.xlu1 %2730 }
 0x7fb   : > { %4670 = vrcp.f32 %v2731_v4 }
 0x805   : > { %v4671_v19 = vpop.eup %4670 }
 0x806   : > { %v2733_v33 = vmul.f32 %v4671_v19, %v4669_v52  ;;  %v6967_v52 = vld [vmem:[%s7654_s7] ss:$0 sm:$0xff] }
 0x808   : > { %4203 = vmatmul.mubr.f32.vlgmr.msra.gmra.mrb[4].mxu0 %v2733_v33 }
 0x8db   : > { %v2800_v22 = vpop.f32.mrb[4].mxu0 }
 0x8dc   : > { %v4204_v29 = vpop.f32.mrb[5].mxu0  ;;  %4214 = vmatmul.mubr.msk.f32.vlgmr.msra.gmra.mrb[2].mxu1 %vm7855_vm8, %v2800_v22  ;;  %vm7864_vm8 = vmmov %vm7860_vm0 }
 0x9af   : > { %v2877_v38 = vpop.f32.mrb[2].mxu1 }
 0x9b0   : > { %v6896_v24 = vrot.slane %v2877_v38, %v7856_v39  ;;  %v4215_v45 = vpop.f32.mrb[3].mxu1  ;;  %v2898_v40 = vcombine.high %v2877_v38, %v2877_v38 }
 0x9b2   : > { %v2920_v9 = vrot.slane %v6896_v24, %v7856_v39  ;;  %v2912_v54 = vrot.slane %v2898_v40, %v7856_v39  ;;  %v2913_v36 = vcombine.high %v6896_v24, %v6896_v24 }
 0x9b4   : > { %v6901_v3 = vrot.slane %v2920_v9, %v7857_v34  ;;  %v2935_v32 = vcombine.high %v2920_v9, %v2920_v9  ;;  %v2927_v25 = vrot.slane %v2912_v54, %v7856_v39 }
 0x9b6   : > { %v2963_v41 = vadd.f32 %v6901_v3, %v6904_v17  ;;  %v2962_v62 = vadd.f32 %v6901_v3, %v6907_v2  ;;  %v2965_v49 = vadd.f32 %v6901_v3, %v6910_v20  ;;  %v2964_v58 = vadd.f32 %v6901_v3, %v6913_v42 }
 0x9b7   : > { %v2967_v21 = vadd.f32 %v6901_v3, %v6917_v12  ;;  %v2966_v56 = vadd.f32 %v6901_v3, %v6926_v47  ;;  %v6942_v13 = vrot.slane %v2935_v32, %v7857_v34  ;;  %v2969_v8 = vadd.f32 %v6901_v3, %v6936_v7 }
 0x9b8   : > { %4672 = vtanh.f32 %v2963_v41  ;;  %v6950_v44 = vrot.slane %v2927_v25, %v7857_v34  ;;  %v2968_v46 = vadd.f32 %v6901_v3, %v6939_v61  ;;  %v2971_v15 = vadd.f32 %v6901_v3, %v6947_v55  ;;  %v7034_v25 = vld [vmem:[%s5222_s10 + $0x60] sm:$0xff] }
 0x9b9   : > { %4674 = vtanh.f32 %v2962_v62  ;;  %v2970_v37 = vadd.f32 %v6901_v3, %v6955_v43  ;;  %v6976_v53 = vadd.f32 %v6942_v13, %v6904_v17  ;;  %v6980_v48 = vadd.f32 %v6942_v13, %v6907_v2 }
 0x9ba   : > { %4676 = vtanh.f32 %v2965_v49  ;;  %v6984_v31 = vadd.f32 %v6942_v13, %v6910_v20  ;;  %v6988_v35 = vadd.f32 %v6942_v13, %v6913_v42  ;;  %v6992_v6 = vadd.f32 %v6950_v44, %v6904_v17 }
 0x9bb   : > { %4678 = vtanh.f32 %v2964_v58  ;;  %v2973_v4 = vadd.f32 %v6901_v3, %v6962_v10  ;;  %v6998_v19 = vadd.f32 %v6950_v44, %v6907_v2  ;;  %v7002_v33 = vadd.f32 %v6942_v13, %v6917_v12 }
 0x9bc   : > { %4680 = vtanh.f32 %v2967_v21  ;;  %v7006_v22 = vadd.f32 %v6942_v13, %v6926_v47  ;;  %v2972_v24 = vadd.f32 %v6901_v3, %v6972_v51  ;;  %v7013_v45 = vadd.f32 %v6950_v44, %v6910_v20  ;;  %v7031_v21 = vld [vmem:[%s5222_s10 + $0x68] sm:$0xff] }
 0x9bd   : > { %4682 = vtanh.f32 %v2966_v56  ;;  %v7017_v40 = vadd.f32 %v6950_v44, %v6913_v42  ;;  %v7022_v41 = vadd.f32 %v6942_v13, %v6936_v7  ;;  %v7026_v62 = vadd.f32 %v6942_v13, %v6939_v61 }
 0x9be   : > { %4684 = vtanh.f32 %v2969_v8  ;;  %v7038_v56 = vadd.f32 %v6950_v44, %v6917_v12  ;;  %v7082_v60 = vadd.f32 %v6942_v13, %v6962_v10  ;;  %v7126_v59 = vadd.f32 %v6950_v44, %v6972_v51 }
 0x9bf   : > { %4686 = vtanh.f32 %v2968_v46  ;;  %v7153_v30 = vadd.f32 %v6950_v44, %v7034_v25 }
 0x9c0   : > { %4688 = vtanh.f32 %v2971_v15 }
 0x9c1   : > { %4690 = vtanh.f32 %v2970_v37 }
 0x9c2   : > { %v4673_v57 = vpop.eup %4672  ;;  %4692 = vtanh.f32 %v2973_v4  ;;  %v7069_v4 = vadd.f32 %v6950_v44, %v6936_v7 }
 0x9c3   : > { %v4675_v29 = vpop.eup %4674  ;;  %v3130_v38 = vmul.f32 %v4673_v57, %v6967_v52  ;;  %v7044_v57 = vadd.f32 %v6950_v44, %v6926_v47  ;;  %4694 = vtanh.f32 %v2972_v24 }
 0x9c4   : > { %v4677_v9 = vpop.eup %4676  ;;  %v3129_v54 = vmul.f32 %v4675_v29, %v6967_v52  ;;  %v2934_v29 = vrot.slane %v2913_v36, %v7856_v39  ;;  %v7062_v36 = vld [vmem:[%s5222_s10 + $0x78] sm:$0xff] }
 0x9c5   : > { %v4679_v49 = vpop.eup %4678  ;;  %v3212_v58 = vsel %vm7858_vm10, %v3130_v38, 0.0  ;;  %v3132_v32 = vmul.f32 %v4677_v9, %v6967_v52  ;;  %v7049_v38 = vadd.f32 %v6942_v13, %v6947_v55  ;;  %v2975_v9 = vadd.f32 %v6901_v3, %v7031_v21  ;;  %vm7865_vm10 = vmmov %vm7860_vm0 }
 0x9c6   : > { %v4681_v8 = vpop.eup %4680  ;;  %3213 = vadd.xlane.f32.xlu1 %v3212_v58  ;;  %v3209_v46 = vsel %vm7859_vm6, %v3129_v54, 0.0  ;;  %v3131_v15 = vmul.f32 %v4679_v49, %v6967_v52  ;;  %v2974_v54 = vadd.f32 %v6901_v3, %v7034_v25  ;;  %v7057_v49 = vadd.f32 %v6942_v13, %v6955_v43  ;;  %vm7866_vm6 = vmmov %vm7860_vm0 }
 0x9c7   : > { %v4683_v37 = vpop.eup %4682  ;;  %3210 = vadd.xlane.f32.xlu0 %v3209_v46  ;;  %v3218_v58 = vsel %vm7860_vm0, %v3132_v32, 0.0  ;;  %v3134_v39 = vmul.f32 %v4681_v8, %v6967_v52  ;;  %v7065_v46 = vld [vmem:[%s5222_s10 + $0x70] sm:$0xff]  ;;  %v7075_v32 = vadd.f32 %v6950_v44, %v6939_v61  ;;  %v7078_v24 = vrot.slane %v2934_v29, %v7857_v34 }
 0x9c8   : > { %v4685_v63 = vpop.eup %4684  ;;  %v3215_v50 = vsel %vm7861_vm5, %v3131_v15, 0.0  ;;  %v3133_v16 = vmul.f32 %v4683_v37, %v6967_v52  ;;  %4696 = vtanh.f32 %v2975_v9  ;;  %v2976_v15 = vadd.f32 %v6901_v3, %v7065_v46  ;;  %vm7868_vm5 = vmmov %vm7860_vm0 }
 0x9c9   : > { %v4687_v8 = vpop.eup %4686  ;;  %v7090_v37 = vadd.f32 %v6942_v13, %v6972_v51  ;;  %v3224_v23 = vsel %vm7862_vm1, %v3134_v39, 0.0  ;;  %v3136_v0 = vmul.f32 %v4685_v63, %v6967_v52  ;;  %4698 = vtanh.f32 %v2974_v54  ;;  %vm7869_vm1 = vmmov %vm7860_vm0 }
 0x9ca   : > { %3219 = vadd.xlane.f32.xlu1 %v3218_v58  ;;  %v2977_v58 = vadd.f32 %v6901_v3, %v7062_v36  ;;  %v4689_v9 = vpop.eup %4688  ;;  %v3221_v11 = vsel %vm7863_vm4, %v3133_v16, 0.0  ;;  %v3135_v14 = vmul.f32 %v4687_v8, %v6967_v52  ;;  %v7102_v3 = vadd.f32 %v6950_v44, %v6955_v43  ;;  %vm7870_vm4 = vmmov %vm7860_vm0 }
 0x9cb   : > { %3216 = vadd.xlane.f32.xlu0 %v3215_v50  ;;  %v7096_v50 = vadd.f32 %v6950_v44, %v6947_v55  ;;  %v4691_v27 = vpop.eup %4690  ;;  %v2936_v5 = vcombine.high %v2934_v29, %v2934_v29  ;;  %v7106_v63 = vadd.f32 %v6942_v13, %v7031_v21  ;;  %v2979_v54 = vadd.f32 %v7078_v24, %v6904_v17 }
 0x9cc   : > { %4700 = vtanh.f32 %v2977_v58  ;;  %v7114_v16 = vadd.f32 %v6942_v13, %v7034_v25  ;;  %v3230_v39 = vsel %vm7864_vm8, %v3136_v0, 0.0  ;;  %v3138_v29 = vmul.f32 %v4689_v9, %v6967_v52  ;;  %v4693_v8 = vpop.eup %4692  ;;  %vm7871_vm8 = vmmov %vm7860_vm0 }
 0x9cd   : > { %4702 = vtanh.f32 %v2976_v15  ;;  %v3227_v58 = vsel %vm7865_vm10, %v3135_v14, 0.0  ;;  %v3137_v18 = vmul.f32 %v4691_v27, %v6967_v52  ;;  %v4695_v28 = vpop.eup %4694  ;;  %v7129_v0 = vrot.slane %v2936_v5, %v7857_v34  ;;  %vm7873_vm10 = vmmov %vm7860_vm0 }
 0x9ce   : > { %3225 = vadd.xlane.f32.xlu1 %v3224_v23  ;;  %v2978_v23 = vadd.f32 %v7078_v24, %v6907_v2  ;;  %v7133_v15 = vadd.f32 %v6942_v13, %v7062_v36  ;;  %4704 = vtanh.f32 %v2979_v54  ;;  %v2981_v9 = vadd.f32 %v7078_v24, %v6910_v20 }
 0x9cf   : > { %3222 = vadd.xlane.f32.xlu0 %v3221_v11  ;;  %v7120_v11 = vadd.f32 %v6950_v44, %v6962_v10  ;;  %v2980_v27 = vadd.f32 %v7078_v24, %v6913_v42  ;;  %v7141_v14 = vadd.f32 %v6942_v13, %v7065_v46  ;;  %v3140_v5 = vmul.f32 %v4693_v8, %v6967_v52 }
 0x9d0   : > { %4706 = vtanh.f32 %v2978_v23  ;;  %v7147_v34 = vadd.f32 %v6950_v44, %v7031_v21  ;;  %v3139_v1 = vmul.f32 %v4695_v28, %v6967_v52  ;;  %v2983_v23 = vadd.f32 %v7078_v24, %v6917_v12 }
 0x9d1   : > { %4708 = vtanh.f32 %v2981_v9  ;;  %v2982_v8 = vadd.f32 %v7078_v24, %v6926_v47  ;;  %v3242_v28 = vsel %vm7868_vm5, %v3140_v5, 0.0  ;;  %v7181_v5 = vadd.f32 %v7129_v0, %v6910_v20  ;;  %vm7876_vm5 = vmmov %vm7860_vm0 }
 0x9d2   : > { %3231 = vadd.xlane.f32.xlu1 %v3230_v39  ;;  %v3236_v39 = vsel %vm7866_vm6, %v3138_v29, 0.0  ;;  %v4697_v54 = vpop.eup %4696  ;;  %v7157_v29 = vadd.f32 %v7129_v0, %v6904_v17  ;;  %4710 = vtanh.f32 %v2980_v27  ;;  %v7171_v17 = vadd.f32 %v7129_v0, %v6913_v42  ;;  %vm7874_vm6 = vmmov %vm7860_vm0 }
 0x9d3   : > { %3228 = vadd.xlane.f32.xlu0 %v3227_v58  ;;  %v3233_v58 = vsel %vm7860_vm0, %v3137_v18, 0.0  ;;  %v4699_v13 = vpop.eup %4698  ;;  %v7165_v18 = vadd.f32 %v7129_v0, %v6907_v2  ;;  %4712 = vtanh.f32 %v2983_v23  ;;  %v2985_v42 = vadd.f32 %v7078_v24, %v6936_v7 }
 0x9d4   : > { %7867 = vst [vmem:[#allocation18_spill] sm:$0xff] %v7157_v29  ;;  %v3141_v26 = vmul.f32 %v4699_v13, %v6967_v52  ;;  %v7177_v29 = vadd.f32 %v7129_v0, %v6926_v47  ;;  %v2984_v27 = vadd.f32 %v7078_v24, %v6939_v61  ;;  %4714 = vtanh.f32 %v2982_v8 }
 0x9d5   : > { %v7195_v20 = vadd.f32 %v7129_v0, %v6917_v12  ;;  %4716 = vtanh.f32 %v2985_v42  ;;  %v2987_v12 = vadd.f32 %v7078_v24, %v6947_v55  ;;  %v2986_v8 = vadd.f32 %v7078_v24, %v6955_v43 }
 0x9d6   : > { %3237 = vadd.xlane.f32.xlu1 %v3236_v39  ;;  %v3142_v39 = vmul.f32 %v4697_v54, %v6967_v52  ;;  %v4701_v9 = vpop.eup %4700  ;;  %v3245_v23 = vsel %vm7871_vm8, %v3141_v26, 0.0  ;;  %v7213_v26 = vadd.f32 %v7129_v0, %v6972_v51  ;;  %4718 = vtanh.f32 %v2984_v27  ;;  %vm7880_vm8 = vmmov %vm7860_vm0 }
 0x9d7   : > { %3234 = vadd.xlane.f32.xlu0 %v3233_v58  ;;  %v3239_v58 = vsel %vm7869_vm1, %v3139_v1, 0.0  ;;  %v4703_v2 = vpop.eup %4702  ;;  %v7189_v1 = vadd.f32 %v7129_v0, %v6939_v61  ;;  %v3144_v54 = vmul.f32 %v4701_v9, %v6967_v52  ;;  %4720 = vtanh.f32 %v2987_v12  ;;  %vm7878_vm1 = vmmov %vm7860_vm0 }
 0x9d8   : > { %v3248_v47 = vsel %vm7870_vm4, %v3142_v39, 0.0  ;;  %v4705_v13 = vpop.eup %4704  ;;  %v7205_v39 = vadd.f32 %v7129_v0, %v6936_v7  ;;  %v7219_v7 = vadd.f32 %v7129_v0, %v6947_v55  ;;  %v2989_v55 = vadd.f32 %v7078_v24, %v6962_v10  ;;  %vm7879_vm4 = vmmov %vm7860_vm0 }
 0x9d9   : > { %v3254_v9 = vsel %vm7873_vm10, %v3144_v54, 0.0  ;;  %v7229_v54 = vadd.f32 %v7129_v0, %v6962_v10  ;;  %v2988_v27 = vadd.f32 %v7078_v24, %v6972_v51  ;;  %4722 = vtanh.f32 %v2986_v8  ;;  %vm7881_vm10 = vmmov %vm7860_vm0 }
 0x9da   : > { %3243 = vadd.xlane.f32.xlu1 %v3242_v28  ;;  %v3143_v28 = vmul.f32 %v4703_v2, %v6967_v52  ;;  %v4707_v61 = vpop.eup %4706  ;;  %7872 = vst [vmem:[#allocation20_spill] sm:$0xff] %v7205_v39  ;;  %v3146_v2 = vmul.f32 %v4705_v13, %v6967_v52  ;;  %v7237_v13 = vadd.f32 %v7129_v0, %v7065_v46  ;;  %4724 = vtanh.f32 %v2989_v55 }
 0x9db   : > { %3240 = vadd.xlane.f32.xlu0 %v3239_v58  ;;  %v7201_v58 = vadd.f32 %v7129_v0, %v6955_v43  ;;  %v4709_v42 = vpop.eup %4708  ;;  %v7225_v43 = vadd.f32 %v7129_v0, %v7034_v25  ;;  %7875 = vst [vmem:[#allocation17_spill] sm:$0xff] %v7229_v54  ;;  %v7249_v51 = vadd.f32 %v7129_v0, %v7062_v36  ;;  %4726 = vtanh.f32 %v2988_v27 }
 0x9dc   : > { %v4711_v39 = vpop.eup %4710  ;;  %v2991_v8 = vadd.f32 %v7078_v24, %v7031_v21 }
 0x9dd   : > { %v4713_v12 = vpop.eup %4712 }
 0x9de   : > { %3249 = vadd.xlane.f32.xlu1 %v3248_v47  ;;  %v3251_v47 = vsel %vm7874_vm6, %v3143_v28, 0.0  ;;  %v3260_v28 = vsel %vm7860_vm0, %v3146_v2, 0.0  ;;  %v4715_v54 = vpop.eup %4714  ;;  %v7253_v2 = vadd.f32 %v6950_v44, %v7065_v46  ;;  %4728 = vtanh.f32 %v2991_v8  ;;  %vm7882_vm6 = vmmov %vm7860_vm0 }
 0x9df   : > { %3246 = vadd.xlane.f32.xlu0 %v3245_v23  ;;  %v3145_v23 = vmul.f32 %v4707_v61, %v6967_v52  ;;  %v3148_v61 = vmul.f32 %v4709_v42, %v6967_v52  ;;  %v7259_v42 = vadd.f32 %v6950_v44, %v7062_v36  ;;  %v3149_v55 = vmul.f32 %v4715_v54, %v6967_v52 }
 0x9e0   : > { %7877 = vst [vmem:[#allocation27_spill] sm:$0xff] %v7253_v2  ;;  %v2993_v44 = vadd.f32 %v7078_v24, %v7062_v36 }
 0x9e1   : > { %v3257_v10 = vsel %vm7876_vm5, %v3145_v23, 0.0  ;;  %v3150_v23 = vmul.f32 %v4713_v12, %v6967_v52  ;;  %v3269_v12 = vsel %vm7881_vm10, %v3149_v55, 0.0  ;;  %vm7883_vm5 = vmmov %vm7860_vm0 }
 0x9e2   : > { %3255 = vadd.xlane.f32.xlu1 %v3254_v9  ;;  %v7243_v9 = vadd.f32 %v7129_v0, %v7031_v21  ;;  %v2990_v0 = vadd.f32 %v7078_v24, %v7034_v25  ;;  %v2992_v25 = vadd.f32 %v7078_v24, %v7065_v46  ;;  %vm7887_vm10 = vmmov %vm7860_vm0 }
 0x9e3   : > { %3252 = vadd.xlane.f32.xlu0 %v3251_v47  ;;  %v3147_v47 = vmul.f32 %v4711_v39, %v6967_v52  ;;  %v3266_v39 = vsel %vm7878_vm1, %v3148_v61, 0.0  ;;  %v3272_v21 = vsel %vm7880_vm8, %v3150_v23, 0.0  ;;  %vm7884_vm1 = vmmov %vm7860_vm0 }
 0x9e4   : > { %4730 = vtanh.f32 %v2990_v0  ;;  %vm7886_vm8 = vmmov %vm7860_vm0 }
 0x9e5   : > { %4732 = vtanh.f32 %v2993_v44 }
 0x9e6   : > { %3261 = vadd.xlane.f32.xlu1 %v3260_v28  ;;  %v4717_v28 = vpop.eup %4716  ;;  %4734 = vtanh.f32 %v2992_v25 }
 0x9e7   : > { %3258 = vadd.xlane.f32.xlu0 %v3257_v10  ;;  %v3263_v10 = vsel %vm7879_vm4, %v3147_v47, 0.0  ;;  %v4719_v2 = vpop.eup %4718  ;;  %v3152_v61 = vmul.f32 %v4717_v28, %v6967_v52  ;;  %4736 = vtanh.f32 %v6976_v53  ;;  %vm7885_vm4 = vmmov %vm7860_vm0 }
 0x9e8   : > { %v4721_v27 = vpop.eup %4720  ;;  %v3151_v54 = vmul.f32 %v4719_v2, %v6967_v52  ;;  %4738 = vtanh.f32 %v6980_v48 }
 0x9e9   : > { %v4723_v47 = vpop.eup %4722  ;;  %v3278_v8 = vsel %vm7882_vm6, %v3152_v61, 0.0  ;;  %v3154_v36 = vmul.f32 %v4721_v27, %v6967_v52  ;;  %4740 = vtanh.f32 %v6984_v31  ;;  %vm7888_vm6 = vmmov %vm7860_vm0 }
 0x9ea   : > { %3267 = vadd.xlane.f32.xlu1 %v3266_v39  ;;  %v4725_v39 = vpop.eup %4724  ;;  %v3275_v23 = vsel %vm7860_vm0, %v3151_v54, 0.0  ;;  %v3153_v46 = vmul.f32 %v4723_v47, %v6967_v52  ;;  %4742 = vtanh.f32 %v6988_v35 }
 0x9eb   : > { %3264 = vadd.xlane.f32.xlu0 %v3263_v10  ;;  %v4727_v24 = vpop.eup %4726  ;;  %v3284_v2 = vsel %vm7883_vm5, %v3154_v36, 0.0  ;;  %v3156_v0 = vmul.f32 %v4725_v39, %v6967_v52  ;;  %4744 = vtanh.f32 %v6998_v19  ;;  %vm7889_vm5 = vmmov %vm7860_vm0 }
 0x9ec   : > { %v4729_v28 = vpop.eup %4728  ;;  %v3281_v10 = vsel %vm7884_vm1, %v3153_v46, 0.0  ;;  %v3155_v55 = vmul.f32 %v4727_v24, %v6967_v52  ;;  %4746 = vtanh.f32 %v6992_v6  ;;  %vm7890_vm1 = vmmov %vm7860_vm0 }
 0x9ed   : > { %v3158_v53 = vmul.f32 %v4729_v28, %v6967_v52  ;;  %4748 = vtanh.f32 %v7006_v22 }
 0x9ee   : > { %3273 = vadd.xlane.f32.xlu1 %v3272_v21  ;;  %v4731_v44 = vpop.eup %4730  ;;  %v3290_v21 = vsel %vm7885_vm4, %v3156_v0, 0.0  ;;  %v3287_v48 = vsel %vm7886_vm8, %v3155_v55, 0.0  ;;  %4750 = vtanh.f32 %v7002_v33  ;;  %vm7891_vm4 = vmmov %vm7860_vm0 }
 0x9ef   : > { %3270 = vadd.xlane.f32.xlu0 %v3269_v12  ;;  %v4733_v61 = vpop.eup %4732  ;;  %v3157_v25 = vmul.f32 %v4731_v44, %v6967_v52  ;;  %v3296_v12 = vsel %vm7887_vm10, %v3158_v53, 0.0  ;;  %4752 = vtanh.f32 %v7017_v40  ;;  %vm7892_vm8 = vmmov %vm7860_vm0 }
 0x9f0   : > { %v4735_v27 = vpop.eup %4734  ;;  %v3160_v31 = vmul.f32 %v4733_v61, %v6967_v52  ;;  %4754 = vtanh.f32 %v7013_v45  ;;  %vm7893_vm10 = vmmov %vm7860_vm0 }
 0x9f1   : > { %v4737_v54 = vpop.eup %4736  ;;  %v3293_v35 = vsel %vm7888_vm6, %v3157_v25, 0.0  ;;  %v3159_v47 = vmul.f32 %v4735_v27, %v6967_v52  ;;  %4756 = vtanh.f32 %v7026_v62  ;;  %vm7894_vm6 = vmmov %vm7860_vm0 }
 0x9f2   : > { %3279 = vadd.xlane.f32.xlu1 %v3278_v8  ;;  %v4739_v8 = vpop.eup %4738  ;;  %v3302_v36 = vsel %vm7860_vm0, %v3160_v31, 0.0  ;;  %v3162_v19 = vmul.f32 %v4737_v54, %v6967_v52  ;;  %4758 = vtanh.f32 %v7022_v41 }
 0x9f3   : > { %3276 = vadd.xlane.f32.xlu0 %v3275_v23  ;;  %v4741_v39 = vpop.eup %4740  ;;  %v3299_v6 = vsel %vm7889_vm5, %v3159_v47, 0.0  ;;  %v3161_v23 = vmul.f32 %v4739_v8, %v6967_v52  ;;  %4760 = vtanh.f32 %v7044_v57  ;;  %vm7895_vm5 = vmmov %vm7860_vm0 }
 0x9f4   : > { %v4743_v46 = vpop.eup %4742  ;;  %v3308_v24 = vsel %vm7890_vm1, %v3162_v19, 0.0  ;;  %v3164_v22 = vmul.f32 %v4741_v39, %v6967_v52  ;;  %4762 = vtanh.f32 %v7038_v56  ;;  %vm7896_vm1 = vmmov %vm7860_vm0 }
 0x9f5   : > { %v3305_v33 = vsel %vm7891_vm4, %v3161_v23, 0.0  ;;  %v3163_v0 = vmul.f32 %v4743_v46, %v6967_v52  ;;  %4764 = vtanh.f32 %v7057_v49  ;;  %vm7897_vm4 = vmmov %vm7860_vm0 }
 0x9f6   : > { %3285 = vadd.xlane.f32.xlu1 %v3284_v2  ;;  %v4745_v2 = vpop.eup %4744  ;;  %4766 = vtanh.f32 %v7049_v38 }
 0x9f7   : > { %3282 = vadd.xlane.f32.xlu0 %v3281_v10  ;;  %v4747_v28 = vpop.eup %4746  ;;  %v3314_v10 = vsel %vm7892_vm8, %v3164_v22, 0.0  ;;  %v3193_v40 = vmul.f32 %v4745_v2, %v6967_v52  ;;  %v3311_v45 = vsel %vm7893_vm10, %v3163_v0, 0.0  ;;  %4768 = vtanh.f32 %v7075_v32  ;;  %vm7898_vm8 = vmmov %vm7860_vm0 }
 0x9f8   : > { %v4749_v55 = vpop.eup %4748  ;;  %v3194_v44 = vmul.f32 %v4747_v28, %v6967_v52  ;;  %4770 = vtanh.f32 %v7069_v4  ;;  %vm7899_vm10 = vmmov %vm7860_vm0 }
 0x9f9   : > { %v3401_v53 = vsel %vm7894_vm6, %v3193_v40, 0.0  ;;  %v3165_v62 = vmul.f32 %v4749_v55, %v6967_v52  ;;  %4772 = vtanh.f32 %v7090_v37  ;;  %vm7900_vm6 = vmmov %vm7860_vm0 }
 0x9fa   : > { %3291 = vadd.xlane.f32.xlu1 %v3290_v21  ;;  %v4751_v21 = vpop.eup %4750  ;;  %4774 = vtanh.f32 %v7082_v60 }
 0x9fb   : > { %3288 = vadd.xlane.f32.xlu0 %v3287_v48  ;;  %v4753_v61 = vpop.eup %4752  ;;  %v3404_v48 = vsel %vm7860_vm0, %v3194_v44, 0.0  ;;  %v3166_v41 = vmul.f32 %v4751_v21, %v6967_v52  ;;  %v3317_v27 = vsel %vm7895_vm5, %v3165_v62, 0.0  ;;  %4776 = vtanh.f32 %v7102_v3  ;;  %vm7901_vm5 = vmmov %vm7860_vm0 }
 0x9fc   : > { %v4755_v25 = vpop.eup %4754  ;;  %v3195_v57 = vmul.f32 %v4753_v61, %v6967_v52  ;;  %4778 = vtanh.f32 %v7096_v50 }
 0x9fd   : > { %v3320_v31 = vsel %vm7896_vm1, %v3166_v41, 0.0  ;;  %v3196_v56 = vmul.f32 %v4755_v25, %v6967_v52  ;;  %4780 = vtanh.f32 %v7114_v16  ;;  %vm7902_vm1 = vmmov %vm7860_vm0 }
 0x9fe   : > { %3297 = vadd.xlane.f32.xlu1 %v3296_v12  ;;  %v4757_v12 = vpop.eup %4756  ;;  %4782 = vtanh.f32 %v7106_v63 }
 0x9ff   : > { %3294 = vadd.xlane.f32.xlu0 %v3293_v35  ;;  %v4759_v54 = vpop.eup %4758  ;;  %v3407_v35 = vsel %vm7897_vm4, %v3195_v57, 0.0  ;;  %v3167_v49 = vmul.f32 %v4757_v12, %v6967_v52  ;;  %v3410_v8 = vsel %vm7898_vm8, %v3196_v56, 0.0  ;;  %vm7903_vm4 = vmmov %vm7860_vm0  ;;  %4784 = vtanh.f32 %v7126_v59  ;;  %v7910_v12 = vld [vmem:[#allocation18_spill] sm:$0xff] }
 0xa00   : > { %v4761_v47 = vpop.eup %4760  ;;  %v3168_v38 = vmul.f32 %v4759_v54, %v6967_v52  ;;  %vm7904_vm8 = vmmov %vm7860_vm0  ;;  %4786 = vtanh.f32 %v7120_v11 }
 0xa01   : > { %v3323_v19 = vsel %vm7899_vm10, %v3167_v49, 0.0  ;;  %v3197_v32 = vmul.f32 %v4761_v47, %v6967_v52  ;;  %vm7905_vm10 = vmmov %vm7860_vm0  ;;  %4788 = vtanh.f32 %v7141_v14 }
 0xa02   : > { %3303 = vadd.xlane.f32.xlu1 %v3302_v36  ;;  %v4763_v36 = vpop.eup %4762  ;;  %4790 = vtanh.f32 %v7133_v15 }
 0xa03   : > { %3300 = vadd.xlane.f32.xlu0 %v3299_v6  ;;  %v4765_v39 = vpop.eup %4764  ;;  %v3326_v6 = vsel %vm7900_vm6, %v3168_v38, 0.0  ;;  %v3198_v4 = vmul.f32 %v4763_v36, %v6967_v52  ;;  %v3413_v46 = vsel %vm7860_vm0, %v3197_v32, 0.0  ;;  %vm7906_vm6 = vmmov %vm7860_vm0  ;;  %4792 = vtanh.f32 %v7153_v30 }
 0xa04   : > { %v4767_v23 = vpop.eup %4766  ;;  %v3169_v37 = vmul.f32 %v4765_v39, %v6967_v52  ;;  %4794 = vtanh.f32 %v7147_v34 }
 0xa05   : > { %v3416_v22 = vsel %vm7901_vm5, %v3198_v4, 0.0  ;;  %v3170_v60 = vmul.f32 %v4767_v23, %v6967_v52  ;;  %vm7907_vm5 = vmmov %vm7860_vm0  ;;  %4796 = vtanh.f32 %v7165_v18 }
 0xa06   : > { %3309 = vadd.xlane.f32.xlu1 %v3308_v24  ;;  %v4769_v24 = vpop.eup %4768  ;;  %4798 = vtanh.f32 %v7910_v12 }
 0xa07   : > { %3306 = vadd.xlane.f32.xlu0 %v3305_v33  ;;  %v4771_v2 = vpop.eup %4770  ;;  %v3329_v33 = vsel %vm7902_vm1, %v3169_v37, 0.0  ;;  %v3199_v3 = vmul.f32 %v4769_v24, %v6967_v52  ;;  %v3332_v28 = vsel %vm7903_vm4, %v3170_v60, 0.0  ;;  %vm7908_vm1 = vmmov %vm7860_vm0  ;;  %4800 = vtanh.f32 %v7177_v29  ;;  %v7918_v24 = vld [vmem:[#allocation20_spill] sm:$0xff] }
 0xa08   : > { %v4773_v0 = vpop.eup %4772  ;;  %v3200_v50 = vmul.f32 %v4771_v2, %v6967_v52  ;;  %vm7909_vm4 = vmmov %vm7860_vm0  ;;  %4802 = vtanh.f32 %v7171_v17 }
 0xa09   : > { %v3419_v40 = vsel %vm7904_vm8, %v3199_v3, 0.0  ;;  %v3171_v16 = vmul.f32 %v4773_v0, %v6967_v52  ;;  %vm7911_vm8 = vmmov %vm7860_vm0  ;;  %4804 = vtanh.f32 %v7189_v1 }
 0xa0a   : > { %3315 = vadd.xlane.f32.xlu1 %v3314_v10  ;;  %v4775_v10 = vpop.eup %4774  ;;  %4806 = vtanh.f32 %v7181_v5 }
 0xa0b   : > { %3312 = vadd.xlane.f32.xlu0 %v3311_v45  ;;  %v4777_v55 = vpop.eup %4776  ;;  %v3422_v45 = vsel %vm7905_vm10, %v3200_v50, 0.0  ;;  %v3172_v63 = vmul.f32 %v4775_v10, %v6967_v52  ;;  %v3335_v21 = vsel %vm7906_vm6, %v3171_v16, 0.0  ;;  %vm7912_vm10 = vmmov %vm7860_vm0  ;;  %4808 = vtanh.f32 %v7201_v58 }
 0xa0c   : > { %v4779_v44 = vpop.eup %4778  ;;  %v3201_v59 = vmul.f32 %v4777_v55, %v6967_v52  ;;  %vm7913_vm6 = vmmov %vm7860_vm0  ;;  %4810 = vtanh.f32 %v7195_v20 }
 0xa0d   : > { %v3338_v62 = vsel %vm7860_vm0, %v3172_v63, 0.0  ;;  %v3202_v11 = vmul.f32 %v4779_v44, %v6967_v52 }
 0xa0e   : > { %3402 = vadd.xlane.f32.xlu1 %v3401_v53  ;;  %v4781_v53 = vpop.eup %4780  ;;  %4812 = vtanh.f32 %v7213_v26 }
 0xa0f   : > { %3405 = vadd.xlane.f32.xlu0 %v3404_v48  ;;  %v4783_v61 = vpop.eup %4782  ;;  %v3425_v48 = vsel %vm7907_vm5, %v3201_v59, 0.0  ;;  %v3173_v14 = vmul.f32 %v4781_v53, %v6967_v52  ;;  %v3428_v25 = vsel %vm7908_vm1, %v3202_v11, 0.0  ;;  %vm7914_vm5 = vmmov %vm7860_vm0  ;;  %4814 = vtanh.f32 %v7918_v24  ;;  %v7927_v11 = vld [vmem:[#allocation27_spill] sm:$0xff] }
 0xa10   : > { %v4785_v41 = vpop.eup %4784  ;;  %v3174_v15 = vmul.f32 %v4783_v61, %v6967_v52  ;;  %vm7915_vm1 = vmmov %vm7860_vm0  ;;  %4816 = vtanh.f32 %v7225_v43 }
 0xa11   : > { %v3341_v57 = vsel %vm7909_vm4, %v3173_v14, 0.0  ;;  %v3203_v30 = vmul.f32 %v4785_v41, %v6967_v52  ;;  %vm7916_vm4 = vmmov %vm7860_vm0 }
 0xa12   : > { %3318 = vadd.xlane.f32.xlu1 %v3317_v27  ;;  %v4787_v27 = vpop.eup %4786  ;;  %v3344_v56 = vsel %vm7911_vm8, %v3174_v15, 0.0  ;;  %vm7917_vm8 = vmmov %vm7860_vm0  ;;  %4818 = vtanh.f32 %v7219_v7 }
 0xa13   : > { %3321 = vadd.xlane.f32.xlu0 %v3320_v31  ;;  %v4789_v31 = vpop.eup %4788  ;;  %v3204_v34 = vmul.f32 %v4787_v27, %v6967_v52  ;;  %4820 = vtanh.f32 %v7237_v13 }
 0xa14   : > { %v4791_v54 = vpop.eup %4790  ;;  %v3175_v18 = vmul.f32 %v4789_v31, %v6967_v52 }
 0xa15   : > { %v4793_v49 = vpop.eup %4792  ;;  %v3434_v47 = vsel %vm7913_vm6, %v3204_v34, 0.0  ;;  %vm7920_vm6 = vmmov %vm7860_vm0 }
 0xa16   : > { %3408 = vadd.xlane.f32.xlu1 %v3407_v35  ;;  %v3431_v35 = vsel %vm7912_vm10, %v3203_v30, 0.0  ;;  %v4795_v38 = vpop.eup %4794  ;;  %v3347_v36 = vsel %vm7860_vm0, %v3175_v18, 0.0  ;;  %v3205_v29 = vmul.f32 %v4793_v49, %v6967_v52  ;;  %vm7919_vm10 = vmmov %vm7860_vm0  ;;  %v7932_v49 = vld [vmem:[#allocation26_spill] sm:$0xff] }
 0xa17   : > { %3411 = vadd.xlane.f32.xlu0 %v3410_v8  ;;  %v3176_v8 = vmul.f32 %v4791_v54, %v6967_v52  ;;  %v3206_v17 = vmul.f32 %v4795_v38, %v6967_v52  ;;  %v7933_v38 = vld [vmem:[#allocation23_spill] sm:$0xff] }
 0xa19   : > { %v3350_v32 = vsel %vm7914_vm5, %v3176_v8, 0.0  ;;  %v3440_v23 = vsel %vm7916_vm4, %v3206_v17, 0.0  ;;  %vm7921_vm5 = vmmov %vm7860_vm0 }
 0xa1a   : > { %3324 = vadd.xlane.f32.xlu1 %v3323_v19  ;;  %v4797_v19 = vpop.eup %4796  ;;  %vm7924_vm4 = vmmov %vm7860_vm0 }
 0xa1b   : > { %3327 = vadd.xlane.f32.xlu0 %v3326_v6  ;;  %v4799_v39 = vpop.eup %4798  ;;  %v3437_v6 = vsel %vm7915_vm1, %v3205_v29, 0.0  ;;  %v3177_v1 = vmul.f32 %v4797_v19, %v6967_v52  ;;  %vm7923_vm1 = vmmov %vm7860_vm0 }
 0xa1c   : > { %v4801_v4 = vpop.eup %4800  ;;  %v3178_v5 = vmul.f32 %v4799_v39, %v6967_v52 }
 0xa1d   : > { %v3353_v37 = vsel %vm7917_vm8, %v3177_v1, 0.0  ;;  %v3181_v58 = vmul.f32 %v4801_v4, %v6967_v52  ;;  %vm7925_vm8 = vmmov %vm7860_vm0 }
 0xa1e   : > { %3414 = vadd.xlane.f32.xlu1 %v3413_v46  ;;  %v4803_v46 = vpop.eup %4802  ;;  %v3356_v60 = vsel %vm7919_vm10, %v3178_v5, 0.0  ;;  %vm7926_vm10 = vmmov %vm7860_vm0 }
 0xa1f   : > { %3417 = vadd.xlane.f32.xlu0 %v3416_v22  ;;  %v4805_v22 = vpop.eup %4804  ;;  %v3179_v20 = vmul.f32 %v4803_v46, %v6967_v52 }
 0xa20   : > { %v4807_v2 = vpop.eup %4806  ;;  %v3183_v26 = vmul.f32 %v4805_v22, %v6967_v52 }
 0xa21   : > { %v4809_v3 = vpop.eup %4808  ;;  %v3359_v0 = vsel %vm7860_vm0, %v3179_v20, 0.0 }
 0xa22   : > { %3330 = vadd.xlane.f32.xlu1 %v3329_v33  ;;  %v3365_v33 = vsel %vm7920_vm6, %v3181_v58, 0.0  ;;  %v4811_v50 = vpop.eup %4810  ;;  %v3371_v10 = vsel %vm7921_vm5, %v3183_v26, 0.0  ;;  %v3185_v43 = vmul.f32 %v4809_v3, %v6967_v52  ;;  %vm7928_vm6 = vmmov %vm7860_vm0  ;;  %v7938_v58 = vld [vmem:[#allocation29_spill] sm:$0xff] }
 0xa23   : > { %3333 = vadd.xlane.f32.xlu0 %v3332_v28  ;;  %v3180_v28 = vmul.f32 %v4807_v2, %v6967_v52  ;;  %v4813_v16 = vpop.eup %4812  ;;  %v3182_v7 = vmul.f32 %v4811_v50, %v6967_v52  ;;  %vm7931_vm5 = vmmov %vm7860_vm0  ;;  %v7942_v3 = vld [vmem:[#allocation37_spill] sm:$0xff] }
 0xa24   : > { %v3377_v63 = vsel %vm7924_vm4, %v3185_v43, 0.0  ;;  %v3187_v13 = vmul.f32 %v4813_v16, %v6967_v52  ;;  %vm7935_vm4 = vmmov %vm7860_vm0 }
 0xa25   : > { %v3362_v55 = vsel %vm7923_vm1, %v3180_v28, 0.0  ;;  %vm7934_vm1 = vmmov %vm7860_vm0 }
 0xa26   : > { %3420 = vadd.xlane.f32.xlu1 %v3419_v40  ;;  %v7922_v40 = vld [vmem:[#allocation17_spill] sm:$0xff] }
 0xa27   : > { %3423 = vadd.xlane.f32.xlu0 %v3422_v45  ;;  %4822 = vtanh.f32 %v7922_v40  ;;  %v4815_v45 = vpop.eup %4814 }
 0xa28   : > { %4824 = vtanh.f32 %v7249_v51  ;;  %v4817_v44 = vpop.eup %4816  ;;  %v3184_v59 = vmul.f32 %v4815_v45, %v6967_v52 }
 0xa29   : > { %4826 = vtanh.f32 %v7243_v9  ;;  %v4819_v53 = vpop.eup %4818  ;;  %v3189_v51 = vmul.f32 %v4817_v44, %v6967_v52  ;;  %v7949_v44 = vld [vmem:[#allocation36_spill] sm:$0xff] }
 0xa2a   : > { %3336 = vadd.xlane.f32.xlu1 %v3335_v21  ;;  %v3368_v21 = vsel %vm7925_vm8, %v3182_v7, 0.0  ;;  %4828 = vtanh.f32 %v7259_v42  ;;  %v4821_v61 = vpop.eup %4820  ;;  %v3186_v9 = vmul.f32 %v4819_v53, %v6967_v52  ;;  %vm7937_vm8 = vcmask 261312   ;;  %v7947_v7 = vld [vmem:[#allocation41_spill] sm:$0xff] }
 0xa2b   : > { %3339 = vadd.xlane.f32.xlu0 %v3338_v62  ;;  %v3383_v62 = vsel %vm7926_vm10, %v3187_v13, 0.0  ;;  %4830 = vtanh.f32 %v7927_v11  ;;  %v3389_v30 = vsel %vm7860_vm0, %v3189_v51, 0.0  ;;  %v3191_v12 = vmul.f32 %v4821_v61, %v6967_v52  ;;  %vm7939_vm10 = vmmov %vm7860_vm0 }
 0xa2d   : > { %v3395_v29 = vsel %vm7934_vm1, %v3191_v12, 0.0  ;;  %v7956_v12 = vld [vmem:[#allocation46_spill] sm:$0xff] }
 0xa2e   : > { %3426 = vadd.xlane.f32.xlu1 %v3425_v48  ;;  %v3374_v48 = vsel %vm7928_vm6, %v3184_v59, 0.0  ;;  %vm7940_vm6 = vmmov %vm7860_vm0  ;;  %vm7941_vm0 = vcmask 326912  }
 0xa2f   : > { %3429 = vadd.xlane.f32.xlu0 %v3428_v25  ;;  %v7929_v25 = vld [vmem:[#allocation21_spill] sm:$0xff] }
 0xa31   : > { %v4823_v14 = vpop.eup %4822 }
 0xa32   : > { %3342 = vadd.xlane.f32.xlu1 %v3341_v57  ;;  %v7930_v57 = vld [vmem:[#allocation25_spill] sm:$0xff]  ;;  %v4825_v31 = vpop.eup %4824  ;;  %v3188_v34 = vmul.f32 %v4823_v14, %v6967_v52 }
 0xa33   : > { %3345 = vadd.xlane.f32.xlu0 %v3344_v56  ;;  %v3380_v56 = vsel %vm7931_vm5, %v3186_v9, 0.0  ;;  %v4827_v54 = vpop.eup %4826  ;;  %v3192_v19 = vmul.f32 %v4825_v31, %v6967_v52  ;;  %vm7943_vm5 = vcmask 392512  }
 0xa34   : > { %v3386_v17 = vsel %vm7935_vm4, %v3188_v34, 0.0  ;;  %v3190_v39 = vmul.f32 %v4827_v54, %v6967_v52  ;;  %vm7945_vm4 = vmmov %vm7934_vm1  ;;  %v7958_v54 = vld [vmem:[#allocation45_spill] sm:$0xff] }
 0xa35   : > { %v3398_v22 = vsel %vm7939_vm10, %v3192_v19, 0.0  ;;  %vm7948_vm10 = vcmask 523712  }
 0xa36   : > { %3432 = vadd.xlane.f32.xlu1 %v3431_v35  ;;  %v3392_v20 = vsel %vm7940_vm6, %v3190_v39, 0.0  ;;  %vm7951_vm6 = vcmask 654912  }
 0xa37   : > { %3435 = vadd.xlane.f32.xlu0 %v3434_v47 }
 0xa3a   : > { %3348 = vadd.xlane.f32.xlu1 %v3347_v36 }
 0xa3b   : > { %3351 = vadd.xlane.f32.xlu0 %v3350_v32  ;;  %v4829_v32 = vpop.eup %4828 }
 0xa3e   : > { %3438 = vadd.xlane.f32.xlu1 %v3437_v6  ;;  %v4831_v6 = vpop.eup %4830 }
 0xa3f   : > { %3441 = vadd.xlane.f32.xlu0 %v3440_v23  ;;  %v7936_v23 = vld [vmem:[#allocation32_spill] sm:$0xff]  ;;  %v3207_v2 = vmul.f32 %v4831_v6, %v6967_v52 }
 0xa41   : > { %v3443_v16 = vsel %vm7945_vm4, %v3207_v2, 0.0  ;;  %vm7960_vm4 = vcmask 261312  }
 0xa42   : > { %3354 = vadd.xlane.f32.xlu1 %v3353_v37 }
 0xa43   : > { %3357 = vadd.xlane.f32.xlu0 %v3356_v60  ;;  %v3208_v60 = vmul.f32 %v4829_v32, %v6967_v52 }
 0xa45   : > { %v3446_v40 = vsel %vm7934_vm1, %v3208_v60, 0.0  ;;  %vm7957_vm1 = vcmask 851712  }
 0xa46   : > { %3366 = vadd.xlane.f32.xlu1 %v3365_v33 }
 0xa47   : > { %3360 = vadd.xlane.f32.xlu0 %v3359_v0 }
 0xa4a   : > { %3372 = vadd.xlane.f32.xlu1 %v3371_v10  ;;  %v7944_v10 = vld [vmem:[#allocation33_spill] sm:$0xff] }
 0xa4b   : > { %3363 = vadd.xlane.f32.xlu0 %v3362_v55 }
 0xa4e   : > { %3378 = vadd.xlane.f32.xlu1 %v3377_v63 }
 0xa4f   : > { %3369 = vadd.xlane.f32.xlu0 %v3368_v21 }
 0xa52   : > { %3384 = vadd.xlane.f32.xlu1 %v3383_v62  ;;  %v7950_v62 = vld [vmem:[#allocation42_spill] sm:$0xff] }
 0xa53   : > { %3375 = vadd.xlane.f32.xlu0 %v3374_v48  ;;  %v3214_v41 = vpop.xlane.xlu1 %3213  ;;  %v7952_v48 = vld [vmem:[#allocation40_spill] sm:$0xff] }
 0xa54   : > { %v3536_v15 = vrot.slane %v3214_v41, %v7929_v25  ;;  %v3211_v27 = vpop.xlane.xlu0 %3210 }
 0xa55   : > { %v3532_v42 = vrot.slane %v3211_v27, %v7930_v57 }
 0xa56   : > { %3390 = vadd.xlane.f32.xlu1 %v3389_v30 }
 0xa57   : > { %v3537_v35 = vsel %vm1116_vm2, %v3536_v15, %v3532_v42  ;;  %3381 = vadd.xlane.f32.xlu0 %v3380_v56  ;;  %v3220_v18 = vpop.xlane.xlu1 %3219  ;;  %v7954_v15 = vld [vmem:[#allocation44_spill] sm:$0xff] }
 0xa58   : > { %v3546_v47 = vrot.slane %v3220_v18, %v7932_v49  ;;  %v3217_v8 = vpop.xlane.xlu0 %3216 }
 0xa59   : > { %v3541_v36 = vrot.slane %v3217_v8, %v7933_v38  ;;  %v7959_v8 = vld [vmem:[#allocation47_spill] sm:$0xff] }
 0xa5a   : > { %3396 = vadd.xlane.f32.xlu1 %v3395_v29 }
 0xa5b   : > { %v3542_v1 = vsel %vm1123_vm3, %v3541_v36, %v3537_v35  ;;  %3387 = vadd.xlane.f32.xlu0 %v3386_v17  ;;  %v3226_v4 = vpop.xlane.xlu1 %3225 }
 0xa5c   : > { %v3556_v5 = vrot.slane %v3226_v4, %v7936_v23  ;;  %v3547_v46 = vsel %vm7937_vm8, %v3546_v47, %v3542_v1  ;;  %v3223_v37 = vpop.xlane.xlu0 %3222  ;;  %vm7946_vm8 = vcmask 458112  }
 0xa5d   : > { %v3551_v24 = vrot.slane %v3223_v37, %v7938_v58 }
 0xa5e   : > { %3399 = vadd.xlane.f32.xlu1 %v3398_v22 }
 0xa5f   : > { %v3552_v33 = vsel %vm7941_vm0, %v3551_v24, %v3547_v46  ;;  %3393 = vadd.xlane.f32.xlu0 %v3392_v20  ;;  %v3232_v26 = vpop.xlane.xlu1 %3231  ;;  %vm7953_vm0 = vcmask 720512  }
 0xa60   : > { %v3566_v0 = vrot.slane %v3232_v26, %v7942_v3  ;;  %v3557_v28 = vsel %vm7943_vm5, %v3556_v5, %v3552_v33  ;;  %v3229_v50 = vpop.xlane.xlu0 %3228  ;;  %vm7955_vm5 = vcmask 786112  }
 0xa61   : > { %v3561_v43 = vrot.slane %v3229_v50, %v7944_v10 }
 0xa62   : > { %3447 = vadd.xlane.f32.xlu1 %v3446_v40 }
 0xa63   : > { %v3562_v55 = vsel %vm7946_vm8, %v3561_v43, %v3557_v28  ;;  %3444 = vadd.xlane.f32.xlu0 %v3443_v16  ;;  %v3238_v52 = vpop.xlane.xlu1 %3237  ;;  %vm7961_vm8 = vcmask 326912  }
 0xa64   : > { %v3576_v45 = vrot.slane %v3238_v52, %v7947_v7  ;;  %v3567_v63 = vsel %vm7948_vm10, %v3566_v0, %v3562_v55  ;;  %v3235_v13 = vpop.xlane.xlu0 %3234  ;;  %vm7962_vm10 = vcmask 392512  }
 0xa65   : > { %v3571_v21 = vrot.slane %v3235_v13, %v7949_v44 }
 0xa67   : > { %v3572_v59 = vsel %vm1165_vm9, %v3571_v21, %v3567_v63  ;;  %v3244_v53 = vpop.xlane.xlu1 %3243 }
 0xa68   : > { %v3586_v51 = vrot.slane %v3244_v53, %v7950_v62  ;;  %v3577_v11 = vsel %vm7951_vm6, %v3576_v45, %v3572_v59  ;;  %v3241_v61 = vpop.xlane.xlu0 %3240  ;;  %vm7963_vm6 = vcmask 458112  }
 0xa69   : > { %v3581_v9 = vrot.slane %v3241_v61, %v7952_v48 }
 0xa6b   : > { %v3582_v14 = vsel %vm7953_vm0, %v3581_v9, %v3577_v11  ;;  %v3250_v41 = vpop.xlane.xlu1 %3249  ;;  %vm7964_vm0 = vcmask 523712  }
 0xa6c   : > { %v3596_v27 = vrot.slane %v3250_v41, %v7954_v15  ;;  %v3587_v42 = vsel %vm7955_vm5, %v3586_v51, %v3582_v14  ;;  %v3247_v30 = vpop.xlane.xlu0 %3246  ;;  %vm7965_vm5 = vcmask 654912  }
 0xa6d   : > { %v3591_v31 = vrot.slane %v3247_v30, %v7956_v12 }
 0xa6f   : > { %v3592_v56 = vsel %vm7957_vm1, %v3591_v31, %v3587_v42  ;;  %v3256_v34 = vpop.xlane.xlu1 %3255  ;;  %vm7966_vm1 = vcmask 720512  }
 0xa70   : > { %v3606_v35 = vrot.slane %v3256_v34, %v7958_v54  ;;  %v3597_v18 = vsel %vm1200_vm14, %v3596_v27, %v3592_v56  ;;  %v3253_v47 = vpop.xlane.xlu0 %3252 }
 0xa71   : > { %v3601_v36 = vrot.slane %v3253_v47, %v7959_v8 }
 0xa73   : > { %v3602_v29 = vsel %vm1207_vm15, %v3601_v36, %v3597_v18  ;;  %v3262_v19 = vpop.xlane.xlu1 %3261 }
 0xa74   : > { %v3607_v32 = vsel %vm1214_vm7, %v3606_v35, %v3602_v29  ;;  %v3615_v17 = vrot.slane %v3262_v19, %v7929_v25  ;;  %v3259_v39 = vpop.xlane.xlu0 %3258 }
 0xa75   : > { %v3611_v6 = vrot.slane %v3259_v39, %v7930_v57 }
 0xa77   : > { %v3616_v1 = vsel %vm1116_vm2, %v3615_v17, %v3611_v6  ;;  %v3268_v4 = vpop.xlane.xlu1 %3267 }
 0xa78   : > { %v3625_v5 = vrot.slane %v3268_v4, %v7932_v49  ;;  %v3265_v46 = vpop.xlane.xlu0 %3264 }
 0xa79   : > { %v3620_v37 = vrot.slane %v3265_v46, %v7933_v38 }
 0xa7b   : > { %v3621_v24 = vsel %vm1123_vm3, %v3620_v37, %v3616_v1  ;;  %v3274_v22 = vpop.xlane.xlu1 %3273 }
 0xa7c   : > { %v3635_v60 = vrot.slane %v3274_v22, %v7936_v23  ;;  %v3626_v20 = vsel %vm7960_vm4, %v3625_v5, %v3621_v24  ;;  %v3271_v2 = vpop.xlane.xlu0 %3270  ;;  %vm7967_vm4 = vcmask 786112  }
 0xa7d   : > { %v3630_v33 = vrot.slane %v3271_v2, %v7938_v58 }
 0xa7f   : > { %v3631_v26 = vsel %vm7961_vm8, %v3630_v33, %v3626_v20  ;;  %v3280_v0 = vpop.xlane.xlu1 %3279  ;;  %vm7968_vm8 = vcmask 851712  }
 0xa80   : > { %v3645_v28 = vrot.slane %v3280_v0, %v7942_v3  ;;  %v3636_v50 = vsel %vm7962_vm10, %v3635_v60, %v3631_v26  ;;  %v3277_v43 = vpop.xlane.xlu0 %3276  ;;  %vm7969_vm10 = vcmask 1041409  }
 0xa81   : > { %v3640_v40 = vrot.slane %v3277_v43, %v7944_v10 }
 0xa83   : > { %v3641_v16 = vsel %vm7963_vm6, %v3640_v40, %v3636_v50  ;;  %v3286_v55 = vpop.xlane.xlu1 %3285  ;;  %vm7970_vm6 = vcmask 261312  }
 0xa84   : > { %v3655_v52 = vrot.slane %v3286_v55, %v7947_v7  ;;  %v3646_v45 = vsel %vm7964_vm0, %v3645_v28, %v3641_v16  ;;  %v3283_v63 = vpop.xlane.xlu0 %3282  ;;  %vm7971_vm0 = vcmask 326912  }
 0xa85   : > { %v3650_v13 = vrot.slane %v3283_v63, %v7949_v44 }
 0xa87   : > { %v3651_v21 = vsel %vm1165_vm9, %v3650_v13, %v3646_v45  ;;  %v3292_v59 = vpop.xlane.xlu1 %3291 }
 0xa88   : > { %v3665_v53 = vrot.slane %v3292_v59, %v7950_v62  ;;  %v3656_v51 = vsel %vm7965_vm5, %v3655_v52, %v3651_v21  ;;  %v3289_v11 = vpop.xlane.xlu0 %3288  ;;  %vm7972_vm5 = vcmask 392512  }
 0xa89   : > { %v3660_v61 = vrot.slane %v3289_v11, %v7952_v48 }
 0xa8b   : > { %v3661_v9 = vsel %vm7966_vm1, %v3660_v61, %v3656_v51  ;;  %v3298_v14 = vpop.xlane.xlu1 %3297  ;;  %vm7973_vm1 = vmmov %vm7970_vm6 }
 0xa8c   : > { %v3675_v41 = vrot.slane %v3298_v14, %v7954_v15  ;;  %v3666_v27 = vsel %vm7967_vm4, %v3665_v53, %v3661_v9  ;;  %v3295_v42 = vpop.xlane.xlu0 %3294  ;;  %vm7974_vm4 = vcmask 458112  }
 0xa8d   : > { %v3670_v30 = vrot.slane %v3295_v42, %v7956_v12 }
 0xa8f   : > { %v3671_v31 = vsel %vm7968_vm8, %v3670_v30, %v3666_v27  ;;  %v3304_v56 = vpop.xlane.xlu1 %3303  ;;  %vm7975_vm8 = vcmask 523712  }
 0xa90   : > { %v3685_v34 = vrot.slane %v3304_v56, %v7958_v54  ;;  %v3676_v35 = vsel %vm1200_vm14, %v3675_v41, %v3671_v31  ;;  %v3301_v18 = vpop.xlane.xlu0 %3300 }
 0xa91   : > { %v3680_v47 = vrot.slane %v3301_v18, %v7959_v8 }
 0xa93   : > { %v3681_v36 = vsel %vm1207_vm15, %v3680_v47, %v3676_v35  ;;  %v3310_v29 = vpop.xlane.xlu1 %3309 }
 0xa94   : > { %v3686_v19 = vsel %vm1214_vm7, %v3685_v34, %v3681_v36  ;;  %v3694_v17 = vrot.slane %v3310_v29, %v7929_v25  ;;  %v3307_v39 = vpop.xlane.xlu0 %3306 }
 0xa95   : > { %v7501_v6 = vsel %vm7969_vm10, %v3686_v19, %v3607_v32  ;;  %v3690_v1 = vrot.slane %v3307_v39, %v7930_v57  ;;  %vm7976_vm10 = vcmask 654912  }
 0xa97   : > { %v3695_v4 = vsel %vm1116_vm2, %v3694_v17, %v3690_v1  ;;  %v3316_v5 = vpop.xlane.xlu1 %3315 }
 0xa98   : > { %v3704_v46 = vrot.slane %v3316_v5, %v7932_v49  ;;  %v3313_v37 = vpop.xlane.xlu0 %3312 }
 0xa99   : > { %v3699_v24 = vrot.slane %v3313_v37, %v7933_v38 }
 0xa9b   : > { %v3700_v22 = vsel %vm1123_vm3, %v3699_v24, %v3695_v4  ;;  %v3403_v60 = vpop.xlane.xlu1 %3402 }
 0xa9c   : > { %v3406_v20 = vpop.xlane.xlu0 %3405  ;;  %v3848_v2 = vrot.slane %v3403_v60, %v7930_v57  ;;  %v3705_v33 = vsel %vm7970_vm6, %v3704_v46, %v3700_v22  ;;  %vm7977_vm6 = vcmask 720512  }
 0xa9d   : > { %v3852_v32 = vrot.slane %v3406_v20, %v7929_v25 }
 0xa9f   : > { %v3853_v26 = vsel %vm1116_vm2, %v3852_v32, %v3848_v2  ;;  %v3319_v0 = vpop.xlane.xlu1 %3318 }
 0xaa0   : > { %v3322_v28 = vpop.xlane.xlu0 %3321  ;;  %v3709_v50 = vrot.slane %v3319_v0, %v7938_v58 }
 0xaa1   : > { %v3714_v43 = vrot.slane %v3322_v28, %v7936_v23 }
 0xaa2   : > { %v3710_v40 = vsel %vm7971_vm0, %v3709_v50, %v3705_v33  ;;  %vm7978_vm0 = vcmask 786112  }
 0xaa3   : > { %v3409_v16 = vpop.xlane.xlu1 %3408  ;;  %v3715_v55 = vsel %vm7972_vm5, %v3714_v43, %v3710_v40  ;;  %vm7979_vm5 = vcmask 851712  }
 0xaa4   : > { %v3412_v52 = vpop.xlane.xlu0 %3411  ;;  %v3857_v45 = vrot.slane %v3409_v16, %v7933_v38 }
 0xaa5   : > { %v3862_v63 = vrot.slane %v3412_v52, %v7932_v49 }
 0xaa6   : > { %v3858_v13 = vsel %vm1123_vm3, %v3857_v45, %v3853_v26 }
 0xaa7   : > { %v3325_v21 = vpop.xlane.xlu1 %3324  ;;  %v3863_v59 = vsel %vm7973_vm1, %v3862_v63, %v3858_v13 }
 0xaa8   : > { %v3328_v53 = vpop.xlane.xlu0 %3327  ;;  %v3719_v27 = vrot.slane %v3325_v21, %v7944_v10 }
 0xaa9   : > { %v3724_v31 = vrot.slane %v3328_v53, %v7942_v3 }
 0xaaa   : > { %v3720_v56 = vsel %vm7974_vm4, %v3719_v27, %v3715_v55 }
 0xaab   : > { %v3415_v51 = vpop.xlane.xlu1 %3414  ;;  %v3725_v36 = vsel %vm7975_vm8, %v3724_v31, %v3720_v56  ;;  %vm7985_vm8 = vcmask 458112  }
 0xaac   : > { %v7520_v11 = vpop.xlane.xlu0 %3417 }
 0xaaf   : > { %v3331_v61 = vpop.xlane.xlu1 %3330 }
 0xab0   : > { %v3334_v9 = vpop.xlane.xlu0 %3333  ;;  %v3729_v34 = vrot.slane %v3331_v61, %v7949_v44 }
 0xab1   : > { %v3734_v47 = vrot.slane %v3334_v9, %v7947_v7 }
 0xab2   : > { %v3730_v29 = vsel %vm1165_vm9, %v3729_v34, %v3725_v36 }
 0xab3   : > { %v7522_v14 = vpop.xlane.xlu1 %3420  ;;  %v3735_v4 = vsel %vm7976_vm10, %v3734_v47, %v3730_v29  ;;  %vm7986_vm10 = vmmov %vm7985_vm8 }
 0xab4   : > { %v7524_v41 = vpop.xlane.xlu0 %3423 }
 0xab7   : > { %v3337_v42 = vpop.xlane.xlu1 %3336 }
 0xab8   : > { %v3340_v30 = vpop.xlane.xlu0 %3339  ;;  %v3739_v19 = vrot.slane %v3337_v42, %v7952_v48 }
 0xab9   : > { %v3744_v1 = vrot.slane %v3340_v30, %v7950_v62 }
 0xaba   : > { %v3740_v5 = vsel %vm7977_vm6, %v3739_v19, %v3735_v4  ;;  %vm7987_vm6 = vcmask 523712  }
 0xabb   : > { %v7530_v35 = vpop.xlane.xlu1 %3426  ;;  %v3745_v60 = vsel %vm7978_vm0, %v3744_v1, %v3740_v5  ;;  %vm7988_vm0 = vmmov %vm7987_vm6 }
 0xabc   : > { %v7532_v18 = vpop.xlane.xlu0 %3429 }
 0xabf   : > { %v3343_v17 = vpop.xlane.xlu1 %3342 }
 0xac0   : > { %v3346_v39 = vpop.xlane.xlu0 %3345  ;;  %v3749_v46 = vrot.slane %v3343_v17, %v7956_v12 }
 0xac1   : > { %v3754_v22 = vrot.slane %v3346_v39, %v7954_v15  ;;  %v3882_v39 = vrot.slane %v7524_v41, %v7942_v3 }
 0xac2   : > { %v3750_v20 = vsel %vm7979_vm5, %v3749_v46, %v3745_v60  ;;  %vm7989_vm5 = vcmask 654912  }
 0xac3   : > { %v7542_v37 = vpop.xlane.xlu1 %3432  ;;  %v3755_v0 = vsel %vm1200_vm14, %v3754_v22, %v3750_v20 }
 0xac4   : > { %v7544_v24 = vpop.xlane.xlu0 %3435 }
 0xac7   : > { %v3349_v2 = vpop.xlane.xlu1 %3348 }
 0xac8   : > { %v3352_v33 = vpop.xlane.xlu0 %3351  ;;  %v3759_v32 = vrot.slane %v3349_v2, %v7959_v8 }
 0xac9   : > { %v3764_v26 = vrot.slane %v3352_v33, %v7958_v54 }
 0xaca   : > { %v3760_v28 = vsel %vm1207_vm15, %v3759_v32, %v3755_v0 }
 0xacb   : > { %v3765_v50 = vsel %vm1214_vm7, %v3764_v26, %v3760_v28  ;;  %v7554_v43 = vpop.xlane.xlu1 %3438 }
 0xacc   : > { %v7556_v40 = vpop.xlane.xlu0 %3441  ;;  %v7560_v16 = vsel %vm1534_vm11, %v3765_v50, %v7501_v6  ;;  %v3867_v6 = vrot.slane %v3415_v51, %v7938_v58  ;;  %vm7980_vm11 = vmmov %vm7973_vm1  ;;  %vm7981_vm1 = vcmask 326912  }
 0xacf   : > { %v3355_v55 = vpop.xlane.xlu1 %3354 }
 0xad0   : > { %v3358_v52 = vpop.xlane.xlu0 %3357  ;;  %v3769_v21 = vrot.slane %v3355_v55, %v7930_v57 }
 0xad1   : > { %v3773_v13 = vrot.slane %v3358_v52, %v7929_v25 }
 0xad3   : > { %v3367_v45 = vpop.xlane.xlu1 %3366  ;;  %v3774_v27 = vsel %vm1116_vm2, %v3773_v13, %v3769_v21  ;;  %vm7982_vm2 = vmmov %vm7981_vm1 }
 0xad4   : > { %v3361_v63 = vpop.xlane.xlu0 %3360  ;;  %v3788_v34 = vrot.slane %v3367_v45, %v7938_v58  ;;  %v3868_v36 = vsel %vm7982_vm2, %v3867_v6, %v3863_v59 }
 0xad5   : > { %v3778_v53 = vrot.slane %v3361_v63, %v7933_v38  ;;  %v3872_v38 = vrot.slane %v7520_v11, %v7936_v23 }
 0xad7   : > { %v3373_v61 = vpop.xlane.xlu1 %3372  ;;  %v3779_v30 = vsel %vm1123_vm3, %v3778_v53, %v3774_v27  ;;  %vm7983_vm3 = vcmask 392512  }
 0xad8   : > { %v3364_v9 = vpop.xlane.xlu0 %3363  ;;  %v3798_v19 = vrot.slane %v3373_v61, %v7944_v10  ;;  %vm7984_vm4 = vmmov %vm7983_vm3 }
 0xad9   : > { %v3783_v42 = vrot.slane %v3364_v9, %v7932_v49  ;;  %v3877_v49 = vrot.slane %v7522_v14, %v7944_v10  ;;  %v3887_v14 = vrot.slane %v7530_v35, %v7949_v44  ;;  %v3897_v35 = vrot.slane %v7542_v37, %v7952_v48 }
 0xada   : > { %v3907_v37 = vrot.slane %v7554_v43, %v7956_v12 }
 0xadb   : > { %v3784_v31 = vsel %vm7980_vm11, %v3783_v42, %v3779_v30  ;;  %v3379_v56 = vpop.xlane.xlu1 %3378  ;;  %vm7990_vm11 = vmmov %vm7989_vm5 }
 0xadc   : > { %v3370_v25 = vpop.xlane.xlu0 %3369  ;;  %v3789_v47 = vsel %vm7981_vm1, %v3788_v34, %v3784_v31  ;;  %v3808_v10 = vrot.slane %v3379_v56, %v7949_v44  ;;  %vm7991_vm1 = vcmask 720512  }
 0xadd   : > { %v3793_v57 = vrot.slane %v3370_v25, %v7936_v23  ;;  %v3873_v23 = vsel %vm7984_vm4, %v3872_v38, %v3868_v36  ;;  %vm7992_vm2 = vmmov %vm7991_vm1  ;;  %vm7995_vm4 = vcmask 851712  }
 0xade   : > { %v3878_v59 = vsel %vm7986_vm10, %v3877_v49, %v3873_v23 }
 0xadf   : > { %v3794_v51 = vsel %vm7983_vm3, %v3793_v57, %v3789_v47  ;;  %v3385_v29 = vpop.xlane.xlu1 %3384  ;;  %v3883_v41 = vsel %vm7988_vm0, %v3882_v39, %v3878_v59 }
 0xae0   : > { %v3376_v17 = vpop.xlane.xlu0 %3375  ;;  %v3799_v11 = vsel %vm7985_vm8, %v3798_v19, %v3794_v51  ;;  %v3888_v60 = vsel %vm1165_vm9, %v3887_v14, %v3883_v41  ;;  %v3818_v44 = vrot.slane %v3385_v29, %v7952_v48  ;;  %vm7996_vm8 = vmmov %vm7995_vm4 }
 0xae1   : > { %v3803_v58 = vrot.slane %v3376_v17, %v7942_v3  ;;  %v3892_v3 = vrot.slane %v7532_v18, %v7947_v7 }
 0xae3   : > { %v3804_v1 = vsel %vm7987_vm6, %v3803_v58, %v3799_v11  ;;  %v3391_v4 = vpop.xlane.xlu1 %3390  ;;  %v3893_v18 = vsel %vm7990_vm11, %v3892_v3, %v3888_v60 }
 0xae4   : > { %v3382_v5 = vpop.xlane.xlu0 %3381  ;;  %v3809_v22 = vsel %vm1165_vm9, %v3808_v10, %v3804_v1  ;;  %v3898_v0 = vsel %vm7992_vm2, %v3897_v35, %v3893_v18  ;;  %vm7993_vm9 = vcmask 786112   ;;  %v3828_v48 = vrot.slane %v3391_v4, %v7956_v12 }
 0xae5   : > { %v3813_v46 = vrot.slane %v3382_v5, %v7947_v7  ;;  %v3902_v7 = vrot.slane %v7544_v24, %v7950_v62  ;;  %vm7994_vm3 = vmmov %vm7993_vm9 }
 0xae7   : > { %v3814_v20 = vsel %vm7989_vm5, %v3813_v46, %v3809_v22  ;;  %v3397_v2 = vpop.xlane.xlu1 %3396  ;;  %v3903_v24 = vsel %vm7994_vm3, %v3902_v7, %v3898_v0 }
 0xae8   : > { %v3388_v33 = vpop.xlane.xlu0 %3387  ;;  %v3819_v26 = vsel %vm7991_vm1, %v3818_v44, %v3814_v20  ;;  %v3838_v45 = vrot.slane %v3397_v2, %v7959_v8  ;;  %v3908_v43 = vsel %vm7996_vm8, %v3907_v37, %v3903_v24 }
 0xae9   : > { %v3823_v32 = vrot.slane %v3388_v33, %v7950_v62  ;;  %v3912_v62 = vrot.slane %v7556_v40, %v7954_v15 }
 0xaeb   : > { %v3824_v28 = vsel %vm7993_vm9, %v3823_v32, %v3819_v26  ;;  %v3400_v50 = vpop.xlane.xlu1 %3399  ;;  %v3913_v27 = vsel %vm1200_vm14, %v3912_v62, %v3908_v43 }
 0xaec   : > { %v3394_v55 = vpop.xlane.xlu0 %3393  ;;  %v3829_v63 = vsel %vm7995_vm4, %v3828_v48, %v3824_v28  ;;  %v3843_v21 = vrot.slane %v3400_v50, %v7958_v54 }
 0xaed   : > { %v3833_v52 = vrot.slane %v3394_v55, %v7954_v15 }
 0xaef   : > { %v3834_v13 = vsel %vm1200_vm14, %v3833_v52, %v3829_v63  ;;  %v3448_v12 = vpop.xlane.xlu1 %3447 }
 0xaf0   : > { %v3839_v53 = vsel %vm1207_vm15, %v3838_v45, %v3834_v13  ;;  %v3445_v61 = vpop.xlane.xlu0 %3444  ;;  %v3922_v9 = vrot.slane %v3448_v12, %v7958_v54 }
 0xaf1   : > { %v3844_v15 = vsel %vm1214_vm7, %v3843_v21, %v3839_v53  ;;  %v3917_v40 = vrot.slane %v3445_v61, %v7959_v8 }
 0xaf2   : > { %v3926_v30 = vsel %vm1536_vm13, %v3844_v15, %v7560_v16 }
 0xaf3   : > { %v3918_v42 = vsel %vm1207_vm15, %v3917_v40, %v3913_v27 }
 0xaf4   : > { %v3923_v6 = vsel %vm1214_vm7, %v3922_v9, %v3918_v42 }
 0xaf5   : > { %v3927_v54 = vsel %vm1538_vm12, %v3923_v6, %v3926_v30 }
 0xaf6   : > { %3929 = vst [vmem:[%s374_s16] sm:$0x1f] %v3927_v54 }
 0xaf7 PF: > { %p27_p0 = scmp.ge.s32.totalorder %s5097_s19, 4   ;;  %s7997_s10 = smov %s4985_s0 }
 0xaf8   : > { %s7998_s0 = smov %s4989_s11  ;;  %s7999_s11 = smov %s5126_s22 }
 0xaf9   : > { %s8000_s12 = smov %s5097_s19  ;;  %29 = sbr.rel (!%p27_p0) target bundleno = 20 (0x14), region = 108 }
 0xb00   :  { %3949 = vsyncpa [#allocation5], 1 }
 0xb01   :  { %3951 = vsyncpa [#allocation5 + $0x1], 1 }
 0xb02   :  { %3952 = vsyncpa [#allocation7], 1 }
 0xb03   :  { %3954 = vsyncpa [#allocation7 + $0x1], 1 }

// kernel: pointer_net_forward.4
= control target key start
LH: loop header
LB: loop body
LE: loop exit
PB: predicated region body
PF: predicated region fallthrough
CT: control target
= control target key end

     0   :  { %12 = vsyncpa [#allocation5], 0  ;;  %s5253_s0 = inlined_call_operand.hbm [shape: f32[5,2,128], index: 0, kind: input, shape index: {}]   ;;  %s5254_s1 = inlined_call_operand.hbm [shape: f32[2,2,128], index: 1, kind: input, shape index: {}]   ;;  %s5255_s2 = inlined_call_operand.hbm [shape: f32[2,2,128], index: 2, kind: input, shape index: {}]   ;;  %s5256_s3 = inlined_call_operand.hbm [shape: f32[256,512], index: 3, kind: input, shape index: {}]   ;;  %s5257_s4 = inlined_call_operand.hbm [shape: f32[1,512], index: 4, kind: input, shape index: {}]   ;;  %s5258_s5 = inlined_call_operand.hbm [shape: f32[256,512], index: 5, kind: input, shape index: {}]   ;;  %s5259_s6 = inlined_call_operand.hbm [shape: f32[1,512], index: 6, kind: input, shape index: {}]   ;;  %s5260_s7 = inlined_call_operand.hbm [shape: f32[5,2,128], index: 7, kind: output, shape index: {}]  }
   0x1   :  { %13 = vsyncpa [#allocation8], 0 }
   0x2   :  { %14 = vsyncpa [#allocation11], 0 }
   0x3   :  { %15 = vsyncpa [#allocation14], 0 }
   0x4   :  { %16 = vsyncpa [#allocation6], 0  ;;  %s5037_s24 = smov [#allocation7]   ;;  %s5038_s26 = smov [#allocation10]  }
   0x5   :  { %s34_s25 = sshll.u32 %s5037_s24, 4  ;;  %s58_s27 = sshll.u32 %s5038_s26, 4  ;;  %s35_s25 = int_to_ptr.vmem [resolvable:$true] %s34_s25  ;;  %s5088_s27 = int_to_ptr.vmem [resolvable:$true] %s58_s27 }
   0x6   :  { %s4851_s30 = scalar_lea.hbm %s5254_s1, 64 }
   0x7   :  { %p4852_p0 = scmp.ne.s32.totalorder %s5254_s1, %s4851_s30  ;;  %p4855_p1 = scmp.lt.u32.totalorder %s4851_s30, %s5254_s1 }
   0x9   :  { %p4857_p2 = pnand %p4855_p1, %p4852_p0 }
   0xb   :  { %4860 = shalt.err (!%p4857_p2)
}
   0xc   :  { %s4861_s12 = scalar_lea.vmem %s35_s25, 64  ;;  %p4866_p4 = scmp.lt.s32.totalorder %s35_s25, %s35_s25 }
   0xd   :  { %p4862_p3 = scmp.ne.s32.totalorder %s35_s25, %s4861_s12  ;;  %p4867_p5 = scmp.lt.s32.totalorder %s4861_s12, %s4861_s12 }
   0xf   :  { %p4868_p6 = por %p4867_p5, %p4866_p4 }
  0x11   :  { %p4869_p7 = pnand %p4868_p6, %p4862_p3 }
  0x13   :  { %4872 = shalt.err (!%p4869_p7)
}
  0x14   :  { %s5039_s13 = smov 32   ;;  %s5040_s14 = smov 2  }
  0x15   :  { %40 = dma.hbm_to_vmem [thread:$0]  %s5254_s1, 64, %s35_s25, [#allocation8], %s5039_s13, %s5039_s13, %s5040_s14  }
  0x16   :  { %s4873_s19 = scalar_lea.hbm %s5256_s3, 16384 }
  0x17   :  { %p4874_p8 = scmp.ne.s32.totalorder %s5256_s3, %s4873_s19  ;;  %p4877_p9 = scmp.lt.u32.totalorder %s4873_s19, %s5256_s3 }
  0x19   :  { %p4879_p10 = pnand %p4877_p9, %p4874_p8 }
  0x1b   :  { %4882 = shalt.err (!%p4879_p10)
}
  0x1c   :  { %s4883_s24 = scalar_lea.vmem %s5088_s27, 16384  ;;  %p4888_p12 = scmp.lt.s32.totalorder %s5088_s27, %s5088_s27 }
  0x1d   :  { %p4884_p11 = scmp.ne.s32.totalorder %s5088_s27, %s4883_s24  ;;  %p4889_p13 = scmp.lt.s32.totalorder %s4883_s24, %s4883_s24 }
  0x1f   :  { %p4890_p0 = por %p4889_p13, %p4888_p12 }
  0x21   :  { %p4891_p1 = pnand %p4890_p0, %p4884_p11 }
  0x23   :  { %4894 = shalt.err (!%p4891_p1)
}
  0x24   :  { %s5041_s1 = smov 512   ;;  %s5042_s28 = smov [#allocation13]  }
  0x25   :  { %64 = dma.hbm_to_vmem [thread:$0]  %s5256_s3, 16384, %s5088_s27, [#allocation11], %s5041_s1, %s5041_s1, %s5039_s13  }
  0x26   :  { %s80_s29 = sshll.u32 %s5042_s28, 4  ;;  %s5043_s30 = smov [#allocation4]   ;;  %s81_s29 = int_to_ptr.vmem [resolvable:$true] %s80_s29 }
  0x27   :  { %s22_s8 = sshll.u32 %s5043_s30, 4  ;;  %s4895_s11 = scalar_lea.hbm %s5258_s5, 16384  ;;  %s23_s8 = int_to_ptr.vmem [resolvable:$true] %s22_s8 }
  0x28   :  { %p4896_p2 = scmp.ne.s32.totalorder %s5258_s5, %s4895_s11  ;;  %p4899_p3 = scmp.lt.u32.totalorder %s4895_s11, %s5258_s5 }
  0x2a   :  { %p4901_p4 = pnand %p4899_p3, %p4896_p2 }
  0x2c   :  { %4904 = shalt.err (!%p4901_p4)
}
  0x2d   :  { %s4905_s3 = scalar_lea.vmem %s81_s29, 16384  ;;  %p4910_p6 = scmp.lt.s32.totalorder %s81_s29, %s81_s29 }
  0x2e   :  { %p4906_p5 = scmp.ne.s32.totalorder %s81_s29, %s4905_s3  ;;  %p4911_p7 = scmp.lt.s32.totalorder %s4905_s3, %s4905_s3 }
  0x30   :  { %p4912_p8 = por %p4911_p7, %p4910_p6 }
  0x32   :  { %p4913_p9 = pnand %p4912_p8, %p4906_p5 }
  0x34   :  { %4916 = shalt.err (!%p4913_p9)
}
  0x35   :  { %86 = dma.hbm_to_vmem [thread:$0]  %s5258_s5, 16384, %s81_s29, [#allocation14], %s5041_s1, %s5041_s1, %s5039_s13  }
  0x36   :  { %s4917_s21 = scalar_lea.hbm %s5253_s0, 160 }
  0x37   :  { %p4918_p10 = scmp.ne.s32.totalorder %s5253_s0, %s4917_s21  ;;  %p4921_p11 = scmp.lt.u32.totalorder %s4917_s21, %s5253_s0 }
  0x39   :  { %p4923_p12 = pnand %p4921_p11, %p4918_p10 }
  0x3b   :  { %4926 = shalt.err (!%p4923_p12)
}
  0x3c   :  { %s4927_s26 = scalar_lea.vmem %s23_s8, 160  ;;  %p4932_p0 = scmp.lt.s32.totalorder %s23_s8, %s23_s8 }
  0x3d   :  { %p4928_p13 = scmp.ne.s32.totalorder %s23_s8, %s4927_s26  ;;  %p4933_p1 = scmp.lt.s32.totalorder %s4927_s26, %s4927_s26 }
  0x3f   :  { %p4934_p2 = por %p4933_p1, %p4932_p0 }
  0x41   :  { %p4935_p3 = pnand %p4934_p2, %p4928_p13 }
  0x43   :  { %4938 = shalt.err (!%p4935_p3)
}
  0x44   :  { %28 = dma.hbm_to_vmem [thread:$0]  %s5253_s0, 160, %s23_s8, [#allocation5], %s5039_s13, %s5039_s13, %s5040_s14  }
  0x45   :  { %s5044_s28 = smov [#allocation9]   ;;  %s5045_s30 = smov [#allocation12]  }
  0x46   :  { %s46_s29 = sshll.u32 %s5044_s28, 4  ;;  %s71_s9 = sshll.u32 %s5045_s30, 4  ;;  %s47_s29 = int_to_ptr.vmem [resolvable:$true] %s46_s29  ;;  %s72_s9 = int_to_ptr.vmem [resolvable:$true] %s71_s9 }
  0x47   :  { %s4939_s12 = scalar_lea.hbm %s5255_s2, 64 }
  0x48   :  { %p4940_p4 = scmp.ne.s32.totalorder %s5255_s2, %s4939_s12  ;;  %p4943_p5 = scmp.lt.u32.totalorder %s4939_s12, %s5255_s2 }
  0x4a   :  { %p4945_p6 = pnand %p4943_p5, %p4940_p4 }
  0x4c   :  { %4948 = shalt.err (!%p4945_p6)
}
  0x4d   :  { %s4949_s0 = scalar_lea.vmem %s47_s29, 64  ;;  %p4954_p8 = scmp.lt.s32.totalorder %s47_s29, %s47_s29 }
  0x4e   :  { %p4950_p7 = scmp.ne.s32.totalorder %s47_s29, %s4949_s0  ;;  %p4955_p9 = scmp.lt.s32.totalorder %s4949_s0, %s4949_s0 }
  0x50   :  { %p4956_p10 = por %p4955_p9, %p4954_p8 }
  0x52   :  { %p4957_p11 = pnand %p4956_p10, %p4950_p7 }
  0x54   :  { %4960 = shalt.err (!%p4957_p11)
}
  0x55   :  { %52 = dma.hbm_to_vmem [thread:$0]  %s5255_s2, 64, %s47_s29, [#allocation8], %s5039_s13, %s5039_s13, %s5040_s14  }
  0x56   :  { %s4961_s20 = scalar_lea.hbm %s5257_s4, 64 }
  0x57   :  { %p4962_p12 = scmp.ne.s32.totalorder %s5257_s4, %s4961_s20  ;;  %p4965_p13 = scmp.lt.u32.totalorder %s4961_s20, %s5257_s4 }
  0x59   :  { %p4967_p0 = pnand %p4965_p13, %p4962_p12 }
  0x5b   :  { %4970 = shalt.err (!%p4967_p0)
}
  0x5c   :  { %s4971_s25 = scalar_lea.vmem %s72_s9, 64  ;;  %p4976_p2 = scmp.lt.s32.totalorder %s72_s9, %s72_s9 }
  0x5d   :  { %p4972_p1 = scmp.ne.s32.totalorder %s72_s9, %s4971_s25  ;;  %p4977_p3 = scmp.lt.s32.totalorder %s4971_s25, %s4971_s25 }
  0x5f   :  { %p4978_p4 = por %p4977_p3, %p4976_p2 }
  0x61   :  { %p4979_p5 = pnand %p4978_p4, %p4972_p1 }
  0x63   :  { %4982 = shalt.err (!%p4979_p5)
}
  0x64   :  { %74 = dma.hbm_to_vmem [thread:$0]  %s5257_s4, 64, %s72_s9, [#allocation11]  }
  0x65   :  { %s5046_s5 = smov [#allocation15]   ;;  %s4983_s30 = scalar_lea.hbm %s5259_s6, 64 }
  0x66   :  { %s93_s1 = sshll.u32 %s5046_s5, 4  ;;  %p4984_p6 = scmp.ne.s32.totalorder %s5259_s6, %s4983_s30  ;;  %s94_s1 = int_to_ptr.vmem [resolvable:$true] %s93_s1 }
  0x67   :  { %p4987_p7 = scmp.lt.u32.totalorder %s4983_s30, %s5259_s6 }
  0x69   :  { %p4989_p8 = pnand %p4987_p7, %p4984_p6 }
  0x6b   :  { %4992 = shalt.err (!%p4989_p8)
}
  0x6c   :  { %s4993_s16 = scalar_lea.vmem %s94_s1, 64  ;;  %p4998_p10 = scmp.lt.s32.totalorder %s94_s1, %s94_s1 }
  0x6d   :  { %p4994_p9 = scmp.ne.s32.totalorder %s94_s1, %s4993_s16  ;;  %p4999_p11 = scmp.lt.s32.totalorder %s4993_s16, %s4993_s16 }
  0x6f   :  { %p5000_p12 = por %p4999_p11, %p4998_p10 }
  0x71   :  { %p5001_p13 = pnand %p5000_p12, %p4994_p9 }
  0x73   :  { %5004 = shalt.err (!%p5001_p13)
}
  0x74   :  { %96 = dma.hbm_to_vmem [thread:$0]  %s5259_s6, 64, %s94_s1, [#allocation14]  }
  0x75   :  { %5027 = dma.done.wait [#allocation5], 160  }
  0x76   :  { %5028 = vsyncadd [#allocation5], 4294967136 }
  0x77   :  { %5029 = dma.done.wait [#allocation8], 128  }
  0x78   :  { %5030 = vsyncadd [#allocation8], 4294967168 }
  0x79   :  { %5031 = dma.done.wait [#allocation11], 16448  }
  0x7a   :  { %5032 = vsyncadd [#allocation11], 4294950848 }
  0x7b   :  { %5033 = dma.done.wait [#allocation14], 16448  }
  0x7c   :  { %5034 = vsyncadd [#allocation14], 4294950848  ;;  %v132_v0 = vld [vmem:[#allocation10 + $0x8] sm:$0xff]  ;;  %v131_v2 = vld [vmem:[#allocation10] sm:$0xff]  ;;  %s5047_s6 = smov [#allocation16]  }
  0x7d   :  { %v136_v1 = vld [vmem:[#allocation10 + $0x28] sm:$0xff]  ;;  %v135_v4 = vld [vmem:[#allocation10 + $0x20] sm:$0xff]  ;;  %v134_v18 = vld [vmem:[#allocation10 + $0x18] sm:$0xff]  ;;  %s3355_s17 = sshll.u32 %s5047_s6, 4  ;;  %s3356_s17 = int_to_ptr.vmem [resolvable:$true] %s3355_s17 }
  0x7e   :  { %v3400_v3 = vpack.c.bf16 %v136_v1, %v132_v0  ;;  %v140_v5 = vld [vmem:[#allocation10 + $0x48] sm:$0xff]  ;;  %v3402_v7 = vpack.c.bf16 %v135_v4, %v131_v2  ;;  %v139_v9 = vld [vmem:[#allocation10 + $0x40] sm:$0xff]  ;;  %v138_v19 = vld [vmem:[#allocation10 + $0x38] sm:$0xff]  ;;  %s5005_s3 = scalar_lea.vmem %s3356_s17, 160  ;;  %p5010_p1 = scmp.lt.s32.totalorder %s3356_s17, %s3356_s17 }
  0x7f   :  { %v144_v6 = vld [vmem:[#allocation10 + $0x68] sm:$0xff]  ;;  %v143_v10 = vld [vmem:[#allocation10 + $0x60] sm:$0xff]  ;;  %v3464_v21 = vpack.c.bf16 %v138_v19, %v134_v18  ;;  %v133_v22 = vld [vmem:[#allocation10 + $0x10] sm:$0xff]  ;;  %p5006_p0 = scmp.ne.s32.totalorder %s3356_s17, %s5005_s3  ;;  %p5011_p2 = scmp.lt.s32.totalorder %s5005_s3, %s5005_s3 }
  0x80   :  { %v3404_v8 = vpack.c.bf16 %v144_v6, %v140_v5  ;;  %v148_v11 = vld [vmem:[#allocation10 + $0x88] sm:$0xff]  ;;  %3401 = vmatprep.subr.bf16.mxu0 %v3400_v3  ;;  %v3406_v13 = vpack.c.bf16 %v143_v10, %v139_v9  ;;  %v147_v14 = vld [vmem:[#allocation10 + $0x80] sm:$0xff]  ;;  %v137_v23 = vld [vmem:[#allocation10 + $0x30] sm:$0xff] }
  0x81   :  { %v152_v12 = vld [vmem:[#allocation10 + $0xa8] sm:$0xff]  ;;  %3403 = vmatpush1.bf16.msra.mxu0 %v3402_v7  ;;  %v151_v15 = vld [vmem:[#allocation10 + $0xa0] sm:$0xff]  ;;  %v3466_v24 = vpack.c.bf16 %v137_v23, %v133_v22  ;;  %3465 = vmatprep.subr.bf16.mxu1 %v3464_v21  ;;  %v142_v26 = vld [vmem:[#allocation10 + $0x58] sm:$0xff]  ;;  %p5012_p3 = por %p5011_p2, %p5010_p1 }
  0x82   :  { %3405 = vmatprep.subr.bf16.mxu0 %v3404_v8  ;;  %v3408_v16 = vpack.c.bf16 %v152_v12, %v148_v11  ;;  %v156_v17 = vld [vmem:[#allocation10 + $0xc8] sm:$0xff]  ;;  %v3410_v25 = vpack.c.bf16 %v151_v15, %v147_v14  ;;  %v146_v27 = vld [vmem:[#allocation10 + $0x78] sm:$0xff]  ;;  %v141_v28 = vld [vmem:[#allocation10 + $0x50] sm:$0xff] }
  0x83   :  { %v160_v20 = vld [vmem:[#allocation10 + $0xe8] sm:$0xff]  ;;  %v155_v30 = vld [vmem:[#allocation10 + $0xc0] sm:$0xff]  ;;  %3467 = vmatpush1.bf16.msra.mxu1 %v3466_v24  ;;  %v3468_v32 = vpack.c.bf16 %v146_v27, %v142_v26  ;;  %v145_v33 = vld [vmem:[#allocation10 + $0x70] sm:$0xff]  ;;  %p5013_p4 = pnand %p5012_p3, %p5006_p0 }
  0x84   :  { %v3412_v29 = vpack.c.bf16 %v160_v20, %v156_v17  ;;  %v159_v31 = vld [vmem:[#allocation10 + $0xe0] sm:$0xff]  ;;  %v164_v34 = vld [vmem:[#allocation10 + $0x108] sm:$0xff]  ;;  %v3470_v36 = vpack.c.bf16 %v145_v33, %v141_v28  ;;  %v150_v37 = vld [vmem:[#allocation10 + $0x98] sm:$0xff] }
  0x85   :  { %3407 = vmatpush1.bf16.msra.mxu0 %v3406_v13  ;;  %v168_v35 = vld [vmem:[#allocation10 + $0x128] sm:$0xff]  ;;  %3469 = vmatprep.subr.bf16.mxu1 %v3468_v32  ;;  %v154_v38 = vld [vmem:[#allocation10 + $0xb8] sm:$0xff]  ;;  %v149_v39 = vld [vmem:[#allocation10 + $0x90] sm:$0xff]  ;;  %v3414_v41 = vpack.c.bf16 %v159_v31, %v155_v30 }
  0x86   :  { %3409 = vmatprep.subr.bf16.mxu0 %v3408_v16  ;;  %v153_v40 = vld [vmem:[#allocation10 + $0xb0] sm:$0xff]  ;;  %v163_v42 = vld [vmem:[#allocation10 + $0x100] sm:$0xff]  ;;  %v3472_v44 = vpack.c.bf16 %v154_v38, %v150_v37  ;;  %v3416_v45 = vpack.c.bf16 %v168_v35, %v164_v34  ;;  %v172_v46 = vld [vmem:[#allocation10 + $0x148] sm:$0xff] }
  0x87   :  { %v167_v43 = vld [vmem:[#allocation10 + $0x120] sm:$0xff]  ;;  %3471 = vmatpush1.bf16.msra.mxu1 %v3470_v36  ;;  %v3474_v47 = vpack.c.bf16 %v153_v40, %v149_v39  ;;  %v158_v48 = vld [vmem:[#allocation10 + $0xd8] sm:$0xff]  ;;  %v176_v50 = vld [vmem:[#allocation10 + $0x168] sm:$0xff] }
  0x88   :  { %v162_v49 = vld [vmem:[#allocation10 + $0xf8] sm:$0xff]  ;;  %3473 = vmatprep.subr.bf16.mxu1 %v3472_v44  ;;  %v157_v52 = vld [vmem:[#allocation10 + $0xd0] sm:$0xff]  ;;  %v3418_v54 = vpack.c.bf16 %v167_v43, %v163_v42  ;;  %v3420_v57 = vpack.c.bf16 %v176_v50, %v172_v46  ;;  %v171_v58 = vld [vmem:[#allocation10 + $0x140] sm:$0xff] }
  0x89   :  { %3411 = vmatpush1.bf16.msra.mxu0 %v3410_v25  ;;  %v3476_v51 = vpack.c.bf16 %v162_v49, %v158_v48  ;;  %v161_v53 = vld [vmem:[#allocation10 + $0xf0] sm:$0xff]  ;;  %v166_v55 = vld [vmem:[#allocation10 + $0x118] sm:$0xff]  ;;  %v175_v59 = vld [vmem:[#allocation10 + $0x160] sm:$0xff] }
  0x8a   :  { %3413 = vmatprep.subr.bf16.mxu0 %v3412_v29  ;;  %v170_v56 = vld [vmem:[#allocation10 + $0x138] sm:$0xff]  ;;  %v180_v60 = vld [vmem:[#allocation10 + $0x188] sm:$0xff]  ;;  %v3478_v61 = vpack.c.bf16 %v161_v53, %v157_v52  ;;  %v165_v0 = vld [vmem:[#allocation10 + $0x110] sm:$0xff]  ;;  %v3422_v4 = vpack.c.bf16 %v175_v59, %v171_v58 }
  0x8b   :  { %3475 = vmatpush1.bf16.msra.mxu1 %v3474_v47  ;;  %v184_v62 = vld [vmem:[#allocation10 + $0x1a8] sm:$0xff]  ;;  %v3480_v63 = vpack.c.bf16 %v170_v56, %v166_v55  ;;  %v169_v1 = vld [vmem:[#allocation10 + $0x130] sm:$0xff]  ;;  %v174_v2 = vld [vmem:[#allocation10 + $0x158] sm:$0xff] }
  0x8c   :  { %3477 = vmatprep.subr.bf16.mxu1 %v3476_v51  ;;  %v178_v3 = vld [vmem:[#allocation10 + $0x178] sm:$0xff]  ;;  %v3424_v5 = vpack.c.bf16 %v184_v62, %v180_v60  ;;  %v179_v6 = vld [vmem:[#allocation10 + $0x180] sm:$0xff]  ;;  %v188_v8 = vld [vmem:[#allocation10 + $0x1c8] sm:$0xff]  ;;  %v3482_v9 = vpack.c.bf16 %v169_v1, %v165_v0 }
  0x8d   :  { %3415 = vmatpush1.bf16.msra.mxu0 %v3414_v41  ;;  %v183_v7 = vld [vmem:[#allocation10 + $0x1a0] sm:$0xff]  ;;  %v192_v10 = vld [vmem:[#allocation10 + $0x1e8] sm:$0xff]  ;;  %v3484_v11 = vpack.c.bf16 %v178_v3, %v174_v2  ;;  %v173_v12 = vld [vmem:[#allocation10 + $0x150] sm:$0xff] }
  0x8e   :  { %3417 = vmatprep.subr.bf16.mxu0 %v3416_v45  ;;  %v177_v13 = vld [vmem:[#allocation10 + $0x170] sm:$0xff]  ;;  %v182_v14 = vld [vmem:[#allocation10 + $0x198] sm:$0xff]  ;;  %v3426_v16 = vpack.c.bf16 %v183_v7, %v179_v6  ;;  %v3428_v17 = vpack.c.bf16 %v192_v10, %v188_v8  ;;  %v187_v18 = vld [vmem:[#allocation10 + $0x1c0] sm:$0xff] }
  0x8f   :  { %3479 = vmatpush1.bf16.msra.mxu1 %v3478_v61  ;;  %v186_v15 = vld [vmem:[#allocation10 + $0x1b8] sm:$0xff]  ;;  %v191_v19 = vld [vmem:[#allocation10 + $0x1e0] sm:$0xff]  ;;  %v196_v20 = vld [vmem:[#allocation10 + $0x208] sm:$0xff]  ;;  %v3486_v21 = vpack.c.bf16 %v177_v13, %v173_v12 }
  0x90   :  { %3481 = vmatprep.subr.bf16.mxu1 %v3480_v63  ;;  %v200_v22 = vld [vmem:[#allocation10 + $0x228] sm:$0xff]  ;;  %v3488_v23 = vpack.c.bf16 %v186_v15, %v182_v14  ;;  %v181_v24 = vld [vmem:[#allocation10 + $0x190] sm:$0xff]  ;;  %v190_v26 = vld [vmem:[#allocation10 + $0x1d8] sm:$0xff]  ;;  %v3430_v28 = vpack.c.bf16 %v191_v19, %v187_v18 }
  0x91   :  { %3419 = vmatpush1.bf16.msra.mxu0 %v3418_v54  ;;  %v185_v25 = vld [vmem:[#allocation10 + $0x1b0] sm:$0xff]  ;;  %v194_v27 = vld [vmem:[#allocation10 + $0x1f8] sm:$0xff]  ;;  %v3432_v29 = vpack.c.bf16 %v200_v22, %v196_v20  ;;  %v195_v30 = vld [vmem:[#allocation10 + $0x200] sm:$0xff] }
  0x92   :  { %3421 = vmatprep.subr.bf16.mxu0 %v3420_v57  ;;  %v199_v31 = vld [vmem:[#allocation10 + $0x220] sm:$0xff]  ;;  %v204_v32 = vld [vmem:[#allocation10 + $0x248] sm:$0xff]  ;;  %v3490_v33 = vpack.c.bf16 %v185_v25, %v181_v24  ;;  %v3492_v35 = vpack.c.bf16 %v194_v27, %v190_v26  ;;  %v189_v36 = vld [vmem:[#allocation10 + $0x1d0] sm:$0xff] }
  0x93   :  { %3483 = vmatpush1.bf16.msra.mxu1 %v3482_v9  ;;  %v208_v34 = vld [vmem:[#allocation10 + $0x268] sm:$0xff]  ;;  %v193_v37 = vld [vmem:[#allocation10 + $0x1f0] sm:$0xff]  ;;  %v198_v38 = vld [vmem:[#allocation10 + $0x218] sm:$0xff]  ;;  %v3434_v40 = vpack.c.bf16 %v199_v31, %v195_v30 }
  0x94   :  { %3485 = vmatprep.subr.bf16.mxu1 %v3484_v11  ;;  %v202_v39 = vld [vmem:[#allocation10 + $0x238] sm:$0xff]  ;;  %v3436_v41 = vpack.c.bf16 %v208_v34, %v204_v32  ;;  %v203_v42 = vld [vmem:[#allocation10 + $0x240] sm:$0xff]  ;;  %v212_v44 = vld [vmem:[#allocation10 + $0x288] sm:$0xff]  ;;  %v3494_v45 = vpack.c.bf16 %v193_v37, %v189_v36 }
  0x95   :  { %3423 = vmatpush1.bf16.msra.mxu0 %v3422_v4  ;;  %v207_v43 = vld [vmem:[#allocation10 + $0x260] sm:$0xff]  ;;  %v216_v46 = vld [vmem:[#allocation10 + $0x2a8] sm:$0xff]  ;;  %v3496_v47 = vpack.c.bf16 %v202_v39, %v198_v38  ;;  %v197_v48 = vld [vmem:[#allocation10 + $0x210] sm:$0xff] }
  0x96   :  { %3425 = vmatprep.subr.bf16.mxu0 %v3424_v5  ;;  %v201_v49 = vld [vmem:[#allocation10 + $0x230] sm:$0xff]  ;;  %v206_v50 = vld [vmem:[#allocation10 + $0x258] sm:$0xff]  ;;  %v3438_v52 = vpack.c.bf16 %v207_v43, %v203_v42  ;;  %v211_v53 = vld [vmem:[#allocation10 + $0x280] sm:$0xff]  ;;  %v3440_v54 = vpack.c.bf16 %v216_v46, %v212_v44 }
  0x97   :  { %3487 = vmatpush1.bf16.msra.mxu1 %v3486_v21  ;;  %v210_v51 = vld [vmem:[#allocation10 + $0x278] sm:$0xff]  ;;  %v215_v55 = vld [vmem:[#allocation10 + $0x2a0] sm:$0xff]  ;;  %v220_v56 = vld [vmem:[#allocation10 + $0x2c8] sm:$0xff]  ;;  %v3498_v58 = vpack.c.bf16 %v201_v49, %v197_v48 }
  0x98   :  { %3489 = vmatprep.subr.bf16.mxu1 %v3488_v23  ;;  %v224_v57 = vld [vmem:[#allocation10 + $0x2e8] sm:$0xff]  ;;  %v3500_v59 = vpack.c.bf16 %v210_v51, %v206_v50  ;;  %v205_v60 = vld [vmem:[#allocation10 + $0x250] sm:$0xff]  ;;  %v122_v62 = vld [vmem:[#allocation7] sm:$0x3]  ;;  %v3442_v1 = vpack.c.bf16 %v215_v55, %v211_v53 }
  0x99   :  { %3427 = vmatpush1.bf16.msra.mxu0 %v3426_v16  ;;  %v209_v61 = vld [vmem:[#allocation10 + $0x270] sm:$0xff]  ;;  %v214_v63 = vld [vmem:[#allocation10 + $0x298] sm:$0xff]  ;;  %124 = vst [vmem:[#allocation2] sm:$0x3] %v122_v62  ;;  %v3444_v2 = vpack.c.bf16 %v224_v57, %v220_v56  ;;  %v219_v3 = vld [vmem:[#allocation10 + $0x2c0] sm:$0xff] }
  0x9a   :  { %3429 = vmatprep.subr.bf16.mxu0 %v3428_v17  ;;  %v218_v0 = vld [vmem:[#allocation10 + $0x2b8] sm:$0xff]  ;;  %v223_v4 = vld [vmem:[#allocation10 + $0x2e0] sm:$0xff]  ;;  %v228_v5 = vld [vmem:[#allocation10 + $0x308] sm:$0xff]  ;;  %v3502_v6 = vpack.c.bf16 %v209_v61, %v205_v60 }
  0x9b   :  { %3491 = vmatpush1.bf16.msra.mxu1 %v3490_v33  ;;  %v232_v7 = vld [vmem:[#allocation10 + $0x328] sm:$0xff]  ;;  %v3504_v8 = vpack.c.bf16 %v218_v0, %v214_v63  ;;  %v213_v9 = vld [vmem:[#allocation10 + $0x290] sm:$0xff]  ;;  %v222_v11 = vld [vmem:[#allocation10 + $0x2d8] sm:$0xff]  ;;  %v3446_v13 = vpack.c.bf16 %v223_v4, %v219_v3 }
  0x9c   :  { %3493 = vmatprep.subr.bf16.mxu1 %v3492_v35  ;;  %v217_v10 = vld [vmem:[#allocation10 + $0x2b0] sm:$0xff]  ;;  %v226_v12 = vld [vmem:[#allocation10 + $0x2f8] sm:$0xff]  ;;  %v227_v14 = vld [vmem:[#allocation10 + $0x300] sm:$0xff]  ;;  %v3448_v15 = vpack.c.bf16 %v232_v7, %v228_v5 }
  0x9d   :  { %3431 = vmatpush1.bf16.msra.mxu0 %v3430_v28  ;;  %v231_v16 = vld [vmem:[#allocation10 + $0x320] sm:$0xff]  ;;  %v236_v17 = vld [vmem:[#allocation10 + $0x348] sm:$0xff]  ;;  %v3506_v19 = vpack.c.bf16 %v217_v10, %v213_v9  ;;  %v3508_v20 = vpack.c.bf16 %v226_v12, %v222_v11  ;;  %v221_v21 = vld [vmem:[#allocation10 + $0x2d0] sm:$0xff] }
  0x9e   :  { %3433 = vmatprep.subr.bf16.mxu0 %v3432_v29  ;;  %v240_v18 = vld [vmem:[#allocation10 + $0x368] sm:$0xff]  ;;  %v225_v22 = vld [vmem:[#allocation10 + $0x2f0] sm:$0xff]  ;;  %v230_v24 = vld [vmem:[#allocation10 + $0x318] sm:$0xff]  ;;  %v3450_v26 = vpack.c.bf16 %v231_v16, %v227_v14 }
  0x9f   :  { %3495 = vmatpush1.bf16.msra.mxu1 %v3494_v45  ;;  %v234_v25 = vld [vmem:[#allocation10 + $0x338] sm:$0xff]  ;;  %v3452_v27 = vpack.c.bf16 %v240_v18, %v236_v17  ;;  %v235_v28 = vld [vmem:[#allocation10 + $0x340] sm:$0xff]  ;;  %v244_v30 = vld [vmem:[#allocation10 + $0x388] sm:$0xff]  ;;  %v3510_v31 = vpack.c.bf16 %v225_v22, %v221_v21 }
  0xa0   :  { %3497 = vmatprep.subr.bf16.mxu1 %v3496_v47  ;;  %v260_v23 = vld [vmem:[#allocation2] sm:$0x3]  ;;  %v248_v32 = vld [vmem:[#allocation10 + $0x3a8] sm:$0xff]  ;;  %v3512_v33 = vpack.c.bf16 %v234_v25, %v230_v24  ;;  %v229_v34 = vld [vmem:[#allocation10 + $0x310] sm:$0xff] }
  0xa1   :  { %3435 = vmatpush1.bf16.msra.mxu0 %v3434_v40  ;;  %346 = vmatprep.mubr.f32.mxu0 %v260_v23  ;;  %v239_v29 = vld [vmem:[#allocation10 + $0x360] sm:$0xff]  ;;  %v233_v35 = vld [vmem:[#allocation10 + $0x330] sm:$0xff]  ;;  %v238_v36 = vld [vmem:[#allocation10 + $0x358] sm:$0xff]  ;;  %v3456_v39 = vpack.c.bf16 %v248_v32, %v244_v30 }
  0xa2   :  { %3437 = vmatprep.subr.bf16.mxu0 %v3436_v41  ;;  %417 = vmatprep.mubr.f32.mxu1 %v260_v23  ;;  %v242_v37 = vld [vmem:[#allocation10 + $0x378] sm:$0xff]  ;;  %v3454_v38 = vpack.c.bf16 %v239_v29, %v235_v28  ;;  %v243_v40 = vld [vmem:[#allocation10 + $0x380] sm:$0xff]  ;;  %v252_v42 = vld [vmem:[#allocation10 + $0x3c8] sm:$0xff]  ;;  %v3514_v43 = vpack.c.bf16 %v233_v35, %v229_v34 }
  0xa3   :  { %3499 = vmatpush1.bf16.msra.mxu1 %v3498_v58  ;;  %v247_v41 = vld [vmem:[#allocation10 + $0x3a0] sm:$0xff]  ;;  %v256_v44 = vld [vmem:[#allocation10 + $0x3e8] sm:$0xff]  ;;  %v3516_v45 = vpack.c.bf16 %v242_v37, %v238_v36  ;;  %v237_v46 = vld [vmem:[#allocation10 + $0x350] sm:$0xff] }
  0xa4   :  { %3501 = vmatprep.subr.bf16.mxu1 %v3500_v59  ;;  %v241_v47 = vld [vmem:[#allocation10 + $0x370] sm:$0xff]  ;;  %v246_v48 = vld [vmem:[#allocation10 + $0x398] sm:$0xff]  ;;  %v3458_v50 = vpack.c.bf16 %v247_v41, %v243_v40  ;;  %v3460_v51 = vpack.c.bf16 %v256_v44, %v252_v42  ;;  %v255_v53 = vld [vmem:[#allocation10 + $0x3e0] sm:$0xff] }
  0xa5   :  { %3439 = vmatpush1.bf16.msra.mxu0 %v3438_v52  ;;  %v250_v49 = vld [vmem:[#allocation10 + $0x3b8] sm:$0xff]  ;;  %v251_v52 = vld [vmem:[#allocation10 + $0x3c0] sm:$0xff]  ;;  %v245_v55 = vld [vmem:[#allocation10 + $0x390] sm:$0xff] }
  0xa6   :  { %3441 = vmatprep.subr.bf16.mxu0 %v3440_v54  ;;  %v3518_v54 = vpack.c.bf16 %v241_v47, %v237_v46  ;;  %v3520_v56 = vpack.c.bf16 %v250_v49, %v246_v48  ;;  %v249_v57 = vld [vmem:[#allocation10 + $0x3b0] sm:$0xff]  ;;  %v254_v60 = vld [vmem:[#allocation10 + $0x3d8] sm:$0xff]  ;;  %v3462_v62 = vpack.c.bf16 %v255_v53, %v251_v52  ;;  %v455_v3 = vld [vmem:[#allocation13 + $0x20] sm:$0xff] }
  0xa7   :  { %3503 = vmatpush1.bf16.msra.mxu1 %v3502_v6  ;;  %v452_v58 = vld [vmem:[#allocation13 + $0x8] sm:$0xff]  ;;  %v258_v61 = vld [vmem:[#allocation10 + $0x3f8] sm:$0xff]  ;;  %v3522_v63 = vpack.c.bf16 %v249_v57, %v245_v55  ;;  %v463_v16 = vld [vmem:[#allocation13 + $0x60] sm:$0xff] }
  0xa8   :  { %3505 = vmatprep.subr.bf16.mxu1 %v3504_v8  ;;  %v456_v59 = vld [vmem:[#allocation13 + $0x28] sm:$0xff]  ;;  %v3524_v4 = vpack.c.bf16 %v258_v61, %v254_v60  ;;  %v454_v8 = vld [vmem:[#allocation13 + $0x18] sm:$0xff]  ;;  %v457_v18 = vld [vmem:[#allocation13 + $0x30] sm:$0xff] }
  0xa9   :  { %3443 = vmatpush1.bf16.msra.mxu0 %v3442_v1  ;;  %v253_v0 = vld [vmem:[#allocation10 + $0x3d0] sm:$0xff]  ;;  %v3528_v1 = vpack.c.bf16 %v456_v59, %v452_v58  ;;  %v458_v9 = vld [vmem:[#allocation13 + $0x38] sm:$0xff]  ;;  %v130_v10 = vld [vmem:[#allocation4] sm:$0x3] }
  0xaa   :  { %3445 = vmatprep.subr.bf16.mxu0 %v3444_v2  ;;  %v451_v2 = vld [vmem:[#allocation13] sm:$0xff]  ;;  %v257_v5 = vld [vmem:[#allocation10 + $0x3f0] sm:$0xff]  ;;  %v3592_v17 = vpack.c.bf16 %v458_v9, %v454_v8  ;;  %v462_v21 = vld [vmem:[#allocation13 + $0x58] sm:$0xff] }
  0xab   :  { %3507 = vmatpush1.bf16.msra.mxu1 %v3506_v19  ;;  %v460_v6 = vld [vmem:[#allocation13 + $0x48] sm:$0xff]  ;;  %v3530_v11 = vpack.c.bf16 %v455_v3, %v451_v2  ;;  %v3526_v12 = vpack.c.bf16 %v257_v5, %v253_v0  ;;  %v466_v22 = vld [vmem:[#allocation13 + $0x78] sm:$0xff]  ;;  %v461_v25 = vld [vmem:[#allocation13 + $0x50] sm:$0xff] }
  0xac   :  { %3509 = vmatprep.subr.bf16.mxu1 %v3508_v20  ;;  %v464_v7 = vld [vmem:[#allocation13 + $0x68] sm:$0xff]  ;;  %v471_v28 = vld [vmem:[#allocation13 + $0xa0] sm:$0xff]  ;;  %v3596_v29 = vpack.c.bf16 %v466_v22, %v462_v21  ;;  %v465_v30 = vld [vmem:[#allocation13 + $0x70] sm:$0xff] }
  0xad   :  { %3447 = vmatpush1.bf16.msra.mxu0 %v3446_v13  ;;  %v453_v13 = vld [vmem:[#allocation13 + $0x10] sm:$0xff]  ;;  %v3532_v14 = vpack.c.bf16 %v464_v7, %v460_v6  ;;  %v468_v19 = vld [vmem:[#allocation13 + $0x88] sm:$0xff]  ;;  %v474_v34 = vld [vmem:[#allocation13 + $0xb8] sm:$0xff]  ;;  %v3598_v36 = vpack.c.bf16 %v465_v30, %v461_v25 }
  0xae   :  { %3449 = vmatprep.subr.bf16.mxu0 %v3448_v15  ;;  %v459_v15 = vld [vmem:[#allocation13 + $0x40] sm:$0xff]  ;;  %v472_v20 = vld [vmem:[#allocation13 + $0xa8] sm:$0xff]  ;;  %v3594_v24 = vpack.c.bf16 %v457_v18, %v453_v13  ;;  %v469_v37 = vld [vmem:[#allocation13 + $0x90] sm:$0xff] }
  0xaf   :  { %3511 = vmatpush1.bf16.msra.mxu1 %v3510_v31  ;;  %v3534_v23 = vpack.c.bf16 %v463_v16, %v459_v15  ;;  %v476_v31 = vld [vmem:[#allocation13 + $0xc8] sm:$0xff]  ;;  %v479_v40 = vld [vmem:[#allocation13 + $0xe0] sm:$0xff]  ;;  %v473_v42 = vld [vmem:[#allocation13 + $0xb0] sm:$0xff] }
  0xb0   :  { %3513 = vmatprep.subr.bf16.mxu1 %v3512_v33  ;;  %v480_v32 = vld [vmem:[#allocation13 + $0xe8] sm:$0xff]  ;;  %v470_v33 = vld [vmem:[#allocation13 + $0x98] sm:$0xff]  ;;  %v3602_v48 = vpack.c.bf16 %v473_v42, %v469_v37  ;;  %v477_v53 = vld [vmem:[#allocation13 + $0xd0] sm:$0xff] }
  0xb1   :  { %3451 = vmatpush1.bf16.msra.mxu0 %v3450_v26  ;;  %v3536_v26 = vpack.c.bf16 %v472_v20, %v468_v19  ;;  %v3600_v41 = vpack.c.bf16 %v474_v34, %v470_v33  ;;  %v488_v44 = vld [vmem:[#allocation13 + $0x128] sm:$0xff]  ;;  %v482_v46 = vld [vmem:[#allocation13 + $0xf8] sm:$0xff]  ;;  %v485_v60 = vld [vmem:[#allocation13 + $0x110] sm:$0xff] }
  0xb2   :  { %3453 = vmatprep.subr.bf16.mxu0 %v3452_v27  ;;  %v467_v27 = vld [vmem:[#allocation13 + $0x80] sm:$0xff]  ;;  %v486_v55 = vld [vmem:[#allocation13 + $0x118] sm:$0xff]  ;;  %v489_v61 = vld [vmem:[#allocation13 + $0x130] sm:$0xff] }
  0xb3   :  { %3515 = vmatpush1.bf16.msra.mxu1 %v3514_v43  ;;  %v3538_v35 = vpack.c.bf16 %v471_v28, %v467_v27  ;;  %v484_v43 = vld [vmem:[#allocation13 + $0x108] sm:$0xff]  ;;  %v491_v2 = vld [vmem:[#allocation13 + $0x140] sm:$0xff]  ;;  %v498_v6 = vld [vmem:[#allocation13 + $0x178] sm:$0xff] }
  0xb4   :  { %3517 = vmatprep.subr.bf16.mxu1 %v3516_v45  ;;  %v478_v45 = vld [vmem:[#allocation13 + $0xd8] sm:$0xff]  ;;  %v3544_v49 = vpack.c.bf16 %v488_v44, %v484_v43  ;;  %v496_v0 = vld [vmem:[#allocation13 + $0x168] sm:$0xff]  ;;  %v495_v3 = vld [vmem:[#allocation13 + $0x160] sm:$0xff] }
  0xb5   :  { %3455 = vmatpush1.bf16.msra.mxu0 %v3454_v38  ;;  %v3540_v38 = vpack.c.bf16 %v480_v32, %v476_v31  ;;  %v3604_v52 = vpack.c.bf16 %v482_v46, %v478_v45  ;;  %v3550_v5 = vpack.c.bf16 %v495_v3, %v491_v2  ;;  %v493_v7 = vld [vmem:[#allocation13 + $0x150] sm:$0xff]  ;;  %v503_v15 = vld [vmem:[#allocation13 + $0x1a0] sm:$0xff]  ;;  %v502_v16 = vld [vmem:[#allocation13 + $0x198] sm:$0xff] }
  0xb6   :  { %3457 = vmatprep.subr.bf16.mxu0 %v3456_v39  ;;  %v475_v39 = vld [vmem:[#allocation13 + $0xc0] sm:$0xff]  ;;  %v497_v8 = vld [vmem:[#allocation13 + $0x170] sm:$0xff]  ;;  %v506_v18 = vld [vmem:[#allocation13 + $0x1b8] sm:$0xff] }
  0xb7   :  { %3519 = vmatpush1.bf16.msra.mxu1 %v3518_v54  ;;  %v3542_v47 = vpack.c.bf16 %v479_v40, %v475_v39  ;;  %v481_v54 = vld [vmem:[#allocation13 + $0xf0] sm:$0xff]  ;;  %v3616_v21 = vpack.c.bf16 %v506_v18, %v502_v16  ;;  %v511_v27 = vld [vmem:[#allocation13 + $0x1e0] sm:$0xff]  ;;  %v510_v28 = vld [vmem:[#allocation13 + $0x1d8] sm:$0xff] }
  0xb8   :  { %3521 = vmatprep.subr.bf16.mxu1 %v3520_v56  ;;  %v490_v56 = vld [vmem:[#allocation13 + $0x138] sm:$0xff]  ;;  %v3606_v58 = vpack.c.bf16 %v481_v54, %v477_v53  ;;  %v501_v19 = vld [vmem:[#allocation13 + $0x190] sm:$0xff]  ;;  %v519_v39 = vld [vmem:[#allocation13 + $0x220] sm:$0xff] }
  0xb9   :  { %3459 = vmatpush1.bf16.msra.mxu0 %v3458_v50  ;;  %v483_v50 = vld [vmem:[#allocation13 + $0x100] sm:$0xff]  ;;  %v3608_v59 = vpack.c.bf16 %v490_v56, %v486_v55  ;;  %v505_v20 = vld [vmem:[#allocation13 + $0x1b0] sm:$0xff]  ;;  %v514_v30 = vld [vmem:[#allocation13 + $0x1f8] sm:$0xff] }
  0xba   :  { %3461 = vmatprep.subr.bf16.mxu0 %v3460_v51  ;;  %v487_v51 = vld [vmem:[#allocation13 + $0x120] sm:$0xff]  ;;  %v3618_v22 = vpack.c.bf16 %v505_v20, %v501_v19  ;;  %v509_v31 = vld [vmem:[#allocation13 + $0x1d0] sm:$0xff]  ;;  %v3620_v33 = vpack.c.bf16 %v514_v30, %v510_v28  ;;  %v518_v40 = vld [vmem:[#allocation13 + $0x218] sm:$0xff] }
  0xbb   :  { %3523 = vmatpush1.bf16.msra.mxu1 %v3522_v63  ;;  %v3546_v57 = vpack.c.bf16 %v487_v51, %v483_v50  ;;  %v492_v63 = vld [vmem:[#allocation13 + $0x148] sm:$0xff]  ;;  %v513_v32 = vld [vmem:[#allocation13 + $0x1f0] sm:$0xff]  ;;  %v522_v42 = vld [vmem:[#allocation13 + $0x238] sm:$0xff] }
  0xbc   :  { %3525 = vmatprep.subr.bf16.mxu1 %v3524_v4  ;;  %v494_v4 = vld [vmem:[#allocation13 + $0x158] sm:$0xff]  ;;  %v3622_v34 = vpack.c.bf16 %v513_v32, %v509_v31  ;;  %v517_v43 = vld [vmem:[#allocation13 + $0x210] sm:$0xff]  ;;  %v3624_v45 = vpack.c.bf16 %v522_v42, %v518_v40  ;;  %v523_v50 = vld [vmem:[#allocation13 + $0x240] sm:$0xff] }
  0xbd   :  { %3463 = vmatpush1.bf16.msra.mxu0 %v3462_v62  ;;  %v3610_v62 = vpack.c.bf16 %v489_v61, %v485_v60  ;;  %v3612_v9 = vpack.c.bf16 %v498_v6, %v494_v4  ;;  %v521_v44 = vld [vmem:[#allocation13 + $0x230] sm:$0xff]  ;;  %v527_v51 = vld [vmem:[#allocation13 + $0x260] sm:$0xff]  ;;  %v530_v54 = vld [vmem:[#allocation13 + $0x278] sm:$0xff] }
  0xbe   :  { %3529 = vmatprep.subr.bf16.mxu0 %v3528_v1  ;;  %v3548_v1 = vpack.c.bf16 %v496_v0, %v492_v63  ;;  %v3626_v46 = vpack.c.bf16 %v521_v44, %v517_v43  ;;  %v3566_v53 = vpack.c.bf16 %v527_v51, %v523_v50  ;;  %v525_v55 = vld [vmem:[#allocation13 + $0x250] sm:$0xff]  ;;  %v532_v60 = vld [vmem:[#allocation13 + $0x288] sm:$0xff]  ;;  %v531_v63 = vld [vmem:[#allocation13 + $0x280] sm:$0xff] }
  0xbf   :  { %3527 = vmatpush1.bf16.msra.mxu1 %v3526_v12  ;;  %v504_v12 = vld [vmem:[#allocation13 + $0x1a8] sm:$0xff]  ;;  %v529_v56 = vld [vmem:[#allocation13 + $0x270] sm:$0xff]  ;;  %v535_v0 = vld [vmem:[#allocation13 + $0x2a0] sm:$0xff] }
  0xc0   :  { %347 = vmatmul.mubr.f32.vlgmr.msra.gmra.mrb[0].mxu0 %v130_v10  ;;  %3593 = vmatprep.subr.bf16.mxu1 %v3592_v17  ;;  %v536_v61 = vld [vmem:[#allocation13 + $0x2a8] sm:$0xff]  ;;  %v3570_v2 = vpack.c.bf16 %v535_v0, %v531_v63  ;;  %v538_v3 = vld [vmem:[#allocation13 + $0x2b8] sm:$0xff]  ;;  %v533_v4 = vld [vmem:[#allocation13 + $0x290] sm:$0xff] }
  0xc1   :  { %3531 = vmatpush1.bf16.msra.mxu0 %v3530_v11  ;;  %v500_v11 = vld [vmem:[#allocation13 + $0x188] sm:$0xff]  ;;  %v541_v16 = vld [vmem:[#allocation13 + $0x2d0] sm:$0xff]  ;;  %v570_v50 = vld [vmem:[#allocation13 + $0x3b8] sm:$0xff] }
  0xc2   :  { %3533 = vmatprep.subr.bf16.mxu0 %v3532_v14  ;;  %418 = vmatmul.mubr.f32.vlgmr.msra.gmra.mrb[0].mxu1 %v130_v10  ;;  %v3614_v10 = vpack.c.bf16 %v497_v8, %v493_v7  ;;  %v3552_v13 = vpack.c.bf16 %v504_v12, %v500_v11  ;;  %v499_v14 = vld [vmem:[#allocation13 + $0x180] sm:$0xff]  ;;  %v540_v8 = vld [vmem:[#allocation13 + $0x2c8] sm:$0xff]  ;;  %v549_v28 = vld [vmem:[#allocation13 + $0x310] sm:$0xff] }
  0xc3   :  { %3595 = vmatpush1.bf16.msra.mxu1 %v3594_v24  ;;  %v3554_v17 = vpack.c.bf16 %v503_v15, %v499_v14  ;;  %v512_v24 = vld [vmem:[#allocation13 + $0x1e8] sm:$0xff]  ;;  %v539_v11 = vld [vmem:[#allocation13 + $0x2c0] sm:$0xff]  ;;  %v546_v15 = vld [vmem:[#allocation13 + $0x2f8] sm:$0xff] }
  0xc4   :  { %3597 = vmatprep.subr.bf16.mxu1 %v3596_v29  ;;  %v543_v12 = vld [vmem:[#allocation13 + $0x2e0] sm:$0xff]  ;;  %v548_v20 = vld [vmem:[#allocation13 + $0x308] sm:$0xff]  ;;  %v557_v40 = vld [vmem:[#allocation13 + $0x350] sm:$0xff] }
  0xc5   :  { %3535 = vmatpush1.bf16.msra.mxu0 %v3534_v23  ;;  %v508_v23 = vld [vmem:[#allocation13 + $0x1c8] sm:$0xff]  ;;  %v3574_v14 = vpack.c.bf16 %v543_v12, %v539_v11  ;;  %v573_v63 = vld [vmem:[#allocation13 + $0x3d0] sm:$0xff]  ;;  %v262_v12 = vlaneseq }
  0xc6   :  { %3537 = vmatprep.subr.bf16.mxu0 %v3536_v26  ;;  %v3556_v25 = vpack.c.bf16 %v512_v24, %v508_v23  ;;  %v507_v26 = vld [vmem:[#allocation13 + $0x1c0] sm:$0xff]  ;;  %v556_v32 = vld [vmem:[#allocation13 + $0x348] sm:$0xff] }
  0xc7   :  { %3599 = vmatpush1.bf16.msra.mxu1 %v3598_v36  ;;  %v3558_v29 = vpack.c.bf16 %v511_v27, %v507_v26  ;;  %v520_v36 = vld [vmem:[#allocation13 + $0x228] sm:$0xff]  ;;  %v547_v23 = vld [vmem:[#allocation13 + $0x300] sm:$0xff]  ;;  %v554_v27 = vld [vmem:[#allocation13 + $0x338] sm:$0xff] }
  0xc8   :  { %3601 = vmatprep.subr.bf16.mxu1 %v3600_v41  ;;  %v551_v24 = vld [vmem:[#allocation13 + $0x320] sm:$0xff]  ;;  %v564_v44 = vld [vmem:[#allocation13 + $0x388] sm:$0xff] }
  0xc9   :  { %3539 = vmatpush1.bf16.msra.mxu0 %v3538_v35  ;;  %v516_v35 = vld [vmem:[#allocation13 + $0x208] sm:$0xff]  ;;  %v3578_v26 = vpack.c.bf16 %v551_v24, %v547_v23 }
  0xca   :  { %3541 = vmatprep.subr.bf16.mxu0 %v3540_v38  ;;  %v3560_v37 = vpack.c.bf16 %v520_v36, %v516_v35  ;;  %v515_v38 = vld [vmem:[#allocation13 + $0x200] sm:$0xff] }
  0xcb   :  { %3603 = vmatpush1.bf16.msra.mxu1 %v3602_v48  ;;  %v3562_v41 = vpack.c.bf16 %v519_v39, %v515_v38  ;;  %v528_v48 = vld [vmem:[#allocation13 + $0x268] sm:$0xff]  ;;  %v555_v35 = vld [vmem:[#allocation13 + $0x340] sm:$0xff]  ;;  %v562_v39 = vld [vmem:[#allocation13 + $0x378] sm:$0xff] }
  0xcc   :  { %3605 = vmatprep.subr.bf16.mxu1 %v3604_v52  ;;  %v526_v52 = vld [vmem:[#allocation13 + $0x258] sm:$0xff]  ;;  %v559_v36 = vld [vmem:[#allocation13 + $0x360] sm:$0xff] }
  0xcd   :  { %3543 = vmatpush1.bf16.msra.mxu0 %v3542_v47  ;;  %v524_v47 = vld [vmem:[#allocation13 + $0x248] sm:$0xff]  ;;  %v3582_v38 = vpack.c.bf16 %v559_v36, %v555_v35 }
  0xce   :  { %3545 = vmatprep.subr.bf16.mxu0 %v3544_v49  ;;  %v3564_v49 = vpack.c.bf16 %v528_v48, %v524_v47  ;;  %v567_v48 = vld [vmem:[#allocation13 + $0x3a0] sm:$0xff] }
  0xcf   :  { %3607 = vmatpush1.bf16.msra.mxu1 %v3606_v58  ;;  %v3628_v58 = vpack.c.bf16 %v530_v54, %v526_v52  ;;  %v569_v54 = vld [vmem:[#allocation13 + $0x3b0] sm:$0xff] }
  0xd0   :  { %3609 = vmatprep.subr.bf16.mxu1 %v3608_v59  ;;  %v3630_v59 = vpack.c.bf16 %v529_v56, %v525_v55  ;;  %v572_v55 = vld [vmem:[#allocation13 + $0x3c8] sm:$0xff] }
  0xd1   :  { %3547 = vmatpush1.bf16.msra.mxu0 %v3546_v57  ;;  %v126_v57 = vld [vmem:[#allocation9] sm:$0x3] }
  0xd2   :  { %3549 = vmatprep.subr.bf16.mxu0 %v3548_v1  ;;  %128 = vst [vmem:[#allocation3] sm:$0x3] %v126_v57  ;;  %v534_v1 = vld [vmem:[#allocation13 + $0x298] sm:$0xff]  ;;  %v576_v57 = vld [vmem:[#allocation13 + $0x3e8] sm:$0xff] }
  0xd3   :  { %3611 = vmatpush1.bf16.msra.mxu1 %v3610_v62  ;;  %v3568_v62 = vpack.c.bf16 %v536_v61, %v532_v60  ;;  %v3632_v6 = vpack.c.bf16 %v538_v3, %v534_v1  ;;  %v3588_v60 = vpack.c.bf16 %v576_v57, %v572_v55  ;;  %v574_v61 = vld [vmem:[#allocation13 + $0x3d8] sm:$0xff]  ;;  %v123_v3 = vld [vmem:[#allocation7 + $0x2] sm:$0x3] }
  0xd4   :  { %3613 = vmatprep.subr.bf16.mxu1 %v3612_v9  ;;  %v544_v9 = vld [vmem:[#allocation13 + $0x2e8] sm:$0xff]  ;;  %125 = vst [vmem:[#allocation2 + $0x2] sm:$0x3] %v123_v3  ;;  %v791_v55 = vld [vmem:[#allocation10 + $0x78] sm:$0xff] }
  0xd5   :  { %3551 = vmatpush1.bf16.msra.mxu0 %v3550_v5  ;;  %v537_v5 = vld [vmem:[#allocation13 + $0x2b0] sm:$0xff]  ;;  %v797_v3 = vld [vmem:[#allocation10 + $0xa8] sm:$0xff] }
  0xd6   :  { %3553 = vmatprep.subr.bf16.mxu0 %v3552_v13  ;;  %v3634_v7 = vpack.c.bf16 %v537_v5, %v533_v4  ;;  %v542_v13 = vld [vmem:[#allocation13 + $0x2d8] sm:$0xff]  ;;  %v777_v4 = vld [vmem:[#allocation10 + $0x8] sm:$0xff] }
  0xd7   :  { %3615 = vmatpush1.bf16.msra.mxu1 %v3614_v10  ;;  %v3572_v10 = vpack.c.bf16 %v544_v9, %v540_v8  ;;  %v3636_v18 = vpack.c.bf16 %v546_v15, %v542_v13  ;;  %v781_v5 = vld [vmem:[#allocation10 + $0x28] sm:$0xff]  ;;  %v779_v9 = vld [vmem:[#allocation10 + $0x18] sm:$0xff]  ;;  %v263_v13 = vshrl.u32 %v262_v12, 7  ;;  %v259_v15 = vld [vmem:[#allocation12] sm:$0xf] }
  0xd8   :  { %3617 = vmatprep.subr.bf16.mxu1 %v3616_v21  ;;  %v552_v21 = vld [vmem:[#allocation13 + $0x328] sm:$0xff] }
  0xd9   :  { %3555 = vmatpush1.bf16.msra.mxu0 %v3554_v17  ;;  %v545_v17 = vld [vmem:[#allocation13 + $0x2f0] sm:$0xff] }
  0xda   :  { %3557 = vmatprep.subr.bf16.mxu0 %v3556_v25  ;;  %v3638_v19 = vpack.c.bf16 %v545_v17, %v541_v16  ;;  %v550_v25 = vld [vmem:[#allocation13 + $0x318] sm:$0xff]  ;;  %v5192_v16 = vsub.s32 1, %v263_v13 }
  0xdb   :  { %3619 = vmatpush1.bf16.msra.mxu1 %v3618_v22  ;;  %v3576_v22 = vpack.c.bf16 %v552_v21, %v548_v20  ;;  %v3640_v30 = vpack.c.bf16 %v554_v27, %v550_v25  ;;  %v581_v8 = vld [vmem:[#allocation2 + $0x2] sm:$0x3]  ;;  %v5199_v27 = vsub.s32 2, %v263_v13 }
  0xdc   :  { %3621 = vmatprep.subr.bf16.mxu1 %v3620_v33  ;;  %v560_v33 = vld [vmem:[#allocation13 + $0x368] sm:$0xff]  ;;  %667 = vmatprep.mubr.f32.mxu0 %v581_v8 }
  0xdd   :  { %3559 = vmatpush1.bf16.msra.mxu0 %v3558_v29  ;;  %v553_v29 = vld [vmem:[#allocation13 + $0x330] sm:$0xff]  ;;  %738 = vmatprep.mubr.f32.mxu1 %v581_v8  ;;  %v796_v8 = vld [vmem:[#allocation10 + $0xa0] sm:$0xff] }
  0xde   :  { %3561 = vmatprep.subr.bf16.mxu0 %v3560_v37  ;;  %v3642_v31 = vpack.c.bf16 %v553_v29, %v549_v28  ;;  %v558_v37 = vld [vmem:[#allocation13 + $0x358] sm:$0xff] }
  0xdf   :  { %3623 = vmatpush1.bf16.msra.mxu1 %v3622_v34  ;;  %v3580_v34 = vpack.c.bf16 %v560_v33, %v556_v32  ;;  %v3644_v42 = vpack.c.bf16 %v562_v39, %v558_v37 }
  0xe0   :  { %3625 = vmatprep.subr.bf16.mxu1 %v3624_v45  ;;  %v568_v45 = vld [vmem:[#allocation13 + $0x3a8] sm:$0xff] }
  0xe1   :  { %3563 = vmatpush1.bf16.msra.mxu0 %v3562_v41  ;;  %v561_v41 = vld [vmem:[#allocation13 + $0x370] sm:$0xff]  ;;  %v3584_v47 = vpack.c.bf16 %v568_v45, %v564_v44 }
  0xe2   :  { %3565 = vmatprep.subr.bf16.mxu0 %v3564_v49  ;;  %v3646_v43 = vpack.c.bf16 %v561_v41, %v557_v40  ;;  %v566_v49 = vld [vmem:[#allocation13 + $0x398] sm:$0xff]  ;;  %v443_v40 = vld [vmem:[#allocation3] sm:$0x3] }
  0xe3   :  { %3627 = vmatpush1.bf16.msra.mxu1 %v3626_v46  ;;  %v563_v46 = vld [vmem:[#allocation13 + $0x380] sm:$0xff]  ;;  %v3648_v52 = vpack.c.bf16 %v570_v50, %v566_v49  ;;  %v778_v50 = vld [vmem:[#allocation10 + $0x10] sm:$0xff] }
  0xe4   :  { %3629 = vmatprep.subr.bf16.mxu1 %v3628_v58  ;;  %v3586_v51 = vpack.c.bf16 %v567_v48, %v563_v46  ;;  %v571_v58 = vld [vmem:[#allocation13 + $0x3c0] sm:$0xff] }
  0xe5   :  { %3567 = vmatpush1.bf16.msra.mxu0 %v3566_v53  ;;  %v565_v53 = vld [vmem:[#allocation13 + $0x390] sm:$0xff]  ;;  %v780_v48 = vld [vmem:[#allocation10 + $0x20] sm:$0xff]  ;;  %v785_v49 = vld [vmem:[#allocation10 + $0x48] sm:$0xff] }
  0xe6   :  { %3569 = vmatprep.subr.bf16.mxu0 %v3568_v62  ;;  %v3650_v56 = vpack.c.bf16 %v569_v54, %v565_v53  ;;  %v578_v62 = vld [vmem:[#allocation13 + $0x3f8] sm:$0xff]  ;;  %v789_v53 = vld [vmem:[#allocation10 + $0x68] sm:$0xff] }
  0xe7   :  { %3631 = vmatpush1.bf16.msra.mxu1 %v3630_v59  ;;  %v575_v59 = vld [vmem:[#allocation13 + $0x3e0] sm:$0xff]  ;;  %v3652_v1 = vpack.c.bf16 %v578_v62, %v574_v61  ;;  %v787_v54 = vld [vmem:[#allocation10 + $0x58] sm:$0xff]  ;;  %v3660_v62 = vpack.c.bf16 %v789_v53, %v785_v49 }
  0xe8   :  { %3633 = vmatprep.subr.bf16.mxu1 %v3632_v6  ;;  %v3590_v0 = vpack.c.bf16 %v575_v59, %v571_v58  ;;  %v784_v58 = vld [vmem:[#allocation10 + $0x40] sm:$0xff] }
  0xe9   :  { %3571 = vmatpush1.bf16.msra.mxu0 %v3570_v2  ;;  %v577_v2 = vld [vmem:[#allocation13 + $0x3f0] sm:$0xff]  ;;  %v788_v59 = vld [vmem:[#allocation10 + $0x60] sm:$0xff] }
  0xea   :  { %3573 = vmatprep.subr.bf16.mxu0 %v3572_v10  ;;  %v3654_v6 = vpack.c.bf16 %v577_v2, %v573_v63  ;;  %v783_v10 = vld [vmem:[#allocation10 + $0x38] sm:$0xff]  ;;  %v793_v63 = vld [vmem:[#allocation10 + $0x88] sm:$0xff]  ;;  %v790_v2 = vld [vmem:[#allocation10 + $0x70] sm:$0xff] }
  0xeb   :  { %3635 = vmatpush1.bf16.msra.mxu1 %v3634_v7  ;;  %v3656_v7 = vpack.c.bf16 %v781_v5, %v777_v4  ;;  %v3720_v11 = vpack.c.bf16 %v783_v10, %v779_v9  ;;  %v795_v4 = vld [vmem:[#allocation10 + $0x98] sm:$0xff]  ;;  %v3664_v10 = vpack.c.bf16 %v797_v3, %v793_v63  ;;  %v820_v49 = vld [vmem:[#allocation10 + $0x160] sm:$0xff]  ;;  %v830_v3 = vld [vmem:[#allocation10 + $0x1b0] sm:$0xff] }
  0xec   :  { %3637 = vmatprep.subr.bf16.mxu1 %v3636_v18  ;;  %v269_v18 = vrot.slane %v259_v15, %v5192_v16  ;;  %v799_v5 = vld [vmem:[#allocation10 + $0xb8] sm:$0xff] }
  0xed   :  { %3575 = vmatpush1.bf16.msra.mxu0 %v3574_v14  ;;  %v5190_v14 = vsub.s32 0, %v263_v13  ;;  %v3728_v12 = vpack.c.bf16 %v799_v5, %v795_v4  ;;  %v837_v4 = vld [vmem:[#allocation10 + $0x1e8] sm:$0xff]  ;;  %v835_v5 = vld [vmem:[#allocation10 + $0x1d8] sm:$0xff] }
  0xee   :  { %3577 = vmatprep.subr.bf16.mxu0 %v3576_v22 }
  0xef   :  { %3639 = vmatpush1.bf16.msra.mxu1 %v3638_v19  ;;  %v265_v17 = vrot.slane %v259_v15, %v5190_v14  ;;  %v5196_v19 = vsub.s32 3, %v263_v13  ;;  %v794_v13 = vld [vmem:[#allocation10 + $0x90] sm:$0xff] }
  0xf0   :  { %3641 = vmatprep.subr.bf16.mxu1 %v3640_v30 }
  0xf1   :  { %3579 = vmatpush1.bf16.msra.mxu0 %v3578_v26  ;;  %v277_v25 = vrot.slane %v259_v15, %v5196_v19 }
  0xf2   :  { %3581 = vmatprep.subr.bf16.mxu0 %v3580_v34 }
  0xf3   :  { %3643 = vmatpush1.bf16.msra.mxu1 %v3642_v31  ;;  %v273_v31 = vrot.slane %v259_v15, %v5199_v27  ;;  %v798_v15 = vld [vmem:[#allocation10 + $0xb0] sm:$0xff] }
  0xf4   :  { %3645 = vmatprep.subr.bf16.mxu1 %v3644_v42 }
  0xf5   :  { %3583 = vmatpush1.bf16.msra.mxu0 %v3582_v38 }
  0xf6   :  { %3585 = vmatprep.subr.bf16.mxu0 %v3584_v47  ;;  %v776_v47 = vld [vmem:[#allocation10] sm:$0xff] }
  0xf7   :  { %3647 = vmatpush1.bf16.msra.mxu1 %v3646_v43  ;;  %v3658_v57 = vpack.c.bf16 %v780_v48, %v776_v47  ;;  %v816_v48 = vld [vmem:[#allocation10 + $0x140] sm:$0xff] }
  0xf8   :  { %3649 = vmatprep.subr.bf16.mxu1 %v3648_v52 }
  0xf9   :  { %3587 = vmatpush1.bf16.msra.mxu0 %v3586_v51  ;;  %v782_v51 = vld [vmem:[#allocation10 + $0x30] sm:$0xff] }
  0xfa   :  { %3589 = vmatprep.subr.bf16.mxu0 %v3588_v60  ;;  %v3722_v60 = vpack.c.bf16 %v782_v51, %v778_v50 }
  0xfb   :  { %3651 = vmatpush1.bf16.msra.mxu1 %v3650_v56 }
  0xfc   :  { %3653 = vmatprep.subr.bf16.mxu1 %v3652_v1  ;;  %v786_v1 = vld [vmem:[#allocation10 + $0x50] sm:$0xff] }
  0xfd   :  { %3591 = vmatpush1.bf16.msra.mxu0 %v3590_v0  ;;  %v3724_v0 = vpack.c.bf16 %v791_v55, %v787_v54  ;;  %v3726_v9 = vpack.c.bf16 %v790_v2, %v786_v1  ;;  %v818_v54 = vld [vmem:[#allocation10 + $0x150] sm:$0xff] }
  0xfe   :  { %3657 = vmatprep.subr.bf16.mxu0 %v3656_v7  ;;  %v792_v7 = vld [vmem:[#allocation10 + $0x80] sm:$0xff]  ;;  %v822_v55 = vld [vmem:[#allocation10 + $0x170] sm:$0xff] }
  0xff   :  { %3655 = vmatpush1.bf16.msra.mxu1 %v3654_v6  ;;  %v3662_v6 = vpack.c.bf16 %v788_v59, %v784_v58  ;;  %v831_v58 = vld [vmem:[#allocation10 + $0x1b8] sm:$0xff]  ;;  %v3678_v59 = vpack.c.bf16 %v820_v49, %v816_v48  ;;  %v826_v2 = vld [vmem:[#allocation10 + $0x190] sm:$0xff]  ;;  %v856_v48 = vld [vmem:[#allocation10 + $0x280] sm:$0xff] }
 0x100   :  { %3721 = vmatprep.subr.bf16.mxu1 %v3720_v11  ;;  %v801_v11 = vld [vmem:[#allocation10 + $0xc8] sm:$0xff]  ;;  %v860_v49 = vld [vmem:[#allocation10 + $0x2a0] sm:$0xff] }
 0x193   :  { %v348_v20 = vpop.f32.mrb[0].mxu0 }
 0x194   :  { %v349_v21 = vadd.f32 %v348_v20, %v265_v17  ;;  %v350_v22 = vpop.f32.mrb[1].mxu0  ;;  %v805_v17 = vld [vmem:[#allocation10 + $0xe8] sm:$0xff]  ;;  %v807_v20 = vld [vmem:[#allocation10 + $0xf8] sm:$0xff] }
 0x195   :  { %v351_v23 = vadd.f32 %v350_v22, %v269_v18  ;;  %v419_v28 = vpop.f32.mrb[0].mxu1  ;;  %v803_v18 = vld [vmem:[#allocation10 + $0xd8] sm:$0xff]  ;;  %v800_v22 = vld [vmem:[#allocation10 + $0xc0] sm:$0xff] }
 0x196   :  { %v3370_v24 = vmul.f32 -1.442695, %v349_v21  ;;  %v421_v29 = vpop.f32.mrb[1].mxu1  ;;  %v420_v33 = vadd.f32 %v419_v28, %v273_v31  ;;  %v3666_v21 = vpack.c.bf16 %v796_v8, %v792_v7  ;;  %v813_v28 = vld [vmem:[#allocation10 + $0x128] sm:$0xff]  ;;  %v806_v31 = vld [vmem:[#allocation10 + $0xf0] sm:$0xff]  ;;  %v832_v8 = vld [vmem:[#allocation10 + $0x1c0] sm:$0xff] }
 0x197   :  { %v3371_v26 = vmul.f32 -1.442695, %v351_v23  ;;  %v422_v30 = vadd.f32 %v421_v29, %v277_v25  ;;  %v804_v23 = vld [vmem:[#allocation10 + $0xe0] sm:$0xff]  ;;  %v3730_v25 = vpack.c.bf16 %v798_v15, %v794_v13  ;;  %v3732_v29 = vpack.c.bf16 %v807_v20, %v803_v18  ;;  %v834_v15 = vld [vmem:[#allocation10 + $0x1d0] sm:$0xff]  ;;  %v845_v18 = vld [vmem:[#allocation10 + $0x228] sm:$0xff] }
 0x198   :  { %4691 = vpow2.f32 %v3370_v24  ;;  %v809_v24 = vld [vmem:[#allocation10 + $0x108] sm:$0xff]  ;;  %v843_v20 = vld [vmem:[#allocation10 + $0x218] sm:$0xff] }
 0x199   :  { %4693 = vpow2.f32 %v3371_v26  ;;  %v3372_v32 = vmul.f32 -1.442695, %v422_v30  ;;  %v3668_v26 = vpack.c.bf16 %v805_v17, %v801_v11  ;;  %v802_v30 = vld [vmem:[#allocation10 + $0xd0] sm:$0xff] }
 0x19a   :  { %v838_v17 = vld [vmem:[#allocation10 + $0x1f0] sm:$0xff] }
 0x19b   :  { %4695 = vpow2.f32 %v3372_v32 }
 0x19c   :  { %4697 = vtanh.f32 %v420_v33  ;;  %v811_v33 = vld [vmem:[#allocation10 + $0x118] sm:$0xff] }
 0x1a2   :  { %v4692_v34 = vpop.eup %4691 }
 0x1a3   :  { %v4694_v35 = vpop.eup %4693  ;;  %v427_v36 = vadd.f32 1.0, %v4692_v34  ;;  %v815_v34 = vld [vmem:[#allocation10 + $0x138] sm:$0xff] }
 0x1a4   :  { %v433_v37 = vadd.f32 1.0, %v4694_v35  ;;  %v3670_v35 = vpack.c.bf16 %v804_v23, %v800_v22  ;;  %v840_v23 = vld [vmem:[#allocation10 + $0x200] sm:$0xff] }
 0x1a5   :  { %4699 = vrcp.f32 %v427_v36  ;;  %v4696_v38 = vpop.eup %4695  ;;  %v808_v36 = vld [vmem:[#allocation10 + $0x100] sm:$0xff] }
 0x1a6   :  { %4701 = vrcp.f32 %v433_v37  ;;  %v4698_v39 = vpop.eup %4697  ;;  %v440_v42 = vadd.f32 1.0, %v4696_v38  ;;  %v812_v37 = vld [vmem:[#allocation10 + $0x120] sm:$0xff]  ;;  %v3734_v38 = vpack.c.bf16 %v806_v31, %v802_v30  ;;  %v842_v30 = vld [vmem:[#allocation10 + $0x210] sm:$0xff] }
 0x1a7   :  { %v3674_v47 = vpack.c.bf16 %v812_v37, %v808_v36  ;;  %v846_v31 = vld [vmem:[#allocation10 + $0x230] sm:$0xff]  ;;  %v848_v36 = vld [vmem:[#allocation10 + $0x240] sm:$0xff] }
 0x1a8   :  { %4703 = vrcp.f32 %v440_v42  ;;  %v810_v42 = vld [vmem:[#allocation10 + $0x110] sm:$0xff]  ;;  %v852_v37 = vld [vmem:[#allocation10 + $0x260] sm:$0xff] }
 0x1af   :  { %v4700_v41 = vpop.eup %4699 }
 0x1b0   :  { %v4702_v43 = vpop.eup %4701  ;;  %v445_v44 = vmul.f32 %v4700_v41, %v4698_v39  ;;  %v3672_v39 = vpack.c.bf16 %v813_v28, %v809_v24  ;;  %v3736_v41 = vpack.c.bf16 %v815_v34, %v811_v33  ;;  %v844_v24 = vld [vmem:[#allocation10 + $0x220] sm:$0xff]  ;;  %v849_v28 = vld [vmem:[#allocation10 + $0x248] sm:$0xff]  ;;  %v851_v33 = vld [vmem:[#allocation10 + $0x258] sm:$0xff] }
 0x1b1   :  { %v444_v45 = vmul.f32 %v4702_v43, %v443_v40  ;;  %v817_v40 = vld [vmem:[#allocation10 + $0x148] sm:$0xff]  ;;  %v814_v43 = vld [vmem:[#allocation10 + $0x130] sm:$0xff]  ;;  %v855_v34 = vld [vmem:[#allocation10 + $0x278] sm:$0xff] }
 0x1b2   :  { %v4704_v52 = vpop.eup %4703  ;;  %v3738_v50 = vpack.c.bf16 %v814_v43, %v810_v42  ;;  %v850_v42 = vld [vmem:[#allocation10 + $0x250] sm:$0xff] }
 0x1b3   :  { %v446_v46 = vadd.f32 %v445_v44, %v444_v45  ;;  %v821_v44 = vld [vmem:[#allocation10 + $0x168] sm:$0xff]  ;;  %v819_v45 = vld [vmem:[#allocation10 + $0x158] sm:$0xff]  ;;  %v854_v43 = vld [vmem:[#allocation10 + $0x270] sm:$0xff] }
 0x1b4   :  { %v3676_v51 = vpack.c.bf16 %v821_v44, %v817_v40  ;;  %v857_v40 = vld [vmem:[#allocation10 + $0x288] sm:$0xff] }
 0x1b5   :  { %4705 = vtanh.f32 %v446_v46  ;;  %450 = vst [vmem:[#allocation3] sm:$0x3] %v446_v46  ;;  %v823_v46 = vld [vmem:[#allocation10 + $0x178] sm:$0xff]  ;;  %v861_v44 = vld [vmem:[#allocation10 + $0x2a8] sm:$0xff] }
 0x1b6   :  { %v3740_v53 = vpack.c.bf16 %v823_v46, %v819_v45  ;;  %v859_v45 = vld [vmem:[#allocation10 + $0x298] sm:$0xff] }
 0x1b7   :  { %v863_v46 = vld [vmem:[#allocation10 + $0x2b8] sm:$0xff] }
 0x1bf   :  { %v4706_v56 = vpop.eup %4705 }
 0x1c0   :  { %v448_v61 = vmul.f32 %v4706_v56, %v4704_v52  ;;  %v825_v52 = vld [vmem:[#allocation10 + $0x188] sm:$0xff] }
 0x1c1   :  { %v829_v56 = vld [vmem:[#allocation10 + $0x1a8] sm:$0xff] }
 0x1c2   :  { %449 = vst [vmem:[#allocation2] sm:$0x3] %v448_v61  ;;  %668 = vmatmul.mubr.f32.vlgmr.msra.gmra.mrb[2].mxu0 %v448_v61  ;;  %739 = vmatmul.mubr.f32.vlgmr.msra.gmra.mrb[2].mxu1 %v448_v61  ;;  %v828_v61 = vld [vmem:[#allocation10 + $0x1a0] sm:$0xff]  ;;  %v3680_v63 = vpack.c.bf16 %v829_v56, %v825_v52  ;;  %v865_v52 = vld [vmem:[#allocation10 + $0x2c8] sm:$0xff] }
 0x1c3   :  { %3659 = vmatpush1.bf16.msra.mxu0 %v3658_v57  ;;  %3723 = vmatpush1.bf16.msra.mxu1 %v3722_v60  ;;  %v827_v57 = vld [vmem:[#allocation10 + $0x198] sm:$0xff]  ;;  %v824_v60 = vld [vmem:[#allocation10 + $0x180] sm:$0xff]  ;;  %v869_v56 = vld [vmem:[#allocation10 + $0x2e8] sm:$0xff] }
 0x1c4   :  { %3661 = vmatprep.subr.bf16.mxu0 %v3660_v62  ;;  %3725 = vmatprep.subr.bf16.mxu1 %v3724_v0  ;;  %v3742_v62 = vpack.c.bf16 %v822_v55, %v818_v54  ;;  %v833_v0 = vld [vmem:[#allocation10 + $0x1c8] sm:$0xff]  ;;  %v3744_v1 = vpack.c.bf16 %v831_v58, %v827_v57  ;;  %v3682_v7 = vpack.c.bf16 %v828_v61, %v824_v60  ;;  %v858_v54 = vld [vmem:[#allocation10 + $0x290] sm:$0xff]  ;;  %v867_v57 = vld [vmem:[#allocation10 + $0x2d8] sm:$0xff] }
 0x1c5   :  { %v3684_v11 = vpack.c.bf16 %v837_v4, %v833_v0  ;;  %v862_v55 = vld [vmem:[#allocation10 + $0x2b0] sm:$0xff]  ;;  %v871_v58 = vld [vmem:[#allocation10 + $0x2f8] sm:$0xff]  ;;  %v864_v60 = vld [vmem:[#allocation10 + $0x2c0] sm:$0xff] }
 0x1c6   :  { %v868_v61 = vld [vmem:[#allocation10 + $0x2e0] sm:$0xff]  ;;  %v873_v0 = vld [vmem:[#allocation10 + $0x308] sm:$0xff] }
 0x1c7   :  { %3663 = vmatpush1.bf16.msra.mxu0 %v3662_v6  ;;  %3727 = vmatpush1.bf16.msra.mxu1 %v3726_v9  ;;  %v839_v6 = vld [vmem:[#allocation10 + $0x1f8] sm:$0xff]  ;;  %v836_v9 = vld [vmem:[#allocation10 + $0x1e0] sm:$0xff]  ;;  %v877_v4 = vld [vmem:[#allocation10 + $0x328] sm:$0xff] }
 0x1c8   :  { %3665 = vmatprep.subr.bf16.mxu0 %v3664_v10  ;;  %3729 = vmatprep.subr.bf16.mxu1 %v3728_v12  ;;  %v3746_v10 = vpack.c.bf16 %v830_v3, %v826_v2  ;;  %v841_v12 = vld [vmem:[#allocation10 + $0x208] sm:$0xff]  ;;  %v3748_v13 = vpack.c.bf16 %v839_v6, %v835_v5  ;;  %v3686_v22 = vpack.c.bf16 %v836_v9, %v832_v8  ;;  %v866_v2 = vld [vmem:[#allocation10 + $0x2d0] sm:$0xff]  ;;  %v875_v5 = vld [vmem:[#allocation10 + $0x318] sm:$0xff] }
 0x1c9   :  { %v905_v32 = vld [vmem:[#allocation2] sm:$0x3]  ;;  %v870_v3 = vld [vmem:[#allocation10 + $0x2f0] sm:$0xff]  ;;  %v879_v6 = vld [vmem:[#allocation10 + $0x338] sm:$0xff] }
 0x1ca   :  { %991 = vmatprep.mubr.f32.mxu0 %v905_v32  ;;  %1062 = vmatprep.mubr.f32.mxu1 %v905_v32  ;;  %v853_v32 = vld [vmem:[#allocation10 + $0x268] sm:$0xff]  ;;  %v872_v8 = vld [vmem:[#allocation10 + $0x300] sm:$0xff] }
 0x1cb   :  { %3667 = vmatpush1.bf16.msra.mxu0 %v3666_v21  ;;  %3731 = vmatpush1.bf16.msra.mxu1 %v3730_v25  ;;  %v847_v21 = vld [vmem:[#allocation10 + $0x238] sm:$0xff]  ;;  %v3750_v25 = vpack.c.bf16 %v838_v17, %v834_v15  ;;  %v876_v9 = vld [vmem:[#allocation10 + $0x320] sm:$0xff]  ;;  %v874_v15 = vld [vmem:[#allocation10 + $0x310] sm:$0xff] }
 0x1cc   :  { %3669 = vmatprep.subr.bf16.mxu0 %v3668_v26  ;;  %3733 = vmatprep.subr.bf16.mxu1 %v3732_v29  ;;  %v3688_v26 = vpack.c.bf16 %v845_v18, %v841_v12  ;;  %v3752_v29 = vpack.c.bf16 %v847_v21, %v843_v20  ;;  %v881_v12 = vld [vmem:[#allocation10 + $0x348] sm:$0xff]  ;;  %v878_v17 = vld [vmem:[#allocation10 + $0x330] sm:$0xff]  ;;  %v883_v20 = vld [vmem:[#allocation10 + $0x358] sm:$0xff] }
 0x1cd   :  { %v885_v18 = vld [vmem:[#allocation10 + $0x368] sm:$0xff]  ;;  %v887_v21 = vld [vmem:[#allocation10 + $0x378] sm:$0xff] }
 0x1cf   :  { %3671 = vmatpush1.bf16.msra.mxu0 %v3670_v35  ;;  %3735 = vmatpush1.bf16.msra.mxu1 %v3734_v38  ;;  %v3690_v35 = vpack.c.bf16 %v844_v24, %v840_v23  ;;  %v3754_v38 = vpack.c.bf16 %v846_v31, %v842_v30  ;;  %v880_v23 = vld [vmem:[#allocation10 + $0x340] sm:$0xff]  ;;  %v882_v30 = vld [vmem:[#allocation10 + $0x350] sm:$0xff] }
 0x1d0   :  { %3673 = vmatprep.subr.bf16.mxu0 %v3672_v39  ;;  %3737 = vmatprep.subr.bf16.mxu1 %v3736_v41  ;;  %v3692_v39 = vpack.c.bf16 %v853_v32, %v849_v28  ;;  %v3756_v41 = vpack.c.bf16 %v855_v34, %v851_v33  ;;  %v884_v24 = vld [vmem:[#allocation10 + $0x360] sm:$0xff]  ;;  %v889_v28 = vld [vmem:[#allocation10 + $0x388] sm:$0xff]  ;;  %v886_v31 = vld [vmem:[#allocation10 + $0x370] sm:$0xff] }
 0x1d1   :  { %v893_v32 = vld [vmem:[#allocation10 + $0x3a8] sm:$0xff]  ;;  %v891_v33 = vld [vmem:[#allocation10 + $0x398] sm:$0xff] }
 0x1d2   :  { %v895_v34 = vld [vmem:[#allocation10 + $0x3b8] sm:$0xff] }
 0x1d3   :  { %3675 = vmatpush1.bf16.msra.mxu0 %v3674_v47  ;;  %3739 = vmatpush1.bf16.msra.mxu1 %v3738_v50  ;;  %v3694_v47 = vpack.c.bf16 %v852_v37, %v848_v36  ;;  %v3758_v50 = vpack.c.bf16 %v854_v43, %v850_v42  ;;  %v888_v36 = vld [vmem:[#allocation10 + $0x380] sm:$0xff]  ;;  %v890_v42 = vld [vmem:[#allocation10 + $0x390] sm:$0xff] }
 0x1d4   :  { %3677 = vmatprep.subr.bf16.mxu0 %v3676_v51  ;;  %3741 = vmatprep.subr.bf16.mxu1 %v3740_v53  ;;  %v3696_v51 = vpack.c.bf16 %v861_v44, %v857_v40  ;;  %v3760_v53 = vpack.c.bf16 %v863_v46, %v859_v45  ;;  %v892_v37 = vld [vmem:[#allocation10 + $0x3a0] sm:$0xff]  ;;  %v897_v40 = vld [vmem:[#allocation10 + $0x3c8] sm:$0xff]  ;;  %v894_v43 = vld [vmem:[#allocation10 + $0x3b0] sm:$0xff] }
 0x1d5   :  { %v901_v44 = vld [vmem:[#allocation10 + $0x3e8] sm:$0xff]  ;;  %v899_v45 = vld [vmem:[#allocation10 + $0x3d8] sm:$0xff] }
 0x1d6   :  { %v903_v46 = vld [vmem:[#allocation10 + $0x3f8] sm:$0xff] }
 0x1d7   :  { %3679 = vmatpush1.bf16.msra.mxu0 %v3678_v59  ;;  %3743 = vmatpush1.bf16.msra.mxu1 %v3742_v62  ;;  %v3698_v59 = vpack.c.bf16 %v860_v49, %v856_v48  ;;  %v3762_v62 = vpack.c.bf16 %v862_v55, %v858_v54  ;;  %v896_v48 = vld [vmem:[#allocation10 + $0x3c0] sm:$0xff]  ;;  %v3778_v49 = vpack.c.bf16 %v894_v43, %v890_v42  ;;  %v902_v54 = vld [vmem:[#allocation10 + $0x3f0] sm:$0xff] }
 0x1d8   :  { %3681 = vmatprep.subr.bf16.mxu0 %v3680_v63  ;;  %3745 = vmatprep.subr.bf16.mxu1 %v3744_v1  ;;  %v3700_v63 = vpack.c.bf16 %v869_v56, %v865_v52  ;;  %v3764_v1 = vpack.c.bf16 %v871_v58, %v867_v57  ;;  %v3780_v52 = vpack.c.bf16 %v903_v46, %v899_v45  ;;  %v775_v57 = vld [vmem:[#allocation4 + $0x2] sm:$0x3]  ;;  %v127_v58 = vld [vmem:[#allocation9 + $0x2] sm:$0x3]  ;;  %v1126_v45 = vld [vmem:[#allocation13 + $0xf0] sm:$0xff] }
 0x1d9   :  { %129 = vst [vmem:[#allocation3 + $0x2] sm:$0x3] %v127_v58  ;;  %v1129_v46 = vld [vmem:[#allocation13 + $0x108] sm:$0xff] }
 0x1db   :  { %3683 = vmatpush1.bf16.msra.mxu0 %v3682_v7  ;;  %3747 = vmatpush1.bf16.msra.mxu1 %v3746_v10  ;;  %v3702_v7 = vpack.c.bf16 %v868_v61, %v864_v60  ;;  %v3766_v10 = vpack.c.bf16 %v870_v3, %v866_v2  ;;  %v1101_v60 = vld [vmem:[#allocation13 + $0x28] sm:$0xff]  ;;  %v1103_v2 = vld [vmem:[#allocation13 + $0x38] sm:$0xff]  ;;  %v1098_v3 = vld [vmem:[#allocation13 + $0x10] sm:$0xff] }
 0x1dc   :  { %3685 = vmatprep.subr.bf16.mxu0 %v3684_v11  ;;  %3749 = vmatprep.subr.bf16.mxu1 %v3748_v13  ;;  %v3704_v11 = vpack.c.bf16 %v877_v4, %v873_v0  ;;  %v3768_v13 = vpack.c.bf16 %v879_v6, %v875_v5  ;;  %v1099_v0 = vld [vmem:[#allocation13 + $0x18] sm:$0xff]  ;;  %v1102_v4 = vld [vmem:[#allocation13 + $0x30] sm:$0xff] }
 0x1dd   :  { %v3848_v5 = vpack.c.bf16 %v1103_v2, %v1099_v0  ;;  %v3850_v6 = vpack.c.bf16 %v1102_v4, %v1098_v3  ;;  %v1139_v0 = vld [vmem:[#allocation13 + $0x158] sm:$0xff]  ;;  %v1138_v3 = vld [vmem:[#allocation13 + $0x150] sm:$0xff] }
 0x1de   :  { %v1143_v2 = vld [vmem:[#allocation13 + $0x178] sm:$0xff]  ;;  %v1142_v4 = vld [vmem:[#allocation13 + $0x170] sm:$0xff] }
 0x1df   :  { %3687 = vmatpush1.bf16.msra.mxu0 %v3686_v22  ;;  %3751 = vmatpush1.bf16.msra.mxu1 %v3750_v25  ;;  %v3706_v22 = vpack.c.bf16 %v876_v9, %v872_v8  ;;  %v3770_v25 = vpack.c.bf16 %v878_v17, %v874_v15  ;;  %v1109_v8 = vld [vmem:[#allocation13 + $0x68] sm:$0xff]  ;;  %v1104_v9 = vld [vmem:[#allocation13 + $0x40] sm:$0xff] }
 0x1e0   :  { %3689 = vmatprep.subr.bf16.mxu0 %v3688_v26  ;;  %3753 = vmatprep.subr.bf16.mxu1 %v3752_v29  ;;  %v3708_v26 = vpack.c.bf16 %v885_v18, %v881_v12  ;;  %v3772_v29 = vpack.c.bf16 %v887_v21, %v883_v20  ;;  %v1107_v12 = vld [vmem:[#allocation13 + $0x58] sm:$0xff]  ;;  %v1106_v18 = vld [vmem:[#allocation13 + $0x50] sm:$0xff]  ;;  %v1113_v21 = vld [vmem:[#allocation13 + $0x88] sm:$0xff] }
 0x1e1   :  { %v1110_v20 = vld [vmem:[#allocation13 + $0x70] sm:$0xff] }
 0x1e3   :  { %3691 = vmatpush1.bf16.msra.mxu0 %v3690_v35  ;;  %3755 = vmatpush1.bf16.msra.mxu1 %v3754_v38  ;;  %v3710_v35 = vpack.c.bf16 %v884_v24, %v880_v23  ;;  %v3774_v38 = vpack.c.bf16 %v886_v31, %v882_v30  ;;  %v1117_v23 = vld [vmem:[#allocation13 + $0xa8] sm:$0xff]  ;;  %v1112_v24 = vld [vmem:[#allocation13 + $0x80] sm:$0xff]  ;;  %v1119_v30 = vld [vmem:[#allocation13 + $0xb8] sm:$0xff] }
 0x1e4   :  { %3693 = vmatprep.subr.bf16.mxu0 %v3692_v39  ;;  %3757 = vmatprep.subr.bf16.mxu1 %v3756_v41  ;;  %v3712_v39 = vpack.c.bf16 %v893_v32, %v889_v28  ;;  %v3776_v41 = vpack.c.bf16 %v895_v34, %v891_v33  ;;  %v1114_v32 = vld [vmem:[#allocation13 + $0x90] sm:$0xff] }
 0x1e5   :  { %v1118_v33 = vld [vmem:[#allocation13 + $0xb0] sm:$0xff] }
 0x1e6   :  { %v3858_v34 = vpack.c.bf16 %v1118_v33, %v1114_v32  ;;  %v1158_v32 = vld [vmem:[#allocation13 + $0x1f0] sm:$0xff] }
 0x1e7   :  { %3695 = vmatpush1.bf16.msra.mxu0 %v3694_v47  ;;  %3759 = vmatpush1.bf16.msra.mxu1 %v3758_v50  ;;  %v3714_v47 = vpack.c.bf16 %v892_v37, %v888_v36  ;;  %v3716_v50 = vpack.c.bf16 %v901_v44, %v897_v40  ;;  %v1125_v36 = vld [vmem:[#allocation13 + $0xe8] sm:$0xff]  ;;  %v1120_v37 = vld [vmem:[#allocation13 + $0xc0] sm:$0xff]  ;;  %v1123_v40 = vld [vmem:[#allocation13 + $0xd8] sm:$0xff] }
 0x1e8   :  { %3697 = vmatprep.subr.bf16.mxu0 %v3696_v51  ;;  %3761 = vmatprep.subr.bf16.mxu1 %v3760_v53  ;;  %v900_v51 = vld [vmem:[#allocation10 + $0x3e0] sm:$0xff]  ;;  %v898_v53 = vld [vmem:[#allocation10 + $0x3d0] sm:$0xff] }
 0x1e9   :  { %v3718_v55 = vpack.c.bf16 %v900_v51, %v896_v48  ;;  %v3782_v56 = vpack.c.bf16 %v902_v54, %v898_v53  ;;  %v1122_v44 = vld [vmem:[#allocation13 + $0xd0] sm:$0xff]  ;;  %v1133_v48 = vld [vmem:[#allocation13 + $0x128] sm:$0xff]  ;;  %v1131_v53 = vld [vmem:[#allocation13 + $0x118] sm:$0xff] }
 0x1ea   :  { %v3800_v51 = vpack.c.bf16 %v1133_v48, %v1129_v46  ;;  %v1135_v54 = vld [vmem:[#allocation13 + $0x138] sm:$0xff]  ;;  %v1173_v48 = vld [vmem:[#allocation13 + $0x268] sm:$0xff] }
 0x1eb   :  { %3699 = vmatpush1.bf16.msra.mxu0 %v3698_v59  ;;  %3763 = vmatpush1.bf16.msra.mxu1 %v3762_v62  ;;  %v1097_v59 = vld [vmem:[#allocation13 + $0x8] sm:$0xff]  ;;  %v1096_v62 = vld [vmem:[#allocation13] sm:$0xff] }
 0x1ec   :  { %3701 = vmatprep.subr.bf16.mxu0 %v3700_v63  ;;  %3765 = vmatprep.subr.bf16.mxu1 %v3764_v1  ;;  %v3784_v61 = vpack.c.bf16 %v1101_v60, %v1097_v59  ;;  %v1100_v63 = vld [vmem:[#allocation13 + $0x20] sm:$0xff]  ;;  %v1137_v59 = vld [vmem:[#allocation13 + $0x148] sm:$0xff] }
 0x1ed   :  { %v3786_v1 = vpack.c.bf16 %v1100_v63, %v1096_v62  ;;  %v1141_v60 = vld [vmem:[#allocation13 + $0x168] sm:$0xff]  ;;  %v1136_v62 = vld [vmem:[#allocation13 + $0x140] sm:$0xff] }
 0x1ee   :  { %v1140_v63 = vld [vmem:[#allocation13 + $0x160] sm:$0xff] }
 0x1ef   :  { %3703 = vmatpush1.bf16.msra.mxu0 %v3702_v7  ;;  %3767 = vmatpush1.bf16.msra.mxu1 %v3766_v10  ;;  %v1105_v7 = vld [vmem:[#allocation13 + $0x48] sm:$0xff] }
 0x1f0   :  { %3705 = vmatprep.subr.bf16.mxu0 %v3704_v11  ;;  %3769 = vmatprep.subr.bf16.mxu1 %v3768_v13  ;;  %v3788_v10 = vpack.c.bf16 %v1109_v8, %v1105_v7  ;;  %v1108_v11 = vld [vmem:[#allocation13 + $0x60] sm:$0xff]  ;;  %v1111_v13 = vld [vmem:[#allocation13 + $0x78] sm:$0xff]  ;;  %v1145_v7 = vld [vmem:[#allocation13 + $0x188] sm:$0xff] }
 0x1f1   :  { %v3790_v15 = vpack.c.bf16 %v1108_v11, %v1104_v9  ;;  %v3852_v17 = vpack.c.bf16 %v1111_v13, %v1107_v12  ;;  %v1149_v8 = vld [vmem:[#allocation13 + $0x1a8] sm:$0xff]  ;;  %v1148_v11 = vld [vmem:[#allocation13 + $0x1a0] sm:$0xff]  ;;  %v1147_v12 = vld [vmem:[#allocation13 + $0x198] sm:$0xff] }
 0x1f2   :  { %v3808_v9 = vpack.c.bf16 %v1149_v8, %v1145_v7  ;;  %v1185_v7 = vld [vmem:[#allocation13 + $0x2c8] sm:$0xff] }
 0x1f3   :  { %3707 = vmatpush1.bf16.msra.mxu0 %v3706_v22  ;;  %3771 = vmatpush1.bf16.msra.mxu1 %v3770_v25  ;;  %v3854_v22 = vpack.c.bf16 %v1110_v20, %v1106_v18  ;;  %v1116_v25 = vld [vmem:[#allocation13 + $0xa0] sm:$0xff]  ;;  %v1150_v18 = vld [vmem:[#allocation13 + $0x1b0] sm:$0xff]  ;;  %v1189_v8 = vld [vmem:[#allocation13 + $0x2e8] sm:$0xff] }
 0x1f4   :  { %3709 = vmatprep.subr.bf16.mxu0 %v3708_v26  ;;  %3773 = vmatprep.subr.bf16.mxu1 %v3772_v29  ;;  %v3792_v26 = vpack.c.bf16 %v1117_v23, %v1113_v21  ;;  %v3794_v28 = vpack.c.bf16 %v1116_v25, %v1112_v24  ;;  %v1115_v29 = vld [vmem:[#allocation13 + $0x98] sm:$0xff]  ;;  %v1157_v23 = vld [vmem:[#allocation13 + $0x1e8] sm:$0xff]  ;;  %v1152_v25 = vld [vmem:[#allocation13 + $0x1c0] sm:$0xff] }
 0x1f5   :  { %v3856_v31 = vpack.c.bf16 %v1119_v30, %v1115_v29  ;;  %v1159_v30 = vld [vmem:[#allocation13 + $0x1f8] sm:$0xff] }
 0x1f7   :  { %3711 = vmatpush1.bf16.msra.mxu0 %v3710_v35  ;;  %3775 = vmatpush1.bf16.msra.mxu1 %v3774_v38  ;;  %v1121_v35 = vld [vmem:[#allocation13 + $0xc8] sm:$0xff] }
 0x1f8   :  { %3713 = vmatprep.subr.bf16.mxu0 %v3712_v39  ;;  %3777 = vmatprep.subr.bf16.mxu1 %v3776_v41  ;;  %v3796_v38 = vpack.c.bf16 %v1125_v36, %v1121_v35  ;;  %v1124_v39 = vld [vmem:[#allocation13 + $0xe0] sm:$0xff]  ;;  %v1127_v41 = vld [vmem:[#allocation13 + $0xf8] sm:$0xff]  ;;  %v1161_v35 = vld [vmem:[#allocation13 + $0x208] sm:$0xff] }
 0x1f9   :  { %v3798_v42 = vpack.c.bf16 %v1124_v39, %v1120_v37  ;;  %v3860_v43 = vpack.c.bf16 %v1127_v41, %v1123_v40  ;;  %v1165_v36 = vld [vmem:[#allocation13 + $0x228] sm:$0xff]  ;;  %v1164_v39 = vld [vmem:[#allocation13 + $0x220] sm:$0xff]  ;;  %v1163_v40 = vld [vmem:[#allocation13 + $0x218] sm:$0xff] }
 0x1fa   :  { %v3816_v37 = vpack.c.bf16 %v1165_v36, %v1161_v35  ;;  %v1201_v35 = vld [vmem:[#allocation13 + $0x348] sm:$0xff] }
 0x1fb   :  { %3715 = vmatpush1.bf16.msra.mxu0 %v3714_v47  ;;  %3779 = vmatpush1.bf16.msra.mxu1 %v3778_v49  ;;  %v3862_v47 = vpack.c.bf16 %v1126_v45, %v1122_v44  ;;  %v1128_v49 = vld [vmem:[#allocation13 + $0x100] sm:$0xff]  ;;  %v1166_v44 = vld [vmem:[#allocation13 + $0x230] sm:$0xff]  ;;  %v1205_v36 = vld [vmem:[#allocation13 + $0x368] sm:$0xff] }
 0x1fc   :  { %3717 = vmatprep.subr.bf16.mxu0 %v3716_v50  ;;  %3781 = vmatprep.subr.bf16.mxu1 %v3780_v52  ;;  %v1132_v50 = vld [vmem:[#allocation13 + $0x120] sm:$0xff] }
 0x1fd   :  { %v3802_v52 = vpack.c.bf16 %v1132_v50, %v1128_v49  ;;  %v1168_v50 = vld [vmem:[#allocation13 + $0x240] sm:$0xff] }
 0x1ff   :  { %3719 = vmatpush1.bf16.msra.mxu0 %v3718_v55  ;;  %3783 = vmatpush1.bf16.msra.mxu1 %v3782_v56  ;;  %v3864_v55 = vpack.c.bf16 %v1135_v54, %v1131_v53  ;;  %v1130_v56 = vld [vmem:[#allocation13 + $0x110] sm:$0xff]  ;;  %v1175_v54 = vld [vmem:[#allocation13 + $0x278] sm:$0xff] }
 0x200   :  { %3785 = vmatprep.subr.bf16.mxu0 %v3784_v61  ;;  %3849 = vmatprep.subr.bf16.mxu1 %v3848_v5  ;;  %v3804_v61 = vpack.c.bf16 %v1141_v60, %v1137_v59  ;;  %v3868_v5 = vpack.c.bf16 %v1143_v2, %v1139_v0  ;;  %v1177_v59 = vld [vmem:[#allocation13 + $0x288] sm:$0xff]  ;;  %v1179_v0 = vld [vmem:[#allocation13 + $0x298] sm:$0xff] }
 0x201   :  { %v1181_v60 = vld [vmem:[#allocation13 + $0x2a8] sm:$0xff]  ;;  %v1183_v2 = vld [vmem:[#allocation13 + $0x2b8] sm:$0xff] }
 0x202   :  { %992 = vmatmul.mubr.f32.vlgmr.msra.gmra.mrb[4].mxu0 %v775_v57  ;;  %1063 = vmatmul.mubr.f32.vlgmr.msra.gmra.mrb[4].mxu1 %v775_v57  ;;  %v1134_v57 = vld [vmem:[#allocation13 + $0x130] sm:$0xff] }
 0x203   :  { %3787 = vmatpush1.bf16.msra.mxu0 %v3786_v1  ;;  %3851 = vmatpush1.bf16.msra.mxu1 %v3850_v6  ;;  %v3866_v58 = vpack.c.bf16 %v1134_v57, %v1130_v56  ;;  %v3806_v1 = vpack.c.bf16 %v1140_v63, %v1136_v62  ;;  %v3870_v6 = vpack.c.bf16 %v1142_v4, %v1138_v3  ;;  %v1174_v56 = vld [vmem:[#allocation13 + $0x270] sm:$0xff]  ;;  %v1176_v62 = vld [vmem:[#allocation13 + $0x280] sm:$0xff] }
 0x204   :  { %3789 = vmatprep.subr.bf16.mxu0 %v3788_v10  ;;  %3853 = vmatprep.subr.bf16.mxu1 %v3852_v17  ;;  %v1144_v10 = vld [vmem:[#allocation13 + $0x180] sm:$0xff]  ;;  %v1146_v17 = vld [vmem:[#allocation13 + $0x190] sm:$0xff] }
 0x205   :  { %v3810_v13 = vpack.c.bf16 %v1148_v11, %v1144_v10  ;;  %v3874_v21 = vpack.c.bf16 %v1150_v18, %v1146_v17  ;;  %v1180_v63 = vld [vmem:[#allocation13 + $0x2a0] sm:$0xff]  ;;  %v1178_v3 = vld [vmem:[#allocation13 + $0x290] sm:$0xff] }
 0x206   :  { %v1182_v4 = vld [vmem:[#allocation13 + $0x2b0] sm:$0xff]  ;;  %v1184_v10 = vld [vmem:[#allocation13 + $0x2c0] sm:$0xff] }
 0x207   :  { %3791 = vmatpush1.bf16.msra.mxu0 %v3790_v15  ;;  %3855 = vmatpush1.bf16.msra.mxu1 %v3854_v22  ;;  %v1151_v15 = vld [vmem:[#allocation13 + $0x1b8] sm:$0xff]  ;;  %v1153_v22 = vld [vmem:[#allocation13 + $0x1c8] sm:$0xff]  ;;  %v1188_v11 = vld [vmem:[#allocation13 + $0x2e0] sm:$0xff] }
 0x208   :  { %3793 = vmatprep.subr.bf16.mxu0 %v3792_v26  ;;  %3857 = vmatprep.subr.bf16.mxu1 %v3856_v31  ;;  %v3872_v20 = vpack.c.bf16 %v1151_v15, %v1147_v12  ;;  %v3812_v24 = vpack.c.bf16 %v1157_v23, %v1153_v22  ;;  %v1156_v26 = vld [vmem:[#allocation13 + $0x1e0] sm:$0xff]  ;;  %v1154_v31 = vld [vmem:[#allocation13 + $0x1d0] sm:$0xff]  ;;  %v1187_v12 = vld [vmem:[#allocation13 + $0x2d8] sm:$0xff] }
 0x209   :  { %v3814_v29 = vpack.c.bf16 %v1156_v26, %v1152_v25  ;;  %v1191_v15 = vld [vmem:[#allocation13 + $0x2f8] sm:$0xff]  ;;  %v1186_v17 = vld [vmem:[#allocation13 + $0x2d0] sm:$0xff]  ;;  %v1193_v22 = vld [vmem:[#allocation13 + $0x308] sm:$0xff] }
 0x20a   :  { %v1190_v18 = vld [vmem:[#allocation13 + $0x2f0] sm:$0xff]  ;;  %v1197_v23 = vld [vmem:[#allocation13 + $0x328] sm:$0xff]  ;;  %v1192_v25 = vld [vmem:[#allocation13 + $0x300] sm:$0xff] }
 0x20b   :  { %3795 = vmatpush1.bf16.msra.mxu0 %v3794_v28  ;;  %3859 = vmatpush1.bf16.msra.mxu1 %v3858_v34  ;;  %v1155_v28 = vld [vmem:[#allocation13 + $0x1d8] sm:$0xff]  ;;  %v3878_v34 = vpack.c.bf16 %v1158_v32, %v1154_v31  ;;  %v1196_v26 = vld [vmem:[#allocation13 + $0x320] sm:$0xff]  ;;  %v1194_v31 = vld [vmem:[#allocation13 + $0x310] sm:$0xff] }
 0x20c   :  { %3797 = vmatprep.subr.bf16.mxu0 %v3796_v38  ;;  %3861 = vmatprep.subr.bf16.mxu1 %v3860_v43  ;;  %v3876_v33 = vpack.c.bf16 %v1159_v30, %v1155_v28  ;;  %v1160_v38 = vld [vmem:[#allocation13 + $0x200] sm:$0xff]  ;;  %v1162_v43 = vld [vmem:[#allocation13 + $0x210] sm:$0xff]  ;;  %v1195_v28 = vld [vmem:[#allocation13 + $0x318] sm:$0xff] }
 0x20d   :  { %v3818_v41 = vpack.c.bf16 %v1164_v39, %v1160_v38  ;;  %v3882_v46 = vpack.c.bf16 %v1166_v44, %v1162_v43  ;;  %v1199_v30 = vld [vmem:[#allocation13 + $0x338] sm:$0xff]  ;;  %v1198_v32 = vld [vmem:[#allocation13 + $0x330] sm:$0xff]  ;;  %v1200_v38 = vld [vmem:[#allocation13 + $0x340] sm:$0xff] }
 0x20e   :  { %v1204_v39 = vld [vmem:[#allocation13 + $0x360] sm:$0xff]  ;;  %v1202_v43 = vld [vmem:[#allocation13 + $0x350] sm:$0xff] }
 0x20f   :  { %3799 = vmatpush1.bf16.msra.mxu0 %v3798_v42  ;;  %3863 = vmatpush1.bf16.msra.mxu1 %v3862_v47  ;;  %v1167_v42 = vld [vmem:[#allocation13 + $0x238] sm:$0xff]  ;;  %v1169_v47 = vld [vmem:[#allocation13 + $0x248] sm:$0xff]  ;;  %v1206_v44 = vld [vmem:[#allocation13 + $0x370] sm:$0xff] }
 0x210   :  { %3801 = vmatprep.subr.bf16.mxu0 %v3800_v51  ;;  %3865 = vmatprep.subr.bf16.mxu1 %v3864_v55  ;;  %v3880_v45 = vpack.c.bf16 %v1167_v42, %v1163_v40  ;;  %v3820_v49 = vpack.c.bf16 %v1173_v48, %v1169_v47  ;;  %v1172_v51 = vld [vmem:[#allocation13 + $0x260] sm:$0xff]  ;;  %v1170_v55 = vld [vmem:[#allocation13 + $0x250] sm:$0xff]  ;;  %v1203_v40 = vld [vmem:[#allocation13 + $0x358] sm:$0xff] }
 0x211   :  { %v3822_v53 = vpack.c.bf16 %v1172_v51, %v1168_v50  ;;  %v1207_v42 = vld [vmem:[#allocation13 + $0x378] sm:$0xff]  ;;  %v1209_v47 = vld [vmem:[#allocation13 + $0x388] sm:$0xff]  ;;  %v1212_v51 = vld [vmem:[#allocation13 + $0x3a0] sm:$0xff] }
 0x212   :  { %v1213_v48 = vld [vmem:[#allocation13 + $0x3a8] sm:$0xff] }
 0x213   :  { %3803 = vmatpush1.bf16.msra.mxu0 %v3802_v52  ;;  %3867 = vmatpush1.bf16.msra.mxu1 %v3866_v58  ;;  %v1171_v52 = vld [vmem:[#allocation13 + $0x258] sm:$0xff]  ;;  %v3886_v58 = vpack.c.bf16 %v1174_v56, %v1170_v55  ;;  %v3840_v50 = vpack.c.bf16 %v1213_v48, %v1209_v47  ;;  %v1210_v56 = vld [vmem:[#allocation13 + $0x390] sm:$0xff] }
 0x214   :  { %3805 = vmatprep.subr.bf16.mxu0 %v3804_v61  ;;  %3869 = vmatprep.subr.bf16.mxu1 %v3868_v5  ;;  %v3884_v57 = vpack.c.bf16 %v1175_v54, %v1171_v52  ;;  %v3824_v61 = vpack.c.bf16 %v1181_v60, %v1177_v59  ;;  %v3888_v5 = vpack.c.bf16 %v1183_v2, %v1179_v0  ;;  %v1211_v52 = vld [vmem:[#allocation13 + $0x398] sm:$0xff]  ;;  %v1221_v60 = vld [vmem:[#allocation13 + $0x3e8] sm:$0xff]  ;;  %v1218_v2 = vld [vmem:[#allocation13 + $0x3d0] sm:$0xff] }
 0x215   :  { %v1219_v0 = vld [vmem:[#allocation13 + $0x3d8] sm:$0xff] }
 0x217   :  { %3807 = vmatpush1.bf16.msra.mxu0 %v3806_v1  ;;  %3871 = vmatpush1.bf16.msra.mxu1 %v3870_v6  ;;  %v3826_v1 = vpack.c.bf16 %v1180_v63, %v1176_v62  ;;  %v3890_v6 = vpack.c.bf16 %v1182_v4, %v1178_v3  ;;  %v1220_v62 = vld [vmem:[#allocation13 + $0x3e0] sm:$0xff] }
 0x218   :  { %3809 = vmatprep.subr.bf16.mxu0 %v3808_v9  ;;  %3873 = vmatprep.subr.bf16.mxu1 %v3872_v20  ;;  %v3828_v9 = vpack.c.bf16 %v1189_v8, %v1185_v7  ;;  %v3892_v20 = vpack.c.bf16 %v1191_v15, %v1187_v12  ;;  %v1425_v7 = vld [vmem:[#allocation10 + $0x28] sm:$0xff]  ;;  %v1427_v12 = vld [vmem:[#allocation10 + $0x38] sm:$0xff] }
 0x21b   :  { %3811 = vmatpush1.bf16.msra.mxu0 %v3810_v13  ;;  %3875 = vmatpush1.bf16.msra.mxu1 %v3874_v21  ;;  %v3830_v13 = vpack.c.bf16 %v1188_v11, %v1184_v10  ;;  %v3894_v21 = vpack.c.bf16 %v1190_v18, %v1186_v17  ;;  %v579_v10 = vld [vmem:[#allocation15] sm:$0xf]  ;;  %v1423_v11 = vld [vmem:[#allocation10 + $0x18] sm:$0xff] }
 0x21c   :  { %3813 = vmatprep.subr.bf16.mxu0 %v3812_v24  ;;  %3877 = vmatprep.subr.bf16.mxu1 %v3876_v33  ;;  %v3832_v24 = vpack.c.bf16 %v1197_v23, %v1193_v22  ;;  %v3896_v33 = vpack.c.bf16 %v1199_v30, %v1195_v28  ;;  %v586_v15 = vrot.slane %v579_v10, %v5190_v14 }
 0x21d   :  { %v590_v17 = vrot.slane %v579_v10, %v5192_v16  ;;  %v598_v28 = vrot.slane %v579_v10, %v5196_v19  ;;  %v594_v30 = vrot.slane %v579_v10, %v5199_v27 }
 0x21f   :  { %3815 = vmatpush1.bf16.msra.mxu0 %v3814_v29  ;;  %3879 = vmatpush1.bf16.msra.mxu1 %v3878_v34  ;;  %v3834_v29 = vpack.c.bf16 %v1196_v26, %v1192_v25  ;;  %v3898_v34 = vpack.c.bf16 %v1198_v32, %v1194_v31 }
 0x220   :  { %3817 = vmatprep.subr.bf16.mxu0 %v3816_v37  ;;  %3881 = vmatprep.subr.bf16.mxu1 %v3880_v45  ;;  %v3836_v37 = vpack.c.bf16 %v1205_v36, %v1201_v35  ;;  %v3900_v45 = vpack.c.bf16 %v1207_v42, %v1203_v40 }
 0x223   :  { %3819 = vmatpush1.bf16.msra.mxu0 %v3818_v41  ;;  %3883 = vmatpush1.bf16.msra.mxu1 %v3882_v46  ;;  %v3838_v41 = vpack.c.bf16 %v1204_v39, %v1200_v38  ;;  %v3902_v46 = vpack.c.bf16 %v1206_v44, %v1202_v43  ;;  %v765_v39 = vld [vmem:[#allocation3 + $0x2] sm:$0x3] }
 0x224   :  { %3821 = vmatprep.subr.bf16.mxu0 %v3820_v49  ;;  %3885 = vmatprep.subr.bf16.mxu1 %v3884_v57  ;;  %v1208_v49 = vld [vmem:[#allocation13 + $0x380] sm:$0xff]  ;;  %v1214_v57 = vld [vmem:[#allocation13 + $0x3b0] sm:$0xff] }
 0x225   :  { %v3842_v54 = vpack.c.bf16 %v1212_v51, %v1208_v49  ;;  %v3906_v59 = vpack.c.bf16 %v1214_v57, %v1210_v56 }
 0x227   :  { %3823 = vmatpush1.bf16.msra.mxu0 %v3822_v53  ;;  %3887 = vmatpush1.bf16.msra.mxu1 %v3886_v58  ;;  %v1215_v53 = vld [vmem:[#allocation13 + $0x3b8] sm:$0xff]  ;;  %v1217_v58 = vld [vmem:[#allocation13 + $0x3c8] sm:$0xff] }
 0x228   :  { %3825 = vmatprep.subr.bf16.mxu0 %v3824_v61  ;;  %3889 = vmatprep.subr.bf16.mxu1 %v3888_v5  ;;  %v3904_v55 = vpack.c.bf16 %v1215_v53, %v1211_v52  ;;  %v1216_v61 = vld [vmem:[#allocation13 + $0x3c0] sm:$0xff]  ;;  %v3844_v63 = vpack.c.bf16 %v1221_v60, %v1217_v58  ;;  %v1222_v5 = vld [vmem:[#allocation13 + $0x3f0] sm:$0xff] }
 0x229   :  { %v3846_v3 = vpack.c.bf16 %v1220_v62, %v1216_v61 }
 0x22b   :  { %3827 = vmatpush1.bf16.msra.mxu0 %v3826_v1  ;;  %3891 = vmatpush1.bf16.msra.mxu1 %v3890_v6  ;;  %v1223_v1 = vld [vmem:[#allocation13 + $0x3f8] sm:$0xff]  ;;  %v1421_v6 = vld [vmem:[#allocation10 + $0x8] sm:$0xff] }
 0x22c   :  { %3829 = vmatprep.subr.bf16.mxu0 %v3828_v9  ;;  %3893 = vmatprep.subr.bf16.mxu1 %v3892_v20  ;;  %v3908_v4 = vpack.c.bf16 %v1223_v1, %v1219_v0  ;;  %v3912_v8 = vpack.c.bf16 %v1425_v7, %v1421_v6  ;;  %v3910_v9 = vpack.c.bf16 %v1222_v5, %v1218_v2 }
 0x22f   :  { %3831 = vmatpush1.bf16.msra.mxu0 %v3830_v13  ;;  %3895 = vmatpush1.bf16.msra.mxu1 %v3894_v21  ;;  %v3976_v13 = vpack.c.bf16 %v1427_v12, %v1423_v11  ;;  %v1088_v11 = vld [vmem:[#allocation3] sm:$0x3] }
 0x230   :  { %3833 = vmatprep.subr.bf16.mxu0 %v3832_v24  ;;  %3897 = vmatprep.subr.bf16.mxu1 %v3896_v33 }
 0x233   :  { %3835 = vmatpush1.bf16.msra.mxu0 %v3834_v29  ;;  %3899 = vmatpush1.bf16.msra.mxu1 %v3898_v34 }
 0x234   :  { %3837 = vmatprep.subr.bf16.mxu0 %v3836_v37  ;;  %3901 = vmatprep.subr.bf16.mxu1 %v3900_v45 }
 0x237   :  { %3839 = vmatpush1.bf16.msra.mxu0 %v3838_v41  ;;  %3903 = vmatpush1.bf16.msra.mxu1 %v3902_v46 }
 0x238   :  { %3841 = vmatprep.subr.bf16.mxu0 %v3840_v50  ;;  %3905 = vmatprep.subr.bf16.mxu1 %v3904_v55  ;;  %v904_v50 = vld [vmem:[#allocation12] sm:$0xf] }
 0x239   :  { %v910_v51 = vrot.slane %v904_v50, %v5190_v14  ;;  %v914_v52 = vrot.slane %v904_v50, %v5192_v16  ;;  %v922_v60 = vrot.slane %v904_v50, %v5196_v19 }
 0x23b   :  { %3843 = vmatpush1.bf16.msra.mxu0 %v3842_v54  ;;  %3907 = vmatpush1.bf16.msra.mxu1 %v3906_v59 }
 0x23c   :  { %3845 = vmatprep.subr.bf16.mxu0 %v3844_v63  ;;  %3909 = vmatprep.subr.bf16.mxu1 %v3908_v4  ;;  %v918_v63 = vrot.slane %v904_v50, %v5199_v27  ;;  %v1442_v50 = vld [vmem:[#allocation10 + $0xb0] sm:$0xff] }
 0x23f   :  { %3847 = vmatpush1.bf16.msra.mxu0 %v3846_v3  ;;  %3911 = vmatpush1.bf16.msra.mxu1 %v3910_v9 }
 0x240   :  { %3913 = vmatprep.subr.bf16.mxu0 %v3912_v8  ;;  %3977 = vmatprep.subr.bf16.mxu1 %v3976_v13 }
 0x295   :  { %v669_v18 = vpop.f32.mrb[2].mxu0  ;;  %v740_v20 = vpop.f32.mrb[2].mxu1 }
 0x296   :  { %v670_v21 = vadd.f32 %v669_v18, %v586_v15  ;;  %v671_v22 = vpop.f32.mrb[3].mxu0  ;;  %v742_v23 = vpop.f32.mrb[3].mxu1  ;;  %v741_v32 = vadd.f32 %v740_v20, %v594_v30  ;;  %v1424_v18 = vld [vmem:[#allocation10 + $0x20] sm:$0xff]  ;;  %v1429_v20 = vld [vmem:[#allocation10 + $0x48] sm:$0xff] }
 0x297   :  { %v672_v24 = vadd.f32 %v671_v22, %v590_v17  ;;  %v743_v29 = vadd.f32 %v742_v23, %v598_v28  ;;  %v1420_v17 = vld [vmem:[#allocation10] sm:$0xff]  ;;  %v1426_v22 = vld [vmem:[#allocation10 + $0x30] sm:$0xff] }
 0x298   :  { %v3373_v25 = vmul.f32 -1.442695, %v670_v21  ;;  %v1422_v21 = vld [vmem:[#allocation10 + $0x10] sm:$0xff]  ;;  %v1428_v30 = vld [vmem:[#allocation10 + $0x40] sm:$0xff] }
 0x299   :  { %v3374_v26 = vmul.f32 -1.442695, %v672_v24  ;;  %v3375_v31 = vmul.f32 -1.442695, %v743_v29  ;;  %v1433_v24 = vld [vmem:[#allocation10 + $0x68] sm:$0xff]  ;;  %v3914_v29 = vpack.c.bf16 %v1424_v18, %v1420_v17  ;;  %v1460_v18 = vld [vmem:[#allocation10 + $0x140] sm:$0xff] }
 0x29a   :  { %4707 = vpow2.f32 %v3373_v25  ;;  %v1431_v25 = vld [vmem:[#allocation10 + $0x58] sm:$0xff] }
 0x29b   :  { %4709 = vpow2.f32 %v3374_v26  ;;  %v1435_v26 = vld [vmem:[#allocation10 + $0x78] sm:$0xff] }
 0x29c   :  { %4711 = vpow2.f32 %v3375_v31  ;;  %v1432_v31 = vld [vmem:[#allocation10 + $0x60] sm:$0xff] }
 0x29d   :  { %4713 = vtanh.f32 %v741_v32  ;;  %v3978_v32 = vpack.c.bf16 %v1426_v22, %v1422_v21 }
 0x2a4   :  { %v4708_v33 = vpop.eup %4707 }
 0x2a5   :  { %v4710_v34 = vpop.eup %4709  ;;  %v748_v35 = vadd.f32 1.0, %v4708_v33 }
 0x2a6   :  { %v754_v36 = vadd.f32 1.0, %v4710_v34  ;;  %v4712_v37 = vpop.eup %4711  ;;  %v3916_v34 = vpack.c.bf16 %v1433_v24, %v1429_v20  ;;  %v1464_v20 = vld [vmem:[#allocation10 + $0x160] sm:$0xff] }
 0x2a7   :  { %4715 = vrcp.f32 %v748_v35  ;;  %v4714_v38 = vpop.eup %4713  ;;  %v761_v43 = vadd.f32 1.0, %v4712_v37  ;;  %v1437_v35 = vld [vmem:[#allocation10 + $0x88] sm:$0xff]  ;;  %v1430_v37 = vld [vmem:[#allocation10 + $0x50] sm:$0xff] }
 0x2a8   :  { %4717 = vrcp.f32 %v754_v36  ;;  %v3980_v36 = vpack.c.bf16 %v1435_v26, %v1431_v25  ;;  %v1462_v25 = vld [vmem:[#allocation10 + $0x150] sm:$0xff] }
 0x2a9   :  { %4719 = vrcp.f32 %v761_v43  ;;  %v1436_v43 = vld [vmem:[#allocation10 + $0x80] sm:$0xff]  ;;  %v1466_v26 = vld [vmem:[#allocation10 + $0x170] sm:$0xff] }
 0x2b1   :  { %v4716_v40 = vpop.eup %4715 }
 0x2b2   :  { %v4718_v41 = vpop.eup %4717  ;;  %v767_v42 = vmul.f32 %v4716_v40, %v4714_v38  ;;  %v1434_v38 = vld [vmem:[#allocation10 + $0x70] sm:$0xff]  ;;  %v1439_v40 = vld [vmem:[#allocation10 + $0x98] sm:$0xff] }
 0x2b3   :  { %v766_v44 = vmul.f32 %v4718_v41, %v765_v39  ;;  %v4720_v46 = vpop.eup %4719  ;;  %v1441_v39 = vld [vmem:[#allocation10 + $0xa8] sm:$0xff]  ;;  %v1443_v41 = vld [vmem:[#allocation10 + $0xb8] sm:$0xff] }
 0x2b5   :  { %v768_v45 = vadd.f32 %v767_v42, %v766_v44  ;;  %v3918_v42 = vpack.c.bf16 %v1432_v31, %v1428_v30  ;;  %v1440_v44 = vld [vmem:[#allocation10 + $0xa0] sm:$0xff]  ;;  %v1475_v30 = vld [vmem:[#allocation10 + $0x1b8] sm:$0xff]  ;;  %v3934_v31 = vpack.c.bf16 %v1464_v20, %v1460_v18 }
 0x2b6   :  { %v1500_v18 = vld [vmem:[#allocation10 + $0x280] sm:$0xff] }
 0x2b7   :  { %4721 = vtanh.f32 %v768_v45  ;;  %772 = vst [vmem:[#allocation3 + $0x2] sm:$0x3] %v768_v45  ;;  %v3982_v45 = vpack.c.bf16 %v1434_v38, %v1430_v37  ;;  %v1470_v38 = vld [vmem:[#allocation10 + $0x190] sm:$0xff]  ;;  %v1504_v20 = vld [vmem:[#allocation10 + $0x2a0] sm:$0xff] }
 0x2c1   :  { %v4722_v47 = vpop.eup %4721 }
 0x2c2   :  { %v770_v48 = vmul.f32 %v4722_v47, %v4720_v46  ;;  %v3920_v46 = vpack.c.bf16 %v1441_v39, %v1437_v35  ;;  %v1445_v47 = vld [vmem:[#allocation10 + $0xc8] sm:$0xff]  ;;  %v1474_v39 = vld [vmem:[#allocation10 + $0x1b0] sm:$0xff] }
 0x2c4   :  { %771 = vst [vmem:[#allocation2 + $0x2] sm:$0x3] %v770_v48  ;;  %773 = vst [vmem:[#allocation16] sm:$0x3] %v770_v48  ;;  %v3984_v48 = vpack.c.bf16 %v1443_v41, %v1439_v40  ;;  %v1481_v40 = vld [vmem:[#allocation10 + $0x1e8] sm:$0xff]  ;;  %v1479_v41 = vld [vmem:[#allocation10 + $0x1d8] sm:$0xff] }
 0x2cb   :  { %v1225_v49 = vld [vmem:[#allocation2 + $0x2] sm:$0x3] }
 0x2cc   :  { %1311 = vmatprep.mubr.f32.mxu0 %v1225_v49  ;;  %1382 = vmatprep.mubr.f32.mxu1 %v1225_v49  ;;  %v1438_v49 = vld [vmem:[#allocation10 + $0x90] sm:$0xff] }
 0x2d5   :  { %v993_v53 = vpop.f32.mrb[4].mxu0  ;;  %v1064_v54 = vpop.f32.mrb[4].mxu1 }
 0x2d6   :  { %v994_v55 = vadd.f32 %v993_v53, %v910_v51  ;;  %v995_v56 = vpop.f32.mrb[5].mxu0  ;;  %v1066_v57 = vpop.f32.mrb[5].mxu1  ;;  %v1065_v1 = vadd.f32 %v1064_v54, %v918_v63  ;;  %v1449_v51 = vld [vmem:[#allocation10 + $0xe8] sm:$0xff]  ;;  %v1451_v53 = vld [vmem:[#allocation10 + $0xf8] sm:$0xff]  ;;  %v3922_v54 = vpack.c.bf16 %v1440_v44, %v1436_v43  ;;  %v1450_v63 = vld [vmem:[#allocation10 + $0xf0] sm:$0xff] }
 0x2d7   :  { %v996_v58 = vadd.f32 %v995_v56, %v914_v52  ;;  %v1067_v62 = vadd.f32 %v1066_v57, %v922_v60  ;;  %v1447_v52 = vld [vmem:[#allocation10 + $0xd8] sm:$0xff]  ;;  %v1448_v56 = vld [vmem:[#allocation10 + $0xe0] sm:$0xff]  ;;  %v1453_v57 = vld [vmem:[#allocation10 + $0x108] sm:$0xff] }
 0x2d8   :  { %v3376_v59 = vmul.f32 -1.442695, %v994_v55  ;;  %v1444_v55 = vld [vmem:[#allocation10 + $0xc0] sm:$0xff]  ;;  %v1457_v60 = vld [vmem:[#allocation10 + $0x128] sm:$0xff] }
 0x2d9   :  { %v3377_v61 = vmul.f32 -1.442695, %v996_v58  ;;  %v3378_v0 = vmul.f32 -1.442695, %v1067_v62  ;;  %v3986_v58 = vpack.c.bf16 %v1442_v50, %v1438_v49  ;;  %v1446_v62 = vld [vmem:[#allocation10 + $0xd0] sm:$0xff]  ;;  %v1476_v44 = vld [vmem:[#allocation10 + $0x1c0] sm:$0xff] }
 0x2da   :  { %4723 = vpow2.f32 %v3376_v59  ;;  %v3924_v59 = vpack.c.bf16 %v1449_v51, %v1445_v47  ;;  %v1478_v50 = vld [vmem:[#allocation10 + $0x1d0] sm:$0xff] }
 0x2db   :  { %4725 = vpow2.f32 %v3377_v61  ;;  %v3988_v61 = vpack.c.bf16 %v1451_v53, %v1447_v52  ;;  %v1482_v51 = vld [vmem:[#allocation10 + $0x1f0] sm:$0xff]  ;;  %v1489_v52 = vld [vmem:[#allocation10 + $0x228] sm:$0xff]  ;;  %v1487_v53 = vld [vmem:[#allocation10 + $0x218] sm:$0xff] }
 0x2dc   :  { %4727 = vpow2.f32 %v3378_v0 }
 0x2dd   :  { %4729 = vtanh.f32 %v1065_v1  ;;  %v1455_v1 = vld [vmem:[#allocation10 + $0x118] sm:$0xff] }
 0x2e4   :  { %v4724_v2 = vpop.eup %4723 }
 0x2e5   :  { %v4726_v3 = vpop.eup %4725  ;;  %v1072_v4 = vadd.f32 1.0, %v4724_v2  ;;  %v1459_v2 = vld [vmem:[#allocation10 + $0x138] sm:$0xff] }
 0x2e6   :  { %v1078_v5 = vadd.f32 1.0, %v4726_v3  ;;  %v4728_v6 = vpop.eup %4727  ;;  %v3926_v3 = vpack.c.bf16 %v1448_v56, %v1444_v55  ;;  %v1484_v56 = vld [vmem:[#allocation10 + $0x200] sm:$0xff] }
 0x2e7   :  { %4731 = vrcp.f32 %v1072_v4  ;;  %v4730_v7 = vpop.eup %4729  ;;  %v1085_v9 = vadd.f32 1.0, %v4728_v6  ;;  %v1452_v4 = vld [vmem:[#allocation10 + $0x100] sm:$0xff]  ;;  %v3990_v6 = vpack.c.bf16 %v1450_v63, %v1446_v62  ;;  %v1486_v62 = vld [vmem:[#allocation10 + $0x210] sm:$0xff] }
 0x2e8   :  { %4733 = vrcp.f32 %v1078_v5  ;;  %v1456_v5 = vld [vmem:[#allocation10 + $0x120] sm:$0xff]  ;;  %v1490_v63 = vld [vmem:[#allocation10 + $0x230] sm:$0xff] }
 0x2e9   :  { %4735 = vrcp.f32 %v1085_v9  ;;  %v3992_v9 = vpack.c.bf16 %v1459_v2, %v1455_v1  ;;  %v3930_v17 = vpack.c.bf16 %v1456_v5, %v1452_v4  ;;  %v1495_v1 = vld [vmem:[#allocation10 + $0x258] sm:$0xff]  ;;  %v1492_v4 = vld [vmem:[#allocation10 + $0x240] sm:$0xff] }
 0x2ea   :  { %v1499_v2 = vld [vmem:[#allocation10 + $0x278] sm:$0xff]  ;;  %v1496_v5 = vld [vmem:[#allocation10 + $0x260] sm:$0xff] }
 0x2f1   :  { %v4732_v8 = vpop.eup %4731 }
 0x2f2   :  { %v4734_v10 = vpop.eup %4733  ;;  %v1090_v12 = vmul.f32 %v4732_v8, %v4730_v7  ;;  %v3928_v7 = vpack.c.bf16 %v1457_v60, %v1453_v57  ;;  %v1461_v8 = vld [vmem:[#allocation10 + $0x148] sm:$0xff]  ;;  %v1488_v57 = vld [vmem:[#allocation10 + $0x220] sm:$0xff] }
 0x2f3   :  { %v1089_v13 = vmul.f32 %v4734_v10, %v1088_v11  ;;  %v4736_v23 = vpop.eup %4735  ;;  %v1454_v10 = vld [vmem:[#allocation10 + $0x110] sm:$0xff]  ;;  %v1493_v60 = vld [vmem:[#allocation10 + $0x248] sm:$0xff] }
 0x2f4   :  { %v1458_v11 = vld [vmem:[#allocation10 + $0x130] sm:$0xff] }
 0x2f5   :  { %v1091_v15 = vadd.f32 %v1090_v12, %v1089_v13  ;;  %v1465_v12 = vld [vmem:[#allocation10 + $0x168] sm:$0xff]  ;;  %v1463_v13 = vld [vmem:[#allocation10 + $0x158] sm:$0xff]  ;;  %v3994_v21 = vpack.c.bf16 %v1458_v11, %v1454_v10  ;;  %v1494_v10 = vld [vmem:[#allocation10 + $0x250] sm:$0xff] }
 0x2f6   :  { %v3932_v22 = vpack.c.bf16 %v1465_v12, %v1461_v8  ;;  %v1501_v8 = vld [vmem:[#allocation10 + $0x288] sm:$0xff]  ;;  %v1498_v11 = vld [vmem:[#allocation10 + $0x270] sm:$0xff] }
 0x2f7   :  { %4737 = vtanh.f32 %v1091_v15  ;;  %1095 = vst [vmem:[#allocation3] sm:$0x3] %v1091_v15  ;;  %v1467_v15 = vld [vmem:[#allocation10 + $0x178] sm:$0xff]  ;;  %v1505_v12 = vld [vmem:[#allocation10 + $0x2a8] sm:$0xff] }
 0x2f8   :  { %v3996_v24 = vpack.c.bf16 %v1467_v15, %v1463_v13  ;;  %v1503_v13 = vld [vmem:[#allocation10 + $0x298] sm:$0xff] }
 0x2f9   :  { %v1507_v15 = vld [vmem:[#allocation10 + $0x2b8] sm:$0xff] }
 0x301   :  { %v4738_v28 = vpop.eup %4737 }
 0x302   :  { %v1093_v33 = vmul.f32 %v4738_v28, %v4736_v23  ;;  %v1469_v23 = vld [vmem:[#allocation10 + $0x188] sm:$0xff] }
 0x303   :  { %v1473_v28 = vld [vmem:[#allocation10 + $0x1a8] sm:$0xff] }
 0x304   :  { %1094 = vst [vmem:[#allocation2] sm:$0x3] %v1093_v33  ;;  %1312 = vmatmul.mubr.f32.vlgmr.msra.gmra.mrb[6].mxu0 %v1093_v33  ;;  %1383 = vmatmul.mubr.f32.vlgmr.msra.gmra.mrb[6].mxu1 %v1093_v33  ;;  %v1472_v33 = vld [vmem:[#allocation10 + $0x1a0] sm:$0xff]  ;;  %v3936_v35 = vpack.c.bf16 %v1473_v28, %v1469_v23  ;;  %v1509_v23 = vld [vmem:[#allocation10 + $0x2c8] sm:$0xff] }
 0x305   :  { %3915 = vmatpush1.bf16.msra.mxu0 %v3914_v29  ;;  %3979 = vmatpush1.bf16.msra.mxu1 %v3978_v32  ;;  %v1471_v29 = vld [vmem:[#allocation10 + $0x198] sm:$0xff]  ;;  %v1468_v32 = vld [vmem:[#allocation10 + $0x180] sm:$0xff]  ;;  %v1513_v28 = vld [vmem:[#allocation10 + $0x2e8] sm:$0xff] }
 0x306   :  { %3917 = vmatprep.subr.bf16.mxu0 %v3916_v34  ;;  %3981 = vmatprep.subr.bf16.mxu1 %v3980_v36  ;;  %v3998_v34 = vpack.c.bf16 %v1466_v26, %v1462_v25  ;;  %v1477_v36 = vld [vmem:[#allocation10 + $0x1c8] sm:$0xff]  ;;  %v4000_v37 = vpack.c.bf16 %v1475_v30, %v1471_v29  ;;  %v3938_v43 = vpack.c.bf16 %v1472_v33, %v1468_v32  ;;  %v1502_v25 = vld [vmem:[#allocation10 + $0x290] sm:$0xff]  ;;  %v1511_v29 = vld [vmem:[#allocation10 + $0x2d8] sm:$0xff] }
 0x307   :  { %v3940_v47 = vpack.c.bf16 %v1481_v40, %v1477_v36  ;;  %v1506_v26 = vld [vmem:[#allocation10 + $0x2b0] sm:$0xff]  ;;  %v1515_v30 = vld [vmem:[#allocation10 + $0x2f8] sm:$0xff]  ;;  %v1508_v32 = vld [vmem:[#allocation10 + $0x2c0] sm:$0xff] }
 0x308   :  { %v1512_v33 = vld [vmem:[#allocation10 + $0x2e0] sm:$0xff]  ;;  %v1517_v36 = vld [vmem:[#allocation10 + $0x308] sm:$0xff] }
 0x309   :  { %3919 = vmatpush1.bf16.msra.mxu0 %v3918_v42  ;;  %3983 = vmatpush1.bf16.msra.mxu1 %v3982_v45  ;;  %v1483_v42 = vld [vmem:[#allocation10 + $0x1f8] sm:$0xff]  ;;  %v1480_v45 = vld [vmem:[#allocation10 + $0x1e0] sm:$0xff]  ;;  %v1521_v40 = vld [vmem:[#allocation10 + $0x328] sm:$0xff] }
 0x30a   :  { %3921 = vmatprep.subr.bf16.mxu0 %v3920_v46  ;;  %3985 = vmatprep.subr.bf16.mxu1 %v3984_v48  ;;  %v4002_v46 = vpack.c.bf16 %v1474_v39, %v1470_v38  ;;  %v1485_v48 = vld [vmem:[#allocation10 + $0x208] sm:$0xff]  ;;  %v4004_v49 = vpack.c.bf16 %v1483_v42, %v1479_v41  ;;  %v3942_v55 = vpack.c.bf16 %v1480_v45, %v1476_v44  ;;  %v1510_v38 = vld [vmem:[#allocation10 + $0x2d0] sm:$0xff]  ;;  %v1519_v41 = vld [vmem:[#allocation10 + $0x318] sm:$0xff] }
 0x30b   :  { %v1549_v0 = vld [vmem:[#allocation2] sm:$0x3]  ;;  %v1514_v39 = vld [vmem:[#allocation10 + $0x2f0] sm:$0xff]  ;;  %v1523_v42 = vld [vmem:[#allocation10 + $0x338] sm:$0xff] }
 0x30c   :  { %1635 = vmatprep.mubr.f32.mxu0 %v1549_v0  ;;  %1706 = vmatprep.mubr.f32.mxu1 %v1549_v0  ;;  %v1497_v0 = vld [vmem:[#allocation10 + $0x268] sm:$0xff]  ;;  %v1516_v44 = vld [vmem:[#allocation10 + $0x300] sm:$0xff] }
 0x30d   :  { %3923 = vmatpush1.bf16.msra.mxu0 %v3922_v54  ;;  %3987 = vmatpush1.bf16.msra.mxu1 %v3986_v58  ;;  %v1491_v54 = vld [vmem:[#allocation10 + $0x238] sm:$0xff]  ;;  %v4006_v58 = vpack.c.bf16 %v1482_v51, %v1478_v50  ;;  %v1520_v45 = vld [vmem:[#allocation10 + $0x320] sm:$0xff]  ;;  %v1518_v50 = vld [vmem:[#allocation10 + $0x310] sm:$0xff] }
 0x30e   :  { %3925 = vmatprep.subr.bf16.mxu0 %v3924_v59  ;;  %3989 = vmatprep.subr.bf16.mxu1 %v3988_v61  ;;  %v3944_v59 = vpack.c.bf16 %v1489_v52, %v1485_v48  ;;  %v4008_v61 = vpack.c.bf16 %v1491_v54, %v1487_v53  ;;  %v1525_v48 = vld [vmem:[#allocation10 + $0x348] sm:$0xff]  ;;  %v1522_v51 = vld [vmem:[#allocation10 + $0x330] sm:$0xff]  ;;  %v1527_v53 = vld [vmem:[#allocation10 + $0x358] sm:$0xff] }
 0x30f   :  { %v1529_v52 = vld [vmem:[#allocation10 + $0x368] sm:$0xff]  ;;  %v1531_v54 = vld [vmem:[#allocation10 + $0x378] sm:$0xff] }
 0x311   :  { %3927 = vmatpush1.bf16.msra.mxu0 %v3926_v3  ;;  %3991 = vmatpush1.bf16.msra.mxu1 %v3990_v6  ;;  %v3946_v3 = vpack.c.bf16 %v1488_v57, %v1484_v56  ;;  %v4010_v6 = vpack.c.bf16 %v1490_v63, %v1486_v62  ;;  %v1524_v56 = vld [vmem:[#allocation10 + $0x340] sm:$0xff]  ;;  %v1526_v62 = vld [vmem:[#allocation10 + $0x350] sm:$0xff] }
 0x312   :  { %3929 = vmatprep.subr.bf16.mxu0 %v3928_v7  ;;  %3993 = vmatprep.subr.bf16.mxu1 %v3992_v9  ;;  %v3948_v7 = vpack.c.bf16 %v1497_v0, %v1493_v60  ;;  %v4012_v9 = vpack.c.bf16 %v1499_v2, %v1495_v1  ;;  %v1528_v57 = vld [vmem:[#allocation10 + $0x360] sm:$0xff]  ;;  %v1533_v60 = vld [vmem:[#allocation10 + $0x388] sm:$0xff]  ;;  %v1530_v63 = vld [vmem:[#allocation10 + $0x370] sm:$0xff] }
 0x313   :  { %v1537_v0 = vld [vmem:[#allocation10 + $0x3a8] sm:$0xff]  ;;  %v1535_v1 = vld [vmem:[#allocation10 + $0x398] sm:$0xff] }
 0x314   :  { %v1539_v2 = vld [vmem:[#allocation10 + $0x3b8] sm:$0xff] }
 0x315   :  { %3931 = vmatpush1.bf16.msra.mxu0 %v3930_v17  ;;  %3995 = vmatpush1.bf16.msra.mxu1 %v3994_v21  ;;  %v3950_v17 = vpack.c.bf16 %v1496_v5, %v1492_v4  ;;  %v4014_v21 = vpack.c.bf16 %v1498_v11, %v1494_v10  ;;  %v1532_v4 = vld [vmem:[#allocation10 + $0x380] sm:$0xff]  ;;  %v1534_v10 = vld [vmem:[#allocation10 + $0x390] sm:$0xff] }
 0x316   :  { %3933 = vmatprep.subr.bf16.mxu0 %v3932_v22  ;;  %3997 = vmatprep.subr.bf16.mxu1 %v3996_v24  ;;  %v3952_v22 = vpack.c.bf16 %v1505_v12, %v1501_v8  ;;  %v4016_v24 = vpack.c.bf16 %v1507_v15, %v1503_v13  ;;  %v1536_v5 = vld [vmem:[#allocation10 + $0x3a0] sm:$0xff]  ;;  %v1541_v8 = vld [vmem:[#allocation10 + $0x3c8] sm:$0xff]  ;;  %v1538_v11 = vld [vmem:[#allocation10 + $0x3b0] sm:$0xff] }
 0x317   :  { %v1545_v12 = vld [vmem:[#allocation10 + $0x3e8] sm:$0xff]  ;;  %v1543_v13 = vld [vmem:[#allocation10 + $0x3d8] sm:$0xff] }
 0x318   :  { %v1547_v15 = vld [vmem:[#allocation10 + $0x3f8] sm:$0xff] }
 0x319   :  { %3935 = vmatpush1.bf16.msra.mxu0 %v3934_v31  ;;  %3999 = vmatpush1.bf16.msra.mxu1 %v3998_v34  ;;  %v3954_v31 = vpack.c.bf16 %v1504_v20, %v1500_v18  ;;  %v4018_v34 = vpack.c.bf16 %v1506_v26, %v1502_v25  ;;  %v1540_v18 = vld [vmem:[#allocation10 + $0x3c0] sm:$0xff]  ;;  %v4034_v20 = vpack.c.bf16 %v1538_v11, %v1534_v10  ;;  %v1546_v25 = vld [vmem:[#allocation10 + $0x3f0] sm:$0xff] }
 0x31a   :  { %3937 = vmatprep.subr.bf16.mxu0 %v3936_v35  ;;  %4001 = vmatprep.subr.bf16.mxu1 %v4000_v37  ;;  %v3956_v35 = vpack.c.bf16 %v1513_v28, %v1509_v23  ;;  %v4020_v37 = vpack.c.bf16 %v1515_v30, %v1511_v29  ;;  %v4036_v23 = vpack.c.bf16 %v1547_v15, %v1543_v13  ;;  %v1419_v29 = vld [vmem:[#allocation4 + $0x4] sm:$0x3]  ;;  %v1766_v11 = vld [vmem:[#allocation13 + $0xd0] sm:$0xff] }
 0x31b   :  { %v1741_v30 = vld [vmem:[#allocation13 + $0x8] sm:$0xff] }
 0x31c   :  { %v1773_v13 = vld [vmem:[#allocation13 + $0x108] sm:$0xff] }
 0x31d   :  { %3939 = vmatpush1.bf16.msra.mxu0 %v3938_v43  ;;  %4003 = vmatpush1.bf16.msra.mxu1 %v4002_v46  ;;  %v3958_v43 = vpack.c.bf16 %v1512_v33, %v1508_v32  ;;  %v4022_v46 = vpack.c.bf16 %v1514_v39, %v1510_v38  ;;  %v1740_v33 = vld [vmem:[#allocation13] sm:$0xff]  ;;  %v1742_v38 = vld [vmem:[#allocation13 + $0x10] sm:$0xff] }
 0x31e   :  { %3941 = vmatprep.subr.bf16.mxu0 %v3940_v47  ;;  %4005 = vmatprep.subr.bf16.mxu1 %v4004_v49  ;;  %v3960_v47 = vpack.c.bf16 %v1521_v40, %v1517_v36  ;;  %v4024_v49 = vpack.c.bf16 %v1523_v42, %v1519_v41  ;;  %v1746_v39 = vld [vmem:[#allocation13 + $0x30] sm:$0xff]  ;;  %v1749_v42 = vld [vmem:[#allocation13 + $0x48] sm:$0xff] }
 0x31f   :  { %v4106_v41 = vpack.c.bf16 %v1746_v39, %v1742_v38  ;;  %v1782_v38 = vld [vmem:[#allocation13 + $0x150] sm:$0xff] }
 0x320   :  { %v1786_v39 = vld [vmem:[#allocation13 + $0x170] sm:$0xff] }
 0x321   :  { %3943 = vmatpush1.bf16.msra.mxu0 %v3942_v55  ;;  %4007 = vmatpush1.bf16.msra.mxu1 %v4006_v58  ;;  %v3962_v55 = vpack.c.bf16 %v1520_v45, %v1516_v44  ;;  %v4026_v58 = vpack.c.bf16 %v1522_v51, %v1518_v50  ;;  %v1748_v44 = vld [vmem:[#allocation13 + $0x40] sm:$0xff]  ;;  %v1750_v51 = vld [vmem:[#allocation13 + $0x50] sm:$0xff] }
 0x322   :  { %3945 = vmatprep.subr.bf16.mxu0 %v3944_v59  ;;  %4009 = vmatprep.subr.bf16.mxu1 %v4008_v61  ;;  %v3964_v59 = vpack.c.bf16 %v1529_v52, %v1525_v48  ;;  %v4028_v61 = vpack.c.bf16 %v1531_v54, %v1527_v53  ;;  %v1755_v48 = vld [vmem:[#allocation13 + $0x78] sm:$0xff]  ;;  %v1754_v52 = vld [vmem:[#allocation13 + $0x70] sm:$0xff]  ;;  %v1757_v53 = vld [vmem:[#allocation13 + $0x88] sm:$0xff] }
 0x323   :  { %v4110_v54 = vpack.c.bf16 %v1754_v52, %v1750_v51  ;;  %v1794_v51 = vld [vmem:[#allocation13 + $0x1b0] sm:$0xff] }
 0x325   :  { %3947 = vmatpush1.bf16.msra.mxu0 %v3946_v3  ;;  %4011 = vmatpush1.bf16.msra.mxu1 %v4010_v6  ;;  %v3966_v3 = vpack.c.bf16 %v1528_v57, %v1524_v56  ;;  %v4030_v6 = vpack.c.bf16 %v1530_v63, %v1526_v62  ;;  %v1756_v56 = vld [vmem:[#allocation13 + $0x80] sm:$0xff]  ;;  %v1758_v63 = vld [vmem:[#allocation13 + $0x90] sm:$0xff] }
 0x326   :  { %3949 = vmatprep.subr.bf16.mxu0 %v3948_v7  ;;  %4013 = vmatprep.subr.bf16.mxu1 %v4012_v9  ;;  %v3968_v7 = vpack.c.bf16 %v1537_v0, %v1533_v60  ;;  %v4032_v9 = vpack.c.bf16 %v1539_v2, %v1535_v1  ;;  %v1760_v57 = vld [vmem:[#allocation13 + $0xa0] sm:$0xff]  ;;  %v1759_v60 = vld [vmem:[#allocation13 + $0x98] sm:$0xff]  ;;  %v1762_v0 = vld [vmem:[#allocation13 + $0xb0] sm:$0xff] }
 0x327   :  { %v4114_v1 = vpack.c.bf16 %v1762_v0, %v1758_v63  ;;  %v1765_v2 = vld [vmem:[#allocation13 + $0xc8] sm:$0xff]  ;;  %v1802_v63 = vld [vmem:[#allocation13 + $0x1f0] sm:$0xff] }
 0x329   :  { %3951 = vmatpush1.bf16.msra.mxu0 %v3950_v17  ;;  %4015 = vmatpush1.bf16.msra.mxu1 %v4014_v21  ;;  %v3970_v17 = vpack.c.bf16 %v1536_v5, %v1532_v4  ;;  %v3972_v21 = vpack.c.bf16 %v1545_v12, %v1541_v8  ;;  %v1764_v4 = vld [vmem:[#allocation13 + $0xc0] sm:$0xff]  ;;  %v1771_v8 = vld [vmem:[#allocation13 + $0xf8] sm:$0xff]  ;;  %v1770_v12 = vld [vmem:[#allocation13 + $0xf0] sm:$0xff] }
 0x32a   :  { %3953 = vmatprep.subr.bf16.mxu0 %v3952_v22  ;;  %4017 = vmatprep.subr.bf16.mxu1 %v4016_v24  ;;  %v1544_v22 = vld [vmem:[#allocation10 + $0x3e0] sm:$0xff]  ;;  %v1542_v24 = vld [vmem:[#allocation10 + $0x3d0] sm:$0xff]  ;;  %v4118_v15 = vpack.c.bf16 %v1770_v12, %v1766_v11 }
 0x32b   :  { %v3974_v26 = vpack.c.bf16 %v1544_v22, %v1540_v18  ;;  %v4038_v28 = vpack.c.bf16 %v1546_v25, %v1542_v24  ;;  %v1772_v18 = vld [vmem:[#allocation13 + $0x100] sm:$0xff]  ;;  %v1779_v24 = vld [vmem:[#allocation13 + $0x138] sm:$0xff]  ;;  %v1810_v11 = vld [vmem:[#allocation13 + $0x230] sm:$0xff] }
 0x32d   :  { %3955 = vmatpush1.bf16.msra.mxu0 %v3954_v31  ;;  %4019 = vmatpush1.bf16.msra.mxu1 %v4018_v34  ;;  %v1745_v31 = vld [vmem:[#allocation13 + $0x28] sm:$0xff]  ;;  %v1744_v34 = vld [vmem:[#allocation13 + $0x20] sm:$0xff] }
 0x32e   :  { %3957 = vmatprep.subr.bf16.mxu0 %v3956_v35  ;;  %4021 = vmatprep.subr.bf16.mxu1 %v4020_v37  ;;  %v4040_v32 = vpack.c.bf16 %v1745_v31, %v1741_v30  ;;  %v1743_v35 = vld [vmem:[#allocation13 + $0x18] sm:$0xff]  ;;  %v4042_v36 = vpack.c.bf16 %v1744_v34, %v1740_v33  ;;  %v1781_v30 = vld [vmem:[#allocation13 + $0x148] sm:$0xff]  ;;  %v1780_v33 = vld [vmem:[#allocation13 + $0x140] sm:$0xff] }
 0x32f   :  { %v1747_v37 = vld [vmem:[#allocation13 + $0x38] sm:$0xff]  ;;  %v1785_v31 = vld [vmem:[#allocation13 + $0x168] sm:$0xff]  ;;  %v1784_v34 = vld [vmem:[#allocation13 + $0x160] sm:$0xff] }
 0x330   :  { %v4104_v40 = vpack.c.bf16 %v1747_v37, %v1743_v35  ;;  %v1783_v35 = vld [vmem:[#allocation13 + $0x158] sm:$0xff] }
 0x331   :  { %3959 = vmatpush1.bf16.msra.mxu0 %v3958_v43  ;;  %4023 = vmatpush1.bf16.msra.mxu1 %v4022_v46  ;;  %v1753_v43 = vld [vmem:[#allocation13 + $0x68] sm:$0xff]  ;;  %v1752_v46 = vld [vmem:[#allocation13 + $0x60] sm:$0xff]  ;;  %v1787_v37 = vld [vmem:[#allocation13 + $0x178] sm:$0xff] }
 0x332   :  { %3961 = vmatprep.subr.bf16.mxu0 %v3960_v47  ;;  %4025 = vmatprep.subr.bf16.mxu1 %v4024_v49  ;;  %v4044_v45 = vpack.c.bf16 %v1753_v43, %v1749_v42  ;;  %v1751_v47 = vld [vmem:[#allocation13 + $0x58] sm:$0xff]  ;;  %v4046_v49 = vpack.c.bf16 %v1752_v46, %v1748_v44  ;;  %v1789_v42 = vld [vmem:[#allocation13 + $0x188] sm:$0xff]  ;;  %v1792_v46 = vld [vmem:[#allocation13 + $0x1a0] sm:$0xff] }
 0x333   :  { %v4108_v50 = vpack.c.bf16 %v1755_v48, %v1751_v47  ;;  %v1793_v43 = vld [vmem:[#allocation13 + $0x1a8] sm:$0xff]  ;;  %v1791_v47 = vld [vmem:[#allocation13 + $0x198] sm:$0xff] }
 0x334   :  { %v4064_v44 = vpack.c.bf16 %v1793_v43, %v1789_v42  ;;  %v1829_v42 = vld [vmem:[#allocation13 + $0x2c8] sm:$0xff] }
 0x335   :  { %3963 = vmatpush1.bf16.msra.mxu0 %v3962_v55  ;;  %4027 = vmatpush1.bf16.msra.mxu1 %v4026_v58  ;;  %v1761_v55 = vld [vmem:[#allocation13 + $0xa8] sm:$0xff] }
 0x336   :  { %3965 = vmatprep.subr.bf16.mxu0 %v3964_v59  ;;  %4029 = vmatprep.subr.bf16.mxu1 %v4028_v61  ;;  %v4048_v58 = vpack.c.bf16 %v1761_v55, %v1757_v53  ;;  %v4050_v59 = vpack.c.bf16 %v1760_v57, %v1756_v56  ;;  %v1763_v61 = vld [vmem:[#allocation13 + $0xb8] sm:$0xff]  ;;  %v1801_v55 = vld [vmem:[#allocation13 + $0x1e8] sm:$0xff]  ;;  %v1796_v57 = vld [vmem:[#allocation13 + $0x1c0] sm:$0xff] }
 0x337   :  { %v4112_v62 = vpack.c.bf16 %v1763_v61, %v1759_v60  ;;  %v1803_v61 = vld [vmem:[#allocation13 + $0x1f8] sm:$0xff]  ;;  %v1833_v43 = vld [vmem:[#allocation13 + $0x2e8] sm:$0xff] }
 0x339   :  { %3967 = vmatpush1.bf16.msra.mxu0 %v3966_v3  ;;  %4031 = vmatpush1.bf16.msra.mxu1 %v4030_v6  ;;  %v1769_v3 = vld [vmem:[#allocation13 + $0xe8] sm:$0xff]  ;;  %v1768_v6 = vld [vmem:[#allocation13 + $0xe0] sm:$0xff] }
 0x33a   :  { %3969 = vmatprep.subr.bf16.mxu0 %v3968_v7  ;;  %4033 = vmatprep.subr.bf16.mxu1 %v4032_v9  ;;  %v4052_v5 = vpack.c.bf16 %v1769_v3, %v1765_v2  ;;  %v1767_v7 = vld [vmem:[#allocation13 + $0xd8] sm:$0xff]  ;;  %v4054_v9 = vpack.c.bf16 %v1768_v6, %v1764_v4  ;;  %v1805_v2 = vld [vmem:[#allocation13 + $0x208] sm:$0xff]  ;;  %v1808_v6 = vld [vmem:[#allocation13 + $0x220] sm:$0xff] }
 0x33b   :  { %v4116_v10 = vpack.c.bf16 %v1771_v8, %v1767_v7  ;;  %v1809_v3 = vld [vmem:[#allocation13 + $0x228] sm:$0xff]  ;;  %v1807_v7 = vld [vmem:[#allocation13 + $0x218] sm:$0xff] }
 0x33c   :  { %v4072_v4 = vpack.c.bf16 %v1809_v3, %v1805_v2  ;;  %v1845_v2 = vld [vmem:[#allocation13 + $0x348] sm:$0xff] }
 0x33d   :  { %3971 = vmatpush1.bf16.msra.mxu0 %v3970_v17  ;;  %4035 = vmatpush1.bf16.msra.mxu1 %v4034_v20  ;;  %v1777_v17 = vld [vmem:[#allocation13 + $0x128] sm:$0xff]  ;;  %v1776_v20 = vld [vmem:[#allocation13 + $0x120] sm:$0xff] }
 0x33e   :  { %3973 = vmatprep.subr.bf16.mxu0 %v3972_v21  ;;  %4037 = vmatprep.subr.bf16.mxu1 %v4036_v23  ;;  %v4056_v21 = vpack.c.bf16 %v1777_v17, %v1773_v13  ;;  %v4058_v22 = vpack.c.bf16 %v1776_v20, %v1772_v18  ;;  %v1775_v23 = vld [vmem:[#allocation13 + $0x118] sm:$0xff]  ;;  %v1817_v17 = vld [vmem:[#allocation13 + $0x268] sm:$0xff]  ;;  %v1812_v20 = vld [vmem:[#allocation13 + $0x240] sm:$0xff] }
 0x33f   :  { %v4120_v25 = vpack.c.bf16 %v1779_v24, %v1775_v23  ;;  %v1819_v24 = vld [vmem:[#allocation13 + $0x278] sm:$0xff]  ;;  %v1849_v3 = vld [vmem:[#allocation13 + $0x368] sm:$0xff] }
 0x341   :  { %3975 = vmatpush1.bf16.msra.mxu0 %v3974_v26  ;;  %4039 = vmatpush1.bf16.msra.mxu1 %v4038_v28  ;;  %v1774_v26 = vld [vmem:[#allocation13 + $0x110] sm:$0xff] }
 0x342   :  { %4041 = vmatprep.subr.bf16.mxu0 %v4040_v32  ;;  %4105 = vmatprep.subr.bf16.mxu1 %v4104_v40  ;;  %v1778_v28 = vld [vmem:[#allocation13 + $0x130] sm:$0xff]  ;;  %v4060_v32 = vpack.c.bf16 %v1785_v31, %v1781_v30  ;;  %v4124_v40 = vpack.c.bf16 %v1787_v37, %v1783_v35  ;;  %v1821_v30 = vld [vmem:[#allocation13 + $0x288] sm:$0xff]  ;;  %v1823_v35 = vld [vmem:[#allocation13 + $0x298] sm:$0xff] }
 0x343   :  { %v1825_v31 = vld [vmem:[#allocation13 + $0x2a8] sm:$0xff]  ;;  %v1827_v37 = vld [vmem:[#allocation13 + $0x2b8] sm:$0xff] }
 0x344   :  { %1636 = vmatmul.mubr.f32.vlgmr.msra.gmra.mrb[8].mxu0 %v1419_v29  ;;  %1707 = vmatmul.mubr.f32.vlgmr.msra.gmra.mrb[8].mxu1 %v1419_v29  ;;  %v4122_v29 = vpack.c.bf16 %v1778_v28, %v1774_v26  ;;  %v1818_v26 = vld [vmem:[#allocation13 + $0x270] sm:$0xff] }
 0x345   :  { %4043 = vmatpush1.bf16.msra.mxu0 %v4042_v36  ;;  %4107 = vmatpush1.bf16.msra.mxu1 %v4106_v41  ;;  %v4062_v36 = vpack.c.bf16 %v1784_v34, %v1780_v33  ;;  %v4126_v41 = vpack.c.bf16 %v1786_v39, %v1782_v38  ;;  %v1820_v33 = vld [vmem:[#allocation13 + $0x280] sm:$0xff]  ;;  %v1822_v38 = vld [vmem:[#allocation13 + $0x290] sm:$0xff] }
 0x346   :  { %4045 = vmatprep.subr.bf16.mxu0 %v4044_v45  ;;  %4109 = vmatprep.subr.bf16.mxu1 %v4108_v50  ;;  %v1788_v45 = vld [vmem:[#allocation13 + $0x180] sm:$0xff]  ;;  %v1790_v50 = vld [vmem:[#allocation13 + $0x190] sm:$0xff] }
 0x347   :  { %v4066_v48 = vpack.c.bf16 %v1792_v46, %v1788_v45  ;;  %v4130_v53 = vpack.c.bf16 %v1794_v51, %v1790_v50  ;;  %v1824_v34 = vld [vmem:[#allocation13 + $0x2a0] sm:$0xff]  ;;  %v1826_v39 = vld [vmem:[#allocation13 + $0x2b0] sm:$0xff] }
 0x348   :  { %v1828_v45 = vld [vmem:[#allocation13 + $0x2c0] sm:$0xff]  ;;  %v1830_v50 = vld [vmem:[#allocation13 + $0x2d0] sm:$0xff] }
 0x349   :  { %4047 = vmatpush1.bf16.msra.mxu0 %v4046_v49  ;;  %4111 = vmatpush1.bf16.msra.mxu1 %v4110_v54  ;;  %v1795_v49 = vld [vmem:[#allocation13 + $0x1b8] sm:$0xff]  ;;  %v1797_v54 = vld [vmem:[#allocation13 + $0x1c8] sm:$0xff]  ;;  %v1832_v46 = vld [vmem:[#allocation13 + $0x2e0] sm:$0xff] }
 0x34a   :  { %4049 = vmatprep.subr.bf16.mxu0 %v4048_v58  ;;  %4113 = vmatprep.subr.bf16.mxu1 %v4112_v62  ;;  %v4128_v52 = vpack.c.bf16 %v1795_v49, %v1791_v47  ;;  %v4068_v56 = vpack.c.bf16 %v1801_v55, %v1797_v54  ;;  %v1800_v58 = vld [vmem:[#allocation13 + $0x1e0] sm:$0xff]  ;;  %v1798_v62 = vld [vmem:[#allocation13 + $0x1d0] sm:$0xff]  ;;  %v1831_v47 = vld [vmem:[#allocation13 + $0x2d8] sm:$0xff] }
 0x34b   :  { %v4070_v60 = vpack.c.bf16 %v1800_v58, %v1796_v57  ;;  %v1835_v49 = vld [vmem:[#allocation13 + $0x2f8] sm:$0xff]  ;;  %v1834_v51 = vld [vmem:[#allocation13 + $0x2f0] sm:$0xff]  ;;  %v1837_v54 = vld [vmem:[#allocation13 + $0x308] sm:$0xff] }
 0x34c   :  { %v1841_v55 = vld [vmem:[#allocation13 + $0x328] sm:$0xff]  ;;  %v1836_v57 = vld [vmem:[#allocation13 + $0x300] sm:$0xff] }
 0x34d   :  { %4051 = vmatpush1.bf16.msra.mxu0 %v4050_v59  ;;  %4115 = vmatpush1.bf16.msra.mxu1 %v4114_v1  ;;  %v1799_v59 = vld [vmem:[#allocation13 + $0x1d8] sm:$0xff]  ;;  %v4134_v1 = vpack.c.bf16 %v1802_v63, %v1798_v62  ;;  %v1840_v58 = vld [vmem:[#allocation13 + $0x320] sm:$0xff]  ;;  %v1838_v62 = vld [vmem:[#allocation13 + $0x310] sm:$0xff] }
 0x34e   :  { %4053 = vmatprep.subr.bf16.mxu0 %v4052_v5  ;;  %4117 = vmatprep.subr.bf16.mxu1 %v4116_v10  ;;  %v4132_v0 = vpack.c.bf16 %v1803_v61, %v1799_v59  ;;  %v1804_v5 = vld [vmem:[#allocation13 + $0x200] sm:$0xff]  ;;  %v1806_v10 = vld [vmem:[#allocation13 + $0x210] sm:$0xff]  ;;  %v1839_v59 = vld [vmem:[#allocation13 + $0x318] sm:$0xff] }
 0x34f   :  { %v4074_v8 = vpack.c.bf16 %v1808_v6, %v1804_v5  ;;  %v4138_v13 = vpack.c.bf16 %v1810_v11, %v1806_v10  ;;  %v1843_v61 = vld [vmem:[#allocation13 + $0x338] sm:$0xff]  ;;  %v1842_v63 = vld [vmem:[#allocation13 + $0x330] sm:$0xff]  ;;  %v1844_v5 = vld [vmem:[#allocation13 + $0x340] sm:$0xff] }
 0x350   :  { %v1848_v6 = vld [vmem:[#allocation13 + $0x360] sm:$0xff]  ;;  %v1846_v10 = vld [vmem:[#allocation13 + $0x350] sm:$0xff] }
 0x351   :  { %4055 = vmatpush1.bf16.msra.mxu0 %v4054_v9  ;;  %4119 = vmatpush1.bf16.msra.mxu1 %v4118_v15  ;;  %v1811_v9 = vld [vmem:[#allocation13 + $0x238] sm:$0xff]  ;;  %v1813_v15 = vld [vmem:[#allocation13 + $0x248] sm:$0xff]  ;;  %v1850_v11 = vld [vmem:[#allocation13 + $0x370] sm:$0xff] }
 0x352   :  { %4057 = vmatprep.subr.bf16.mxu0 %v4056_v21  ;;  %4121 = vmatprep.subr.bf16.mxu1 %v4120_v25  ;;  %v4136_v12 = vpack.c.bf16 %v1811_v9, %v1807_v7  ;;  %v4076_v18 = vpack.c.bf16 %v1817_v17, %v1813_v15  ;;  %v1816_v21 = vld [vmem:[#allocation13 + $0x260] sm:$0xff]  ;;  %v1814_v25 = vld [vmem:[#allocation13 + $0x250] sm:$0xff]  ;;  %v1847_v7 = vld [vmem:[#allocation13 + $0x358] sm:$0xff] }
 0x353   :  { %v4078_v23 = vpack.c.bf16 %v1816_v21, %v1812_v20  ;;  %v1851_v9 = vld [vmem:[#allocation13 + $0x378] sm:$0xff]  ;;  %v1853_v15 = vld [vmem:[#allocation13 + $0x388] sm:$0xff]  ;;  %v1856_v21 = vld [vmem:[#allocation13 + $0x3a0] sm:$0xff] }
 0x354   :  { %v1857_v17 = vld [vmem:[#allocation13 + $0x3a8] sm:$0xff] }
 0x355   :  { %4059 = vmatpush1.bf16.msra.mxu0 %v4058_v22  ;;  %4123 = vmatpush1.bf16.msra.mxu1 %v4122_v29  ;;  %v1815_v22 = vld [vmem:[#allocation13 + $0x258] sm:$0xff]  ;;  %v4142_v29 = vpack.c.bf16 %v1818_v26, %v1814_v25  ;;  %v4096_v20 = vpack.c.bf16 %v1857_v17, %v1853_v15  ;;  %v1854_v26 = vld [vmem:[#allocation13 + $0x390] sm:$0xff] }
 0x356   :  { %4061 = vmatprep.subr.bf16.mxu0 %v4060_v32  ;;  %4125 = vmatprep.subr.bf16.mxu1 %v4124_v40  ;;  %v4140_v28 = vpack.c.bf16 %v1819_v24, %v1815_v22  ;;  %v4080_v32 = vpack.c.bf16 %v1825_v31, %v1821_v30  ;;  %v4144_v40 = vpack.c.bf16 %v1827_v37, %v1823_v35  ;;  %v1855_v22 = vld [vmem:[#allocation13 + $0x398] sm:$0xff]  ;;  %v1865_v31 = vld [vmem:[#allocation13 + $0x3e8] sm:$0xff]  ;;  %v1862_v37 = vld [vmem:[#allocation13 + $0x3d0] sm:$0xff] }
 0x357   :  { %v1863_v35 = vld [vmem:[#allocation13 + $0x3d8] sm:$0xff] }
 0x359   :  { %4063 = vmatpush1.bf16.msra.mxu0 %v4062_v36  ;;  %4127 = vmatpush1.bf16.msra.mxu1 %v4126_v41  ;;  %v4082_v36 = vpack.c.bf16 %v1824_v34, %v1820_v33  ;;  %v4146_v41 = vpack.c.bf16 %v1826_v39, %v1822_v38  ;;  %v1864_v33 = vld [vmem:[#allocation13 + $0x3e0] sm:$0xff] }
 0x35a   :  { %4065 = vmatprep.subr.bf16.mxu0 %v4064_v44  ;;  %4129 = vmatprep.subr.bf16.mxu1 %v4128_v52  ;;  %v4084_v44 = vpack.c.bf16 %v1833_v43, %v1829_v42  ;;  %v4148_v52 = vpack.c.bf16 %v1835_v49, %v1831_v47  ;;  %v2069_v42 = vld [vmem:[#allocation10 + $0x28] sm:$0xff]  ;;  %v2071_v47 = vld [vmem:[#allocation10 + $0x38] sm:$0xff] }
 0x35d   :  { %4067 = vmatpush1.bf16.msra.mxu0 %v4066_v48  ;;  %4131 = vmatpush1.bf16.msra.mxu1 %v4130_v53  ;;  %v4086_v48 = vpack.c.bf16 %v1832_v46, %v1828_v45  ;;  %v4150_v53 = vpack.c.bf16 %v1834_v51, %v1830_v50  ;;  %v1224_v45 = vld [vmem:[#allocation15] sm:$0xf]  ;;  %v2067_v46 = vld [vmem:[#allocation10 + $0x18] sm:$0xff] }
 0x35e   :  { %4069 = vmatprep.subr.bf16.mxu0 %v4068_v56  ;;  %4133 = vmatprep.subr.bf16.mxu1 %v4132_v0  ;;  %v4088_v56 = vpack.c.bf16 %v1841_v55, %v1837_v54  ;;  %v4152_v0 = vpack.c.bf16 %v1843_v61, %v1839_v59  ;;  %v1230_v49 = vrot.slane %v1224_v45, %v5190_v14 }
 0x35f   :  { %v1234_v50 = vrot.slane %v1224_v45, %v5192_v16  ;;  %v1242_v59 = vrot.slane %v1224_v45, %v5196_v19  ;;  %v1238_v61 = vrot.slane %v1224_v45, %v5199_v27 }
 0x361   :  { %4071 = vmatpush1.bf16.msra.mxu0 %v4070_v60  ;;  %4135 = vmatpush1.bf16.msra.mxu1 %v4134_v1  ;;  %v4090_v60 = vpack.c.bf16 %v1840_v58, %v1836_v57  ;;  %v4154_v1 = vpack.c.bf16 %v1842_v63, %v1838_v62 }
 0x362   :  { %4073 = vmatprep.subr.bf16.mxu0 %v4072_v4  ;;  %4137 = vmatprep.subr.bf16.mxu1 %v4136_v12  ;;  %v4092_v4 = vpack.c.bf16 %v1849_v3, %v1845_v2  ;;  %v4156_v12 = vpack.c.bf16 %v1851_v9, %v1847_v7  ;;  %v1408_v9 = vld [vmem:[#allocation3 + $0x2] sm:$0x3] }
 0x365   :  { %4075 = vmatpush1.bf16.msra.mxu0 %v4074_v8  ;;  %4139 = vmatpush1.bf16.msra.mxu1 %v4138_v13  ;;  %v4094_v8 = vpack.c.bf16 %v1848_v6, %v1844_v5  ;;  %v4158_v13 = vpack.c.bf16 %v1850_v11, %v1846_v10 }
 0x366   :  { %4077 = vmatprep.subr.bf16.mxu0 %v4076_v18  ;;  %4141 = vmatprep.subr.bf16.mxu1 %v4140_v28  ;;  %v1852_v18 = vld [vmem:[#allocation13 + $0x380] sm:$0xff]  ;;  %v1858_v28 = vld [vmem:[#allocation13 + $0x3b0] sm:$0xff] }
 0x367   :  { %v4098_v24 = vpack.c.bf16 %v1856_v21, %v1852_v18  ;;  %v4162_v30 = vpack.c.bf16 %v1858_v28, %v1854_v26 }
 0x369   :  { %4079 = vmatpush1.bf16.msra.mxu0 %v4078_v23  ;;  %4143 = vmatpush1.bf16.msra.mxu1 %v4142_v29  ;;  %v1859_v23 = vld [vmem:[#allocation13 + $0x3b8] sm:$0xff]  ;;  %v1861_v29 = vld [vmem:[#allocation13 + $0x3c8] sm:$0xff] }
 0x36a   :  { %4081 = vmatprep.subr.bf16.mxu0 %v4080_v32  ;;  %4145 = vmatprep.subr.bf16.mxu1 %v4144_v40  ;;  %v4160_v25 = vpack.c.bf16 %v1859_v23, %v1855_v22  ;;  %v1860_v32 = vld [vmem:[#allocation13 + $0x3c0] sm:$0xff]  ;;  %v4100_v34 = vpack.c.bf16 %v1865_v31, %v1861_v29  ;;  %v1866_v40 = vld [vmem:[#allocation13 + $0x3f0] sm:$0xff] }
 0x36b   :  { %v4102_v38 = vpack.c.bf16 %v1864_v33, %v1860_v32 }
 0x36d   :  { %4083 = vmatpush1.bf16.msra.mxu0 %v4082_v36  ;;  %4147 = vmatpush1.bf16.msra.mxu1 %v4146_v41  ;;  %v1867_v36 = vld [vmem:[#allocation13 + $0x3f8] sm:$0xff]  ;;  %v2065_v41 = vld [vmem:[#allocation10 + $0x8] sm:$0xff] }
 0x36e   :  { %4085 = vmatprep.subr.bf16.mxu0 %v4084_v44  ;;  %4149 = vmatprep.subr.bf16.mxu1 %v4148_v52  ;;  %v4164_v39 = vpack.c.bf16 %v1867_v36, %v1863_v35  ;;  %v4168_v43 = vpack.c.bf16 %v2069_v42, %v2065_v41  ;;  %v4166_v44 = vpack.c.bf16 %v1866_v40, %v1862_v37 }
 0x371   :  { %4087 = vmatpush1.bf16.msra.mxu0 %v4086_v48  ;;  %4151 = vmatpush1.bf16.msra.mxu1 %v4150_v53  ;;  %v4232_v48 = vpack.c.bf16 %v2071_v47, %v2067_v46  ;;  %v1732_v46 = vld [vmem:[#allocation3] sm:$0x3] }
 0x372   :  { %4089 = vmatprep.subr.bf16.mxu0 %v4088_v56  ;;  %4153 = vmatprep.subr.bf16.mxu1 %v4152_v0 }
 0x375   :  { %4091 = vmatpush1.bf16.msra.mxu0 %v4090_v60  ;;  %4155 = vmatpush1.bf16.msra.mxu1 %v4154_v1 }
 0x376   :  { %4093 = vmatprep.subr.bf16.mxu0 %v4092_v4  ;;  %4157 = vmatprep.subr.bf16.mxu1 %v4156_v12 }
 0x379   :  { %4095 = vmatpush1.bf16.msra.mxu0 %v4094_v8  ;;  %4159 = vmatpush1.bf16.msra.mxu1 %v4158_v13 }
 0x37a   :  { %4097 = vmatprep.subr.bf16.mxu0 %v4096_v20  ;;  %4161 = vmatprep.subr.bf16.mxu1 %v4160_v25  ;;  %v1548_v20 = vld [vmem:[#allocation12] sm:$0xf] }
 0x37b   :  { %v1554_v21 = vrot.slane %v1548_v20, %v5190_v14  ;;  %v1558_v22 = vrot.slane %v1548_v20, %v5192_v16  ;;  %v1566_v31 = vrot.slane %v1548_v20, %v5196_v19 }
 0x37d   :  { %4099 = vmatpush1.bf16.msra.mxu0 %v4098_v24  ;;  %4163 = vmatpush1.bf16.msra.mxu1 %v4162_v30 }
 0x37e   :  { %4101 = vmatprep.subr.bf16.mxu0 %v4100_v34  ;;  %4165 = vmatprep.subr.bf16.mxu1 %v4164_v39  ;;  %v1562_v34 = vrot.slane %v1548_v20, %v5199_v27  ;;  %v2086_v20 = vld [vmem:[#allocation10 + $0xb0] sm:$0xff] }
 0x381   :  { %4103 = vmatpush1.bf16.msra.mxu0 %v4102_v38  ;;  %4167 = vmatpush1.bf16.msra.mxu1 %v4166_v44 }
 0x382   :  { %4169 = vmatprep.subr.bf16.mxu0 %v4168_v43  ;;  %4233 = vmatprep.subr.bf16.mxu1 %v4232_v48 }
 0x3d7   :  { %v1313_v51 = vpop.f32.mrb[6].mxu0  ;;  %v1384_v52 = vpop.f32.mrb[6].mxu1 }
 0x3d8   :  { %v1314_v53 = vadd.f32 %v1313_v51, %v1230_v49  ;;  %v1315_v54 = vpop.f32.mrb[7].mxu0  ;;  %v1386_v55 = vpop.f32.mrb[7].mxu1  ;;  %v1385_v63 = vadd.f32 %v1384_v52, %v1238_v61  ;;  %v2068_v51 = vld [vmem:[#allocation10 + $0x20] sm:$0xff]  ;;  %v2073_v52 = vld [vmem:[#allocation10 + $0x48] sm:$0xff] }
 0x3d9   :  { %v1316_v56 = vadd.f32 %v1315_v54, %v1234_v50  ;;  %v1387_v60 = vadd.f32 %v1386_v55, %v1242_v59  ;;  %v2064_v50 = vld [vmem:[#allocation10] sm:$0xff]  ;;  %v2070_v54 = vld [vmem:[#allocation10 + $0x30] sm:$0xff] }
 0x3da   :  { %v3379_v57 = vmul.f32 -1.442695, %v1314_v53  ;;  %v2066_v53 = vld [vmem:[#allocation10 + $0x10] sm:$0xff]  ;;  %v2072_v61 = vld [vmem:[#allocation10 + $0x40] sm:$0xff] }
 0x3db   :  { %v3380_v58 = vmul.f32 -1.442695, %v1316_v56  ;;  %v3381_v62 = vmul.f32 -1.442695, %v1387_v60  ;;  %v2077_v56 = vld [vmem:[#allocation10 + $0x68] sm:$0xff]  ;;  %v4170_v60 = vpack.c.bf16 %v2068_v51, %v2064_v50  ;;  %v2104_v51 = vld [vmem:[#allocation10 + $0x140] sm:$0xff] }
 0x3dc   :  { %4739 = vpow2.f32 %v3379_v57  ;;  %v2075_v57 = vld [vmem:[#allocation10 + $0x58] sm:$0xff] }
 0x3dd   :  { %4741 = vpow2.f32 %v3380_v58  ;;  %v2079_v58 = vld [vmem:[#allocation10 + $0x78] sm:$0xff] }
 0x3de   :  { %4743 = vpow2.f32 %v3381_v62  ;;  %v2076_v62 = vld [vmem:[#allocation10 + $0x60] sm:$0xff] }
 0x3df   :  { %4745 = vtanh.f32 %v1385_v63  ;;  %v4234_v63 = vpack.c.bf16 %v2070_v54, %v2066_v53 }
 0x3e6   :  { %v4740_v0 = vpop.eup %4739 }
 0x3e7   :  { %v4742_v1 = vpop.eup %4741  ;;  %v1392_v2 = vadd.f32 1.0, %v4740_v0 }
 0x3e8   :  { %v1398_v3 = vadd.f32 1.0, %v4742_v1  ;;  %v4744_v4 = vpop.eup %4743  ;;  %v4172_v1 = vpack.c.bf16 %v2077_v56, %v2073_v52  ;;  %v2108_v52 = vld [vmem:[#allocation10 + $0x160] sm:$0xff] }
 0x3e9   :  { %4747 = vrcp.f32 %v1392_v2  ;;  %v4746_v5 = vpop.eup %4745  ;;  %v1405_v10 = vadd.f32 1.0, %v4744_v4  ;;  %v2081_v2 = vld [vmem:[#allocation10 + $0x88] sm:$0xff]  ;;  %v2074_v4 = vld [vmem:[#allocation10 + $0x50] sm:$0xff] }
 0x3ea   :  { %4749 = vrcp.f32 %v1398_v3  ;;  %v4236_v3 = vpack.c.bf16 %v2079_v58, %v2075_v57  ;;  %v2106_v57 = vld [vmem:[#allocation10 + $0x150] sm:$0xff] }
 0x3eb   :  { %4751 = vrcp.f32 %v1405_v10  ;;  %v2080_v10 = vld [vmem:[#allocation10 + $0x80] sm:$0xff]  ;;  %v2110_v58 = vld [vmem:[#allocation10 + $0x170] sm:$0xff] }
 0x3f3   :  { %v4748_v6 = vpop.eup %4747 }
 0x3f4   :  { %v4750_v7 = vpop.eup %4749  ;;  %v1410_v8 = vmul.f32 %v4748_v6, %v4746_v5  ;;  %v2078_v5 = vld [vmem:[#allocation10 + $0x70] sm:$0xff]  ;;  %v2085_v6 = vld [vmem:[#allocation10 + $0xa8] sm:$0xff] }
 0x3f5   :  { %v1409_v11 = vmul.f32 %v4750_v7, %v1408_v9  ;;  %v4752_v13 = vpop.eup %4751  ;;  %v2083_v7 = vld [vmem:[#allocation10 + $0x98] sm:$0xff]  ;;  %v4174_v9 = vpack.c.bf16 %v2076_v62, %v2072_v61  ;;  %v4190_v62 = vpack.c.bf16 %v2108_v52, %v2104_v51  ;;  %v2144_v51 = vld [vmem:[#allocation10 + $0x280] sm:$0xff] }
 0x3f6   :  { %v2119_v61 = vld [vmem:[#allocation10 + $0x1b8] sm:$0xff]  ;;  %v2148_v52 = vld [vmem:[#allocation10 + $0x2a0] sm:$0xff] }
 0x3f7   :  { %v1411_v12 = vadd.f32 %v1410_v8, %v1409_v11  ;;  %v2087_v8 = vld [vmem:[#allocation10 + $0xb8] sm:$0xff]  ;;  %v2084_v11 = vld [vmem:[#allocation10 + $0xa0] sm:$0xff] }
 0x3f9   :  { %4753 = vtanh.f32 %v1411_v12  ;;  %1415 = vst [vmem:[#allocation3 + $0x2] sm:$0x3] %v1411_v12  ;;  %v4238_v12 = vpack.c.bf16 %v2078_v5, %v2074_v4  ;;  %v2114_v5 = vld [vmem:[#allocation10 + $0x190] sm:$0xff] }
 0x403   :  { %v4754_v15 = vpop.eup %4753 }
 0x404   :  { %v1413_v17 = vmul.f32 %v4754_v15, %v4752_v13  ;;  %v4176_v13 = vpack.c.bf16 %v2085_v6, %v2081_v2  ;;  %v2089_v15 = vld [vmem:[#allocation10 + $0xc8] sm:$0xff]  ;;  %v2118_v6 = vld [vmem:[#allocation10 + $0x1b0] sm:$0xff] }
 0x406   :  { %1414 = vst [vmem:[#allocation2 + $0x2] sm:$0x3] %v1413_v17  ;;  %1417 = vst [vmem:[#allocation16 + $0x2] sm:$0x3] %v1413_v17  ;;  %v4240_v17 = vpack.c.bf16 %v2087_v8, %v2083_v7  ;;  %v2125_v7 = vld [vmem:[#allocation10 + $0x1e8] sm:$0xff]  ;;  %v2123_v8 = vld [vmem:[#allocation10 + $0x1d8] sm:$0xff] }
 0x40d   :  { %v1869_v18 = vld [vmem:[#allocation2 + $0x2] sm:$0x3] }
 0x40e   :  { %1955 = vmatprep.mubr.f32.mxu0 %v1869_v18  ;;  %2026 = vmatprep.mubr.f32.mxu1 %v1869_v18  ;;  %v2082_v18 = vld [vmem:[#allocation10 + $0x90] sm:$0xff] }
 0x417   :  { %v1637_v23 = vpop.f32.mrb[8].mxu0  ;;  %v1708_v24 = vpop.f32.mrb[8].mxu1 }
 0x418   :  { %v1638_v25 = vadd.f32 %v1637_v23, %v1554_v21  ;;  %v1639_v26 = vpop.f32.mrb[9].mxu0  ;;  %v1710_v28 = vpop.f32.mrb[9].mxu1  ;;  %v1709_v36 = vadd.f32 %v1708_v24, %v1562_v34  ;;  %v2093_v21 = vld [vmem:[#allocation10 + $0xe8] sm:$0xff]  ;;  %v2095_v23 = vld [vmem:[#allocation10 + $0xf8] sm:$0xff]  ;;  %v4178_v24 = vpack.c.bf16 %v2084_v11, %v2080_v10  ;;  %v2094_v34 = vld [vmem:[#allocation10 + $0xf0] sm:$0xff] }
 0x419   :  { %v1640_v29 = vadd.f32 %v1639_v26, %v1558_v22  ;;  %v1711_v33 = vadd.f32 %v1710_v28, %v1566_v31  ;;  %v2091_v22 = vld [vmem:[#allocation10 + $0xd8] sm:$0xff]  ;;  %v2092_v26 = vld [vmem:[#allocation10 + $0xe0] sm:$0xff]  ;;  %v2097_v28 = vld [vmem:[#allocation10 + $0x108] sm:$0xff] }
 0x41a   :  { %v3382_v30 = vmul.f32 -1.442695, %v1638_v25  ;;  %v2088_v25 = vld [vmem:[#allocation10 + $0xc0] sm:$0xff]  ;;  %v2101_v31 = vld [vmem:[#allocation10 + $0x128] sm:$0xff] }
 0x41b   :  { %v3383_v32 = vmul.f32 -1.442695, %v1640_v29  ;;  %v3384_v35 = vmul.f32 -1.442695, %v1711_v33  ;;  %v4242_v29 = vpack.c.bf16 %v2086_v20, %v2082_v18  ;;  %v2090_v33 = vld [vmem:[#allocation10 + $0xd0] sm:$0xff]  ;;  %v2120_v11 = vld [vmem:[#allocation10 + $0x1c0] sm:$0xff] }
 0x41c   :  { %4755 = vpow2.f32 %v3382_v30  ;;  %v4180_v30 = vpack.c.bf16 %v2093_v21, %v2089_v15  ;;  %v2122_v20 = vld [vmem:[#allocation10 + $0x1d0] sm:$0xff] }
 0x41d   :  { %4757 = vpow2.f32 %v3383_v32  ;;  %v4244_v32 = vpack.c.bf16 %v2095_v23, %v2091_v22  ;;  %v2126_v21 = vld [vmem:[#allocation10 + $0x1f0] sm:$0xff]  ;;  %v2133_v22 = vld [vmem:[#allocation10 + $0x228] sm:$0xff]  ;;  %v2131_v23 = vld [vmem:[#allocation10 + $0x218] sm:$0xff] }
 0x41e   :  { %4759 = vpow2.f32 %v3384_v35 }
 0x41f   :  { %4761 = vtanh.f32 %v1709_v36  ;;  %v2099_v36 = vld [vmem:[#allocation10 + $0x118] sm:$0xff] }
 0x426   :  { %v4756_v37 = vpop.eup %4755 }
 0x427   :  { %v4758_v38 = vpop.eup %4757  ;;  %v1716_v39 = vadd.f32 1.0, %v4756_v37  ;;  %v2103_v37 = vld [vmem:[#allocation10 + $0x138] sm:$0xff] }
 0x428   :  { %v1722_v40 = vadd.f32 1.0, %v4758_v38  ;;  %v4760_v41 = vpop.eup %4759  ;;  %v4182_v38 = vpack.c.bf16 %v2092_v26, %v2088_v25  ;;  %v2128_v26 = vld [vmem:[#allocation10 + $0x200] sm:$0xff] }
 0x429   :  { %4763 = vrcp.f32 %v1716_v39  ;;  %v4762_v42 = vpop.eup %4761  ;;  %v1729_v44 = vadd.f32 1.0, %v4760_v41  ;;  %v2096_v39 = vld [vmem:[#allocation10 + $0x100] sm:$0xff]  ;;  %v4246_v41 = vpack.c.bf16 %v2094_v34, %v2090_v33  ;;  %v2130_v33 = vld [vmem:[#allocation10 + $0x210] sm:$0xff] }
 0x42a   :  { %4765 = vrcp.f32 %v1722_v40  ;;  %v2100_v40 = vld [vmem:[#allocation10 + $0x120] sm:$0xff]  ;;  %v2134_v34 = vld [vmem:[#allocation10 + $0x230] sm:$0xff] }
 0x42b   :  { %4767 = vrcp.f32 %v1729_v44  ;;  %v4248_v44 = vpack.c.bf16 %v2103_v37, %v2099_v36  ;;  %v4186_v50 = vpack.c.bf16 %v2100_v40, %v2096_v39  ;;  %v2139_v36 = vld [vmem:[#allocation10 + $0x258] sm:$0xff]  ;;  %v2136_v39 = vld [vmem:[#allocation10 + $0x240] sm:$0xff] }
 0x42c   :  { %v2143_v37 = vld [vmem:[#allocation10 + $0x278] sm:$0xff]  ;;  %v2140_v40 = vld [vmem:[#allocation10 + $0x260] sm:$0xff] }
 0x433   :  { %v4764_v43 = vpop.eup %4763 }
 0x434   :  { %v4766_v45 = vpop.eup %4765  ;;  %v1734_v47 = vmul.f32 %v4764_v43, %v4762_v42  ;;  %v4184_v42 = vpack.c.bf16 %v2101_v31, %v2097_v28  ;;  %v2105_v43 = vld [vmem:[#allocation10 + $0x148] sm:$0xff]  ;;  %v2132_v28 = vld [vmem:[#allocation10 + $0x220] sm:$0xff] }
 0x435   :  { %v1733_v48 = vmul.f32 %v4766_v45, %v1732_v46  ;;  %v4768_v55 = vpop.eup %4767  ;;  %v2098_v45 = vld [vmem:[#allocation10 + $0x110] sm:$0xff]  ;;  %v2137_v31 = vld [vmem:[#allocation10 + $0x248] sm:$0xff] }
 0x436   :  { %v2102_v46 = vld [vmem:[#allocation10 + $0x130] sm:$0xff] }
 0x437   :  { %v1735_v49 = vadd.f32 %v1734_v47, %v1733_v48  ;;  %v2109_v47 = vld [vmem:[#allocation10 + $0x168] sm:$0xff]  ;;  %v2107_v48 = vld [vmem:[#allocation10 + $0x158] sm:$0xff]  ;;  %v4250_v53 = vpack.c.bf16 %v2102_v46, %v2098_v45  ;;  %v2138_v45 = vld [vmem:[#allocation10 + $0x250] sm:$0xff] }
 0x438   :  { %v4188_v54 = vpack.c.bf16 %v2109_v47, %v2105_v43  ;;  %v2145_v43 = vld [vmem:[#allocation10 + $0x288] sm:$0xff]  ;;  %v2142_v46 = vld [vmem:[#allocation10 + $0x270] sm:$0xff] }
 0x439   :  { %4769 = vtanh.f32 %v1735_v49  ;;  %1739 = vst [vmem:[#allocation3] sm:$0x3] %v1735_v49  ;;  %v2111_v49 = vld [vmem:[#allocation10 + $0x178] sm:$0xff]  ;;  %v2149_v47 = vld [vmem:[#allocation10 + $0x2a8] sm:$0xff] }
 0x43a   :  { %v4252_v56 = vpack.c.bf16 %v2111_v49, %v2107_v48  ;;  %v2147_v48 = vld [vmem:[#allocation10 + $0x298] sm:$0xff] }
 0x43b   :  { %v2151_v49 = vld [vmem:[#allocation10 + $0x2b8] sm:$0xff] }
 0x443   :  { %v4770_v59 = vpop.eup %4769 }
 0x444   :  { %v1737_v0 = vmul.f32 %v4770_v59, %v4768_v55  ;;  %v2113_v55 = vld [vmem:[#allocation10 + $0x188] sm:$0xff] }
 0x445   :  { %v2117_v59 = vld [vmem:[#allocation10 + $0x1a8] sm:$0xff] }
 0x446   :  { %1738 = vst [vmem:[#allocation2] sm:$0x3] %v1737_v0  ;;  %1956 = vmatmul.mubr.f32.vlgmr.msra.gmra.mrb[10].mxu0 %v1737_v0  ;;  %2027 = vmatmul.mubr.f32.vlgmr.msra.gmra.mrb[10].mxu1 %v1737_v0  ;;  %v2116_v0 = vld [vmem:[#allocation10 + $0x1a0] sm:$0xff]  ;;  %v4192_v2 = vpack.c.bf16 %v2117_v59, %v2113_v55  ;;  %v2153_v55 = vld [vmem:[#allocation10 + $0x2c8] sm:$0xff] }
 0x447   :  { %4171 = vmatpush1.bf16.msra.mxu0 %v4170_v60  ;;  %4235 = vmatpush1.bf16.msra.mxu1 %v4234_v63  ;;  %v2115_v60 = vld [vmem:[#allocation10 + $0x198] sm:$0xff]  ;;  %v2112_v63 = vld [vmem:[#allocation10 + $0x180] sm:$0xff]  ;;  %v2157_v59 = vld [vmem:[#allocation10 + $0x2e8] sm:$0xff] }
 0x448   :  { %4173 = vmatprep.subr.bf16.mxu0 %v4172_v1  ;;  %4237 = vmatprep.subr.bf16.mxu1 %v4236_v3  ;;  %v4254_v1 = vpack.c.bf16 %v2110_v58, %v2106_v57  ;;  %v2121_v3 = vld [vmem:[#allocation10 + $0x1c8] sm:$0xff]  ;;  %v4256_v4 = vpack.c.bf16 %v2119_v61, %v2115_v60  ;;  %v4194_v10 = vpack.c.bf16 %v2116_v0, %v2112_v63  ;;  %v2146_v57 = vld [vmem:[#allocation10 + $0x290] sm:$0xff]  ;;  %v2155_v60 = vld [vmem:[#allocation10 + $0x2d8] sm:$0xff] }
 0x449   :  { %v4196_v15 = vpack.c.bf16 %v2125_v7, %v2121_v3  ;;  %v2150_v58 = vld [vmem:[#allocation10 + $0x2b0] sm:$0xff]  ;;  %v2159_v61 = vld [vmem:[#allocation10 + $0x2f8] sm:$0xff]  ;;  %v2152_v63 = vld [vmem:[#allocation10 + $0x2c0] sm:$0xff] }
 0x44a   :  { %v2156_v0 = vld [vmem:[#allocation10 + $0x2e0] sm:$0xff]  ;;  %v2161_v3 = vld [vmem:[#allocation10 + $0x308] sm:$0xff] }
 0x44b   :  { %4175 = vmatpush1.bf16.msra.mxu0 %v4174_v9  ;;  %4239 = vmatpush1.bf16.msra.mxu1 %v4238_v12  ;;  %v2127_v9 = vld [vmem:[#allocation10 + $0x1f8] sm:$0xff]  ;;  %v2124_v12 = vld [vmem:[#allocation10 + $0x1e0] sm:$0xff]  ;;  %v2165_v7 = vld [vmem:[#allocation10 + $0x328] sm:$0xff] }
 0x44c   :  { %4177 = vmatprep.subr.bf16.mxu0 %v4176_v13  ;;  %4241 = vmatprep.subr.bf16.mxu1 %v4240_v17  ;;  %v4258_v13 = vpack.c.bf16 %v2118_v6, %v2114_v5  ;;  %v2129_v17 = vld [vmem:[#allocation10 + $0x208] sm:$0xff]  ;;  %v4260_v18 = vpack.c.bf16 %v2127_v9, %v2123_v8  ;;  %v4198_v25 = vpack.c.bf16 %v2124_v12, %v2120_v11  ;;  %v2154_v5 = vld [vmem:[#allocation10 + $0x2d0] sm:$0xff]  ;;  %v2163_v8 = vld [vmem:[#allocation10 + $0x318] sm:$0xff] }
 0x44d   :  { %v2193_v35 = vld [vmem:[#allocation2] sm:$0x3]  ;;  %v2158_v6 = vld [vmem:[#allocation10 + $0x2f0] sm:$0xff]  ;;  %v2167_v9 = vld [vmem:[#allocation10 + $0x338] sm:$0xff] }
 0x44e   :  { %2279 = vmatprep.mubr.f32.mxu0 %v2193_v35  ;;  %2350 = vmatprep.mubr.f32.mxu1 %v2193_v35  ;;  %v2141_v35 = vld [vmem:[#allocation10 + $0x268] sm:$0xff]  ;;  %v2160_v11 = vld [vmem:[#allocation10 + $0x300] sm:$0xff] }
 0x44f   :  { %4179 = vmatpush1.bf16.msra.mxu0 %v4178_v24  ;;  %4243 = vmatpush1.bf16.msra.mxu1 %v4242_v29  ;;  %v2135_v24 = vld [vmem:[#allocation10 + $0x238] sm:$0xff]  ;;  %v4262_v29 = vpack.c.bf16 %v2126_v21, %v2122_v20  ;;  %v2164_v12 = vld [vmem:[#allocation10 + $0x320] sm:$0xff]  ;;  %v2162_v20 = vld [vmem:[#allocation10 + $0x310] sm:$0xff] }
 0x450   :  { %4181 = vmatprep.subr.bf16.mxu0 %v4180_v30  ;;  %4245 = vmatprep.subr.bf16.mxu1 %v4244_v32  ;;  %v4200_v30 = vpack.c.bf16 %v2133_v22, %v2129_v17  ;;  %v4264_v32 = vpack.c.bf16 %v2135_v24, %v2131_v23  ;;  %v2169_v17 = vld [vmem:[#allocation10 + $0x348] sm:$0xff]  ;;  %v2166_v21 = vld [vmem:[#allocation10 + $0x330] sm:$0xff]  ;;  %v2171_v23 = vld [vmem:[#allocation10 + $0x358] sm:$0xff] }
 0x451   :  { %v2173_v22 = vld [vmem:[#allocation10 + $0x368] sm:$0xff]  ;;  %v2175_v24 = vld [vmem:[#allocation10 + $0x378] sm:$0xff] }
 0x453   :  { %4183 = vmatpush1.bf16.msra.mxu0 %v4182_v38  ;;  %4247 = vmatpush1.bf16.msra.mxu1 %v4246_v41  ;;  %v4202_v38 = vpack.c.bf16 %v2132_v28, %v2128_v26  ;;  %v4266_v41 = vpack.c.bf16 %v2134_v34, %v2130_v33  ;;  %v2168_v26 = vld [vmem:[#allocation10 + $0x340] sm:$0xff]  ;;  %v2170_v33 = vld [vmem:[#allocation10 + $0x350] sm:$0xff] }
 0x454   :  { %4185 = vmatprep.subr.bf16.mxu0 %v4184_v42  ;;  %4249 = vmatprep.subr.bf16.mxu1 %v4248_v44  ;;  %v4204_v42 = vpack.c.bf16 %v2141_v35, %v2137_v31  ;;  %v4268_v44 = vpack.c.bf16 %v2143_v37, %v2139_v36  ;;  %v2172_v28 = vld [vmem:[#allocation10 + $0x360] sm:$0xff]  ;;  %v2177_v31 = vld [vmem:[#allocation10 + $0x388] sm:$0xff]  ;;  %v2174_v34 = vld [vmem:[#allocation10 + $0x370] sm:$0xff] }
 0x455   :  { %v2181_v35 = vld [vmem:[#allocation10 + $0x3a8] sm:$0xff]  ;;  %v2179_v36 = vld [vmem:[#allocation10 + $0x398] sm:$0xff] }
 0x456   :  { %v2183_v37 = vld [vmem:[#allocation10 + $0x3b8] sm:$0xff] }
 0x457   :  { %4187 = vmatpush1.bf16.msra.mxu0 %v4186_v50  ;;  %4251 = vmatpush1.bf16.msra.mxu1 %v4250_v53  ;;  %v4206_v50 = vpack.c.bf16 %v2140_v40, %v2136_v39  ;;  %v4270_v53 = vpack.c.bf16 %v2142_v46, %v2138_v45  ;;  %v2176_v39 = vld [vmem:[#allocation10 + $0x380] sm:$0xff]  ;;  %v2178_v45 = vld [vmem:[#allocation10 + $0x390] sm:$0xff] }
 0x458   :  { %4189 = vmatprep.subr.bf16.mxu0 %v4188_v54  ;;  %4253 = vmatprep.subr.bf16.mxu1 %v4252_v56  ;;  %v4208_v54 = vpack.c.bf16 %v2149_v47, %v2145_v43  ;;  %v4272_v56 = vpack.c.bf16 %v2151_v49, %v2147_v48  ;;  %v2180_v40 = vld [vmem:[#allocation10 + $0x3a0] sm:$0xff]  ;;  %v2185_v43 = vld [vmem:[#allocation10 + $0x3c8] sm:$0xff]  ;;  %v2182_v46 = vld [vmem:[#allocation10 + $0x3b0] sm:$0xff] }
 0x459   :  { %v2189_v47 = vld [vmem:[#allocation10 + $0x3e8] sm:$0xff]  ;;  %v2187_v48 = vld [vmem:[#allocation10 + $0x3d8] sm:$0xff] }
 0x45a   :  { %v2191_v49 = vld [vmem:[#allocation10 + $0x3f8] sm:$0xff] }
 0x45b   :  { %4191 = vmatpush1.bf16.msra.mxu0 %v4190_v62  ;;  %4255 = vmatpush1.bf16.msra.mxu1 %v4254_v1  ;;  %v4210_v62 = vpack.c.bf16 %v2148_v52, %v2144_v51  ;;  %v4274_v1 = vpack.c.bf16 %v2150_v58, %v2146_v57  ;;  %v2184_v51 = vld [vmem:[#allocation10 + $0x3c0] sm:$0xff]  ;;  %v4290_v52 = vpack.c.bf16 %v2182_v46, %v2178_v45  ;;  %v2190_v57 = vld [vmem:[#allocation10 + $0x3f0] sm:$0xff] }
 0x45c   :  { %4193 = vmatprep.subr.bf16.mxu0 %v4192_v2  ;;  %4257 = vmatprep.subr.bf16.mxu1 %v4256_v4  ;;  %v4212_v2 = vpack.c.bf16 %v2157_v59, %v2153_v55  ;;  %v4276_v4 = vpack.c.bf16 %v2159_v61, %v2155_v60  ;;  %v4292_v55 = vpack.c.bf16 %v2191_v49, %v2187_v48  ;;  %v2063_v60 = vld [vmem:[#allocation4 + $0x6] sm:$0x3]  ;;  %v2385_v61 = vld [vmem:[#allocation13 + $0x8] sm:$0xff] }
 0x45d   :  { %v2410_v46 = vld [vmem:[#allocation13 + $0xd0] sm:$0xff]  ;;  %v2417_v48 = vld [vmem:[#allocation13 + $0x108] sm:$0xff] }
 0x45f   :  { %4195 = vmatpush1.bf16.msra.mxu0 %v4194_v10  ;;  %4259 = vmatpush1.bf16.msra.mxu1 %v4258_v13  ;;  %v4214_v10 = vpack.c.bf16 %v2156_v0, %v2152_v63  ;;  %v4278_v13 = vpack.c.bf16 %v2158_v6, %v2154_v5  ;;  %v2384_v0 = vld [vmem:[#allocation13] sm:$0xff]  ;;  %v2386_v5 = vld [vmem:[#allocation13 + $0x10] sm:$0xff] }
 0x460   :  { %4197 = vmatprep.subr.bf16.mxu0 %v4196_v15  ;;  %4261 = vmatprep.subr.bf16.mxu1 %v4260_v18  ;;  %v4216_v15 = vpack.c.bf16 %v2165_v7, %v2161_v3  ;;  %v4280_v18 = vpack.c.bf16 %v2167_v9, %v2163_v8  ;;  %v2390_v6 = vld [vmem:[#allocation13 + $0x30] sm:$0xff]  ;;  %v2393_v9 = vld [vmem:[#allocation13 + $0x48] sm:$0xff] }
 0x461   :  { %v4362_v8 = vpack.c.bf16 %v2390_v6, %v2386_v5  ;;  %v2426_v5 = vld [vmem:[#allocation13 + $0x150] sm:$0xff] }
 0x462   :  { %v2430_v6 = vld [vmem:[#allocation13 + $0x170] sm:$0xff] }
 0x463   :  { %4199 = vmatpush1.bf16.msra.mxu0 %v4198_v25  ;;  %4263 = vmatpush1.bf16.msra.mxu1 %v4262_v29  ;;  %v4218_v25 = vpack.c.bf16 %v2164_v12, %v2160_v11  ;;  %v4282_v29 = vpack.c.bf16 %v2166_v21, %v2162_v20  ;;  %v2392_v11 = vld [vmem:[#allocation13 + $0x40] sm:$0xff]  ;;  %v2394_v21 = vld [vmem:[#allocation13 + $0x50] sm:$0xff] }
 0x464   :  { %4201 = vmatprep.subr.bf16.mxu0 %v4200_v30  ;;  %4265 = vmatprep.subr.bf16.mxu1 %v4264_v32  ;;  %v4220_v30 = vpack.c.bf16 %v2173_v22, %v2169_v17  ;;  %v4284_v32 = vpack.c.bf16 %v2175_v24, %v2171_v23  ;;  %v2399_v17 = vld [vmem:[#allocation13 + $0x78] sm:$0xff]  ;;  %v2398_v22 = vld [vmem:[#allocation13 + $0x70] sm:$0xff]  ;;  %v2401_v23 = vld [vmem:[#allocation13 + $0x88] sm:$0xff] }
 0x465   :  { %v4366_v24 = vpack.c.bf16 %v2398_v22, %v2394_v21  ;;  %v2438_v21 = vld [vmem:[#allocation13 + $0x1b0] sm:$0xff] }
 0x467   :  { %4203 = vmatpush1.bf16.msra.mxu0 %v4202_v38  ;;  %4267 = vmatpush1.bf16.msra.mxu1 %v4266_v41  ;;  %v4222_v38 = vpack.c.bf16 %v2172_v28, %v2168_v26  ;;  %v4286_v41 = vpack.c.bf16 %v2174_v34, %v2170_v33  ;;  %v2400_v26 = vld [vmem:[#allocation13 + $0x80] sm:$0xff]  ;;  %v2402_v34 = vld [vmem:[#allocation13 + $0x90] sm:$0xff] }
 0x468   :  { %4205 = vmatprep.subr.bf16.mxu0 %v4204_v42  ;;  %4269 = vmatprep.subr.bf16.mxu1 %v4268_v44  ;;  %v4224_v42 = vpack.c.bf16 %v2181_v35, %v2177_v31  ;;  %v4288_v44 = vpack.c.bf16 %v2183_v37, %v2179_v36  ;;  %v2404_v28 = vld [vmem:[#allocation13 + $0xa0] sm:$0xff]  ;;  %v2403_v31 = vld [vmem:[#allocation13 + $0x98] sm:$0xff]  ;;  %v2406_v35 = vld [vmem:[#allocation13 + $0xb0] sm:$0xff] }
 0x469   :  { %v4370_v36 = vpack.c.bf16 %v2406_v35, %v2402_v34  ;;  %v2409_v37 = vld [vmem:[#allocation13 + $0xc8] sm:$0xff]  ;;  %v2446_v34 = vld [vmem:[#allocation13 + $0x1f0] sm:$0xff] }
 0x46b   :  { %4207 = vmatpush1.bf16.msra.mxu0 %v4206_v50  ;;  %4271 = vmatpush1.bf16.msra.mxu1 %v4270_v53  ;;  %v4226_v50 = vpack.c.bf16 %v2180_v40, %v2176_v39  ;;  %v4228_v53 = vpack.c.bf16 %v2189_v47, %v2185_v43  ;;  %v2408_v39 = vld [vmem:[#allocation13 + $0xc0] sm:$0xff]  ;;  %v2415_v43 = vld [vmem:[#allocation13 + $0xf8] sm:$0xff]  ;;  %v2414_v47 = vld [vmem:[#allocation13 + $0xf0] sm:$0xff] }
 0x46c   :  { %4209 = vmatprep.subr.bf16.mxu0 %v4208_v54  ;;  %4273 = vmatprep.subr.bf16.mxu1 %v4272_v56  ;;  %v2188_v54 = vld [vmem:[#allocation10 + $0x3e0] sm:$0xff]  ;;  %v2186_v56 = vld [vmem:[#allocation10 + $0x3d0] sm:$0xff]  ;;  %v4374_v49 = vpack.c.bf16 %v2414_v47, %v2410_v46 }
 0x46d   :  { %v4230_v58 = vpack.c.bf16 %v2188_v54, %v2184_v51  ;;  %v4294_v59 = vpack.c.bf16 %v2190_v57, %v2186_v56  ;;  %v2416_v51 = vld [vmem:[#allocation13 + $0x100] sm:$0xff]  ;;  %v2423_v56 = vld [vmem:[#allocation13 + $0x138] sm:$0xff]  ;;  %v2454_v46 = vld [vmem:[#allocation13 + $0x230] sm:$0xff] }
 0x46f   :  { %4211 = vmatpush1.bf16.msra.mxu0 %v4210_v62  ;;  %4275 = vmatpush1.bf16.msra.mxu1 %v4274_v1  ;;  %v2389_v62 = vld [vmem:[#allocation13 + $0x28] sm:$0xff]  ;;  %v2388_v1 = vld [vmem:[#allocation13 + $0x20] sm:$0xff] }
 0x470   :  { %4213 = vmatprep.subr.bf16.mxu0 %v4212_v2  ;;  %4277 = vmatprep.subr.bf16.mxu1 %v4276_v4  ;;  %v4296_v63 = vpack.c.bf16 %v2389_v62, %v2385_v61  ;;  %v2387_v2 = vld [vmem:[#allocation13 + $0x18] sm:$0xff]  ;;  %v4298_v3 = vpack.c.bf16 %v2388_v1, %v2384_v0  ;;  %v2425_v61 = vld [vmem:[#allocation13 + $0x148] sm:$0xff]  ;;  %v2424_v0 = vld [vmem:[#allocation13 + $0x140] sm:$0xff] }
 0x471   :  { %v2391_v4 = vld [vmem:[#allocation13 + $0x38] sm:$0xff]  ;;  %v2429_v62 = vld [vmem:[#allocation13 + $0x168] sm:$0xff]  ;;  %v2428_v1 = vld [vmem:[#allocation13 + $0x160] sm:$0xff] }
 0x472   :  { %v4360_v7 = vpack.c.bf16 %v2391_v4, %v2387_v2  ;;  %v2427_v2 = vld [vmem:[#allocation13 + $0x158] sm:$0xff] }
 0x473   :  { %4215 = vmatpush1.bf16.msra.mxu0 %v4214_v10  ;;  %4279 = vmatpush1.bf16.msra.mxu1 %v4278_v13  ;;  %v2397_v10 = vld [vmem:[#allocation13 + $0x68] sm:$0xff]  ;;  %v2396_v13 = vld [vmem:[#allocation13 + $0x60] sm:$0xff]  ;;  %v2431_v4 = vld [vmem:[#allocation13 + $0x178] sm:$0xff] }
 0x474   :  { %4217 = vmatprep.subr.bf16.mxu0 %v4216_v15  ;;  %4281 = vmatprep.subr.bf16.mxu1 %v4280_v18  ;;  %v4300_v12 = vpack.c.bf16 %v2397_v10, %v2393_v9  ;;  %v2395_v15 = vld [vmem:[#allocation13 + $0x58] sm:$0xff]  ;;  %v4302_v18 = vpack.c.bf16 %v2396_v13, %v2392_v11  ;;  %v2433_v9 = vld [vmem:[#allocation13 + $0x188] sm:$0xff]  ;;  %v2436_v13 = vld [vmem:[#allocation13 + $0x1a0] sm:$0xff] }
 0x475   :  { %v4364_v20 = vpack.c.bf16 %v2399_v17, %v2395_v15  ;;  %v2437_v10 = vld [vmem:[#allocation13 + $0x1a8] sm:$0xff]  ;;  %v2435_v15 = vld [vmem:[#allocation13 + $0x198] sm:$0xff] }
 0x476   :  { %v4320_v11 = vpack.c.bf16 %v2437_v10, %v2433_v9  ;;  %v2473_v9 = vld [vmem:[#allocation13 + $0x2c8] sm:$0xff] }
 0x477   :  { %4219 = vmatpush1.bf16.msra.mxu0 %v4218_v25  ;;  %4283 = vmatpush1.bf16.msra.mxu1 %v4282_v29  ;;  %v2405_v25 = vld [vmem:[#allocation13 + $0xa8] sm:$0xff] }
 0x478   :  { %4221 = vmatprep.subr.bf16.mxu0 %v4220_v30  ;;  %4285 = vmatprep.subr.bf16.mxu1 %v4284_v32  ;;  %v4304_v29 = vpack.c.bf16 %v2405_v25, %v2401_v23  ;;  %v4306_v30 = vpack.c.bf16 %v2404_v28, %v2400_v26  ;;  %v2407_v32 = vld [vmem:[#allocation13 + $0xb8] sm:$0xff]  ;;  %v2445_v25 = vld [vmem:[#allocation13 + $0x1e8] sm:$0xff]  ;;  %v2440_v28 = vld [vmem:[#allocation13 + $0x1c0] sm:$0xff] }
 0x479   :  { %v4368_v33 = vpack.c.bf16 %v2407_v32, %v2403_v31  ;;  %v2447_v32 = vld [vmem:[#allocation13 + $0x1f8] sm:$0xff]  ;;  %v2477_v10 = vld [vmem:[#allocation13 + $0x2e8] sm:$0xff] }
 0x47b   :  { %4223 = vmatpush1.bf16.msra.mxu0 %v4222_v38  ;;  %4287 = vmatpush1.bf16.msra.mxu1 %v4286_v41  ;;  %v2413_v38 = vld [vmem:[#allocation13 + $0xe8] sm:$0xff]  ;;  %v2412_v41 = vld [vmem:[#allocation13 + $0xe0] sm:$0xff] }
 0x47c   :  { %4225 = vmatprep.subr.bf16.mxu0 %v4224_v42  ;;  %4289 = vmatprep.subr.bf16.mxu1 %v4288_v44  ;;  %v4308_v40 = vpack.c.bf16 %v2413_v38, %v2409_v37  ;;  %v2411_v42 = vld [vmem:[#allocation13 + $0xd8] sm:$0xff]  ;;  %v4310_v44 = vpack.c.bf16 %v2412_v41, %v2408_v39  ;;  %v2449_v37 = vld [vmem:[#allocation13 + $0x208] sm:$0xff]  ;;  %v2452_v41 = vld [vmem:[#allocation13 + $0x220] sm:$0xff] }
 0x47d   :  { %v4372_v45 = vpack.c.bf16 %v2415_v43, %v2411_v42  ;;  %v2453_v38 = vld [vmem:[#allocation13 + $0x228] sm:$0xff]  ;;  %v2451_v42 = vld [vmem:[#allocation13 + $0x218] sm:$0xff] }
 0x47e   :  { %v4328_v39 = vpack.c.bf16 %v2453_v38, %v2449_v37  ;;  %v2489_v37 = vld [vmem:[#allocation13 + $0x348] sm:$0xff] }
 0x47f   :  { %4227 = vmatpush1.bf16.msra.mxu0 %v4226_v50  ;;  %4291 = vmatpush1.bf16.msra.mxu1 %v4290_v52  ;;  %v2421_v50 = vld [vmem:[#allocation13 + $0x128] sm:$0xff]  ;;  %v2420_v52 = vld [vmem:[#allocation13 + $0x120] sm:$0xff] }
 0x480   :  { %4229 = vmatprep.subr.bf16.mxu0 %v4228_v53  ;;  %4293 = vmatprep.subr.bf16.mxu1 %v4292_v55  ;;  %v4312_v53 = vpack.c.bf16 %v2421_v50, %v2417_v48  ;;  %v4314_v54 = vpack.c.bf16 %v2420_v52, %v2416_v51  ;;  %v2419_v55 = vld [vmem:[#allocation13 + $0x118] sm:$0xff]  ;;  %v2461_v50 = vld [vmem:[#allocation13 + $0x268] sm:$0xff]  ;;  %v2456_v52 = vld [vmem:[#allocation13 + $0x240] sm:$0xff] }
 0x481   :  { %v4376_v57 = vpack.c.bf16 %v2423_v56, %v2419_v55  ;;  %v2463_v56 = vld [vmem:[#allocation13 + $0x278] sm:$0xff]  ;;  %v2493_v38 = vld [vmem:[#allocation13 + $0x368] sm:$0xff] }
 0x483   :  { %4231 = vmatpush1.bf16.msra.mxu0 %v4230_v58  ;;  %4295 = vmatpush1.bf16.msra.mxu1 %v4294_v59  ;;  %v2418_v58 = vld [vmem:[#allocation13 + $0x110] sm:$0xff] }
 0x484   :  { %4297 = vmatprep.subr.bf16.mxu0 %v4296_v63  ;;  %4361 = vmatprep.subr.bf16.mxu1 %v4360_v7  ;;  %v2422_v59 = vld [vmem:[#allocation13 + $0x130] sm:$0xff]  ;;  %v4316_v63 = vpack.c.bf16 %v2429_v62, %v2425_v61  ;;  %v4380_v7 = vpack.c.bf16 %v2431_v4, %v2427_v2  ;;  %v2465_v61 = vld [vmem:[#allocation13 + $0x288] sm:$0xff]  ;;  %v2467_v2 = vld [vmem:[#allocation13 + $0x298] sm:$0xff] }
 0x485   :  { %v2469_v62 = vld [vmem:[#allocation13 + $0x2a8] sm:$0xff]  ;;  %v2471_v4 = vld [vmem:[#allocation13 + $0x2b8] sm:$0xff] }
 0x486   :  { %2280 = vmatmul.mubr.f32.vlgmr.msra.gmra.mrb[12].mxu0 %v2063_v60  ;;  %2351 = vmatmul.mubr.f32.vlgmr.msra.gmra.mrb[12].mxu1 %v2063_v60  ;;  %v4378_v60 = vpack.c.bf16 %v2422_v59, %v2418_v58  ;;  %v2462_v58 = vld [vmem:[#allocation13 + $0x270] sm:$0xff] }
 0x487   :  { %4299 = vmatpush1.bf16.msra.mxu0 %v4298_v3  ;;  %4363 = vmatpush1.bf16.msra.mxu1 %v4362_v8  ;;  %v4318_v3 = vpack.c.bf16 %v2428_v1, %v2424_v0  ;;  %v4382_v8 = vpack.c.bf16 %v2430_v6, %v2426_v5  ;;  %v2464_v0 = vld [vmem:[#allocation13 + $0x280] sm:$0xff]  ;;  %v2466_v5 = vld [vmem:[#allocation13 + $0x290] sm:$0xff] }
 0x488   :  { %4301 = vmatprep.subr.bf16.mxu0 %v4300_v12  ;;  %4365 = vmatprep.subr.bf16.mxu1 %v4364_v20  ;;  %v2432_v12 = vld [vmem:[#allocation13 + $0x180] sm:$0xff]  ;;  %v2434_v20 = vld [vmem:[#allocation13 + $0x190] sm:$0xff] }
 0x489   :  { %v4322_v17 = vpack.c.bf16 %v2436_v13, %v2432_v12  ;;  %v4386_v23 = vpack.c.bf16 %v2438_v21, %v2434_v20  ;;  %v2468_v1 = vld [vmem:[#allocation13 + $0x2a0] sm:$0xff]  ;;  %v2470_v6 = vld [vmem:[#allocation13 + $0x2b0] sm:$0xff] }
 0x48a   :  { %v2472_v12 = vld [vmem:[#allocation13 + $0x2c0] sm:$0xff]  ;;  %v2474_v20 = vld [vmem:[#allocation13 + $0x2d0] sm:$0xff] }
 0x48b   :  { %4303 = vmatpush1.bf16.msra.mxu0 %v4302_v18  ;;  %4367 = vmatpush1.bf16.msra.mxu1 %v4366_v24  ;;  %v2439_v18 = vld [vmem:[#allocation13 + $0x1b8] sm:$0xff]  ;;  %v2441_v24 = vld [vmem:[#allocation13 + $0x1c8] sm:$0xff]  ;;  %v2476_v13 = vld [vmem:[#allocation13 + $0x2e0] sm:$0xff] }
 0x48c   :  { %4305 = vmatprep.subr.bf16.mxu0 %v4304_v29  ;;  %4369 = vmatprep.subr.bf16.mxu1 %v4368_v33  ;;  %v4384_v22 = vpack.c.bf16 %v2439_v18, %v2435_v15  ;;  %v4324_v26 = vpack.c.bf16 %v2445_v25, %v2441_v24  ;;  %v2444_v29 = vld [vmem:[#allocation13 + $0x1e0] sm:$0xff]  ;;  %v2442_v33 = vld [vmem:[#allocation13 + $0x1d0] sm:$0xff]  ;;  %v2475_v15 = vld [vmem:[#allocation13 + $0x2d8] sm:$0xff] }
 0x48d   :  { %v4326_v31 = vpack.c.bf16 %v2444_v29, %v2440_v28  ;;  %v2479_v18 = vld [vmem:[#allocation13 + $0x2f8] sm:$0xff]  ;;  %v2478_v21 = vld [vmem:[#allocation13 + $0x2f0] sm:$0xff]  ;;  %v2481_v24 = vld [vmem:[#allocation13 + $0x308] sm:$0xff] }
 0x48e   :  { %v2485_v25 = vld [vmem:[#allocation13 + $0x328] sm:$0xff]  ;;  %v2480_v28 = vld [vmem:[#allocation13 + $0x300] sm:$0xff] }
 0x48f   :  { %4307 = vmatpush1.bf16.msra.mxu0 %v4306_v30  ;;  %4371 = vmatpush1.bf16.msra.mxu1 %v4370_v36  ;;  %v2443_v30 = vld [vmem:[#allocation13 + $0x1d8] sm:$0xff]  ;;  %v4390_v36 = vpack.c.bf16 %v2446_v34, %v2442_v33  ;;  %v2484_v29 = vld [vmem:[#allocation13 + $0x320] sm:$0xff]  ;;  %v2482_v33 = vld [vmem:[#allocation13 + $0x310] sm:$0xff] }
 0x490   :  { %4309 = vmatprep.subr.bf16.mxu0 %v4308_v40  ;;  %4373 = vmatprep.subr.bf16.mxu1 %v4372_v45  ;;  %v4388_v35 = vpack.c.bf16 %v2447_v32, %v2443_v30  ;;  %v2448_v40 = vld [vmem:[#allocation13 + $0x200] sm:$0xff]  ;;  %v2450_v45 = vld [vmem:[#allocation13 + $0x210] sm:$0xff]  ;;  %v2483_v30 = vld [vmem:[#allocation13 + $0x318] sm:$0xff] }
 0x491   :  { %v4330_v43 = vpack.c.bf16 %v2452_v41, %v2448_v40  ;;  %v4394_v48 = vpack.c.bf16 %v2454_v46, %v2450_v45  ;;  %v2487_v32 = vld [vmem:[#allocation13 + $0x338] sm:$0xff]  ;;  %v2486_v34 = vld [vmem:[#allocation13 + $0x330] sm:$0xff]  ;;  %v2488_v40 = vld [vmem:[#allocation13 + $0x340] sm:$0xff] }
 0x492   :  { %v2492_v41 = vld [vmem:[#allocation13 + $0x360] sm:$0xff]  ;;  %v2490_v45 = vld [vmem:[#allocation13 + $0x350] sm:$0xff] }
 0x493   :  { %4311 = vmatpush1.bf16.msra.mxu0 %v4310_v44  ;;  %4375 = vmatpush1.bf16.msra.mxu1 %v4374_v49  ;;  %v2455_v44 = vld [vmem:[#allocation13 + $0x238] sm:$0xff]  ;;  %v2457_v49 = vld [vmem:[#allocation13 + $0x248] sm:$0xff]  ;;  %v2494_v46 = vld [vmem:[#allocation13 + $0x370] sm:$0xff] }
 0x494   :  { %4313 = vmatprep.subr.bf16.mxu0 %v4312_v53  ;;  %4377 = vmatprep.subr.bf16.mxu1 %v4376_v57  ;;  %v4392_v47 = vpack.c.bf16 %v2455_v44, %v2451_v42  ;;  %v4332_v51 = vpack.c.bf16 %v2461_v50, %v2457_v49  ;;  %v2460_v53 = vld [vmem:[#allocation13 + $0x260] sm:$0xff]  ;;  %v2458_v57 = vld [vmem:[#allocation13 + $0x250] sm:$0xff]  ;;  %v2491_v42 = vld [vmem:[#allocation13 + $0x358] sm:$0xff] }
 0x495   :  { %v4334_v55 = vpack.c.bf16 %v2460_v53, %v2456_v52  ;;  %v2495_v44 = vld [vmem:[#allocation13 + $0x378] sm:$0xff]  ;;  %v2497_v49 = vld [vmem:[#allocation13 + $0x388] sm:$0xff]  ;;  %v2500_v53 = vld [vmem:[#allocation13 + $0x3a0] sm:$0xff] }
 0x496   :  { %v2501_v50 = vld [vmem:[#allocation13 + $0x3a8] sm:$0xff] }
 0x497   :  { %4315 = vmatpush1.bf16.msra.mxu0 %v4314_v54  ;;  %4379 = vmatpush1.bf16.msra.mxu1 %v4378_v60  ;;  %v2459_v54 = vld [vmem:[#allocation13 + $0x258] sm:$0xff]  ;;  %v4398_v60 = vpack.c.bf16 %v2462_v58, %v2458_v57  ;;  %v4352_v52 = vpack.c.bf16 %v2501_v50, %v2497_v49  ;;  %v2498_v58 = vld [vmem:[#allocation13 + $0x390] sm:$0xff] }
 0x498   :  { %4317 = vmatprep.subr.bf16.mxu0 %v4316_v63  ;;  %4381 = vmatprep.subr.bf16.mxu1 %v4380_v7  ;;  %v4396_v59 = vpack.c.bf16 %v2463_v56, %v2459_v54  ;;  %v4336_v63 = vpack.c.bf16 %v2469_v62, %v2465_v61  ;;  %v4400_v7 = vpack.c.bf16 %v2471_v4, %v2467_v2  ;;  %v2499_v54 = vld [vmem:[#allocation13 + $0x398] sm:$0xff]  ;;  %v2509_v62 = vld [vmem:[#allocation13 + $0x3e8] sm:$0xff]  ;;  %v2506_v4 = vld [vmem:[#allocation13 + $0x3d0] sm:$0xff] }
 0x499   :  { %v2507_v2 = vld [vmem:[#allocation13 + $0x3d8] sm:$0xff] }
 0x49b   :  { %4319 = vmatpush1.bf16.msra.mxu0 %v4318_v3  ;;  %4383 = vmatpush1.bf16.msra.mxu1 %v4382_v8  ;;  %v4338_v3 = vpack.c.bf16 %v2468_v1, %v2464_v0  ;;  %v4402_v8 = vpack.c.bf16 %v2470_v6, %v2466_v5  ;;  %v2508_v0 = vld [vmem:[#allocation13 + $0x3e0] sm:$0xff] }
 0x49c   :  { %4321 = vmatprep.subr.bf16.mxu0 %v4320_v11  ;;  %4385 = vmatprep.subr.bf16.mxu1 %v4384_v22  ;;  %v4340_v11 = vpack.c.bf16 %v2477_v10, %v2473_v9  ;;  %v4404_v22 = vpack.c.bf16 %v2479_v18, %v2475_v15  ;;  %v2713_v9 = vld [vmem:[#allocation10 + $0x28] sm:$0xff]  ;;  %v2715_v15 = vld [vmem:[#allocation10 + $0x38] sm:$0xff] }
 0x49f   :  { %4323 = vmatpush1.bf16.msra.mxu0 %v4322_v17  ;;  %4387 = vmatpush1.bf16.msra.mxu1 %v4386_v23  ;;  %v4342_v17 = vpack.c.bf16 %v2476_v13, %v2472_v12  ;;  %v4406_v23 = vpack.c.bf16 %v2478_v21, %v2474_v20  ;;  %v1868_v12 = vld [vmem:[#allocation15] sm:$0xf]  ;;  %v2711_v13 = vld [vmem:[#allocation10 + $0x18] sm:$0xff] }
 0x4a0   :  { %4325 = vmatprep.subr.bf16.mxu0 %v4324_v26  ;;  %4389 = vmatprep.subr.bf16.mxu1 %v4388_v35  ;;  %v4344_v26 = vpack.c.bf16 %v2485_v25, %v2481_v24  ;;  %v4408_v35 = vpack.c.bf16 %v2487_v32, %v2483_v30  ;;  %v1874_v18 = vrot.slane %v1868_v12, %v5190_v14 }
 0x4a1   :  { %v1878_v20 = vrot.slane %v1868_v12, %v5192_v16  ;;  %v1886_v30 = vrot.slane %v1868_v12, %v5196_v19  ;;  %v1882_v32 = vrot.slane %v1868_v12, %v5199_v27 }
 0x4a3   :  { %4327 = vmatpush1.bf16.msra.mxu0 %v4326_v31  ;;  %4391 = vmatpush1.bf16.msra.mxu1 %v4390_v36  ;;  %v4346_v31 = vpack.c.bf16 %v2484_v29, %v2480_v28  ;;  %v4410_v36 = vpack.c.bf16 %v2486_v34, %v2482_v33 }
 0x4a4   :  { %4329 = vmatprep.subr.bf16.mxu0 %v4328_v39  ;;  %4393 = vmatprep.subr.bf16.mxu1 %v4392_v47  ;;  %v4348_v39 = vpack.c.bf16 %v2493_v38, %v2489_v37  ;;  %v4412_v47 = vpack.c.bf16 %v2495_v44, %v2491_v42  ;;  %v2052_v44 = vld [vmem:[#allocation3 + $0x2] sm:$0x3] }
 0x4a7   :  { %4331 = vmatpush1.bf16.msra.mxu0 %v4330_v43  ;;  %4395 = vmatpush1.bf16.msra.mxu1 %v4394_v48  ;;  %v4350_v43 = vpack.c.bf16 %v2492_v41, %v2488_v40  ;;  %v4414_v48 = vpack.c.bf16 %v2494_v46, %v2490_v45 }
 0x4a8   :  { %4333 = vmatprep.subr.bf16.mxu0 %v4332_v51  ;;  %4397 = vmatprep.subr.bf16.mxu1 %v4396_v59  ;;  %v2496_v51 = vld [vmem:[#allocation13 + $0x380] sm:$0xff]  ;;  %v2502_v59 = vld [vmem:[#allocation13 + $0x3b0] sm:$0xff] }
 0x4a9   :  { %v4354_v56 = vpack.c.bf16 %v2500_v53, %v2496_v51  ;;  %v4418_v61 = vpack.c.bf16 %v2502_v59, %v2498_v58 }
 0x4ab   :  { %4335 = vmatpush1.bf16.msra.mxu0 %v4334_v55  ;;  %4399 = vmatpush1.bf16.msra.mxu1 %v4398_v60  ;;  %v2503_v55 = vld [vmem:[#allocation13 + $0x3b8] sm:$0xff]  ;;  %v2505_v60 = vld [vmem:[#allocation13 + $0x3c8] sm:$0xff] }
 0x4ac   :  { %4337 = vmatprep.subr.bf16.mxu0 %v4336_v63  ;;  %4401 = vmatprep.subr.bf16.mxu1 %v4400_v7  ;;  %v4416_v57 = vpack.c.bf16 %v2503_v55, %v2499_v54  ;;  %v2504_v63 = vld [vmem:[#allocation13 + $0x3c0] sm:$0xff]  ;;  %v4356_v1 = vpack.c.bf16 %v2509_v62, %v2505_v60  ;;  %v2510_v7 = vld [vmem:[#allocation13 + $0x3f0] sm:$0xff] }
 0x4ad   :  { %v4358_v5 = vpack.c.bf16 %v2508_v0, %v2504_v63 }
 0x4af   :  { %4339 = vmatpush1.bf16.msra.mxu0 %v4338_v3  ;;  %4403 = vmatpush1.bf16.msra.mxu1 %v4402_v8  ;;  %v2511_v3 = vld [vmem:[#allocation13 + $0x3f8] sm:$0xff]  ;;  %v2709_v8 = vld [vmem:[#allocation10 + $0x8] sm:$0xff] }
 0x4b0   :  { %4341 = vmatprep.subr.bf16.mxu0 %v4340_v11  ;;  %4405 = vmatprep.subr.bf16.mxu1 %v4404_v22  ;;  %v4420_v6 = vpack.c.bf16 %v2511_v3, %v2507_v2  ;;  %v4424_v10 = vpack.c.bf16 %v2713_v9, %v2709_v8  ;;  %v4422_v11 = vpack.c.bf16 %v2510_v7, %v2506_v4 }
 0x4b3   :  { %4343 = vmatpush1.bf16.msra.mxu0 %v4342_v17  ;;  %4407 = vmatpush1.bf16.msra.mxu1 %v4406_v23  ;;  %v4488_v17 = vpack.c.bf16 %v2715_v15, %v2711_v13  ;;  %v2376_v13 = vld [vmem:[#allocation3] sm:$0x3] }
 0x4b4   :  { %4345 = vmatprep.subr.bf16.mxu0 %v4344_v26  ;;  %4409 = vmatprep.subr.bf16.mxu1 %v4408_v35 }
 0x4b7   :  { %4347 = vmatpush1.bf16.msra.mxu0 %v4346_v31  ;;  %4411 = vmatpush1.bf16.msra.mxu1 %v4410_v36 }
 0x4b8   :  { %4349 = vmatprep.subr.bf16.mxu0 %v4348_v39  ;;  %4413 = vmatprep.subr.bf16.mxu1 %v4412_v47 }
 0x4bb   :  { %4351 = vmatpush1.bf16.msra.mxu0 %v4350_v43  ;;  %4415 = vmatpush1.bf16.msra.mxu1 %v4414_v48 }
 0x4bc   :  { %4353 = vmatprep.subr.bf16.mxu0 %v4352_v52  ;;  %4417 = vmatprep.subr.bf16.mxu1 %v4416_v57  ;;  %v2192_v52 = vld [vmem:[#allocation12] sm:$0xf] }
 0x4bd   :  { %v2198_v53 = vrot.slane %v2192_v52, %v5190_v14  ;;  %v2202_v54 = vrot.slane %v2192_v52, %v5192_v16  ;;  %v2210_v62 = vrot.slane %v2192_v52, %v5196_v19 }
 0x4bf   :  { %4355 = vmatpush1.bf16.msra.mxu0 %v4354_v56  ;;  %4419 = vmatpush1.bf16.msra.mxu1 %v4418_v61 }
 0x4c0   :  { %4357 = vmatprep.subr.bf16.mxu0 %v4356_v1  ;;  %4421 = vmatprep.subr.bf16.mxu1 %v4420_v6  ;;  %v2206_v1 = vrot.slane %v2192_v52, %v5199_v27  ;;  %v2730_v52 = vld [vmem:[#allocation10 + $0xb0] sm:$0xff] }
 0x4c3   :  { %4359 = vmatpush1.bf16.msra.mxu0 %v4358_v5  ;;  %4423 = vmatpush1.bf16.msra.mxu1 %v4422_v11 }
 0x4c4   :  { %4425 = vmatprep.subr.bf16.mxu0 %v4424_v10  ;;  %4489 = vmatprep.subr.bf16.mxu1 %v4488_v17 }
 0x519   :  { %v1957_v21 = vpop.f32.mrb[10].mxu0  ;;  %v2028_v22 = vpop.f32.mrb[10].mxu1 }
 0x51a   :  { %v1958_v23 = vadd.f32 %v1957_v21, %v1874_v18  ;;  %v1959_v24 = vpop.f32.mrb[11].mxu0  ;;  %v2030_v25 = vpop.f32.mrb[11].mxu1  ;;  %v2029_v34 = vadd.f32 %v2028_v22, %v1882_v32  ;;  %v2712_v21 = vld [vmem:[#allocation10 + $0x20] sm:$0xff]  ;;  %v2717_v22 = vld [vmem:[#allocation10 + $0x48] sm:$0xff] }
 0x51b   :  { %v1960_v26 = vadd.f32 %v1959_v24, %v1878_v20  ;;  %v2031_v31 = vadd.f32 %v2030_v25, %v1886_v30  ;;  %v2708_v20 = vld [vmem:[#allocation10] sm:$0xff]  ;;  %v2714_v24 = vld [vmem:[#allocation10 + $0x30] sm:$0xff] }
 0x51c   :  { %v3385_v28 = vmul.f32 -1.442695, %v1958_v23  ;;  %v2710_v23 = vld [vmem:[#allocation10 + $0x10] sm:$0xff]  ;;  %v2716_v32 = vld [vmem:[#allocation10 + $0x40] sm:$0xff] }
 0x51d   :  { %v3386_v29 = vmul.f32 -1.442695, %v1960_v26  ;;  %v3387_v33 = vmul.f32 -1.442695, %v2031_v31  ;;  %v2721_v26 = vld [vmem:[#allocation10 + $0x68] sm:$0xff]  ;;  %v4426_v31 = vpack.c.bf16 %v2712_v21, %v2708_v20  ;;  %v2748_v21 = vld [vmem:[#allocation10 + $0x140] sm:$0xff] }
 0x51e   :  { %4771 = vpow2.f32 %v3385_v28  ;;  %v2719_v28 = vld [vmem:[#allocation10 + $0x58] sm:$0xff] }
 0x51f   :  { %4773 = vpow2.f32 %v3386_v29  ;;  %v2723_v29 = vld [vmem:[#allocation10 + $0x78] sm:$0xff] }
 0x520   :  { %4775 = vpow2.f32 %v3387_v33  ;;  %v2720_v33 = vld [vmem:[#allocation10 + $0x60] sm:$0xff] }
 0x521   :  { %4777 = vtanh.f32 %v2029_v34  ;;  %v4490_v34 = vpack.c.bf16 %v2714_v24, %v2710_v23 }
 0x528   :  { %v4772_v35 = vpop.eup %4771 }
 0x529   :  { %v4774_v36 = vpop.eup %4773  ;;  %v2036_v37 = vadd.f32 1.0, %v4772_v35 }
 0x52a   :  { %v2042_v38 = vadd.f32 1.0, %v4774_v36  ;;  %v4776_v39 = vpop.eup %4775  ;;  %v4428_v36 = vpack.c.bf16 %v2721_v26, %v2717_v22  ;;  %v2752_v22 = vld [vmem:[#allocation10 + $0x160] sm:$0xff] }
 0x52b   :  { %4779 = vrcp.f32 %v2036_v37  ;;  %v4778_v40 = vpop.eup %4777  ;;  %v2049_v45 = vadd.f32 1.0, %v4776_v39  ;;  %v2725_v37 = vld [vmem:[#allocation10 + $0x88] sm:$0xff]  ;;  %v2718_v39 = vld [vmem:[#allocation10 + $0x50] sm:$0xff] }
 0x52c   :  { %4781 = vrcp.f32 %v2042_v38  ;;  %v4492_v38 = vpack.c.bf16 %v2723_v29, %v2719_v28  ;;  %v2750_v28 = vld [vmem:[#allocation10 + $0x150] sm:$0xff] }
 0x52d   :  { %4783 = vrcp.f32 %v2049_v45  ;;  %v2724_v45 = vld [vmem:[#allocation10 + $0x80] sm:$0xff]  ;;  %v2754_v29 = vld [vmem:[#allocation10 + $0x170] sm:$0xff] }
 0x535   :  { %v4780_v41 = vpop.eup %4779 }
 0x536   :  { %v4782_v42 = vpop.eup %4781  ;;  %v2054_v43 = vmul.f32 %v4780_v41, %v4778_v40  ;;  %v2722_v40 = vld [vmem:[#allocation10 + $0x70] sm:$0xff]  ;;  %v2729_v41 = vld [vmem:[#allocation10 + $0xa8] sm:$0xff] }
 0x537   :  { %v2053_v46 = vmul.f32 %v4782_v42, %v2052_v44  ;;  %v4784_v48 = vpop.eup %4783  ;;  %v2727_v42 = vld [vmem:[#allocation10 + $0x98] sm:$0xff]  ;;  %v4430_v44 = vpack.c.bf16 %v2720_v33, %v2716_v32  ;;  %v4446_v33 = vpack.c.bf16 %v2752_v22, %v2748_v21  ;;  %v2788_v21 = vld [vmem:[#allocation10 + $0x280] sm:$0xff] }
 0x538   :  { %v2763_v32 = vld [vmem:[#allocation10 + $0x1b8] sm:$0xff]  ;;  %v2792_v22 = vld [vmem:[#allocation10 + $0x2a0] sm:$0xff] }
 0x539   :  { %v2055_v47 = vadd.f32 %v2054_v43, %v2053_v46  ;;  %v2731_v43 = vld [vmem:[#allocation10 + $0xb8] sm:$0xff]  ;;  %v2728_v46 = vld [vmem:[#allocation10 + $0xa0] sm:$0xff] }
 0x53b   :  { %4785 = vtanh.f32 %v2055_v47  ;;  %2059 = vst [vmem:[#allocation3 + $0x2] sm:$0x3] %v2055_v47  ;;  %v4494_v47 = vpack.c.bf16 %v2722_v40, %v2718_v39  ;;  %v2758_v40 = vld [vmem:[#allocation10 + $0x190] sm:$0xff] }
 0x545   :  { %v4786_v49 = vpop.eup %4785 }
 0x546   :  { %v2057_v50 = vmul.f32 %v4786_v49, %v4784_v48  ;;  %v4432_v48 = vpack.c.bf16 %v2729_v41, %v2725_v37  ;;  %v2733_v49 = vld [vmem:[#allocation10 + $0xc8] sm:$0xff]  ;;  %v2762_v41 = vld [vmem:[#allocation10 + $0x1b0] sm:$0xff] }
 0x548   :  { %2058 = vst [vmem:[#allocation2 + $0x2] sm:$0x3] %v2057_v50  ;;  %2061 = vst [vmem:[#allocation16 + $0x4] sm:$0x3] %v2057_v50  ;;  %v4496_v50 = vpack.c.bf16 %v2731_v43, %v2727_v42  ;;  %v2769_v42 = vld [vmem:[#allocation10 + $0x1e8] sm:$0xff]  ;;  %v2767_v43 = vld [vmem:[#allocation10 + $0x1d8] sm:$0xff] }
 0x54f   :  { %v2513_v51 = vld [vmem:[#allocation2 + $0x2] sm:$0x3] }
 0x550   :  { %2599 = vmatprep.mubr.f32.mxu0 %v2513_v51  ;;  %2670 = vmatprep.mubr.f32.mxu1 %v2513_v51  ;;  %v2726_v51 = vld [vmem:[#allocation10 + $0x90] sm:$0xff] }
 0x559   :  { %v2281_v55 = vpop.f32.mrb[12].mxu0  ;;  %v2352_v56 = vpop.f32.mrb[12].mxu1 }
 0x55a   :  { %v2282_v57 = vadd.f32 %v2281_v55, %v2198_v53  ;;  %v2283_v58 = vpop.f32.mrb[13].mxu0  ;;  %v2354_v59 = vpop.f32.mrb[13].mxu1  ;;  %v2353_v3 = vadd.f32 %v2352_v56, %v2206_v1  ;;  %v2737_v53 = vld [vmem:[#allocation10 + $0xe8] sm:$0xff]  ;;  %v2739_v55 = vld [vmem:[#allocation10 + $0xf8] sm:$0xff]  ;;  %v4434_v56 = vpack.c.bf16 %v2728_v46, %v2724_v45  ;;  %v2738_v1 = vld [vmem:[#allocation10 + $0xf0] sm:$0xff] }
 0x55b   :  { %v2284_v60 = vadd.f32 %v2283_v58, %v2202_v54  ;;  %v2355_v0 = vadd.f32 %v2354_v59, %v2210_v62  ;;  %v2735_v54 = vld [vmem:[#allocation10 + $0xd8] sm:$0xff]  ;;  %v2736_v58 = vld [vmem:[#allocation10 + $0xe0] sm:$0xff]  ;;  %v2741_v59 = vld [vmem:[#allocation10 + $0x108] sm:$0xff] }
 0x55c   :  { %v3388_v61 = vmul.f32 -1.442695, %v2282_v57  ;;  %v2732_v57 = vld [vmem:[#allocation10 + $0xc0] sm:$0xff]  ;;  %v2745_v62 = vld [vmem:[#allocation10 + $0x128] sm:$0xff] }
 0x55d   :  { %v3389_v63 = vmul.f32 -1.442695, %v2284_v60  ;;  %v3390_v2 = vmul.f32 -1.442695, %v2355_v0  ;;  %v4498_v60 = vpack.c.bf16 %v2730_v52, %v2726_v51  ;;  %v2734_v0 = vld [vmem:[#allocation10 + $0xd0] sm:$0xff]  ;;  %v2764_v46 = vld [vmem:[#allocation10 + $0x1c0] sm:$0xff] }
 0x55e   :  { %4787 = vpow2.f32 %v3388_v61  ;;  %v4436_v61 = vpack.c.bf16 %v2737_v53, %v2733_v49  ;;  %v2766_v52 = vld [vmem:[#allocation10 + $0x1d0] sm:$0xff] }
 0x55f   :  { %4789 = vpow2.f32 %v3389_v63  ;;  %v4500_v63 = vpack.c.bf16 %v2739_v55, %v2735_v54  ;;  %v2770_v53 = vld [vmem:[#allocation10 + $0x1f0] sm:$0xff]  ;;  %v2777_v54 = vld [vmem:[#allocation10 + $0x228] sm:$0xff]  ;;  %v2775_v55 = vld [vmem:[#allocation10 + $0x218] sm:$0xff] }
 0x560   :  { %4791 = vpow2.f32 %v3390_v2 }
 0x561   :  { %4793 = vtanh.f32 %v2353_v3  ;;  %v2743_v3 = vld [vmem:[#allocation10 + $0x118] sm:$0xff] }
 0x568   :  { %v4788_v4 = vpop.eup %4787 }
 0x569   :  { %v4790_v5 = vpop.eup %4789  ;;  %v2360_v6 = vadd.f32 1.0, %v4788_v4  ;;  %v2747_v4 = vld [vmem:[#allocation10 + $0x138] sm:$0xff] }
 0x56a   :  { %v2366_v7 = vadd.f32 1.0, %v4790_v5  ;;  %v4792_v8 = vpop.eup %4791  ;;  %v4438_v5 = vpack.c.bf16 %v2736_v58, %v2732_v57  ;;  %v2772_v58 = vld [vmem:[#allocation10 + $0x200] sm:$0xff] }
 0x56b   :  { %4795 = vrcp.f32 %v2360_v6  ;;  %v4794_v9 = vpop.eup %4793  ;;  %v2373_v11 = vadd.f32 1.0, %v4792_v8  ;;  %v2740_v6 = vld [vmem:[#allocation10 + $0x100] sm:$0xff]  ;;  %v4502_v8 = vpack.c.bf16 %v2738_v1, %v2734_v0  ;;  %v2774_v0 = vld [vmem:[#allocation10 + $0x210] sm:$0xff] }
 0x56c   :  { %4797 = vrcp.f32 %v2366_v7  ;;  %v2744_v7 = vld [vmem:[#allocation10 + $0x120] sm:$0xff]  ;;  %v2778_v1 = vld [vmem:[#allocation10 + $0x230] sm:$0xff] }
 0x56d   :  { %4799 = vrcp.f32 %v2373_v11  ;;  %v4504_v11 = vpack.c.bf16 %v2747_v4, %v2743_v3  ;;  %v4442_v20 = vpack.c.bf16 %v2744_v7, %v2740_v6  ;;  %v2783_v3 = vld [vmem:[#allocation10 + $0x258] sm:$0xff]  ;;  %v2780_v6 = vld [vmem:[#allocation10 + $0x240] sm:$0xff] }
 0x56e   :  { %v2787_v4 = vld [vmem:[#allocation10 + $0x278] sm:$0xff]  ;;  %v2784_v7 = vld [vmem:[#allocation10 + $0x260] sm:$0xff] }
 0x575   :  { %v4796_v10 = vpop.eup %4795 }
 0x576   :  { %v4798_v12 = vpop.eup %4797  ;;  %v2378_v15 = vmul.f32 %v4796_v10, %v4794_v9  ;;  %v4440_v9 = vpack.c.bf16 %v2745_v62, %v2741_v59  ;;  %v2749_v10 = vld [vmem:[#allocation10 + $0x148] sm:$0xff]  ;;  %v2776_v59 = vld [vmem:[#allocation10 + $0x220] sm:$0xff] }
 0x577   :  { %v2377_v17 = vmul.f32 %v4798_v12, %v2376_v13  ;;  %v4800_v25 = vpop.eup %4799  ;;  %v2742_v12 = vld [vmem:[#allocation10 + $0x110] sm:$0xff]  ;;  %v2781_v62 = vld [vmem:[#allocation10 + $0x248] sm:$0xff] }
 0x578   :  { %v2746_v13 = vld [vmem:[#allocation10 + $0x130] sm:$0xff] }
 0x579   :  { %v2379_v18 = vadd.f32 %v2378_v15, %v2377_v17  ;;  %v2753_v15 = vld [vmem:[#allocation10 + $0x168] sm:$0xff]  ;;  %v2751_v17 = vld [vmem:[#allocation10 + $0x158] sm:$0xff]  ;;  %v4506_v23 = vpack.c.bf16 %v2746_v13, %v2742_v12  ;;  %v2782_v12 = vld [vmem:[#allocation10 + $0x250] sm:$0xff] }
 0x57a   :  { %v4444_v24 = vpack.c.bf16 %v2753_v15, %v2749_v10  ;;  %v2789_v10 = vld [vmem:[#allocation10 + $0x288] sm:$0xff]  ;;  %v2786_v13 = vld [vmem:[#allocation10 + $0x270] sm:$0xff] }
 0x57b   :  { %4801 = vtanh.f32 %v2379_v18  ;;  %2383 = vst [vmem:[#allocation3] sm:$0x3] %v2379_v18  ;;  %v2755_v18 = vld [vmem:[#allocation10 + $0x178] sm:$0xff]  ;;  %v2793_v15 = vld [vmem:[#allocation10 + $0x2a8] sm:$0xff] }
 0x57c   :  { %v4508_v26 = vpack.c.bf16 %v2755_v18, %v2751_v17  ;;  %v2791_v17 = vld [vmem:[#allocation10 + $0x298] sm:$0xff] }
 0x57d   :  { %v2795_v18 = vld [vmem:[#allocation10 + $0x2b8] sm:$0xff] }
 0x585   :  { %v4802_v30 = vpop.eup %4801 }
 0x586   :  { %v2381_v35 = vmul.f32 %v4802_v30, %v4800_v25  ;;  %v2757_v25 = vld [vmem:[#allocation10 + $0x188] sm:$0xff] }
 0x587   :  { %v2761_v30 = vld [vmem:[#allocation10 + $0x1a8] sm:$0xff] }
 0x588   :  { %2382 = vst [vmem:[#allocation2] sm:$0x3] %v2381_v35  ;;  %2600 = vmatmul.mubr.f32.vlgmr.msra.gmra.mrb[14].mxu0 %v2381_v35  ;;  %2671 = vmatmul.mubr.f32.vlgmr.msra.gmra.mrb[14].mxu1 %v2381_v35  ;;  %v2760_v35 = vld [vmem:[#allocation10 + $0x1a0] sm:$0xff]  ;;  %v4448_v37 = vpack.c.bf16 %v2761_v30, %v2757_v25  ;;  %v2797_v25 = vld [vmem:[#allocation10 + $0x2c8] sm:$0xff] }
 0x589   :  { %4427 = vmatpush1.bf16.msra.mxu0 %v4426_v31  ;;  %4491 = vmatpush1.bf16.msra.mxu1 %v4490_v34  ;;  %v2759_v31 = vld [vmem:[#allocation10 + $0x198] sm:$0xff]  ;;  %v2756_v34 = vld [vmem:[#allocation10 + $0x180] sm:$0xff]  ;;  %v2801_v30 = vld [vmem:[#allocation10 + $0x2e8] sm:$0xff] }
 0x58a   :  { %4429 = vmatprep.subr.bf16.mxu0 %v4428_v36  ;;  %4493 = vmatprep.subr.bf16.mxu1 %v4492_v38  ;;  %v4510_v36 = vpack.c.bf16 %v2754_v29, %v2750_v28  ;;  %v2765_v38 = vld [vmem:[#allocation10 + $0x1c8] sm:$0xff]  ;;  %v4512_v39 = vpack.c.bf16 %v2763_v32, %v2759_v31  ;;  %v4450_v45 = vpack.c.bf16 %v2760_v35, %v2756_v34  ;;  %v2790_v28 = vld [vmem:[#allocation10 + $0x290] sm:$0xff]  ;;  %v2799_v31 = vld [vmem:[#allocation10 + $0x2d8] sm:$0xff] }
 0x58b   :  { %v4452_v49 = vpack.c.bf16 %v2769_v42, %v2765_v38  ;;  %v2794_v29 = vld [vmem:[#allocation10 + $0x2b0] sm:$0xff]  ;;  %v2803_v32 = vld [vmem:[#allocation10 + $0x2f8] sm:$0xff]  ;;  %v2796_v34 = vld [vmem:[#allocation10 + $0x2c0] sm:$0xff] }
 0x58c   :  { %v2800_v35 = vld [vmem:[#allocation10 + $0x2e0] sm:$0xff]  ;;  %v2805_v38 = vld [vmem:[#allocation10 + $0x308] sm:$0xff] }
 0x58d   :  { %4431 = vmatpush1.bf16.msra.mxu0 %v4430_v44  ;;  %4495 = vmatpush1.bf16.msra.mxu1 %v4494_v47  ;;  %v2771_v44 = vld [vmem:[#allocation10 + $0x1f8] sm:$0xff]  ;;  %v2768_v47 = vld [vmem:[#allocation10 + $0x1e0] sm:$0xff]  ;;  %v2809_v42 = vld [vmem:[#allocation10 + $0x328] sm:$0xff] }
 0x58e   :  { %4433 = vmatprep.subr.bf16.mxu0 %v4432_v48  ;;  %4497 = vmatprep.subr.bf16.mxu1 %v4496_v50  ;;  %v4514_v48 = vpack.c.bf16 %v2762_v41, %v2758_v40  ;;  %v2773_v50 = vld [vmem:[#allocation10 + $0x208] sm:$0xff]  ;;  %v4516_v51 = vpack.c.bf16 %v2771_v44, %v2767_v43  ;;  %v4454_v57 = vpack.c.bf16 %v2768_v47, %v2764_v46  ;;  %v2798_v40 = vld [vmem:[#allocation10 + $0x2d0] sm:$0xff]  ;;  %v2807_v43 = vld [vmem:[#allocation10 + $0x318] sm:$0xff] }
 0x58f   :  { %v2837_v2 = vld [vmem:[#allocation2] sm:$0x3]  ;;  %v2802_v41 = vld [vmem:[#allocation10 + $0x2f0] sm:$0xff]  ;;  %v2811_v44 = vld [vmem:[#allocation10 + $0x338] sm:$0xff] }
 0x590   :  { %2923 = vmatprep.mubr.f32.mxu0 %v2837_v2  ;;  %2994 = vmatprep.mubr.f32.mxu1 %v2837_v2  ;;  %v2785_v2 = vld [vmem:[#allocation10 + $0x268] sm:$0xff]  ;;  %v2804_v46 = vld [vmem:[#allocation10 + $0x300] sm:$0xff] }
 0x591   :  { %4435 = vmatpush1.bf16.msra.mxu0 %v4434_v56  ;;  %4499 = vmatpush1.bf16.msra.mxu1 %v4498_v60  ;;  %v2779_v56 = vld [vmem:[#allocation10 + $0x238] sm:$0xff]  ;;  %v4518_v60 = vpack.c.bf16 %v2770_v53, %v2766_v52  ;;  %v2808_v47 = vld [vmem:[#allocation10 + $0x320] sm:$0xff]  ;;  %v2806_v52 = vld [vmem:[#allocation10 + $0x310] sm:$0xff] }
 0x592   :  { %4437 = vmatprep.subr.bf16.mxu0 %v4436_v61  ;;  %4501 = vmatprep.subr.bf16.mxu1 %v4500_v63  ;;  %v4456_v61 = vpack.c.bf16 %v2777_v54, %v2773_v50  ;;  %v4520_v63 = vpack.c.bf16 %v2779_v56, %v2775_v55  ;;  %v2813_v50 = vld [vmem:[#allocation10 + $0x348] sm:$0xff]  ;;  %v2810_v53 = vld [vmem:[#allocation10 + $0x330] sm:$0xff]  ;;  %v2815_v55 = vld [vmem:[#allocation10 + $0x358] sm:$0xff] }
 0x593   :  { %v2817_v54 = vld [vmem:[#allocation10 + $0x368] sm:$0xff]  ;;  %v2819_v56 = vld [vmem:[#allocation10 + $0x378] sm:$0xff] }
 0x595   :  { %4439 = vmatpush1.bf16.msra.mxu0 %v4438_v5  ;;  %4503 = vmatpush1.bf16.msra.mxu1 %v4502_v8  ;;  %v4458_v5 = vpack.c.bf16 %v2776_v59, %v2772_v58  ;;  %v4522_v8 = vpack.c.bf16 %v2778_v1, %v2774_v0  ;;  %v2812_v58 = vld [vmem:[#allocation10 + $0x340] sm:$0xff]  ;;  %v2814_v0 = vld [vmem:[#allocation10 + $0x350] sm:$0xff] }
 0x596   :  { %4441 = vmatprep.subr.bf16.mxu0 %v4440_v9  ;;  %4505 = vmatprep.subr.bf16.mxu1 %v4504_v11  ;;  %v4460_v9 = vpack.c.bf16 %v2785_v2, %v2781_v62  ;;  %v4524_v11 = vpack.c.bf16 %v2787_v4, %v2783_v3  ;;  %v2816_v59 = vld [vmem:[#allocation10 + $0x360] sm:$0xff]  ;;  %v2821_v62 = vld [vmem:[#allocation10 + $0x388] sm:$0xff]  ;;  %v2818_v1 = vld [vmem:[#allocation10 + $0x370] sm:$0xff] }
 0x597   :  { %v2825_v2 = vld [vmem:[#allocation10 + $0x3a8] sm:$0xff]  ;;  %v2823_v3 = vld [vmem:[#allocation10 + $0x398] sm:$0xff] }
 0x598   :  { %v2827_v4 = vld [vmem:[#allocation10 + $0x3b8] sm:$0xff] }
 0x599   :  { %4443 = vmatpush1.bf16.msra.mxu0 %v4442_v20  ;;  %4507 = vmatpush1.bf16.msra.mxu1 %v4506_v23  ;;  %v4462_v20 = vpack.c.bf16 %v2784_v7, %v2780_v6  ;;  %v4526_v23 = vpack.c.bf16 %v2786_v13, %v2782_v12  ;;  %v2820_v6 = vld [vmem:[#allocation10 + $0x380] sm:$0xff]  ;;  %v2822_v12 = vld [vmem:[#allocation10 + $0x390] sm:$0xff] }
 0x59a   :  { %4445 = vmatprep.subr.bf16.mxu0 %v4444_v24  ;;  %4509 = vmatprep.subr.bf16.mxu1 %v4508_v26  ;;  %v4464_v24 = vpack.c.bf16 %v2793_v15, %v2789_v10  ;;  %v4528_v26 = vpack.c.bf16 %v2795_v18, %v2791_v17  ;;  %v2824_v7 = vld [vmem:[#allocation10 + $0x3a0] sm:$0xff]  ;;  %v2829_v10 = vld [vmem:[#allocation10 + $0x3c8] sm:$0xff]  ;;  %v2826_v13 = vld [vmem:[#allocation10 + $0x3b0] sm:$0xff] }
 0x59b   :  { %v2833_v15 = vld [vmem:[#allocation10 + $0x3e8] sm:$0xff]  ;;  %v2831_v17 = vld [vmem:[#allocation10 + $0x3d8] sm:$0xff] }
 0x59c   :  { %v2835_v18 = vld [vmem:[#allocation10 + $0x3f8] sm:$0xff] }
 0x59d   :  { %4447 = vmatpush1.bf16.msra.mxu0 %v4446_v33  ;;  %4511 = vmatpush1.bf16.msra.mxu1 %v4510_v36  ;;  %v4466_v33 = vpack.c.bf16 %v2792_v22, %v2788_v21  ;;  %v4530_v36 = vpack.c.bf16 %v2794_v29, %v2790_v28  ;;  %v2828_v21 = vld [vmem:[#allocation10 + $0x3c0] sm:$0xff]  ;;  %v4546_v22 = vpack.c.bf16 %v2826_v13, %v2822_v12  ;;  %v2834_v28 = vld [vmem:[#allocation10 + $0x3f0] sm:$0xff] }
 0x59e   :  { %4449 = vmatprep.subr.bf16.mxu0 %v4448_v37  ;;  %4513 = vmatprep.subr.bf16.mxu1 %v4512_v39  ;;  %v4468_v37 = vpack.c.bf16 %v2801_v30, %v2797_v25  ;;  %v4532_v39 = vpack.c.bf16 %v2803_v32, %v2799_v31  ;;  %v4548_v25 = vpack.c.bf16 %v2835_v18, %v2831_v17  ;;  %v2707_v31 = vld [vmem:[#allocation4 + $0x8] sm:$0x3]  ;;  %v3029_v32 = vld [vmem:[#allocation13 + $0x8] sm:$0xff] }
 0x59f   :  { %v3054_v13 = vld [vmem:[#allocation13 + $0xd0] sm:$0xff]  ;;  %v3061_v17 = vld [vmem:[#allocation13 + $0x108] sm:$0xff] }
 0x5a1   :  { %4451 = vmatpush1.bf16.msra.mxu0 %v4450_v45  ;;  %4515 = vmatpush1.bf16.msra.mxu1 %v4514_v48  ;;  %v4470_v45 = vpack.c.bf16 %v2800_v35, %v2796_v34  ;;  %v4534_v48 = vpack.c.bf16 %v2802_v41, %v2798_v40  ;;  %v3031_v34 = vld [vmem:[#allocation13 + $0x18] sm:$0xff]  ;;  %v3030_v41 = vld [vmem:[#allocation13 + $0x10] sm:$0xff] }
 0x5a2   :  { %4453 = vmatprep.subr.bf16.mxu0 %v4452_v49  ;;  %4517 = vmatprep.subr.bf16.mxu1 %v4516_v51  ;;  %v4472_v49 = vpack.c.bf16 %v2809_v42, %v2805_v38  ;;  %v4536_v51 = vpack.c.bf16 %v2811_v44, %v2807_v43  ;;  %v3032_v38 = vld [vmem:[#allocation13 + $0x20] sm:$0xff]  ;;  %v3034_v42 = vld [vmem:[#allocation13 + $0x30] sm:$0xff]  ;;  %v3037_v44 = vld [vmem:[#allocation13 + $0x48] sm:$0xff] }
 0x5a3   :  { %v4618_v43 = vpack.c.bf16 %v3034_v42, %v3030_v41  ;;  %v3070_v41 = vld [vmem:[#allocation13 + $0x150] sm:$0xff] }
 0x5a4   :  { %v3074_v42 = vld [vmem:[#allocation13 + $0x170] sm:$0xff] }
 0x5a5   :  { %4455 = vmatpush1.bf16.msra.mxu0 %v4454_v57  ;;  %4519 = vmatpush1.bf16.msra.mxu1 %v4518_v60  ;;  %v4474_v57 = vpack.c.bf16 %v2808_v47, %v2804_v46  ;;  %v4538_v60 = vpack.c.bf16 %v2810_v53, %v2806_v52  ;;  %v3039_v46 = vld [vmem:[#allocation13 + $0x58] sm:$0xff]  ;;  %v3038_v53 = vld [vmem:[#allocation13 + $0x50] sm:$0xff] }
 0x5a6   :  { %4457 = vmatprep.subr.bf16.mxu0 %v4456_v61  ;;  %4521 = vmatprep.subr.bf16.mxu1 %v4520_v63  ;;  %v4476_v61 = vpack.c.bf16 %v2817_v54, %v2813_v50  ;;  %v4540_v63 = vpack.c.bf16 %v2819_v56, %v2815_v55  ;;  %v3040_v50 = vld [vmem:[#allocation13 + $0x60] sm:$0xff]  ;;  %v3042_v54 = vld [vmem:[#allocation13 + $0x70] sm:$0xff]  ;;  %v3045_v55 = vld [vmem:[#allocation13 + $0x88] sm:$0xff] }
 0x5a7   :  { %v4622_v56 = vpack.c.bf16 %v3042_v54, %v3038_v53  ;;  %v3078_v53 = vld [vmem:[#allocation13 + $0x190] sm:$0xff] }
 0x5a8   :  { %v3082_v54 = vld [vmem:[#allocation13 + $0x1b0] sm:$0xff] }
 0x5a9   :  { %4459 = vmatpush1.bf16.msra.mxu0 %v4458_v5  ;;  %4523 = vmatpush1.bf16.msra.mxu1 %v4522_v8  ;;  %v4478_v5 = vpack.c.bf16 %v2816_v59, %v2812_v58  ;;  %v4542_v8 = vpack.c.bf16 %v2818_v1, %v2814_v0  ;;  %v3047_v58 = vld [vmem:[#allocation13 + $0x98] sm:$0xff]  ;;  %v3046_v1 = vld [vmem:[#allocation13 + $0x90] sm:$0xff] }
 0x5aa   :  { %4461 = vmatprep.subr.bf16.mxu0 %v4460_v9  ;;  %4525 = vmatprep.subr.bf16.mxu1 %v4524_v11  ;;  %v4480_v9 = vpack.c.bf16 %v2825_v2, %v2821_v62  ;;  %v4544_v11 = vpack.c.bf16 %v2827_v4, %v2823_v3  ;;  %v3051_v59 = vld [vmem:[#allocation13 + $0xb8] sm:$0xff]  ;;  %v3044_v62 = vld [vmem:[#allocation13 + $0x80] sm:$0xff]  ;;  %v3050_v2 = vld [vmem:[#allocation13 + $0xb0] sm:$0xff] }
 0x5ab   :  { %v4626_v3 = vpack.c.bf16 %v3050_v2, %v3046_v1  ;;  %v3053_v4 = vld [vmem:[#allocation13 + $0xc8] sm:$0xff]  ;;  %v3086_v1 = vld [vmem:[#allocation13 + $0x1d0] sm:$0xff] }
 0x5ac   :  { %v3090_v2 = vld [vmem:[#allocation13 + $0x1f0] sm:$0xff] }
 0x5ad   :  { %4463 = vmatpush1.bf16.msra.mxu0 %v4462_v20  ;;  %4527 = vmatpush1.bf16.msra.mxu1 %v4526_v23  ;;  %v4482_v20 = vpack.c.bf16 %v2824_v7, %v2820_v6  ;;  %v4484_v23 = vpack.c.bf16 %v2833_v15, %v2829_v10  ;;  %v3055_v6 = vld [vmem:[#allocation13 + $0xd8] sm:$0xff]  ;;  %v3056_v10 = vld [vmem:[#allocation13 + $0xe0] sm:$0xff]  ;;  %v3058_v15 = vld [vmem:[#allocation13 + $0xf0] sm:$0xff] }
 0x5ae   :  { %4465 = vmatprep.subr.bf16.mxu0 %v4464_v24  ;;  %4529 = vmatprep.subr.bf16.mxu1 %v4528_v26  ;;  %v2832_v24 = vld [vmem:[#allocation10 + $0x3e0] sm:$0xff]  ;;  %v2830_v26 = vld [vmem:[#allocation10 + $0x3d0] sm:$0xff]  ;;  %v4630_v18 = vpack.c.bf16 %v3058_v15, %v3054_v13 }
 0x5af   :  { %v4486_v29 = vpack.c.bf16 %v2832_v24, %v2828_v21  ;;  %v4550_v30 = vpack.c.bf16 %v2834_v28, %v2830_v26  ;;  %v3063_v21 = vld [vmem:[#allocation13 + $0x118] sm:$0xff]  ;;  %v3064_v26 = vld [vmem:[#allocation13 + $0x120] sm:$0xff]  ;;  %v3062_v28 = vld [vmem:[#allocation13 + $0x110] sm:$0xff] }
 0x5b0   :  { %v3094_v13 = vld [vmem:[#allocation13 + $0x210] sm:$0xff] }
 0x5b1   :  { %4467 = vmatpush1.bf16.msra.mxu0 %v4466_v33  ;;  %4531 = vmatpush1.bf16.msra.mxu1 %v4530_v36  ;;  %v3033_v33 = vld [vmem:[#allocation13 + $0x28] sm:$0xff]  ;;  %v3035_v36 = vld [vmem:[#allocation13 + $0x38] sm:$0xff]  ;;  %v3098_v15 = vld [vmem:[#allocation13 + $0x230] sm:$0xff] }
 0x5b2   :  { %4469 = vmatprep.subr.bf16.mxu0 %v4468_v37  ;;  %4533 = vmatprep.subr.bf16.mxu1 %v4532_v39  ;;  %v4552_v35 = vpack.c.bf16 %v3033_v33, %v3029_v32  ;;  %v3028_v37 = vld [vmem:[#allocation13] sm:$0xff]  ;;  %v4616_v39 = vpack.c.bf16 %v3035_v36, %v3031_v34  ;;  %v3069_v32 = vld [vmem:[#allocation13 + $0x148] sm:$0xff]  ;;  %v3071_v34 = vld [vmem:[#allocation13 + $0x158] sm:$0xff] }
 0x5b3   :  { %v4554_v40 = vpack.c.bf16 %v3032_v38, %v3028_v37  ;;  %v3073_v33 = vld [vmem:[#allocation13 + $0x168] sm:$0xff]  ;;  %v3075_v36 = vld [vmem:[#allocation13 + $0x178] sm:$0xff]  ;;  %v3068_v37 = vld [vmem:[#allocation13 + $0x140] sm:$0xff] }
 0x5b4   :  { %v3072_v38 = vld [vmem:[#allocation13 + $0x160] sm:$0xff] }
 0x5b5   :  { %4471 = vmatpush1.bf16.msra.mxu0 %v4470_v45  ;;  %4535 = vmatpush1.bf16.msra.mxu1 %v4534_v48  ;;  %v3041_v45 = vld [vmem:[#allocation13 + $0x68] sm:$0xff]  ;;  %v3043_v48 = vld [vmem:[#allocation13 + $0x78] sm:$0xff] }
 0x5b6   :  { %4473 = vmatprep.subr.bf16.mxu0 %v4472_v49  ;;  %4537 = vmatprep.subr.bf16.mxu1 %v4536_v51  ;;  %v4556_v47 = vpack.c.bf16 %v3041_v45, %v3037_v44  ;;  %v3036_v49 = vld [vmem:[#allocation13 + $0x40] sm:$0xff]  ;;  %v4620_v51 = vpack.c.bf16 %v3043_v48, %v3039_v46  ;;  %v3077_v44 = vld [vmem:[#allocation13 + $0x188] sm:$0xff]  ;;  %v3079_v46 = vld [vmem:[#allocation13 + $0x198] sm:$0xff] }
 0x5b7   :  { %v4558_v52 = vpack.c.bf16 %v3040_v50, %v3036_v49  ;;  %v3081_v45 = vld [vmem:[#allocation13 + $0x1a8] sm:$0xff]  ;;  %v3083_v48 = vld [vmem:[#allocation13 + $0x1b8] sm:$0xff]  ;;  %v3076_v49 = vld [vmem:[#allocation13 + $0x180] sm:$0xff] }
 0x5b8   :  { %v3080_v50 = vld [vmem:[#allocation13 + $0x1a0] sm:$0xff] }
 0x5b9   :  { %4475 = vmatpush1.bf16.msra.mxu0 %v4474_v57  ;;  %4539 = vmatpush1.bf16.msra.mxu1 %v4538_v60  ;;  %v3049_v57 = vld [vmem:[#allocation13 + $0xa8] sm:$0xff] }
 0x5ba   :  { %4477 = vmatprep.subr.bf16.mxu0 %v4476_v61  ;;  %4541 = vmatprep.subr.bf16.mxu1 %v4540_v63  ;;  %v4560_v60 = vpack.c.bf16 %v3049_v57, %v3045_v55  ;;  %v4624_v61 = vpack.c.bf16 %v3051_v59, %v3047_v58  ;;  %v3048_v63 = vld [vmem:[#allocation13 + $0xa0] sm:$0xff]  ;;  %v4642_v55 = vpack.c.bf16 %v3082_v54, %v3078_v53  ;;  %v3089_v57 = vld [vmem:[#allocation13 + $0x1e8] sm:$0xff]  ;;  %v3087_v58 = vld [vmem:[#allocation13 + $0x1d8] sm:$0xff] }
 0x5bb   :  { %v4562_v0 = vpack.c.bf16 %v3048_v63, %v3044_v62  ;;  %v3088_v62 = vld [vmem:[#allocation13 + $0x1e0] sm:$0xff]  ;;  %v3118_v53 = vld [vmem:[#allocation13 + $0x2d0] sm:$0xff] }
 0x5bc   :  { %v3122_v54 = vld [vmem:[#allocation13 + $0x2f0] sm:$0xff] }
 0x5bd   :  { %4479 = vmatpush1.bf16.msra.mxu0 %v4478_v5  ;;  %4543 = vmatpush1.bf16.msra.mxu1 %v4542_v8  ;;  %v3057_v5 = vld [vmem:[#allocation13 + $0xe8] sm:$0xff]  ;;  %v3059_v8 = vld [vmem:[#allocation13 + $0xf8] sm:$0xff] }
 0x5be   :  { %4481 = vmatprep.subr.bf16.mxu0 %v4480_v9  ;;  %4545 = vmatprep.subr.bf16.mxu1 %v4544_v11  ;;  %v4564_v7 = vpack.c.bf16 %v3057_v5, %v3053_v4  ;;  %v3052_v9 = vld [vmem:[#allocation13 + $0xc0] sm:$0xff]  ;;  %v4628_v11 = vpack.c.bf16 %v3059_v8, %v3055_v6  ;;  %v3093_v4 = vld [vmem:[#allocation13 + $0x208] sm:$0xff]  ;;  %v3095_v6 = vld [vmem:[#allocation13 + $0x218] sm:$0xff] }
 0x5bf   :  { %v4566_v12 = vpack.c.bf16 %v3056_v10, %v3052_v9  ;;  %v3097_v5 = vld [vmem:[#allocation13 + $0x228] sm:$0xff]  ;;  %v3099_v8 = vld [vmem:[#allocation13 + $0x238] sm:$0xff]  ;;  %v3092_v9 = vld [vmem:[#allocation13 + $0x200] sm:$0xff] }
 0x5c0   :  { %v3096_v10 = vld [vmem:[#allocation13 + $0x220] sm:$0xff] }
 0x5c1   :  { %4483 = vmatpush1.bf16.msra.mxu0 %v4482_v20  ;;  %4547 = vmatpush1.bf16.msra.mxu1 %v4546_v22  ;;  %v3065_v20 = vld [vmem:[#allocation13 + $0x128] sm:$0xff]  ;;  %v3067_v22 = vld [vmem:[#allocation13 + $0x138] sm:$0xff] }
 0x5c2   :  { %4485 = vmatprep.subr.bf16.mxu0 %v4484_v23  ;;  %4549 = vmatprep.subr.bf16.mxu1 %v4548_v25  ;;  %v4568_v23 = vpack.c.bf16 %v3065_v20, %v3061_v17  ;;  %v4632_v24 = vpack.c.bf16 %v3067_v22, %v3063_v21  ;;  %v3060_v25 = vld [vmem:[#allocation13 + $0x100] sm:$0xff]  ;;  %v4650_v17 = vpack.c.bf16 %v3098_v15, %v3094_v13  ;;  %v3105_v20 = vld [vmem:[#allocation13 + $0x268] sm:$0xff]  ;;  %v3103_v21 = vld [vmem:[#allocation13 + $0x258] sm:$0xff] }
 0x5c3   :  { %v3134_v13 = vld [vmem:[#allocation13 + $0x350] sm:$0xff] }
 0x5c4   :  { %v3138_v15 = vld [vmem:[#allocation13 + $0x370] sm:$0xff] }
 0x5c5   :  { %4487 = vmatpush1.bf16.msra.mxu0 %v4486_v29  ;;  %4551 = vmatpush1.bf16.msra.mxu1 %v4550_v30  ;;  %v4570_v29 = vpack.c.bf16 %v3064_v26, %v3060_v25  ;;  %v3066_v30 = vld [vmem:[#allocation13 + $0x130] sm:$0xff]  ;;  %v3104_v25 = vld [vmem:[#allocation13 + $0x260] sm:$0xff] }
 0x5c6   :  { %4553 = vmatprep.subr.bf16.mxu0 %v4552_v35  ;;  %4617 = vmatprep.subr.bf16.mxu1 %v4616_v39  ;;  %v4572_v35 = vpack.c.bf16 %v3073_v33, %v3069_v32  ;;  %v4636_v39 = vpack.c.bf16 %v3075_v36, %v3071_v34  ;;  %v3109_v32 = vld [vmem:[#allocation13 + $0x288] sm:$0xff]  ;;  %v3111_v34 = vld [vmem:[#allocation13 + $0x298] sm:$0xff] }
 0x5c7   :  { %v3113_v33 = vld [vmem:[#allocation13 + $0x2a8] sm:$0xff]  ;;  %v3115_v36 = vld [vmem:[#allocation13 + $0x2b8] sm:$0xff] }
 0x5c8   :  { %2924 = vmatmul.mubr.f32.vlgmr.msra.gmra.mrb[16].mxu0 %v2707_v31  ;;  %2995 = vmatmul.mubr.f32.vlgmr.msra.gmra.mrb[16].mxu1 %v2707_v31  ;;  %v4634_v31 = vpack.c.bf16 %v3066_v30, %v3062_v28  ;;  %v3106_v30 = vld [vmem:[#allocation13 + $0x270] sm:$0xff] }
 0x5c9   :  { %4555 = vmatpush1.bf16.msra.mxu0 %v4554_v40  ;;  %4619 = vmatpush1.bf16.msra.mxu1 %v4618_v43  ;;  %v4574_v40 = vpack.c.bf16 %v3072_v38, %v3068_v37  ;;  %v4638_v43 = vpack.c.bf16 %v3074_v42, %v3070_v41  ;;  %v3108_v37 = vld [vmem:[#allocation13 + $0x280] sm:$0xff]  ;;  %v3110_v41 = vld [vmem:[#allocation13 + $0x290] sm:$0xff] }
 0x5ca   :  { %4557 = vmatprep.subr.bf16.mxu0 %v4556_v47  ;;  %4621 = vmatprep.subr.bf16.mxu1 %v4620_v51  ;;  %v4576_v47 = vpack.c.bf16 %v3081_v45, %v3077_v44  ;;  %v4640_v51 = vpack.c.bf16 %v3083_v48, %v3079_v46  ;;  %v3112_v38 = vld [vmem:[#allocation13 + $0x2a0] sm:$0xff]  ;;  %v3114_v42 = vld [vmem:[#allocation13 + $0x2b0] sm:$0xff]  ;;  %v3117_v44 = vld [vmem:[#allocation13 + $0x2c8] sm:$0xff] }
 0x5cb   :  { %v3121_v45 = vld [vmem:[#allocation13 + $0x2e8] sm:$0xff]  ;;  %v3119_v46 = vld [vmem:[#allocation13 + $0x2d8] sm:$0xff] }
 0x5cc   :  { %v3123_v48 = vld [vmem:[#allocation13 + $0x2f8] sm:$0xff] }
 0x5cd   :  { %4559 = vmatpush1.bf16.msra.mxu0 %v4558_v52  ;;  %4623 = vmatpush1.bf16.msra.mxu1 %v4622_v56  ;;  %v4578_v52 = vpack.c.bf16 %v3080_v50, %v3076_v49  ;;  %v3085_v56 = vld [vmem:[#allocation13 + $0x1c8] sm:$0xff]  ;;  %v3116_v49 = vld [vmem:[#allocation13 + $0x2c0] sm:$0xff] }
 0x5ce   :  { %4561 = vmatprep.subr.bf16.mxu0 %v4560_v60  ;;  %4625 = vmatprep.subr.bf16.mxu1 %v4624_v61  ;;  %v4580_v59 = vpack.c.bf16 %v3089_v57, %v3085_v56  ;;  %v3091_v60 = vld [vmem:[#allocation13 + $0x1f8] sm:$0xff]  ;;  %v3084_v61 = vld [vmem:[#allocation13 + $0x1c0] sm:$0xff]  ;;  %v3125_v56 = vld [vmem:[#allocation13 + $0x308] sm:$0xff] }
 0x5cf   :  { %v4644_v63 = vpack.c.bf16 %v3091_v60, %v3087_v58  ;;  %v3120_v50 = vld [vmem:[#allocation13 + $0x2e0] sm:$0xff]  ;;  %v3129_v57 = vld [vmem:[#allocation13 + $0x328] sm:$0xff]  ;;  %v3127_v58 = vld [vmem:[#allocation13 + $0x318] sm:$0xff] }
 0x5d0   :  { %v3131_v60 = vld [vmem:[#allocation13 + $0x338] sm:$0xff] }
 0x5d1   :  { %4563 = vmatpush1.bf16.msra.mxu0 %v4562_v0  ;;  %4627 = vmatpush1.bf16.msra.mxu1 %v4626_v3  ;;  %v4582_v0 = vpack.c.bf16 %v3088_v62, %v3084_v61  ;;  %v4646_v3 = vpack.c.bf16 %v3090_v2, %v3086_v1  ;;  %v3124_v61 = vld [vmem:[#allocation13 + $0x300] sm:$0xff]  ;;  %v3126_v1 = vld [vmem:[#allocation13 + $0x310] sm:$0xff] }
 0x5d2   :  { %4565 = vmatprep.subr.bf16.mxu0 %v4564_v7  ;;  %4629 = vmatprep.subr.bf16.mxu1 %v4628_v11  ;;  %v4584_v7 = vpack.c.bf16 %v3097_v5, %v3093_v4  ;;  %v4648_v11 = vpack.c.bf16 %v3099_v8, %v3095_v6  ;;  %v3128_v62 = vld [vmem:[#allocation13 + $0x320] sm:$0xff]  ;;  %v3130_v2 = vld [vmem:[#allocation13 + $0x330] sm:$0xff]  ;;  %v3133_v4 = vld [vmem:[#allocation13 + $0x348] sm:$0xff] }
 0x5d3   :  { %v3137_v5 = vld [vmem:[#allocation13 + $0x368] sm:$0xff]  ;;  %v3135_v6 = vld [vmem:[#allocation13 + $0x358] sm:$0xff] }
 0x5d4   :  { %v3139_v8 = vld [vmem:[#allocation13 + $0x378] sm:$0xff] }
 0x5d5   :  { %4567 = vmatpush1.bf16.msra.mxu0 %v4566_v12  ;;  %4631 = vmatpush1.bf16.msra.mxu1 %v4630_v18  ;;  %v4586_v12 = vpack.c.bf16 %v3096_v10, %v3092_v9  ;;  %v3101_v18 = vld [vmem:[#allocation13 + $0x248] sm:$0xff]  ;;  %v3132_v9 = vld [vmem:[#allocation13 + $0x340] sm:$0xff] }
 0x5d6   :  { %4569 = vmatprep.subr.bf16.mxu0 %v4568_v23  ;;  %4633 = vmatprep.subr.bf16.mxu1 %v4632_v24  ;;  %v4588_v22 = vpack.c.bf16 %v3105_v20, %v3101_v18  ;;  %v3107_v23 = vld [vmem:[#allocation13 + $0x278] sm:$0xff]  ;;  %v3100_v24 = vld [vmem:[#allocation13 + $0x240] sm:$0xff]  ;;  %v4670_v18 = vpack.c.bf16 %v3138_v15, %v3134_v13  ;;  %v3145_v20 = vld [vmem:[#allocation13 + $0x3a8] sm:$0xff] }
 0x5d7   :  { %v4652_v26 = vpack.c.bf16 %v3107_v23, %v3103_v21  ;;  %v4590_v28 = vpack.c.bf16 %v3104_v25, %v3100_v24  ;;  %v3136_v10 = vld [vmem:[#allocation13 + $0x360] sm:$0xff]  ;;  %v3143_v21 = vld [vmem:[#allocation13 + $0x398] sm:$0xff] }
 0x5d8   :  { %v3140_v25 = vld [vmem:[#allocation13 + $0x380] sm:$0xff]  ;;  %v2836_v13 = vld [vmem:[#allocation12] sm:$0xf] }
 0x5d9   :  { %4571 = vmatpush1.bf16.msra.mxu0 %v4570_v29  ;;  %4635 = vmatpush1.bf16.msra.mxu1 %v4634_v31  ;;  %v3102_v29 = vld [vmem:[#allocation13 + $0x250] sm:$0xff]  ;;  %v2842_v15 = vrot.slane %v2836_v13, %v5190_v14 }
 0x5da   :  { %4573 = vmatprep.subr.bf16.mxu0 %v4572_v35  ;;  %4637 = vmatprep.subr.bf16.mxu1 %v4636_v39  ;;  %v4654_v31 = vpack.c.bf16 %v3106_v30, %v3102_v29  ;;  %v4592_v35 = vpack.c.bf16 %v3113_v33, %v3109_v32  ;;  %v4656_v39 = vpack.c.bf16 %v3115_v36, %v3111_v34  ;;  %v3146_v30 = vld [vmem:[#allocation13 + $0x3b0] sm:$0xff]  ;;  %v3153_v32 = vld [vmem:[#allocation13 + $0x3e8] sm:$0xff]  ;;  %v3155_v36 = vld [vmem:[#allocation13 + $0x3f8] sm:$0xff] }
 0x5dd   :  { %4575 = vmatpush1.bf16.msra.mxu0 %v4574_v40  ;;  %4639 = vmatpush1.bf16.msra.mxu1 %v4638_v43  ;;  %v4594_v40 = vpack.c.bf16 %v3112_v38, %v3108_v37  ;;  %v4658_v43 = vpack.c.bf16 %v3114_v42, %v3110_v41  ;;  %v3148_v37 = vld [vmem:[#allocation13 + $0x3c0] sm:$0xff]  ;;  %v3154_v41 = vld [vmem:[#allocation13 + $0x3f0] sm:$0xff] }
 0x5de   :  { %4577 = vmatprep.subr.bf16.mxu0 %v4576_v47  ;;  %4641 = vmatprep.subr.bf16.mxu1 %v4640_v51  ;;  %v4596_v47 = vpack.c.bf16 %v3121_v45, %v3117_v44  ;;  %v4660_v51 = vpack.c.bf16 %v3123_v48, %v3119_v46  ;;  %v2512_v44 = vld [vmem:[#allocation15] sm:$0xf] }
 0x5df   :  { %v2518_v45 = vrot.slane %v2512_v44, %v5190_v14  ;;  %v2522_v46 = vrot.slane %v2512_v44, %v5192_v16 }
 0x5e1   :  { %4579 = vmatpush1.bf16.msra.mxu0 %v4578_v52  ;;  %4643 = vmatpush1.bf16.msra.mxu1 %v4642_v55  ;;  %v4598_v52 = vpack.c.bf16 %v3120_v50, %v3116_v49  ;;  %v4662_v55 = vpack.c.bf16 %v3122_v54, %v3118_v53 }
 0x5e2   :  { %4581 = vmatprep.subr.bf16.mxu0 %v4580_v59  ;;  %4645 = vmatprep.subr.bf16.mxu1 %v4644_v63  ;;  %v4600_v59 = vpack.c.bf16 %v3129_v57, %v3125_v56  ;;  %v4664_v63 = vpack.c.bf16 %v3131_v60, %v3127_v58  ;;  %v2526_v57 = vrot.slane %v2512_v44, %v5199_v27 }
 0x5e5   :  { %4583 = vmatpush1.bf16.msra.mxu0 %v4582_v0  ;;  %4647 = vmatpush1.bf16.msra.mxu1 %v4646_v3  ;;  %v4602_v0 = vpack.c.bf16 %v3128_v62, %v3124_v61  ;;  %v4666_v3 = vpack.c.bf16 %v3130_v2, %v3126_v1 }
 0x5e6   :  { %4585 = vmatprep.subr.bf16.mxu0 %v4584_v7  ;;  %4649 = vmatprep.subr.bf16.mxu1 %v4648_v11  ;;  %v4604_v7 = vpack.c.bf16 %v3137_v5, %v3133_v4  ;;  %v4668_v11 = vpack.c.bf16 %v3139_v8, %v3135_v6  ;;  %v2696_v5 = vld [vmem:[#allocation3 + $0x2] sm:$0x3] }
 0x5e9   :  { %4587 = vmatpush1.bf16.msra.mxu0 %v4586_v12  ;;  %4651 = vmatpush1.bf16.msra.mxu1 %v4650_v17  ;;  %v4606_v12 = vpack.c.bf16 %v3136_v10, %v3132_v9  ;;  %v3141_v17 = vld [vmem:[#allocation13 + $0x388] sm:$0xff] }
 0x5ea   :  { %4589 = vmatprep.subr.bf16.mxu0 %v4588_v22  ;;  %4653 = vmatprep.subr.bf16.mxu1 %v4652_v26  ;;  %v3147_v22 = vld [vmem:[#allocation13 + $0x3b8] sm:$0xff]  ;;  %v4608_v23 = vpack.c.bf16 %v3145_v20, %v3141_v17  ;;  %v3144_v26 = vld [vmem:[#allocation13 + $0x3a0] sm:$0xff]  ;;  %v2846_v17 = vrot.slane %v2836_v13, %v5192_v16 }
 0x5eb   :  { %v4672_v24 = vpack.c.bf16 %v3147_v22, %v3143_v21  ;;  %v4610_v29 = vpack.c.bf16 %v3144_v26, %v3140_v25  ;;  %v2854_v26 = vrot.slane %v2836_v13, %v5196_v19 }
 0x5ed   :  { %4591 = vmatpush1.bf16.msra.mxu0 %v4590_v28  ;;  %4655 = vmatpush1.bf16.msra.mxu1 %v4654_v31  ;;  %v3142_v28 = vld [vmem:[#allocation13 + $0x390] sm:$0xff]  ;;  %v3149_v31 = vld [vmem:[#allocation13 + $0x3c8] sm:$0xff] }
 0x5ee   :  { %4593 = vmatprep.subr.bf16.mxu0 %v4592_v35  ;;  %4657 = vmatprep.subr.bf16.mxu1 %v4656_v39  ;;  %v4674_v33 = vpack.c.bf16 %v3146_v30, %v3142_v28  ;;  %v4612_v34 = vpack.c.bf16 %v3153_v32, %v3149_v31  ;;  %v3151_v35 = vld [vmem:[#allocation13 + $0x3d8] sm:$0xff]  ;;  %v3152_v39 = vld [vmem:[#allocation13 + $0x3e0] sm:$0xff]  ;;  %v2850_v30 = vrot.slane %v2836_v13, %v5199_v27 }
 0x5ef   :  { %v4676_v38 = vpack.c.bf16 %v3155_v36, %v3151_v35  ;;  %v4614_v42 = vpack.c.bf16 %v3152_v39, %v3148_v37 }
 0x5f1   :  { %4595 = vmatpush1.bf16.msra.mxu0 %v4594_v40  ;;  %4659 = vmatpush1.bf16.msra.mxu1 %v4658_v43  ;;  %v3150_v40 = vld [vmem:[#allocation13 + $0x3d0] sm:$0xff] }
 0x5f2   :  { %4597 = vmatprep.subr.bf16.mxu0 %v4596_v47  ;;  %4661 = vmatprep.subr.bf16.mxu1 %v4660_v51  ;;  %v4678_v43 = vpack.c.bf16 %v3154_v41, %v3150_v40 }
 0x5f5   :  { %4599 = vmatpush1.bf16.msra.mxu0 %v4598_v52  ;;  %4663 = vmatpush1.bf16.msra.mxu1 %v4662_v55  ;;  %v2530_v55 = vrot.slane %v2512_v44, %v5196_v19 }
 0x5f6   :  { %4601 = vmatprep.subr.bf16.mxu0 %v4600_v59  ;;  %4665 = vmatprep.subr.bf16.mxu1 %v4664_v63 }
 0x5f9   :  { %4603 = vmatpush1.bf16.msra.mxu0 %v4602_v0  ;;  %4667 = vmatpush1.bf16.msra.mxu1 %v4666_v3 }
 0x5fa   :  { %4605 = vmatprep.subr.bf16.mxu0 %v4604_v7  ;;  %4669 = vmatprep.subr.bf16.mxu1 %v4668_v11 }
 0x5fd   :  { %4607 = vmatpush1.bf16.msra.mxu0 %v4606_v12  ;;  %4671 = vmatpush1.bf16.msra.mxu1 %v4670_v18 }
 0x5fe   :  { %4609 = vmatprep.subr.bf16.mxu0 %v4608_v23  ;;  %4673 = vmatprep.subr.bf16.mxu1 %v4672_v24 }
 0x601   :  { %4611 = vmatpush1.bf16.msra.mxu0 %v4610_v29  ;;  %4675 = vmatpush1.bf16.msra.mxu1 %v4674_v33 }
 0x602   :  { %4613 = vmatprep.subr.bf16.mxu0 %v4612_v34  ;;  %4677 = vmatprep.subr.bf16.mxu1 %v4676_v38 }
 0x605   :  { %4615 = vmatpush1.bf16.msra.mxu0 %v4614_v42  ;;  %4679 = vmatpush1.bf16.msra.mxu1 %v4678_v43  ;;  %v3020_v42 = vld [vmem:[#allocation3] sm:$0x3] }
 0x65b   :  { %v2601_v47 = vpop.f32.mrb[14].mxu0  ;;  %v2672_v48 = vpop.f32.mrb[14].mxu1 }
 0x65c   :  { %v2602_v49 = vadd.f32 %v2601_v47, %v2518_v45  ;;  %v2603_v50 = vpop.f32.mrb[15].mxu0  ;;  %v2674_v51 = vpop.f32.mrb[15].mxu1  ;;  %v2673_v59 = vadd.f32 %v2672_v48, %v2526_v57 }
 0x65d   :  { %v2604_v52 = vadd.f32 %v2603_v50, %v2522_v46  ;;  %v2675_v56 = vadd.f32 %v2674_v51, %v2530_v55 }
 0x65e   :  { %v3391_v53 = vmul.f32 -1.442695, %v2602_v49  ;;  %v3156_v49 = vld [vmem:[#allocation15] sm:$0xf] }
 0x65f   :  { %v3392_v54 = vmul.f32 -1.442695, %v2604_v52  ;;  %v3393_v58 = vmul.f32 -1.442695, %v2675_v56  ;;  %v3162_v50 = vrot.slane %v3156_v49, %v5190_v14  ;;  %v3166_v51 = vrot.slane %v3156_v49, %v5192_v16 }
 0x660   :  { %4803 = vpow2.f32 %v3391_v53 }
 0x661   :  { %4805 = vpow2.f32 %v3392_v54 }
 0x662   :  { %4807 = vpow2.f32 %v3393_v58 }
 0x663   :  { %4809 = vtanh.f32 %v2673_v59 }
 0x66a   :  { %v4804_v60 = vpop.eup %4803 }
 0x66b   :  { %v4806_v61 = vpop.eup %4805  ;;  %v2680_v62 = vadd.f32 1.0, %v4804_v60  ;;  %v3174_v60 = vrot.slane %v3156_v49, %v5196_v19 }
 0x66c   :  { %v2686_v63 = vadd.f32 1.0, %v4806_v61  ;;  %v4808_v0 = vpop.eup %4807 }
 0x66d   :  { %4811 = vrcp.f32 %v2680_v62  ;;  %v4810_v1 = vpop.eup %4809  ;;  %v2693_v6 = vadd.f32 1.0, %v4808_v0  ;;  %v3170_v62 = vrot.slane %v3156_v49, %v5199_v27 }
 0x66e   :  { %4813 = vrcp.f32 %v2686_v63 }
 0x66f   :  { %4815 = vrcp.f32 %v2693_v6 }
 0x677   :  { %v4812_v2 = vpop.eup %4811 }
 0x678   :  { %v4814_v3 = vpop.eup %4813  ;;  %v2698_v4 = vmul.f32 %v4812_v2, %v4810_v1 }
 0x679   :  { %v2697_v7 = vmul.f32 %v4814_v3, %v2696_v5  ;;  %v4816_v9 = vpop.eup %4815 }
 0x67b   :  { %v2699_v8 = vadd.f32 %v2698_v4, %v2697_v7 }
 0x67d   :  { %4817 = vtanh.f32 %v2699_v8  ;;  %2703 = vst [vmem:[#allocation3 + $0x2] sm:$0x3] %v2699_v8 }
 0x684   :  { %v3340_v7 = vld [vmem:[#allocation3 + $0x2] sm:$0x3] }
 0x687   :  { %v4818_v10 = vpop.eup %4817 }
 0x688   :  { %v2701_v11 = vmul.f32 %v4818_v10, %v4816_v9 }
 0x68a   :  { %2702 = vst [vmem:[#allocation2 + $0x2] sm:$0x3] %v2701_v11  ;;  %2705 = vst [vmem:[#allocation16 + $0x6] sm:$0x3] %v2701_v11 }
 0x691   :  { %v3157_v12 = vld [vmem:[#allocation2 + $0x2] sm:$0x3] }
 0x692   :  { %3243 = vmatprep.mubr.f32.mxu0 %v3157_v12  ;;  %3314 = vmatprep.mubr.f32.mxu1 %v3157_v12 }
 0x69b   :  { %v2925_v18 = vpop.f32.mrb[16].mxu0  ;;  %v2996_v20 = vpop.f32.mrb[16].mxu1 }
 0x69c   :  { %v2926_v21 = vadd.f32 %v2925_v18, %v2842_v15  ;;  %v2927_v22 = vpop.f32.mrb[17].mxu0  ;;  %v2998_v23 = vpop.f32.mrb[17].mxu1  ;;  %v2997_v32 = vadd.f32 %v2996_v20, %v2850_v30 }
 0x69d   :  { %v2928_v24 = vadd.f32 %v2927_v22, %v2846_v17  ;;  %v2999_v29 = vadd.f32 %v2998_v23, %v2854_v26 }
 0x69e   :  { %v3394_v25 = vmul.f32 -1.442695, %v2926_v21 }
 0x69f   :  { %v3395_v28 = vmul.f32 -1.442695, %v2928_v24  ;;  %v3396_v31 = vmul.f32 -1.442695, %v2999_v29 }
 0x6a0   :  { %4819 = vpow2.f32 %v3394_v25 }
 0x6a1   :  { %4821 = vpow2.f32 %v3395_v28 }
 0x6a2   :  { %4823 = vpow2.f32 %v3396_v31 }
 0x6a3   :  { %4825 = vtanh.f32 %v2997_v32 }
 0x6aa   :  { %v4820_v33 = vpop.eup %4819 }
 0x6ab   :  { %v4822_v34 = vpop.eup %4821  ;;  %v3004_v35 = vadd.f32 1.0, %v4820_v33 }
 0x6ac   :  { %v3010_v36 = vadd.f32 1.0, %v4822_v34  ;;  %v4824_v37 = vpop.eup %4823 }
 0x6ad   :  { %4827 = vrcp.f32 %v3004_v35  ;;  %v4826_v38 = vpop.eup %4825  ;;  %v3017_v40 = vadd.f32 1.0, %v4824_v37 }
 0x6ae   :  { %4829 = vrcp.f32 %v3010_v36 }
 0x6af   :  { %4831 = vrcp.f32 %v3017_v40 }
 0x6b7   :  { %v4828_v39 = vpop.eup %4827 }
 0x6b8   :  { %v4830_v41 = vpop.eup %4829  ;;  %v3022_v43 = vmul.f32 %v4828_v39, %v4826_v38 }
 0x6b9   :  { %v3021_v44 = vmul.f32 %v4830_v41, %v3020_v42  ;;  %v4832_v46 = vpop.eup %4831 }
 0x6bb   :  { %v3023_v45 = vadd.f32 %v3022_v43, %v3021_v44 }
 0x6bd   :  { %4833 = vtanh.f32 %v3023_v45  ;;  %3027 = vst [vmem:[#allocation3] sm:$0x3] %v3023_v45 }
 0x6c7   :  { %v4834_v47 = vpop.eup %4833 }
 0x6c8   :  { %v3025_v48 = vmul.f32 %v4834_v47, %v4832_v46 }
 0x6ca   :  { %3026 = vst [vmem:[#allocation2] sm:$0x3] %v3025_v48  ;;  %3244 = vmatmul.mubr.f32.vlgmr.msra.gmra.mrb[18].mxu0 %v3025_v48  ;;  %3315 = vmatmul.mubr.f32.vlgmr.msra.gmra.mrb[18].mxu1 %v3025_v48 }
 0x79d   :  { %v3245_v52 = vpop.f32.mrb[18].mxu0  ;;  %v3316_v53 = vpop.f32.mrb[18].mxu1 }
 0x79e   :  { %v3246_v54 = vadd.f32 %v3245_v52, %v3162_v50  ;;  %v3247_v55 = vpop.f32.mrb[19].mxu0  ;;  %v3318_v56 = vpop.f32.mrb[19].mxu1  ;;  %v3317_v0 = vadd.f32 %v3316_v53, %v3170_v62 }
 0x79f   :  { %v3248_v57 = vadd.f32 %v3247_v55, %v3166_v51  ;;  %v3319_v61 = vadd.f32 %v3318_v56, %v3174_v60 }
 0x7a0   :  { %v3397_v58 = vmul.f32 -1.442695, %v3246_v54 }
 0x7a1   :  { %v3398_v59 = vmul.f32 -1.442695, %v3248_v57  ;;  %v3399_v63 = vmul.f32 -1.442695, %v3319_v61 }
 0x7a2   :  { %4835 = vpow2.f32 %v3397_v58 }
 0x7a3   :  { %4837 = vpow2.f32 %v3398_v59 }
 0x7a4   :  { %4839 = vpow2.f32 %v3399_v63 }
 0x7a5   :  { %4841 = vtanh.f32 %v3317_v0 }
 0x7ac   :  { %v4836_v14 = vpop.eup %4835 }
 0x7ad   :  { %v4838_v1 = vpop.eup %4837  ;;  %v3324_v16 = vadd.f32 1.0, %v4836_v14 }
 0x7ae   :  { %v3330_v2 = vadd.f32 1.0, %v4838_v1  ;;  %v4840_v3 = vpop.eup %4839 }
 0x7af   :  { %4843 = vrcp.f32 %v3324_v16  ;;  %v4842_v4 = vpop.eup %4841  ;;  %v3337_v8 = vadd.f32 1.0, %v4840_v3 }
 0x7b0   :  { %4845 = vrcp.f32 %v3330_v2 }
 0x7b1   :  { %4847 = vrcp.f32 %v3337_v8 }
 0x7b9   :  { %v4844_v5 = vpop.eup %4843 }
 0x7ba   :  { %v4846_v6 = vpop.eup %4845  ;;  %v3342_v19 = vmul.f32 %v4844_v5, %v4842_v4 }
 0x7bb   :  { %v3341_v9 = vmul.f32 %v4846_v6, %v3340_v7  ;;  %v4848_v27 = vpop.eup %4847 }
 0x7bd   :  { %v3343_v10 = vadd.f32 %v3342_v19, %v3341_v9 }
 0x7bf   :  { %4849 = vtanh.f32 %v3343_v10  ;;  %3347 = vst [vmem:[#allocation3 + $0x2] sm:$0x3] %v3343_v10 }
 0x7c9   :  { %v4850_v11 = vpop.eup %4849 }
 0x7ca   :  { %v3345_v12 = vmul.f32 %v4850_v11, %v4848_v27 }
 0x7cc   :  { %3346 = vst [vmem:[#allocation2 + $0x2] sm:$0x3] %v3345_v12  ;;  %3349 = vst [vmem:[#allocation16 + $0x8] sm:$0x3] %v3345_v12 }
 0x7cd   :  { %5016 = shalt.err (!%p5013_p4)
}
 0x7ce   :  { %s5017_s27 = scalar_lea.hbm %s5260_s7, 160 }
 0x7cf   :  { %p5018_p5 = scmp.ne.s32.totalorder %s5260_s7, %s5017_s27  ;;  %p5021_p6 = scmp.lt.u32.totalorder %s5017_s27, %s5260_s7 }
 0x7d1   :  { %p5023_p7 = pnand %p5021_p6, %p5018_p5 }
 0x7d3   :  { %5026 = shalt.err (!%p5023_p7)
}
 0x7d4   :  { %3361 = dma.vmem_to_hbm [thread:$0]  %s3356_s17, 160, %s5260_s7, [#allocation6], %s5039_s13, %s5039_s13, %s5040_s14  }
 0x7d5   :  { %5035 = dma.done.wait [#allocation6], 160  }
 0x7d6   :  { %5036 = vsyncadd [#allocation6], 4294967136 }
 0x7d7   :  { %3365 = vsyncpa [#allocation5], 1 }
 0x7d8   :  { %3366 = vsyncpa [#allocation8], 1 }
 0x7d9   :  { %3367 = vsyncpa [#allocation11], 1 }
 0x7da   :  { %3368 = vsyncpa [#allocation14], 1 }
 0x7db   :  { %3369 = vsyncpa [#allocation6], 1 }

</bundles_post_ra>
